<compile_context>
chip_gen: v5e
topology: v5e:2x2
jax: 0.10.0
libtpu: 0.0.40
codegen_flags: <defaults>
</compile_context>

<pallas_src>
import jax
import jax.numpy as jnp
from jax.experimental import pallas as pl
from jax.experimental.pallas import tpu as pltpu


def _make_basic_block_kernel(N, C, H, W, Hp, Wp, S):
    """Builds the fused kernel for static shapes.

    Layout: every activation row r = channel c holds the flat zero-padded
    image of the whole batch: index S + n*Hp*Wp + h*Wp + w  (h, w in padded
    coords).  S lanes of zero slack on each side keep every +/-(Wp+1)-shifted
    tap read in bounds.
    """
    L1 = Hp * Wp              # flat padded image length per sample
    Lout = N * L1             # lane extent of one activation row (128-multiple)
    Ltot = S + Lout + S       # row length incl. front/back slack
    inv_n = 1.0 / float(N * H * W)
    eps = 1e-5

    def kernel(xpad_ref, mask_ref, w1_ref, g1_ref, b1_ref,
               w2_ref, g2_ref, b2_ref, out_ref, pad1_ref):
        # xpad_ref : (C, Ltot)  padded input x (also the identity source), VMEM
        # mask_ref : (1, Lout)  1.0 on interior positions, 0.0 on halo/pad
        # w*_ref   : (C, 9*C)   conv taps, column index = (ky*3+kx)*C + cin
        # g*_ref/b*_ref : (C,1) BN affine parameters
        # out_ref  : (C, Lout)  lane-dense output slab (garbage on halo lanes,
        #                       sliced away in the wrapper)
        # pad1_ref : (C, Ltot)  VMEM scratch holding padded stage-1 activation
        m = mask_ref[...]                                          # (1, Lout)

        def conv3x3_bn(src_ref, w_ref, g_ref, b_ref):
            # 3x3 conv, pad=1, stride=1: 9 taps x C inputs, each a shifted
            # (lane-offset) row slice FMA'd with a (C,1) weight column on the
            # VPU.  Accumulator is a register value; first term initialises it.
            acc = None
            for ky in range(3):
                for kx in range(3):
                    t = ky * 3 + kx
                    base = S + (ky - 1) * Wp + (kx - 1)
                    for cin in range(C):
                        row = src_ref[cin:cin + 1, base:base + Lout]   # (1, Lout)
                        wcol = w_ref[:, t * C + cin:t * C + cin + 1]   # (C, 1)
                        term = wcol * row                              # (C, Lout)
                        acc = term if acc is None else acc + term

            # Training-mode BatchNorm: batch stats over the N*H*W interior
            # positions only (mask kills the halo lanes), biased variance,
            # folded into a single per-channel scale/shift.
            am = acc * m
            stacked = jnp.concatenate([am, am * am], axis=0)           # (2C, Lout)
            sums = jnp.sum(stacked, axis=1, keepdims=True)             # (2C, 1)
            mean = sums[:C] * inv_n
            var = sums[C:] * inv_n - mean * mean
            scale = g_ref[...] * jax.lax.rsqrt(var + eps)
            shift = b_ref[...] - mean * scale
            return acc * scale + shift

        # ---- Stage 1: conv1 -> bn1 -> relu, kept in VMEM (padded layout) ----
        y1 = jnp.maximum(conv3x3_bn(xpad_ref, w1_ref, g1_ref, b1_ref), 0.0)
        pad1_ref[:, 0:S] = jnp.zeros((C, S), jnp.float32)              # front slack
        pad1_ref[:, S + Lout:Ltot] = jnp.zeros((C, S), jnp.float32)    # back slack
        pad1_ref[:, S:S + Lout] = y1 * m                               # halo -> 0

        # ---- Stage 2: conv2 -> bn2 -> (+ identity) -> relu ----
        y2 = conv3x3_bn(pad1_ref, w2_ref, g2_ref, b2_ref) + xpad_ref[:, S:S + Lout]
        out_ref[...] = jnp.maximum(y2, 0.0)                            # dense store

    return kernel


@jax.jit
def basic_block_forward(x_nchw, w1_oihw, g1, b1, w2_oihw, g2, b2):
    """BasicBlock(inplanes=planes, stride=1, downsample=None) forward.

    Takes PyTorch-layout parameters: conv weights OIHW, BN gamma/beta as (C,).
    """
    N, C, H, W = x_nchw.shape
    Hp = H + 2
    Wp = ((W + 2 + 7) // 8) * 8                 # padded width, multiple of 8
    while (N * Hp * Wp) % 128 != 0:             # make the lane extent 128-dense
        Wp += 8
    S = -(-(Wp + 1) // 128) * 128               # slack >= Wp+1, lane-tile aligned
    L1 = Hp * Wp
    Lout = N * L1

    # Layout plumbing (wrapper-side, fused by XLA): NCHW -> channel-major,
    # zero-pad spatially, flatten spatial+batch onto the lane axis, add slack.
    x = x_nchw.astype(jnp.float32)
    xc = jnp.transpose(x, (1, 0, 2, 3))                                # (C,N,H,W)
    xp = jnp.pad(xc, ((0, 0), (0, 0), (1, Hp - H - 1), (1, Wp - W - 1)))
    xin = jnp.pad(xp.reshape(C, Lout), ((0, 0), (S, S)))               # (C, Ltot)

    # Interior mask (1 on real pixels, 0 on halo / width-pad), per-sample tiled.
    m2 = jnp.zeros((Hp, Wp), jnp.float32).at[1:H + 1, 1:W + 1].set(1.0)
    mask = jnp.tile(m2.reshape(1, L1), (1, N))                         # (1, Lout)

    def pack_w(w_oihw):
        # OIHW (Cout,Cin,3,3) -> (Cout, ky, kx, Cin) -> (Cout, 9*Cin)
        return jnp.transpose(w_oihw.astype(jnp.float32), (0, 2, 3, 1)).reshape(C, 9 * C)

    w1p, w2p = pack_w(w1_oihw), pack_w(w2_oihw)
    g1r = g1.reshape(C, 1).astype(jnp.float32)
    b1r = b1.reshape(C, 1).astype(jnp.float32)
    g2r = g2.reshape(C, 1).astype(jnp.float32)
    b2r = b2.reshape(C, 1).astype(jnp.float32)

    vmem = pl.BlockSpec(memory_space=pltpu.MemorySpace.VMEM)
    kernel = _make_basic_block_kernel(N, C, H, W, Hp, Wp, S)
    out_flat = pl.pallas_call(
        kernel,
        out_shape=jax.ShapeDtypeStruct((C, Lout), jnp.float32),
        in_specs=[vmem] * 8,
        out_specs=vmem,
        scratch_shapes=[pltpu.VMEM((C, S + Lout + S), jnp.float32)],   # padded y1
    )(xin, mask, w1p, g1r, b1r, w2p, g2r, b2r)

    # Lane-dense slab -> NCHW (interior extraction + transpose in the wrapper).
    out = out_flat.reshape(C, N, Hp, Wp)[:, :, 1:H + 1, 1:W + 1]
    return jnp.transpose(out, (1, 0, 2, 3))
    # TODO(synk): downsample branch not implemented (it is None in this config).


def _reference_forward(x, w1_oihw, g1, b1, w2_oihw, g2, b2):
    """Pure-JAX reference mirroring PyTorch BasicBlock.forward (train-mode BN)."""
    def conv(x, w):
        return jax.lax.conv_general_dilated(
            x, w, window_strides=(1, 1), padding=((1, 1), (1, 1)),
            dimension_numbers=("NCHW", "OIHW", "NCHW"))

    def bn(x, g, b):
        mean = x.mean(axis=(0, 2, 3), keepdims=True)
        var = ((x - mean) ** 2).mean(axis=(0, 2, 3), keepdims=True)
        xhat = (x - mean) * jax.lax.rsqrt(var + 1e-5)
        return xhat * g.reshape(1, -1, 1, 1) + b.reshape(1, -1, 1, 1)

    out = jax.nn.relu(bn(conv(x, w1_oihw), g1, b1))
    out = bn(conv(out, w2_oihw), g2, b2) + x
    return jax.nn.relu(out)


if __name__ == "__main__":
    key = jax.random.PRNGKey(0)
    N, C, H, W = 2, 4, 16, 16      # inplanes == planes == 4, stride=1, downsample=None
    k_x, k_w1, k_w2, k_g1, k_b1, k_g2, k_b2 = jax.random.split(key, 7)

    x = jax.random.normal(k_x, (N, C, H, W), jnp.float32)

    fan_in = C * 3 * 3
    w1_oihw = jax.random.normal(k_w1, (C, C, 3, 3), jnp.float32) / jnp.sqrt(fan_in)
    w2_oihw = jax.random.normal(k_w2, (C, C, 3, 3), jnp.float32) / jnp.sqrt(fan_in)
    g1 = 1.0 + 0.1 * jax.random.normal(k_g1, (C,), jnp.float32)
    b1 = 0.1 * jax.random.normal(k_b1, (C,), jnp.float32)
    g2 = 1.0 + 0.1 * jax.random.normal(k_g2, (C,), jnp.float32)
    b2 = 0.1 * jax.random.normal(k_b2, (C,), jnp.float32)

    out = jax.block_until_ready(basic_block_forward(x, w1_oihw, g1, b1, w2_oihw, g2, b2))

    ref = _reference_forward(x, w1_oihw, g1, b1, w2_oihw, g2, b2)
    assert out.shape == (N, C, H, W)
    err = float(jnp.max(jnp.abs(out - ref)))
    assert jnp.allclose(out, ref, rtol=1e-3, atol=1e-3), f"max abs err {err}"
    print("KERNEL_OK")
</pallas_src>

<mosaic_0001>
module attributes {stable_mosaic.version = 11 : i64} {
  func.func @kernel(%arg0: memref<4x1408xf32, #tpu.memory_space<vmem>>, %arg1: memref<1x1152xf32, #tpu.memory_space<vmem>>, %arg2: memref<4x36xf32, #tpu.memory_space<vmem>>, %arg3: memref<4x1xf32, #tpu.memory_space<vmem>>, %arg4: memref<4x1xf32, #tpu.memory_space<vmem>>, %arg5: memref<4x36xf32, #tpu.memory_space<vmem>>, %arg6: memref<4x1xf32, #tpu.memory_space<vmem>>, %arg7: memref<4x1xf32, #tpu.memory_space<vmem>>, %arg8: memref<4x1152xf32, #tpu.memory_space<vmem>>, %arg9: memref<4x1408xf32, #tpu.memory_space<vmem>>) attributes {dimension_semantics = [], scalar_prefetch = 0 : i64, scratch_operands = 1 : i64, tpu.core_type = #tpu.core_type<tc>} {
    %c0 = arith.constant 0 : index
    %c0_0 = arith.constant 0 : index
    %0 = vector.load %arg1[%c0, %c0_0] : memref<1x1152xf32, #tpu.memory_space<vmem>>, vector<1x1152xf32>
    %c0_1 = arith.constant 0 : index
    %c95 = arith.constant 95 : index
    %1 = vector.load %arg0[%c0_1, %c95] : memref<4x1408xf32, #tpu.memory_space<vmem>>, vector<1x1152xf32>
    %c0_2 = arith.constant 0 : index
    %c0_3 = arith.constant 0 : index
    %2 = vector.load %arg2[%c0_2, %c0_3] : memref<4x36xf32, #tpu.memory_space<vmem>>, vector<4x1xf32>
    %3 = vector.broadcast %2 : vector<4x1xf32> to vector<4x1152xf32>
    %4 = vector.broadcast %1 : vector<1x1152xf32> to vector<4x1152xf32>
    %5 = arith.mulf %3, %4 : vector<4x1152xf32>
    %c1 = arith.constant 1 : index
    %c95_4 = arith.constant 95 : index
    %6 = vector.load %arg0[%c1, %c95_4] : memref<4x1408xf32, #tpu.memory_space<vmem>>, vector<1x1152xf32>
    %c0_5 = arith.constant 0 : index
    %c1_6 = arith.constant 1 : index
    %7 = vector.load %arg2[%c0_5, %c1_6] : memref<4x36xf32, #tpu.memory_space<vmem>>, vector<4x1xf32>
    %8 = vector.broadcast %7 : vector<4x1xf32> to vector<4x1152xf32>
    %9 = vector.broadcast %6 : vector<1x1152xf32> to vector<4x1152xf32>
    %10 = arith.mulf %8, %9 : vector<4x1152xf32>
    %11 = arith.addf %5, %10 : vector<4x1152xf32>
    %c2 = arith.constant 2 : index
    %c95_7 = arith.constant 95 : index
    %12 = vector.load %arg0[%c2, %c95_7] : memref<4x1408xf32, #tpu.memory_space<vmem>>, vector<1x1152xf32>
    %c0_8 = arith.constant 0 : index
    %c2_9 = arith.constant 2 : index
    %13 = vector.load %arg2[%c0_8, %c2_9] : memref<4x36xf32, #tpu.memory_space<vmem>>, vector<4x1xf32>
    %14 = vector.broadcast %13 : vector<4x1xf32> to vector<4x1152xf32>
    %15 = vector.broadcast %12 : vector<1x1152xf32> to vector<4x1152xf32>
    %16 = arith.mulf %14, %15 : vector<4x1152xf32>
    %17 = arith.addf %11, %16 : vector<4x1152xf32>
    %c3 = arith.constant 3 : index
    %c95_10 = arith.constant 95 : index
    %18 = vector.load %arg0[%c3, %c95_10] : memref<4x1408xf32, #tpu.memory_space<vmem>>, vector<1x1152xf32>
    %c0_11 = arith.constant 0 : index
    %c3_12 = arith.constant 3 : index
    %19 = vector.load %arg2[%c0_11, %c3_12] : memref<4x36xf32, #tpu.memory_space<vmem>>, vector<4x1xf32>
    %20 = vector.broadcast %19 : vector<4x1xf32> to vector<4x1152xf32>
    %21 = vector.broadcast %18 : vector<1x1152xf32> to vector<4x1152xf32>
    %22 = arith.mulf %20, %21 : vector<4x1152xf32>
    %23 = arith.addf %17, %22 : vector<4x1152xf32>
    %c0_13 = arith.constant 0 : index
    %c96 = arith.constant 96 : index
    %24 = vector.load %arg0[%c0_13, %c96] : memref<4x1408xf32, #tpu.memory_space<vmem>>, vector<1x1152xf32>
    %c0_14 = arith.constant 0 : index
    %c4 = arith.constant 4 : index
    %25 = vector.load %arg2[%c0_14, %c4] : memref<4x36xf32, #tpu.memory_space<vmem>>, vector<4x1xf32>
    %26 = vector.broadcast %25 : vector<4x1xf32> to vector<4x1152xf32>
    %27 = vector.broadcast %24 : vector<1x1152xf32> to vector<4x1152xf32>
    %28 = arith.mulf %26, %27 : vector<4x1152xf32>
    %29 = arith.addf %23, %28 : vector<4x1152xf32>
    %c1_15 = arith.constant 1 : index
    %c96_16 = arith.constant 96 : index
    %30 = vector.load %arg0[%c1_15, %c96_16] : memref<4x1408xf32, #tpu.memory_space<vmem>>, vector<1x1152xf32>
    %c0_17 = arith.constant 0 : index
    %c5 = arith.constant 5 : index
    %31 = vector.load %arg2[%c0_17, %c5] : memref<4x36xf32, #tpu.memory_space<vmem>>, vector<4x1xf32>
    %32 = vector.broadcast %31 : vector<4x1xf32> to vector<4x1152xf32>
    %33 = vector.broadcast %30 : vector<1x1152xf32> to vector<4x1152xf32>
    %34 = arith.mulf %32, %33 : vector<4x1152xf32>
    %35 = arith.addf %29, %34 : vector<4x1152xf32>
    %c2_18 = arith.constant 2 : index
    %c96_19 = arith.constant 96 : index
    %36 = vector.load %arg0[%c2_18, %c96_19] : memref<4x1408xf32, #tpu.memory_space<vmem>>, vector<1x1152xf32>
    %c0_20 = arith.constant 0 : index
    %c6 = arith.constant 6 : index
    %37 = vector.load %arg2[%c0_20, %c6] : memref<4x36xf32, #tpu.memory_space<vmem>>, vector<4x1xf32>
    %38 = vector.broadcast %37 : vector<4x1xf32> to vector<4x1152xf32>
    %39 = vector.broadcast %36 : vector<1x1152xf32> to vector<4x1152xf32>
    %40 = arith.mulf %38, %39 : vector<4x1152xf32>
    %41 = arith.addf %35, %40 : vector<4x1152xf32>
    %c3_21 = arith.constant 3 : index
    %c96_22 = arith.constant 96 : index
    %42 = vector.load %arg0[%c3_21, %c96_22] : memref<4x1408xf32, #tpu.memory_space<vmem>>, vector<1x1152xf32>
    %c0_23 = arith.constant 0 : index
    %c7 = arith.constant 7 : index
    %43 = vector.load %arg2[%c0_23, %c7] : memref<4x36xf32, #tpu.memory_space<vmem>>, vector<4x1xf32>
    %44 = vector.broadcast %43 : vector<4x1xf32> to vector<4x1152xf32>
    %45 = vector.broadcast %42 : vector<1x1152xf32> to vector<4x1152xf32>
    %46 = arith.mulf %44, %45 : vector<4x1152xf32>
    %47 = arith.addf %41, %46 : vector<4x1152xf32>
    %c0_24 = arith.constant 0 : index
    %c97 = arith.constant 97 : index
    %48 = vector.load %arg0[%c0_24, %c97] : memref<4x1408xf32, #tpu.memory_space<vmem>>, vector<1x1152xf32>
    %c0_25 = arith.constant 0 : index
    %c8 = arith.constant 8 : index
    %49 = vector.load %arg2[%c0_25, %c8] : memref<4x36xf32, #tpu.memory_space<vmem>>, vector<4x1xf32>
    %50 = vector.broadcast %49 : vector<4x1xf32> to vector<4x1152xf32>
    %51 = vector.broadcast %48 : vector<1x1152xf32> to vector<4x1152xf32>
    %52 = arith.mulf %50, %51 : vector<4x1152xf32>
    %53 = arith.addf %47, %52 : vector<4x1152xf32>
    %c1_26 = arith.constant 1 : index
    %c97_27 = arith.constant 97 : index
    %54 = vector.load %arg0[%c1_26, %c97_27] : memref<4x1408xf32, #tpu.memory_space<vmem>>, vector<1x1152xf32>
    %c0_28 = arith.constant 0 : index
    %c9 = arith.constant 9 : index
    %55 = vector.load %arg2[%c0_28, %c9] : memref<4x36xf32, #tpu.memory_space<vmem>>, vector<4x1xf32>
    %56 = vector.broadcast %55 : vector<4x1xf32> to vector<4x1152xf32>
    %57 = vector.broadcast %54 : vector<1x1152xf32> to vector<4x1152xf32>
    %58 = arith.mulf %56, %57 : vector<4x1152xf32>
    %59 = arith.addf %53, %58 : vector<4x1152xf32>
    %c2_29 = arith.constant 2 : index
    %c97_30 = arith.constant 97 : index
    %60 = vector.load %arg0[%c2_29, %c97_30] : memref<4x1408xf32, #tpu.memory_space<vmem>>, vector<1x1152xf32>
    %c0_31 = arith.constant 0 : index
    %c10 = arith.constant 10 : index
    %61 = vector.load %arg2[%c0_31, %c10] : memref<4x36xf32, #tpu.memory_space<vmem>>, vector<4x1xf32>
    %62 = vector.broadcast %61 : vector<4x1xf32> to vector<4x1152xf32>
    %63 = vector.broadcast %60 : vector<1x1152xf32> to vector<4x1152xf32>
    %64 = arith.mulf %62, %63 : vector<4x1152xf32>
    %65 = arith.addf %59, %64 : vector<4x1152xf32>
    %c3_32 = arith.constant 3 : index
    %c97_33 = arith.constant 97 : index
    %66 = vector.load %arg0[%c3_32, %c97_33] : memref<4x1408xf32, #tpu.memory_space<vmem>>, vector<1x1152xf32>
    %c0_34 = arith.constant 0 : index
    %c11 = arith.constant 11 : index
    %67 = vector.load %arg2[%c0_34, %c11] : memref<4x36xf32, #tpu.memory_space<vmem>>, vector<4x1xf32>
    %68 = vector.broadcast %67 : vector<4x1xf32> to vector<4x1152xf32>
    %69 = vector.broadcast %66 : vector<1x1152xf32> to vector<4x1152xf32>
    %70 = arith.mulf %68, %69 : vector<4x1152xf32>
    %71 = arith.addf %65, %70 : vector<4x1152xf32>
    %c0_35 = arith.constant 0 : index
    %c127 = arith.constant 127 : index
    %72 = vector.load %arg0[%c0_35, %c127] : memref<4x1408xf32, #tpu.memory_space<vmem>>, vector<1x1152xf32>
    %c0_36 = arith.constant 0 : index
    %c12 = arith.constant 12 : index
    %73 = vector.load %arg2[%c0_36, %c12] : memref<4x36xf32, #tpu.memory_space<vmem>>, vector<4x1xf32>
    %74 = vector.broadcast %73 : vector<4x1xf32> to vector<4x1152xf32>
    %75 = vector.broadcast %72 : vector<1x1152xf32> to vector<4x1152xf32>
    %76 = arith.mulf %74, %75 : vector<4x1152xf32>
    %77 = arith.addf %71, %76 : vector<4x1152xf32>
    %c1_37 = arith.constant 1 : index
    %c127_38 = arith.constant 127 : index
    %78 = vector.load %arg0[%c1_37, %c127_38] : memref<4x1408xf32, #tpu.memory_space<vmem>>, vector<1x1152xf32>
    %c0_39 = arith.constant 0 : index
    %c13 = arith.constant 13 : index
    %79 = vector.load %arg2[%c0_39, %c13] : memref<4x36xf32, #tpu.memory_space<vmem>>, vector<4x1xf32>
    %80 = vector.broadcast %79 : vector<4x1xf32> to vector<4x1152xf32>
    %81 = vector.broadcast %78 : vector<1x1152xf32> to vector<4x1152xf32>
    %82 = arith.mulf %80, %81 : vector<4x1152xf32>
    %83 = arith.addf %77, %82 : vector<4x1152xf32>
    %c2_40 = arith.constant 2 : index
    %c127_41 = arith.constant 127 : index
    %84 = vector.load %arg0[%c2_40, %c127_41] : memref<4x1408xf32, #tpu.memory_space<vmem>>, vector<1x1152xf32>
    %c0_42 = arith.constant 0 : index
    %c14 = arith.constant 14 : index
    %85 = vector.load %arg2[%c0_42, %c14] : memref<4x36xf32, #tpu.memory_space<vmem>>, vector<4x1xf32>
    %86 = vector.broadcast %85 : vector<4x1xf32> to vector<4x1152xf32>
    %87 = vector.broadcast %84 : vector<1x1152xf32> to vector<4x1152xf32>
    %88 = arith.mulf %86, %87 : vector<4x1152xf32>
    %89 = arith.addf %83, %88 : vector<4x1152xf32>
    %c3_43 = arith.constant 3 : index
    %c127_44 = arith.constant 127 : index
    %90 = vector.load %arg0[%c3_43, %c127_44] : memref<4x1408xf32, #tpu.memory_space<vmem>>, vector<1x1152xf32>
    %c0_45 = arith.constant 0 : index
    %c15 = arith.constant 15 : index
    %91 = vector.load %arg2[%c0_45, %c15] : memref<4x36xf32, #tpu.memory_space<vmem>>, vector<4x1xf32>
    %92 = vector.broadcast %91 : vector<4x1xf32> to vector<4x1152xf32>
    %93 = vector.broadcast %90 : vector<1x1152xf32> to vector<4x1152xf32>
    %94 = arith.mulf %92, %93 : vector<4x1152xf32>
    %95 = arith.addf %89, %94 : vector<4x1152xf32>
    %c0_46 = arith.constant 0 : index
    %c128 = arith.constant 128 : index
    %96 = vector.load %arg0[%c0_46, %c128] : memref<4x1408xf32, #tpu.memory_space<vmem>>, vector<1x1152xf32>
    %c0_47 = arith.constant 0 : index
    %c16 = arith.constant 16 : index
    %97 = vector.load %arg2[%c0_47, %c16] : memref<4x36xf32, #tpu.memory_space<vmem>>, vector<4x1xf32>
    %98 = vector.broadcast %97 : vector<4x1xf32> to vector<4x1152xf32>
    %99 = vector.broadcast %96 : vector<1x1152xf32> to vector<4x1152xf32>
    %100 = arith.mulf %98, %99 : vector<4x1152xf32>
    %101 = arith.addf %95, %100 : vector<4x1152xf32>
    %c1_48 = arith.constant 1 : index
    %c128_49 = arith.constant 128 : index
    %102 = vector.load %arg0[%c1_48, %c128_49] : memref<4x1408xf32, #tpu.memory_space<vmem>>, vector<1x1152xf32>
    %c0_50 = arith.constant 0 : index
    %c17 = arith.constant 17 : index
    %103 = vector.load %arg2[%c0_50, %c17] : memref<4x36xf32, #tpu.memory_space<vmem>>, vector<4x1xf32>
    %104 = vector.broadcast %103 : vector<4x1xf32> to vector<4x1152xf32>
    %105 = vector.broadcast %102 : vector<1x1152xf32> to vector<4x1152xf32>
    %106 = arith.mulf %104, %105 : vector<4x1152xf32>
    %107 = arith.addf %101, %106 : vector<4x1152xf32>
    %c2_51 = arith.constant 2 : index
    %c128_52 = arith.constant 128 : index
    %108 = vector.load %arg0[%c2_51, %c128_52] : memref<4x1408xf32, #tpu.memory_space<vmem>>, vector<1x1152xf32>
    %c0_53 = arith.constant 0 : index
    %c18 = arith.constant 18 : index
    %109 = vector.load %arg2[%c0_53, %c18] : memref<4x36xf32, #tpu.memory_space<vmem>>, vector<4x1xf32>
    %110 = vector.broadcast %109 : vector<4x1xf32> to vector<4x1152xf32>
    %111 = vector.broadcast %108 : vector<1x1152xf32> to vector<4x1152xf32>
    %112 = arith.mulf %110, %111 : vector<4x1152xf32>
    %113 = arith.addf %107, %112 : vector<4x1152xf32>
    %c3_54 = arith.constant 3 : index
    %c128_55 = arith.constant 128 : index
    %114 = vector.load %arg0[%c3_54, %c128_55] : memref<4x1408xf32, #tpu.memory_space<vmem>>, vector<1x1152xf32>
    %c0_56 = arith.constant 0 : index
    %c19 = arith.constant 19 : index
    %115 = vector.load %arg2[%c0_56, %c19] : memref<4x36xf32, #tpu.memory_space<vmem>>, vector<4x1xf32>
    %116 = vector.broadcast %115 : vector<4x1xf32> to vector<4x1152xf32>
    %117 = vector.broadcast %114 : vector<1x1152xf32> to vector<4x1152xf32>
    %118 = arith.mulf %116, %117 : vector<4x1152xf32>
    %119 = arith.addf %113, %118 : vector<4x1152xf32>
    %c0_57 = arith.constant 0 : index
    %c129 = arith.constant 129 : index
    %120 = vector.load %arg0[%c0_57, %c129] : memref<4x1408xf32, #tpu.memory_space<vmem>>, vector<1x1152xf32>
    %c0_58 = arith.constant 0 : index
    %c20 = arith.constant 20 : index
    %121 = vector.load %arg2[%c0_58, %c20] : memref<4x36xf32, #tpu.memory_space<vmem>>, vector<4x1xf32>
    %122 = vector.broadcast %121 : vector<4x1xf32> to vector<4x1152xf32>
    %123 = vector.broadcast %120 : vector<1x1152xf32> to vector<4x1152xf32>
    %124 = arith.mulf %122, %123 : vector<4x1152xf32>
    %125 = arith.addf %119, %124 : vector<4x1152xf32>
    %c1_59 = arith.constant 1 : index
    %c129_60 = arith.constant 129 : index
    %126 = vector.load %arg0[%c1_59, %c129_60] : memref<4x1408xf32, #tpu.memory_space<vmem>>, vector<1x1152xf32>
    %c0_61 = arith.constant 0 : index
    %c21 = arith.constant 21 : index
    %127 = vector.load %arg2[%c0_61, %c21] : memref<4x36xf32, #tpu.memory_space<vmem>>, vector<4x1xf32>
    %128 = vector.broadcast %127 : vector<4x1xf32> to vector<4x1152xf32>
    %129 = vector.broadcast %126 : vector<1x1152xf32> to vector<4x1152xf32>
    %130 = arith.mulf %128, %129 : vector<4x1152xf32>
    %131 = arith.addf %125, %130 : vector<4x1152xf32>
    %c2_62 = arith.constant 2 : index
    %c129_63 = arith.constant 129 : index
    %132 = vector.load %arg0[%c2_62, %c129_63] : memref<4x1408xf32, #tpu.memory_space<vmem>>, vector<1x1152xf32>
    %c0_64 = arith.constant 0 : index
    %c22 = arith.constant 22 : index
    %133 = vector.load %arg2[%c0_64, %c22] : memref<4x36xf32, #tpu.memory_space<vmem>>, vector<4x1xf32>
    %134 = vector.broadcast %133 : vector<4x1xf32> to vector<4x1152xf32>
    %135 = vector.broadcast %132 : vector<1x1152xf32> to vector<4x1152xf32>
    %136 = arith.mulf %134, %135 : vector<4x1152xf32>
    %137 = arith.addf %131, %136 : vector<4x1152xf32>
    %c3_65 = arith.constant 3 : index
    %c129_66 = arith.constant 129 : index
    %138 = vector.load %arg0[%c3_65, %c129_66] : memref<4x1408xf32, #tpu.memory_space<vmem>>, vector<1x1152xf32>
    %c0_67 = arith.constant 0 : index
    %c23 = arith.constant 23 : index
    %139 = vector.load %arg2[%c0_67, %c23] : memref<4x36xf32, #tpu.memory_space<vmem>>, vector<4x1xf32>
    %140 = vector.broadcast %139 : vector<4x1xf32> to vector<4x1152xf32>
    %141 = vector.broadcast %138 : vector<1x1152xf32> to vector<4x1152xf32>
    %142 = arith.mulf %140, %141 : vector<4x1152xf32>
    %143 = arith.addf %137, %142 : vector<4x1152xf32>
    %c0_68 = arith.constant 0 : index
    %c159 = arith.constant 159 : index
    %144 = vector.load %arg0[%c0_68, %c159] : memref<4x1408xf32, #tpu.memory_space<vmem>>, vector<1x1152xf32>
    %c0_69 = arith.constant 0 : index
    %c24 = arith.constant 24 : index
    %145 = vector.load %arg2[%c0_69, %c24] : memref<4x36xf32, #tpu.memory_space<vmem>>, vector<4x1xf32>
    %146 = vector.broadcast %145 : vector<4x1xf32> to vector<4x1152xf32>
    %147 = vector.broadcast %144 : vector<1x1152xf32> to vector<4x1152xf32>
    %148 = arith.mulf %146, %147 : vector<4x1152xf32>
    %149 = arith.addf %143, %148 : vector<4x1152xf32>
    %c1_70 = arith.constant 1 : index
    %c159_71 = arith.constant 159 : index
    %150 = vector.load %arg0[%c1_70, %c159_71] : memref<4x1408xf32, #tpu.memory_space<vmem>>, vector<1x1152xf32>
    %c0_72 = arith.constant 0 : index
    %c25 = arith.constant 25 : index
    %151 = vector.load %arg2[%c0_72, %c25] : memref<4x36xf32, #tpu.memory_space<vmem>>, vector<4x1xf32>
    %152 = vector.broadcast %151 : vector<4x1xf32> to vector<4x1152xf32>
    %153 = vector.broadcast %150 : vector<1x1152xf32> to vector<4x1152xf32>
    %154 = arith.mulf %152, %153 : vector<4x1152xf32>
    %155 = arith.addf %149, %154 : vector<4x1152xf32>
    %c2_73 = arith.constant 2 : index
    %c159_74 = arith.constant 159 : index
    %156 = vector.load %arg0[%c2_73, %c159_74] : memref<4x1408xf32, #tpu.memory_space<vmem>>, vector<1x1152xf32>
    %c0_75 = arith.constant 0 : index
    %c26 = arith.constant 26 : index
    %157 = vector.load %arg2[%c0_75, %c26] : memref<4x36xf32, #tpu.memory_space<vmem>>, vector<4x1xf32>
    %158 = vector.broadcast %157 : vector<4x1xf32> to vector<4x1152xf32>
    %159 = vector.broadcast %156 : vector<1x1152xf32> to vector<4x1152xf32>
    %160 = arith.mulf %158, %159 : vector<4x1152xf32>
    %161 = arith.addf %155, %160 : vector<4x1152xf32>
    %c3_76 = arith.constant 3 : index
    %c159_77 = arith.constant 159 : index
    %162 = vector.load %arg0[%c3_76, %c159_77] : memref<4x1408xf32, #tpu.memory_space<vmem>>, vector<1x1152xf32>
    %c0_78 = arith.constant 0 : index
    %c27 = arith.constant 27 : index
    %163 = vector.load %arg2[%c0_78, %c27] : memref<4x36xf32, #tpu.memory_space<vmem>>, vector<4x1xf32>
    %164 = vector.broadcast %163 : vector<4x1xf32> to vector<4x1152xf32>
    %165 = vector.broadcast %162 : vector<1x1152xf32> to vector<4x1152xf32>
    %166 = arith.mulf %164, %165 : vector<4x1152xf32>
    %167 = arith.addf %161, %166 : vector<4x1152xf32>
    %c0_79 = arith.constant 0 : index
    %c160 = arith.constant 160 : index
    %168 = vector.load %arg0[%c0_79, %c160] : memref<4x1408xf32, #tpu.memory_space<vmem>>, vector<1x1152xf32>
    %c0_80 = arith.constant 0 : index
    %c28 = arith.constant 28 : index
    %169 = vector.load %arg2[%c0_80, %c28] : memref<4x36xf32, #tpu.memory_space<vmem>>, vector<4x1xf32>
    %170 = vector.broadcast %169 : vector<4x1xf32> to vector<4x1152xf32>
    %171 = vector.broadcast %168 : vector<1x1152xf32> to vector<4x1152xf32>
    %172 = arith.mulf %170, %171 : vector<4x1152xf32>
    %173 = arith.addf %167, %172 : vector<4x1152xf32>
    %c1_81 = arith.constant 1 : index
    %c160_82 = arith.constant 160 : index
    %174 = vector.load %arg0[%c1_81, %c160_82] : memref<4x1408xf32, #tpu.memory_space<vmem>>, vector<1x1152xf32>
    %c0_83 = arith.constant 0 : index
    %c29 = arith.constant 29 : index
    %175 = vector.load %arg2[%c0_83, %c29] : memref<4x36xf32, #tpu.memory_space<vmem>>, vector<4x1xf32>
    %176 = vector.broadcast %175 : vector<4x1xf32> to vector<4x1152xf32>
    %177 = vector.broadcast %174 : vector<1x1152xf32> to vector<4x1152xf32>
    %178 = arith.mulf %176, %177 : vector<4x1152xf32>
    %179 = arith.addf %173, %178 : vector<4x1152xf32>
    %c2_84 = arith.constant 2 : index
    %c160_85 = arith.constant 160 : index
    %180 = vector.load %arg0[%c2_84, %c160_85] : memref<4x1408xf32, #tpu.memory_space<vmem>>, vector<1x1152xf32>
    %c0_86 = arith.constant 0 : index
    %c30 = arith.constant 30 : index
    %181 = vector.load %arg2[%c0_86, %c30] : memref<4x36xf32, #tpu.memory_space<vmem>>, vector<4x1xf32>
    %182 = vector.broadcast %181 : vector<4x1xf32> to vector<4x1152xf32>
    %183 = vector.broadcast %180 : vector<1x1152xf32> to vector<4x1152xf32>
    %184 = arith.mulf %182, %183 : vector<4x1152xf32>
    %185 = arith.addf %179, %184 : vector<4x1152xf32>
    %c3_87 = arith.constant 3 : index
    %c160_88 = arith.constant 160 : index
    %186 = vector.load %arg0[%c3_87, %c160_88] : memref<4x1408xf32, #tpu.memory_space<vmem>>, vector<1x1152xf32>
    %c0_89 = arith.constant 0 : index
    %c31 = arith.constant 31 : index
    %187 = vector.load %arg2[%c0_89, %c31] : memref<4x36xf32, #tpu.memory_space<vmem>>, vector<4x1xf32>
    %188 = vector.broadcast %187 : vector<4x1xf32> to vector<4x1152xf32>
    %189 = vector.broadcast %186 : vector<1x1152xf32> to vector<4x1152xf32>
    %190 = arith.mulf %188, %189 : vector<4x1152xf32>
    %191 = arith.addf %185, %190 : vector<4x1152xf32>
    %c0_90 = arith.constant 0 : index
    %c161 = arith.constant 161 : index
    %192 = vector.load %arg0[%c0_90, %c161] : memref<4x1408xf32, #tpu.memory_space<vmem>>, vector<1x1152xf32>
    %c0_91 = arith.constant 0 : index
    %c32 = arith.constant 32 : index
    %193 = vector.load %arg2[%c0_91, %c32] : memref<4x36xf32, #tpu.memory_space<vmem>>, vector<4x1xf32>
    %194 = vector.broadcast %193 : vector<4x1xf32> to vector<4x1152xf32>
    %195 = vector.broadcast %192 : vector<1x1152xf32> to vector<4x1152xf32>
    %196 = arith.mulf %194, %195 : vector<4x1152xf32>
    %197 = arith.addf %191, %196 : vector<4x1152xf32>
    %c1_92 = arith.constant 1 : index
    %c161_93 = arith.constant 161 : index
    %198 = vector.load %arg0[%c1_92, %c161_93] : memref<4x1408xf32, #tpu.memory_space<vmem>>, vector<1x1152xf32>
    %c0_94 = arith.constant 0 : index
    %c33 = arith.constant 33 : index
    %199 = vector.load %arg2[%c0_94, %c33] : memref<4x36xf32, #tpu.memory_space<vmem>>, vector<4x1xf32>
    %200 = vector.broadcast %199 : vector<4x1xf32> to vector<4x1152xf32>
    %201 = vector.broadcast %198 : vector<1x1152xf32> to vector<4x1152xf32>
    %202 = arith.mulf %200, %201 : vector<4x1152xf32>
    %203 = arith.addf %197, %202 : vector<4x1152xf32>
    %c2_95 = arith.constant 2 : index
    %c161_96 = arith.constant 161 : index
    %204 = vector.load %arg0[%c2_95, %c161_96] : memref<4x1408xf32, #tpu.memory_space<vmem>>, vector<1x1152xf32>
    %c0_97 = arith.constant 0 : index
    %c34 = arith.constant 34 : index
    %205 = vector.load %arg2[%c0_97, %c34] : memref<4x36xf32, #tpu.memory_space<vmem>>, vector<4x1xf32>
    %206 = vector.broadcast %205 : vector<4x1xf32> to vector<4x1152xf32>
    %207 = vector.broadcast %204 : vector<1x1152xf32> to vector<4x1152xf32>
    %208 = arith.mulf %206, %207 : vector<4x1152xf32>
    %209 = arith.addf %203, %208 : vector<4x1152xf32>
    %c3_98 = arith.constant 3 : index
    %c161_99 = arith.constant 161 : index
    %210 = vector.load %arg0[%c3_98, %c161_99] : memref<4x1408xf32, #tpu.memory_space<vmem>>, vector<1x1152xf32>
    %c0_100 = arith.constant 0 : index
    %c35 = arith.constant 35 : index
    %211 = vector.load %arg2[%c0_100, %c35] : memref<4x36xf32, #tpu.memory_space<vmem>>, vector<4x1xf32>
    %212 = vector.broadcast %211 : vector<4x1xf32> to vector<4x1152xf32>
    %213 = vector.broadcast %210 : vector<1x1152xf32> to vector<4x1152xf32>
    %214 = arith.mulf %212, %213 : vector<4x1152xf32>
    %215 = arith.addf %209, %214 : vector<4x1152xf32>
    %216 = vector.broadcast %0 : vector<1x1152xf32> to vector<4x1152xf32>
    %217 = arith.mulf %215, %216 : vector<4x1152xf32>
    %218 = arith.mulf %217, %217 : vector<4x1152xf32>
    %219 = tpu.concatenate %217, %218 in 0 : vector<4x1152xf32>, vector<4x1152xf32> -> vector<8x1152xf32>
    %cst = arith.constant dense<0.000000e+00> : vector<8xf32>
    %220 = vector.multi_reduction <add>, %219, %cst [1] : vector<8x1152xf32> to vector<8xf32>
    %221 = vector.shape_cast %220 : vector<8xf32> to vector<8x1xf32>
    %222 = vector.extract_strided_slice %221 {offsets = [0, 0], sizes = [4, 1], strides = [1, 1]} : vector<8x1xf32> to vector<4x1xf32>
    %cst_101 = arith.constant 0.001953125 : f32
    %223 = vector.broadcast %cst_101 : f32 to vector<4x1xf32>
    %224 = arith.mulf %222, %223 : vector<4x1xf32>
    %225 = vector.extract_strided_slice %221 {offsets = [4, 0], sizes = [4, 1], strides = [1, 1]} : vector<8x1xf32> to vector<4x1xf32>
    %cst_102 = arith.constant 0.001953125 : f32
    %226 = vector.broadcast %cst_102 : f32 to vector<4x1xf32>
    %227 = arith.mulf %225, %226 : vector<4x1xf32>
    %228 = arith.mulf %224, %224 : vector<4x1xf32>
    %229 = arith.subf %227, %228 : vector<4x1xf32>
    %c0_103 = arith.constant 0 : index
    %c0_104 = arith.constant 0 : index
    %230 = vector.load %arg3[%c0_103, %c0_104] : memref<4x1xf32, #tpu.memory_space<vmem>>, vector<4x1xf32>
    %cst_105 = arith.constant 9.99999974E-6 : f32
    %231 = vector.broadcast %cst_105 : f32 to vector<4x1xf32>
    %232 = arith.addf %229, %231 : vector<4x1xf32>
    %233 = math.rsqrt %232 : vector<4x1xf32>
    %234 = arith.mulf %230, %233 : vector<4x1xf32>
    %c0_106 = arith.constant 0 : index
    %c0_107 = arith.constant 0 : index
    %235 = vector.load %arg4[%c0_106, %c0_107] : memref<4x1xf32, #tpu.memory_space<vmem>>, vector<4x1xf32>
    %236 = arith.mulf %224, %234 : vector<4x1xf32>
    %237 = arith.subf %235, %236 : vector<4x1xf32>
    %238 = vector.broadcast %234 : vector<4x1xf32> to vector<4x1152xf32>
    %239 = arith.mulf %215, %238 : vector<4x1152xf32>
    %240 = vector.broadcast %237 : vector<4x1xf32> to vector<4x1152xf32>
    %241 = arith.addf %239, %240 : vector<4x1152xf32>
    %cst_108 = arith.constant 0.000000e+00 : f32
    %242 = vector.broadcast %cst_108 : f32 to vector<4x1152xf32>
    %243 = arith.maximumf %241, %242 : vector<4x1152xf32>
    %cst_109 = arith.constant 0.000000e+00 : f32
    %244 = vector.broadcast %cst_109 : f32 to vector<4x128xf32>
    %c0_110 = arith.constant 0 : index
    %c0_111 = arith.constant 0 : index
    %245 = vector.load %arg9[%c0_110, %c0_111] : memref<4x1408xf32, #tpu.memory_space<vmem>>, vector<4x128xf32>
    tpu.vector_store %arg9[%c0_110, %c0_111], %244 {strides = array<i32>} : memref<4x1408xf32, #tpu.memory_space<vmem>>, vector<4x128xf32>,
    %cst_112 = arith.constant 0.000000e+00 : f32
    %246 = vector.broadcast %cst_112 : f32 to vector<4x128xf32>
    %c0_113 = arith.constant 0 : index
    %c1280 = arith.constant 1280 : index
    %247 = vector.load %arg9[%c0_113, %c1280] : memref<4x1408xf32, #tpu.memory_space<vmem>>, vector<4x128xf32>
    tpu.vector_store %arg9[%c0_113, %c1280], %246 {strides = array<i32>} : memref<4x1408xf32, #tpu.memory_space<vmem>>, vector<4x128xf32>,
    %248 = vector.broadcast %0 : vector<1x1152xf32> to vector<4x1152xf32>
    %249 = arith.mulf %243, %248 : vector<4x1152xf32>
    %c0_114 = arith.constant 0 : index
    %c128_115 = arith.constant 128 : index
    %250 = vector.load %arg9[%c0_114, %c128_115] : memref<4x1408xf32, #tpu.memory_space<vmem>>, vector<4x1152xf32>
    tpu.vector_store %arg9[%c0_114, %c128_115], %249 {strides = array<i32>} : memref<4x1408xf32, #tpu.memory_space<vmem>>, vector<4x1152xf32>,
    %c0_116 = arith.constant 0 : index
    %c95_117 = arith.constant 95 : index
    %251 = vector.load %arg9[%c0_116, %c95_117] : memref<4x1408xf32, #tpu.memory_space<vmem>>, vector<1x1152xf32>
    %c0_118 = arith.constant 0 : index
    %c0_119 = arith.constant 0 : index
    %252 = vector.load %arg5[%c0_118, %c0_119] : memref<4x36xf32, #tpu.memory_space<vmem>>, vector<4x1xf32>
    %253 = vector.broadcast %252 : vector<4x1xf32> to vector<4x1152xf32>
    %254 = vector.broadcast %251 : vector<1x1152xf32> to vector<4x1152xf32>
    %255 = arith.mulf %253, %254 : vector<4x1152xf32>
    %c1_120 = arith.constant 1 : index
    %c95_121 = arith.constant 95 : index
    %256 = vector.load %arg9[%c1_120, %c95_121] : memref<4x1408xf32, #tpu.memory_space<vmem>>, vector<1x1152xf32>
    %c0_122 = arith.constant 0 : index
    %c1_123 = arith.constant 1 : index
    %257 = vector.load %arg5[%c0_122, %c1_123] : memref<4x36xf32, #tpu.memory_space<vmem>>, vector<4x1xf32>
    %258 = vector.broadcast %257 : vector<4x1xf32> to vector<4x1152xf32>
    %259 = vector.broadcast %256 : vector<1x1152xf32> to vector<4x1152xf32>
    %260 = arith.mulf %258, %259 : vector<4x1152xf32>
    %261 = arith.addf %255, %260 : vector<4x1152xf32>
    %c2_124 = arith.constant 2 : index
    %c95_125 = arith.constant 95 : index
    %262 = vector.load %arg9[%c2_124, %c95_125] : memref<4x1408xf32, #tpu.memory_space<vmem>>, vector<1x1152xf32>
    %c0_126 = arith.constant 0 : index
    %c2_127 = arith.constant 2 : index
    %263 = vector.load %arg5[%c0_126, %c2_127] : memref<4x36xf32, #tpu.memory_space<vmem>>, vector<4x1xf32>
    %264 = vector.broadcast %263 : vector<4x1xf32> to vector<4x1152xf32>
    %265 = vector.broadcast %262 : vector<1x1152xf32> to vector<4x1152xf32>
    %266 = arith.mulf %264, %265 : vector<4x1152xf32>
    %267 = arith.addf %261, %266 : vector<4x1152xf32>
    %c3_128 = arith.constant 3 : index
    %c95_129 = arith.constant 95 : index
    %268 = vector.load %arg9[%c3_128, %c95_129] : memref<4x1408xf32, #tpu.memory_space<vmem>>, vector<1x1152xf32>
    %c0_130 = arith.constant 0 : index
    %c3_131 = arith.constant 3 : index
    %269 = vector.load %arg5[%c0_130, %c3_131] : memref<4x36xf32, #tpu.memory_space<vmem>>, vector<4x1xf32>
    %270 = vector.broadcast %269 : vector<4x1xf32> to vector<4x1152xf32>
    %271 = vector.broadcast %268 : vector<1x1152xf32> to vector<4x1152xf32>
    %272 = arith.mulf %270, %271 : vector<4x1152xf32>
    %273 = arith.addf %267, %272 : vector<4x1152xf32>
    %c0_132 = arith.constant 0 : index
    %c96_133 = arith.constant 96 : index
    %274 = vector.load %arg9[%c0_132, %c96_133] : memref<4x1408xf32, #tpu.memory_space<vmem>>, vector<1x1152xf32>
    %c0_134 = arith.constant 0 : index
    %c4_135 = arith.constant 4 : index
    %275 = vector.load %arg5[%c0_134, %c4_135] : memref<4x36xf32, #tpu.memory_space<vmem>>, vector<4x1xf32>
    %276 = vector.broadcast %275 : vector<4x1xf32> to vector<4x1152xf32>
    %277 = vector.broadcast %274 : vector<1x1152xf32> to vector<4x1152xf32>
    %278 = arith.mulf %276, %277 : vector<4x1152xf32>
    %279 = arith.addf %273, %278 : vector<4x1152xf32>
    %c1_136 = arith.constant 1 : index
    %c96_137 = arith.constant 96 : index
    %280 = vector.load %arg9[%c1_136, %c96_137] : memref<4x1408xf32, #tpu.memory_space<vmem>>, vector<1x1152xf32>
    %c0_138 = arith.constant 0 : index
    %c5_139 = arith.constant 5 : index
    %281 = vector.load %arg5[%c0_138, %c5_139] : memref<4x36xf32, #tpu.memory_space<vmem>>, vector<4x1xf32>
    %282 = vector.broadcast %281 : vector<4x1xf32> to vector<4x1152xf32>
    %283 = vector.broadcast %280 : vector<1x1152xf32> to vector<4x1152xf32>
    %284 = arith.mulf %282, %283 : vector<4x1152xf32>
    %285 = arith.addf %279, %284 : vector<4x1152xf32>
    %c2_140 = arith.constant 2 : index
    %c96_141 = arith.constant 96 : index
    %286 = vector.load %arg9[%c2_140, %c96_141] : memref<4x1408xf32, #tpu.memory_space<vmem>>, vector<1x1152xf32>
    %c0_142 = arith.constant 0 : index
    %c6_143 = arith.constant 6 : index
    %287 = vector.load %arg5[%c0_142, %c6_143] : memref<4x36xf32, #tpu.memory_space<vmem>>, vector<4x1xf32>
    %288 = vector.broadcast %287 : vector<4x1xf32> to vector<4x1152xf32>
    %289 = vector.broadcast %286 : vector<1x1152xf32> to vector<4x1152xf32>
    %290 = arith.mulf %288, %289 : vector<4x1152xf32>
    %291 = arith.addf %285, %290 : vector<4x1152xf32>
    %c3_144 = arith.constant 3 : index
    %c96_145 = arith.constant 96 : index
    %292 = vector.load %arg9[%c3_144, %c96_145] : memref<4x1408xf32, #tpu.memory_space<vmem>>, vector<1x1152xf32>
    %c0_146 = arith.constant 0 : index
    %c7_147 = arith.constant 7 : index
    %293 = vector.load %arg5[%c0_146, %c7_147] : memref<4x36xf32, #tpu.memory_space<vmem>>, vector<4x1xf32>
    %294 = vector.broadcast %293 : vector<4x1xf32> to vector<4x1152xf32>
    %295 = vector.broadcast %292 : vector<1x1152xf32> to vector<4x1152xf32>
    %296 = arith.mulf %294, %295 : vector<4x1152xf32>
    %297 = arith.addf %291, %296 : vector<4x1152xf32>
    %c0_148 = arith.constant 0 : index
    %c97_149 = arith.constant 97 : index
    %298 = vector.load %arg9[%c0_148, %c97_149] : memref<4x1408xf32, #tpu.memory_space<vmem>>, vector<1x1152xf32>
    %c0_150 = arith.constant 0 : index
    %c8_151 = arith.constant 8 : index
    %299 = vector.load %arg5[%c0_150, %c8_151] : memref<4x36xf32, #tpu.memory_space<vmem>>, vector<4x1xf32>
    %300 = vector.broadcast %299 : vector<4x1xf32> to vector<4x1152xf32>
    %301 = vector.broadcast %298 : vector<1x1152xf32> to vector<4x1152xf32>
    %302 = arith.mulf %300, %301 : vector<4x1152xf32>
    %303 = arith.addf %297, %302 : vector<4x1152xf32>
    %c1_152 = arith.constant 1 : index
    %c97_153 = arith.constant 97 : index
    %304 = vector.load %arg9[%c1_152, %c97_153] : memref<4x1408xf32, #tpu.memory_space<vmem>>, vector<1x1152xf32>
    %c0_154 = arith.constant 0 : index
    %c9_155 = arith.constant 9 : index
    %305 = vector.load %arg5[%c0_154, %c9_155] : memref<4x36xf32, #tpu.memory_space<vmem>>, vector<4x1xf32>
    %306 = vector.broadcast %305 : vector<4x1xf32> to vector<4x1152xf32>
    %307 = vector.broadcast %304 : vector<1x1152xf32> to vector<4x1152xf32>
    %308 = arith.mulf %306, %307 : vector<4x1152xf32>
    %309 = arith.addf %303, %308 : vector<4x1152xf32>
    %c2_156 = arith.constant 2 : index
    %c97_157 = arith.constant 97 : index
    %310 = vector.load %arg9[%c2_156, %c97_157] : memref<4x1408xf32, #tpu.memory_space<vmem>>, vector<1x1152xf32>
    %c0_158 = arith.constant 0 : index
    %c10_159 = arith.constant 10 : index
    %311 = vector.load %arg5[%c0_158, %c10_159] : memref<4x36xf32, #tpu.memory_space<vmem>>, vector<4x1xf32>
    %312 = vector.broadcast %311 : vector<4x1xf32> to vector<4x1152xf32>
    %313 = vector.broadcast %310 : vector<1x1152xf32> to vector<4x1152xf32>
    %314 = arith.mulf %312, %313 : vector<4x1152xf32>
    %315 = arith.addf %309, %314 : vector<4x1152xf32>
    %c3_160 = arith.constant 3 : index
    %c97_161 = arith.constant 97 : index
    %316 = vector.load %arg9[%c3_160, %c97_161] : memref<4x1408xf32, #tpu.memory_space<vmem>>, vector<1x1152xf32>
    %c0_162 = arith.constant 0 : index
    %c11_163 = arith.constant 11 : index
    %317 = vector.load %arg5[%c0_162, %c11_163] : memref<4x36xf32, #tpu.memory_space<vmem>>, vector<4x1xf32>
    %318 = vector.broadcast %317 : vector<4x1xf32> to vector<4x1152xf32>
    %319 = vector.broadcast %316 : vector<1x1152xf32> to vector<4x1152xf32>
    %320 = arith.mulf %318, %319 : vector<4x1152xf32>
    %321 = arith.addf %315, %320 : vector<4x1152xf32>
    %c0_164 = arith.constant 0 : index
    %c127_165 = arith.constant 127 : index
    %322 = vector.load %arg9[%c0_164, %c127_165] : memref<4x1408xf32, #tpu.memory_space<vmem>>, vector<1x1152xf32>
    %c0_166 = arith.constant 0 : index
    %c12_167 = arith.constant 12 : index
    %323 = vector.load %arg5[%c0_166, %c12_167] : memref<4x36xf32, #tpu.memory_space<vmem>>, vector<4x1xf32>
    %324 = vector.broadcast %323 : vector<4x1xf32> to vector<4x1152xf32>
    %325 = vector.broadcast %322 : vector<1x1152xf32> to vector<4x1152xf32>
    %326 = arith.mulf %324, %325 : vector<4x1152xf32>
    %327 = arith.addf %321, %326 : vector<4x1152xf32>
    %c1_168 = arith.constant 1 : index
    %c127_169 = arith.constant 127 : index
    %328 = vector.load %arg9[%c1_168, %c127_169] : memref<4x1408xf32, #tpu.memory_space<vmem>>, vector<1x1152xf32>
    %c0_170 = arith.constant 0 : index
    %c13_171 = arith.constant 13 : index
    %329 = vector.load %arg5[%c0_170, %c13_171] : memref<4x36xf32, #tpu.memory_space<vmem>>, vector<4x1xf32>
    %330 = vector.broadcast %329 : vector<4x1xf32> to vector<4x1152xf32>
    %331 = vector.broadcast %328 : vector<1x1152xf32> to vector<4x1152xf32>
    %332 = arith.mulf %330, %331 : vector<4x1152xf32>
    %333 = arith.addf %327, %332 : vector<4x1152xf32>
    %c2_172 = arith.constant 2 : index
    %c127_173 = arith.constant 127 : index
    %334 = vector.load %arg9[%c2_172, %c127_173] : memref<4x1408xf32, #tpu.memory_space<vmem>>, vector<1x1152xf32>
    %c0_174 = arith.constant 0 : index
    %c14_175 = arith.constant 14 : index
    %335 = vector.load %arg5[%c0_174, %c14_175] : memref<4x36xf32, #tpu.memory_space<vmem>>, vector<4x1xf32>
    %336 = vector.broadcast %335 : vector<4x1xf32> to vector<4x1152xf32>
    %337 = vector.broadcast %334 : vector<1x1152xf32> to vector<4x1152xf32>
    %338 = arith.mulf %336, %337 : vector<4x1152xf32>
    %339 = arith.addf %333, %338 : vector<4x1152xf32>
    %c3_176 = arith.constant 3 : index
    %c127_177 = arith.constant 127 : index
    %340 = vector.load %arg9[%c3_176, %c127_177] : memref<4x1408xf32, #tpu.memory_space<vmem>>, vector<1x1152xf32>
    %c0_178 = arith.constant 0 : index
    %c15_179 = arith.constant 15 : index
    %341 = vector.load %arg5[%c0_178, %c15_179] : memref<4x36xf32, #tpu.memory_space<vmem>>, vector<4x1xf32>
    %342 = vector.broadcast %341 : vector<4x1xf32> to vector<4x1152xf32>
    %343 = vector.broadcast %340 : vector<1x1152xf32> to vector<4x1152xf32>
    %344 = arith.mulf %342, %343 : vector<4x1152xf32>
    %345 = arith.addf %339, %344 : vector<4x1152xf32>
    %c0_180 = arith.constant 0 : index
    %c128_181 = arith.constant 128 : index
    %346 = vector.load %arg9[%c0_180, %c128_181] : memref<4x1408xf32, #tpu.memory_space<vmem>>, vector<1x1152xf32>
    %c0_182 = arith.constant 0 : index
    %c16_183 = arith.constant 16 : index
    %347 = vector.load %arg5[%c0_182, %c16_183] : memref<4x36xf32, #tpu.memory_space<vmem>>, vector<4x1xf32>
    %348 = vector.broadcast %347 : vector<4x1xf32> to vector<4x1152xf32>
    %349 = vector.broadcast %346 : vector<1x1152xf32> to vector<4x1152xf32>
    %350 = arith.mulf %348, %349 : vector<4x1152xf32>
    %351 = arith.addf %345, %350 : vector<4x1152xf32>
    %c1_184 = arith.constant 1 : index
    %c128_185 = arith.constant 128 : index
    %352 = vector.load %arg9[%c1_184, %c128_185] : memref<4x1408xf32, #tpu.memory_space<vmem>>, vector<1x1152xf32>
    %c0_186 = arith.constant 0 : index
    %c17_187 = arith.constant 17 : index
    %353 = vector.load %arg5[%c0_186, %c17_187] : memref<4x36xf32, #tpu.memory_space<vmem>>, vector<4x1xf32>
    %354 = vector.broadcast %353 : vector<4x1xf32> to vector<4x1152xf32>
    %355 = vector.broadcast %352 : vector<1x1152xf32> to vector<4x1152xf32>
    %356 = arith.mulf %354, %355 : vector<4x1152xf32>
    %357 = arith.addf %351, %356 : vector<4x1152xf32>
    %c2_188 = arith.constant 2 : index
    %c128_189 = arith.constant 128 : index
    %358 = vector.load %arg9[%c2_188, %c128_189] : memref<4x1408xf32, #tpu.memory_space<vmem>>, vector<1x1152xf32>
    %c0_190 = arith.constant 0 : index
    %c18_191 = arith.constant 18 : index
    %359 = vector.load %arg5[%c0_190, %c18_191] : memref<4x36xf32, #tpu.memory_space<vmem>>, vector<4x1xf32>
    %360 = vector.broadcast %359 : vector<4x1xf32> to vector<4x1152xf32>
    %361 = vector.broadcast %358 : vector<1x1152xf32> to vector<4x1152xf32>
    %362 = arith.mulf %360, %361 : vector<4x1152xf32>
    %363 = arith.addf %357, %362 : vector<4x1152xf32>
    %c3_192 = arith.constant 3 : index
    %c128_193 = arith.constant 128 : index
    %364 = vector.load %arg9[%c3_192, %c128_193] : memref<4x1408xf32, #tpu.memory_space<vmem>>, vector<1x1152xf32>
    %c0_194 = arith.constant 0 : index
    %c19_195 = arith.constant 19 : index
    %365 = vector.load %arg5[%c0_194, %c19_195] : memref<4x36xf32, #tpu.memory_space<vmem>>, vector<4x1xf32>
    %366 = vector.broadcast %365 : vector<4x1xf32> to vector<4x1152xf32>
    %367 = vector.broadcast %364 : vector<1x1152xf32> to vector<4x1152xf32>
    %368 = arith.mulf %366, %367 : vector<4x1152xf32>
    %369 = arith.addf %363, %368 : vector<4x1152xf32>
    %c0_196 = arith.constant 0 : index
    %c129_197 = arith.constant 129 : index
    %370 = vector.load %arg9[%c0_196, %c129_197] : memref<4x1408xf32, #tpu.memory_space<vmem>>, vector<1x1152xf32>
    %c0_198 = arith.constant 0 : index
    %c20_199 = arith.constant 20 : index
    %371 = vector.load %arg5[%c0_198, %c20_199] : memref<4x36xf32, #tpu.memory_space<vmem>>, vector<4x1xf32>
    %372 = vector.broadcast %371 : vector<4x1xf32> to vector<4x1152xf32>
    %373 = vector.broadcast %370 : vector<1x1152xf32> to vector<4x1152xf32>
    %374 = arith.mulf %372, %373 : vector<4x1152xf32>
    %375 = arith.addf %369, %374 : vector<4x1152xf32>
    %c1_200 = arith.constant 1 : index
    %c129_201 = arith.constant 129 : index
    %376 = vector.load %arg9[%c1_200, %c129_201] : memref<4x1408xf32, #tpu.memory_space<vmem>>, vector<1x1152xf32>
    %c0_202 = arith.constant 0 : index
    %c21_203 = arith.constant 21 : index
    %377 = vector.load %arg5[%c0_202, %c21_203] : memref<4x36xf32, #tpu.memory_space<vmem>>, vector<4x1xf32>
    %378 = vector.broadcast %377 : vector<4x1xf32> to vector<4x1152xf32>
    %379 = vector.broadcast %376 : vector<1x1152xf32> to vector<4x1152xf32>
    %380 = arith.mulf %378, %379 : vector<4x1152xf32>
    %381 = arith.addf %375, %380 : vector<4x1152xf32>
    %c2_204 = arith.constant 2 : index
    %c129_205 = arith.constant 129 : index
    %382 = vector.load %arg9[%c2_204, %c129_205] : memref<4x1408xf32, #tpu.memory_space<vmem>>, vector<1x1152xf32>
    %c0_206 = arith.constant 0 : index
    %c22_207 = arith.constant 22 : index
    %383 = vector.load %arg5[%c0_206, %c22_207] : memref<4x36xf32, #tpu.memory_space<vmem>>, vector<4x1xf32>
    %384 = vector.broadcast %383 : vector<4x1xf32> to vector<4x1152xf32>
    %385 = vector.broadcast %382 : vector<1x1152xf32> to vector<4x1152xf32>
    %386 = arith.mulf %384, %385 : vector<4x1152xf32>
    %387 = arith.addf %381, %386 : vector<4x1152xf32>
    %c3_208 = arith.constant 3 : index
    %c129_209 = arith.constant 129 : index
    %388 = vector.load %arg9[%c3_208, %c129_209] : memref<4x1408xf32, #tpu.memory_space<vmem>>, vector<1x1152xf32>
    %c0_210 = arith.constant 0 : index
    %c23_211 = arith.constant 23 : index
    %389 = vector.load %arg5[%c0_210, %c23_211] : memref<4x36xf32, #tpu.memory_space<vmem>>, vector<4x1xf32>
    %390 = vector.broadcast %389 : vector<4x1xf32> to vector<4x1152xf32>
    %391 = vector.broadcast %388 : vector<1x1152xf32> to vector<4x1152xf32>
    %392 = arith.mulf %390, %391 : vector<4x1152xf32>
    %393 = arith.addf %387, %392 : vector<4x1152xf32>
    %c0_212 = arith.constant 0 : index
    %c159_213 = arith.constant 159 : index
    %394 = vector.load %arg9[%c0_212, %c159_213] : memref<4x1408xf32, #tpu.memory_space<vmem>>, vector<1x1152xf32>
    %c0_214 = arith.constant 0 : index
    %c24_215 = arith.constant 24 : index
    %395 = vector.load %arg5[%c0_214, %c24_215] : memref<4x36xf32, #tpu.memory_space<vmem>>, vector<4x1xf32>
    %396 = vector.broadcast %395 : vector<4x1xf32> to vector<4x1152xf32>
    %397 = vector.broadcast %394 : vector<1x1152xf32> to vector<4x1152xf32>
    %398 = arith.mulf %396, %397 : vector<4x1152xf32>
    %399 = arith.addf %393, %398 : vector<4x1152xf32>
    %c1_216 = arith.constant 1 : index
    %c159_217 = arith.constant 159 : index
    %400 = vector.load %arg9[%c1_216, %c159_217] : memref<4x1408xf32, #tpu.memory_space<vmem>>, vector<1x1152xf32>
    %c0_218 = arith.constant 0 : index
    %c25_219 = arith.constant 25 : index
    %401 = vector.load %arg5[%c0_218, %c25_219] : memref<4x36xf32, #tpu.memory_space<vmem>>, vector<4x1xf32>
    %402 = vector.broadcast %401 : vector<4x1xf32> to vector<4x1152xf32>
    %403 = vector.broadcast %400 : vector<1x1152xf32> to vector<4x1152xf32>
    %404 = arith.mulf %402, %403 : vector<4x1152xf32>
    %405 = arith.addf %399, %404 : vector<4x1152xf32>
    %c2_220 = arith.constant 2 : index
    %c159_221 = arith.constant 159 : index
    %406 = vector.load %arg9[%c2_220, %c159_221] : memref<4x1408xf32, #tpu.memory_space<vmem>>, vector<1x1152xf32>
    %c0_222 = arith.constant 0 : index
    %c26_223 = arith.constant 26 : index
    %407 = vector.load %arg5[%c0_222, %c26_223] : memref<4x36xf32, #tpu.memory_space<vmem>>, vector<4x1xf32>
    %408 = vector.broadcast %407 : vector<4x1xf32> to vector<4x1152xf32>
    %409 = vector.broadcast %406 : vector<1x1152xf32> to vector<4x1152xf32>
    %410 = arith.mulf %408, %409 : vector<4x1152xf32>
    %411 = arith.addf %405, %410 : vector<4x1152xf32>
    %c3_224 = arith.constant 3 : index
    %c159_225 = arith.constant 159 : index
    %412 = vector.load %arg9[%c3_224, %c159_225] : memref<4x1408xf32, #tpu.memory_space<vmem>>, vector<1x1152xf32>
    %c0_226 = arith.constant 0 : index
    %c27_227 = arith.constant 27 : index
    %413 = vector.load %arg5[%c0_226, %c27_227] : memref<4x36xf32, #tpu.memory_space<vmem>>, vector<4x1xf32>
    %414 = vector.broadcast %413 : vector<4x1xf32> to vector<4x1152xf32>
    %415 = vector.broadcast %412 : vector<1x1152xf32> to vector<4x1152xf32>
    %416 = arith.mulf %414, %415 : vector<4x1152xf32>
    %417 = arith.addf %411, %416 : vector<4x1152xf32>
    %c0_228 = arith.constant 0 : index
    %c160_229 = arith.constant 160 : index
    %418 = vector.load %arg9[%c0_228, %c160_229] : memref<4x1408xf32, #tpu.memory_space<vmem>>, vector<1x1152xf32>
    %c0_230 = arith.constant 0 : index
    %c28_231 = arith.constant 28 : index
    %419 = vector.load %arg5[%c0_230, %c28_231] : memref<4x36xf32, #tpu.memory_space<vmem>>, vector<4x1xf32>
    %420 = vector.broadcast %419 : vector<4x1xf32> to vector<4x1152xf32>
    %421 = vector.broadcast %418 : vector<1x1152xf32> to vector<4x1152xf32>
    %422 = arith.mulf %420, %421 : vector<4x1152xf32>
    %423 = arith.addf %417, %422 : vector<4x1152xf32>
    %c1_232 = arith.constant 1 : index
    %c160_233 = arith.constant 160 : index
    %424 = vector.load %arg9[%c1_232, %c160_233] : memref<4x1408xf32, #tpu.memory_space<vmem>>, vector<1x1152xf32>
    %c0_234 = arith.constant 0 : index
    %c29_235 = arith.constant 29 : index
    %425 = vector.load %arg5[%c0_234, %c29_235] : memref<4x36xf32, #tpu.memory_space<vmem>>, vector<4x1xf32>
    %426 = vector.broadcast %425 : vector<4x1xf32> to vector<4x1152xf32>
    %427 = vector.broadcast %424 : vector<1x1152xf32> to vector<4x1152xf32>
    %428 = arith.mulf %426, %427 : vector<4x1152xf32>
    %429 = arith.addf %423, %428 : vector<4x1152xf32>
    %c2_236 = arith.constant 2 : index
    %c160_237 = arith.constant 160 : index
    %430 = vector.load %arg9[%c2_236, %c160_237] : memref<4x1408xf32, #tpu.memory_space<vmem>>, vector<1x1152xf32>
    %c0_238 = arith.constant 0 : index
    %c30_239 = arith.constant 30 : index
    %431 = vector.load %arg5[%c0_238, %c30_239] : memref<4x36xf32, #tpu.memory_space<vmem>>, vector<4x1xf32>
    %432 = vector.broadcast %431 : vector<4x1xf32> to vector<4x1152xf32>
    %433 = vector.broadcast %430 : vector<1x1152xf32> to vector<4x1152xf32>
    %434 = arith.mulf %432, %433 : vector<4x1152xf32>
    %435 = arith.addf %429, %434 : vector<4x1152xf32>
    %c3_240 = arith.constant 3 : index
    %c160_241 = arith.constant 160 : index
    %436 = vector.load %arg9[%c3_240, %c160_241] : memref<4x1408xf32, #tpu.memory_space<vmem>>, vector<1x1152xf32>
    %c0_242 = arith.constant 0 : index
    %c31_243 = arith.constant 31 : index
    %437 = vector.load %arg5[%c0_242, %c31_243] : memref<4x36xf32, #tpu.memory_space<vmem>>, vector<4x1xf32>
    %438 = vector.broadcast %437 : vector<4x1xf32> to vector<4x1152xf32>
    %439 = vector.broadcast %436 : vector<1x1152xf32> to vector<4x1152xf32>
    %440 = arith.mulf %438, %439 : vector<4x1152xf32>
    %441 = arith.addf %435, %440 : vector<4x1152xf32>
    %c0_244 = arith.constant 0 : index
    %c161_245 = arith.constant 161 : index
    %442 = vector.load %arg9[%c0_244, %c161_245] : memref<4x1408xf32, #tpu.memory_space<vmem>>, vector<1x1152xf32>
    %c0_246 = arith.constant 0 : index
    %c32_247 = arith.constant 32 : index
    %443 = vector.load %arg5[%c0_246, %c32_247] : memref<4x36xf32, #tpu.memory_space<vmem>>, vector<4x1xf32>
    %444 = vector.broadcast %443 : vector<4x1xf32> to vector<4x1152xf32>
    %445 = vector.broadcast %442 : vector<1x1152xf32> to vector<4x1152xf32>
    %446 = arith.mulf %444, %445 : vector<4x1152xf32>
    %447 = arith.addf %441, %446 : vector<4x1152xf32>
    %c1_248 = arith.constant 1 : index
    %c161_249 = arith.constant 161 : index
    %448 = vector.load %arg9[%c1_248, %c161_249] : memref<4x1408xf32, #tpu.memory_space<vmem>>, vector<1x1152xf32>
    %c0_250 = arith.constant 0 : index
    %c33_251 = arith.constant 33 : index
    %449 = vector.load %arg5[%c0_250, %c33_251] : memref<4x36xf32, #tpu.memory_space<vmem>>, vector<4x1xf32>
    %450 = vector.broadcast %449 : vector<4x1xf32> to vector<4x1152xf32>
    %451 = vector.broadcast %448 : vector<1x1152xf32> to vector<4x1152xf32>
    %452 = arith.mulf %450, %451 : vector<4x1152xf32>
    %453 = arith.addf %447, %452 : vector<4x1152xf32>
    %c2_252 = arith.constant 2 : index
    %c161_253 = arith.constant 161 : index
    %454 = vector.load %arg9[%c2_252, %c161_253] : memref<4x1408xf32, #tpu.memory_space<vmem>>, vector<1x1152xf32>
    %c0_254 = arith.constant 0 : index
    %c34_255 = arith.constant 34 : index
    %455 = vector.load %arg5[%c0_254, %c34_255] : memref<4x36xf32, #tpu.memory_space<vmem>>, vector<4x1xf32>
    %456 = vector.broadcast %455 : vector<4x1xf32> to vector<4x1152xf32>
    %457 = vector.broadcast %454 : vector<1x1152xf32> to vector<4x1152xf32>
    %458 = arith.mulf %456, %457 : vector<4x1152xf32>
    %459 = arith.addf %453, %458 : vector<4x1152xf32>
    %c3_256 = arith.constant 3 : index
    %c161_257 = arith.constant 161 : index
    %460 = vector.load %arg9[%c3_256, %c161_257] : memref<4x1408xf32, #tpu.memory_space<vmem>>, vector<1x1152xf32>
    %c0_258 = arith.constant 0 : index
    %c35_259 = arith.constant 35 : index
    %461 = vector.load %arg5[%c0_258, %c35_259] : memref<4x36xf32, #tpu.memory_space<vmem>>, vector<4x1xf32>
    %462 = vector.broadcast %461 : vector<4x1xf32> to vector<4x1152xf32>
    %463 = vector.broadcast %460 : vector<1x1152xf32> to vector<4x1152xf32>
    %464 = arith.mulf %462, %463 : vector<4x1152xf32>
    %465 = arith.addf %459, %464 : vector<4x1152xf32>
    %466 = vector.broadcast %0 : vector<1x1152xf32> to vector<4x1152xf32>
    %467 = arith.mulf %465, %466 : vector<4x1152xf32>
    %468 = arith.mulf %467, %467 : vector<4x1152xf32>
    %469 = tpu.concatenate %467, %468 in 0 : vector<4x1152xf32>, vector<4x1152xf32> -> vector<8x1152xf32>
    %cst_260 = arith.constant dense<0.000000e+00> : vector<8xf32>
    %470 = vector.multi_reduction <add>, %469, %cst_260 [1] : vector<8x1152xf32> to vector<8xf32>
    %471 = vector.shape_cast %470 : vector<8xf32> to vector<8x1xf32>
    %472 = vector.extract_strided_slice %471 {offsets = [0, 0], sizes = [4, 1], strides = [1, 1]} : vector<8x1xf32> to vector<4x1xf32>
    %cst_261 = arith.constant 0.001953125 : f32
    %473 = vector.broadcast %cst_261 : f32 to vector<4x1xf32>
    %474 = arith.mulf %472, %473 : vector<4x1xf32>
    %475 = vector.extract_strided_slice %471 {offsets = [4, 0], sizes = [4, 1], strides = [1, 1]} : vector<8x1xf32> to vector<4x1xf32>
    %cst_262 = arith.constant 0.001953125 : f32
    %476 = vector.broadcast %cst_262 : f32 to vector<4x1xf32>
    %477 = arith.mulf %475, %476 : vector<4x1xf32>
    %478 = arith.mulf %474, %474 : vector<4x1xf32>
    %479 = arith.subf %477, %478 : vector<4x1xf32>
    %c0_263 = arith.constant 0 : index
    %c0_264 = arith.constant 0 : index
    %480 = vector.load %arg6[%c0_263, %c0_264] : memref<4x1xf32, #tpu.memory_space<vmem>>, vector<4x1xf32>
    %cst_265 = arith.constant 9.99999974E-6 : f32
    %481 = vector.broadcast %cst_265 : f32 to vector<4x1xf32>
    %482 = arith.addf %479, %481 : vector<4x1xf32>
    %483 = math.rsqrt %482 : vector<4x1xf32>
    %484 = arith.mulf %480, %483 : vector<4x1xf32>
    %c0_266 = arith.constant 0 : index
    %c0_267 = arith.constant 0 : index
    %485 = vector.load %arg7[%c0_266, %c0_267] : memref<4x1xf32, #tpu.memory_space<vmem>>, vector<4x1xf32>
    %486 = arith.mulf %474, %484 : vector<4x1xf32>
    %487 = arith.subf %485, %486 : vector<4x1xf32>
    %488 = vector.broadcast %484 : vector<4x1xf32> to vector<4x1152xf32>
    %489 = arith.mulf %465, %488 : vector<4x1152xf32>
    %490 = vector.broadcast %487 : vector<4x1xf32> to vector<4x1152xf32>
    %491 = arith.addf %489, %490 : vector<4x1152xf32>
    %c0_268 = arith.constant 0 : index
    %c128_269 = arith.constant 128 : index
    %492 = vector.load %arg0[%c0_268, %c128_269] : memref<4x1408xf32, #tpu.memory_space<vmem>>, vector<4x1152xf32>
    %493 = arith.addf %491, %492 : vector<4x1152xf32>
    %cst_270 = arith.constant 0.000000e+00 : f32
    %494 = vector.broadcast %cst_270 : f32 to vector<4x1152xf32>
    %495 = arith.maximumf %493, %494 : vector<4x1152xf32>
    %c0_271 = arith.constant 0 : index
    %c0_272 = arith.constant 0 : index
    %496 = vector.load %arg8[%c0_271, %c0_272] : memref<4x1152xf32, #tpu.memory_space<vmem>>, vector<4x1152xf32>
    tpu.vector_store %arg8[%c0_271, %c0_272], %495 {strides = array<i32>} : memref<4x1152xf32, #tpu.memory_space<vmem>>, vector<4x1152xf32>,
    return
  }
}

</mosaic_0001>

<bundles_post_ra>
// kernel: basic_block_forward.1
= control target key start
LH: loop header
LB: loop body
LE: loop exit
PB: predicated region body
PF: predicated region fallthrough
CT: control target
= control target key end

     0   :  { %v12323_v0 = vmov 4   ;;  %v12325_v1 = vmov 2   ;;  %v12328_v3 = vmov 1   ;;  %v6229_v4 = vmov 3   ;;  %s6233_s9 = smov 127   ;;  %s6236_s24 = smov 126   ;;  %s12312_s2 = inlined_call_operand.vmem [shape: f32[4,36], index: 2, kind: input, shape index: {}]   ;;  %s12313_s0 = inlined_call_operand.vmem [shape: f32[4,1408], index: 0, kind: input, shape index: {}]   ;;  %s12314_s1 = inlined_call_operand.vmem [shape: f32[1,1152], index: 1, kind: input, shape index: {}]   ;;  %s12315_s3 = inlined_call_operand.vmem [shape: f32[4,1], index: 3, kind: input, shape index: {}]   ;;  %s12316_s4 = inlined_call_operand.vmem [shape: f32[4,1], index: 4, kind: input, shape index: {}]   ;;  %s12317_s5 = inlined_call_operand.vmem [shape: f32[4,36], index: 5, kind: input, shape index: {}]   ;;  %s12318_s6 = inlined_call_operand.vmem [shape: f32[4,1], index: 6, kind: input, shape index: {}]   ;;  %s12319_s7 = inlined_call_operand.vmem [shape: f32[4,1], index: 7, kind: input, shape index: {}]   ;;  %s12320_s8 = inlined_call_operand.vmem [shape: f32[4,1152], index: 8, kind: output, shape index: {}]  }
   0x1   :  { %6137 = vset.pattern.permute.xlu2 %v12323_v0  ;;  %6135 = vset.pattern.permute.xlu1 %v12325_v1  ;;  %v6322_v2 = vld [vmem:[%s12312_s2] sm:$0xf]  ;;  %v12322_v5 = vmov 6   ;;  %v12327_v6 = vmov 5   ;;  %v12326_v7 = vmov 7   ;;  %v12321_v59 = vmov 8  }
   0x2   :  { %223 = vperm.xlu2 %6137, %v6322_v2   ;;  %127 = vperm.xlu1 %6135, %v6322_v2   ;;  %v31_v8 = vld [vmem:[%s12313_s0] ss:$4 sm:$0xff]  ;;  %v6066_v33 = vld [vmem:[%s12313_s0 + $0x1] ss:$4 sm:$0xff]  ;;  %v6068_v55 = vld [vmem:[%s12313_s0 + $0x2] ss:$4 sm:$0xff] }
   0x3   :  { %6134 = vset.pattern.permute.xlu0 %v12328_v3  ;;  %v6338_v9 = vperm.slane %v31_v8, 3  ;;  %v6340_v10 = vperm.slane %v31_v8, 1  ;;  %v6342_v11 = vperm.slane %v31_v8, 0  ;;  %v6349_v16 = vperm.slane %v31_v8, 6  ;;  %s6241_s25 = smov 96   ;;  %s6246_s28 = smov 95  }
   0x4   :  { %77 = vperm.xlu0 %6134, %v6322_v2   ;;  %v6351_v17 = vperm.slane %v31_v8, 4  ;;  %v6354_v18 = vperm.slane %v31_v8, 2  ;;  %v6065_v22 = vld [vmem:[%s12313_s0 + $0x20] ss:$4 sm:$0x3]  ;;  %v6366_v24 = vperm.slane %v31_v8, 7 }
   0x5   :  { %12951 = vst [vmem:[#allocation3_spill] sm:$0xff] %v6338_v9  ;;  %v6364_v23 = vperm.slane %v6065_v22, 1  ;;  %v6369_v25 = vperm.slane %v31_v8, 5  ;;  %v6377_v29 = vperm.slane %v6065_v22, 0  ;;  %v6388_v34 = vperm.slane %v6066_v33, 1  ;;  %s6251_s29 = smov 94  }
   0x6   :  { %12952 = vst [vmem:[#allocation4_spill] sm:$0xff] %v6340_v10  ;;  %v6390_v35 = vperm.slane %v6066_v33, 2  ;;  %v6392_v36 = vperm.slane %v6066_v33, 0  ;;  %v6400_v41 = vperm.slane %v6066_v33, 4  ;;  %v6402_v42 = vperm.slane %v6066_v33, 5  ;;  %s6256_s23 = smov 64  }
   0x7   :  { %12953 = vst [vmem:[#allocation5_spill] sm:$0xff] %v6342_v11  ;;  %v6404_v43 = vperm.slane %v6066_v33, 3  ;;  %v6067_v48 = vld [vmem:[%s12313_s0 + $0x21] ss:$4 sm:$0x3]  ;;  %v6417_v49 = vperm.slane %v6066_v33, 7 }
   0x8   :  { %12954 = vst [vmem:[#allocation6_spill] sm:$0xff] %v6349_v16  ;;  %v6419_v50 = vperm.slane %v6067_v48, 0  ;;  %v6421_v51 = vperm.slane %v6066_v33, 6  ;;  %v6432_v57 = vperm.slane %v6068_v55, 4  ;;  %v6434_v58 = vperm.slane %v6068_v55, 0  ;;  %s6261_s26 = smov 63  }
   0x9   :  { %12955 = vst [vmem:[#allocation7_spill] sm:$0xff] %v6351_v17  ;;  %v6437_v60 = vperm.slane %v6067_v48, 1  ;;  %v6447_v8 = vperm.slane %v6068_v55, 2  ;;  %v6069_v33 = vld [vmem:[%s12313_s0 + $0x22] ss:$4 sm:$0x3] }
   0xa   :  { %6136 = vset.pattern.permute.xlu1 %v6229_v4  ;;  %12956 = vst [vmem:[#allocation8_spill] sm:$0xff] %v6354_v18  ;;  %v6489_v48 = vperm.slane %v6069_v33, 1  ;;  %s6266_s27 = smov 62   ;;  %vm266_vm0 = vcmask 1039360   ;;  %vm559_vm1 = vcmask 1031168   ;;  %vm852_vm2 = vcmask 785408  }
   0xb   :  { %177 = vperm.xlu1 %6136, %v6322_v2   ;;  %12957 = vst [vmem:[#allocation9_spill] sm:$0xff] %v6364_v23  ;;  %vm1165_vm3 = vcmask 777216   ;;  %vm1540_vm4 = vcmask 769024   ;;  %vm1911_vm5 = vcmask 523264   ;;  %vm2204_vm6 = vcmask 515072  }
   0xc   :  { %6139 = vset.pattern.permute.xlu0 %v12322_v5  ;;  %12958 = vst [vmem:[#allocation10_spill] sm:$0xff] %v6366_v24  ;;  %vm2497_vm7 = vcmask 506880   ;;  %vm2843_vm8 = vcmask 1043456   ;;  %vm2884_vm9 = vcmask 269312  }
   0xd   :  { %370 = vperm.xlu0 %6139, %v6322_v2   ;;  %12959 = vst [vmem:[#allocation11_spill] sm:$0xff] %v6369_v25 }
   0xe   :  { %12960 = vst [vmem:[#allocation12_spill] sm:$0xff] %v6377_v29 }
   0xf   :  { %12962 = vst [vmem:[#allocation14_spill] sm:$0xff] %v6400_v41 }
  0x10   :  { %12963 = vst [vmem:[#allocation15_spill] sm:$0xff] %v6402_v42 }
  0x11   :  { %12964 = vst [vmem:[#allocation16_spill] sm:$0xff] %v6404_v43 }
  0x12   :  { %12965 = vst [vmem:[#allocation17_spill] sm:$0xff] %v6417_v49 }
  0x13   :  { %6138 = vset.pattern.permute.xlu1 %v12327_v6  ;;  %12966 = vst [vmem:[#allocation18_spill] sm:$0xff] %v6419_v50 }
  0x14   :  { %297 = vperm.xlu1 %6138, %v6322_v2   ;;  %12967 = vst [vmem:[#allocation19_spill] sm:$0xff] %v6421_v51 }
  0x15   :  { %6140 = vset.pattern.permute.xlu0 %v12326_v7  ;;  %12968 = vst [vmem:[#allocation20_spill] sm:$0xff] %v6437_v60 }
  0x16   :  { %443 = vperm.xlu0 %6140, %v6322_v2   ;;  %12973 = vst [vmem:[#allocation25_spill] sm:$0xff] %v6489_v48 }
  0x1c   :  { %6173 = vset.pattern.permute.xlu1 %v6229_v4  ;;  %v6445_v4 = vperm.slane %v6068_v55, 7 }
  0x1e   :  { %6141 = vset.pattern.permute.xlu0 %v12321_v59 }
  0x5c   :  { %v224_v12 = vpop.permute.xlu2 %223 }
  0x5d   :  { %v229_v13 = vmul.f32 %v224_v12, %v6338_v9  ;;  %v227_v14 = vmul.f32 %v224_v12, %v6340_v10  ;;  %v226_v15 = vmul.f32 %v224_v12, %v6342_v11  ;;  %v232_v19 = vmul.f32 %v224_v12, %v6349_v16 }
  0x5e   :  { %v230_v20 = vmul.f32 %v224_v12, %v6351_v17  ;;  %v228_v21 = vmul.f32 %v224_v12, %v6354_v18  ;;  %v235_v26 = vmul.f32 %v224_v12, %v6364_v23  ;;  %v233_v27 = vmul.f32 %v224_v12, %v6366_v24 }
  0x5f   :  { %252 = vrot.lane.b32.xlu0 %v229_v13, %s6233_s9  ;;  %248 = vrot.lane.b32.xlu1 %v227_v14, %s6233_s9  ;;  %v231_v28 = vmul.f32 %v224_v12, %v6369_v25  ;;  %v234_v31 = vmul.f32 %v224_v12, %v6377_v29  ;;  %v6449_v12 = vperm.slane %v6068_v55, 1 }
  0x60   :  { %246 = vrot.lane.b32.xlu2 %v226_v15, %s6233_s9 }
  0x67   :  { %258 = vrot.lane.b32.xlu0 %v232_v19, %s6233_s9  ;;  %254 = vrot.lane.b32.xlu1 %v230_v20, %s6233_s9  ;;  %v6070_v19 = vld [vmem:[%s12313_s0 + $0x3] ss:$4 sm:$0xff] }
  0x68   :  { %250 = vrot.lane.b32.xlu2 %v228_v21, %s6233_s9  ;;  %v6460_v21 = vperm.slane %v6070_v19, 4 }
  0x6a   :  { %12969 = vst [vmem:[#allocation21_spill] sm:$0xff] %v6460_v21 }
  0x6f   :  { %264 = vrot.lane.b32.xlu0 %v235_v26, %s6233_s9  ;;  %260 = vrot.lane.b32.xlu1 %v233_v27, %s6233_s9  ;;  %v6463_v26 = vperm.slane %v6068_v55, 5  ;;  %v6465_v27 = vperm.slane %v6068_v55, 3 }
  0x70   :  { %256 = vrot.lane.b32.xlu2 %v231_v28, %s6233_s9 }
  0x74   :  { %v6379_v30 = vpop.permute.xlu1 %127 }
  0x76   :  { %v6409_v47 = vpop.permute.xlu0 %77 }
  0x78   :  { %262 = vrot.lane.b32.xlu2 %v234_v31, %s6233_s9 }
  0x7d   :  { %v6383_v32 = vpop.permute.xlu1 %177 }
  0x7e   :  { %12961 = vst [vmem:[#allocation13_spill] sm:$0xff] %v6383_v32 }
  0x7f   :  { %v371_v56 = vpop.permute.xlu0 %370 }
  0x80   :  { %v377_v61 = vmul.f32 %v371_v56, %v6432_v57  ;;  %v373_v62 = vmul.f32 %v371_v56, %v6434_v58  ;;  %v380_v13 = vmul.f32 %v371_v56, %v6445_v4  ;;  %v375_v14 = vmul.f32 %v371_v56, %v6447_v8 }
  0x81   :  { %v374_v15 = vmul.f32 %v371_v56, %v6449_v12  ;;  %v378_v28 = vmul.f32 %v371_v56, %v6463_v26  ;;  %v376_v31 = vmul.f32 %v371_v56, %v6465_v27 }
  0x86   :  { %v298_v37 = vpop.permute.xlu1 %297 }
  0x87   :  { %v301_v38 = vmul.f32 %v298_v37, %v6388_v34  ;;  %v302_v39 = vmul.f32 %v298_v37, %v6390_v35  ;;  %v300_v40 = vmul.f32 %v298_v37, %v6392_v36  ;;  %v304_v44 = vmul.f32 %v298_v37, %v6400_v41 }
  0x88   :  { %v305_v45 = vmul.f32 %v298_v37, %v6402_v42  ;;  %v303_v46 = vmul.f32 %v298_v37, %v6404_v43  ;;  %v307_v52 = vmul.f32 %v298_v37, %v6417_v49  ;;  %v308_v53 = vmul.f32 %v298_v37, %v6419_v50  ;;  %v444_v20 = vpop.permute.xlu0 %443 }
  0x89   :  { %322 = vrot.lane.b32.xlu0 %v301_v38, %s6233_s9  ;;  %324 = vrot.lane.b32.xlu1 %v302_v39, %s6233_s9  ;;  %v306_v54 = vmul.f32 %v298_v37, %v6421_v51  ;;  %v309_v63 = vmul.f32 %v298_v37, %v6437_v60  ;;  %v450_v22 = vmul.f32 %v444_v20, %v6460_v21  ;;  %v6475_v37 = vperm.slane %v6070_v19, 7 }
  0x8a   :  { %320 = vrot.lane.b32.xlu2 %v300_v40, %s6233_s9  ;;  %v6477_v38 = vperm.slane %v6069_v33, 0  ;;  %v6479_v39 = vperm.slane %v6068_v55, 6  ;;  %v6498_v55 = vperm.slane %v6070_v19, 1 }
  0x8b   :  { %12970 = vst [vmem:[#allocation22_spill] sm:$0xff] %v6475_v37  ;;  %v453_v40 = vmul.f32 %v444_v20, %v6475_v37 }
  0x8c   :  { %12971 = vst [vmem:[#allocation23_spill] sm:$0xff] %v6479_v39 }
  0x8d   :  { %12975 = vst [vmem:[#allocation27_spill] sm:$0xff] %v6498_v55 }
  0x91   :  { %328 = vrot.lane.b32.xlu0 %v304_v44, %s6233_s9  ;;  %330 = vrot.lane.b32.xlu1 %v305_v45, %s6233_s9  ;;  %v381_v44 = vmul.f32 %v371_v56, %v6477_v38  ;;  %v379_v45 = vmul.f32 %v371_v56, %v6479_v39 }
  0x92   :  { %326 = vrot.lane.b32.xlu2 %v303_v46, %s6233_s9  ;;  %v6487_v46 = vperm.slane %v6070_v19, 0 }
  0x94   :  { %12972 = vst [vmem:[#allocation24_spill] sm:$0xff] %v6487_v46 }
  0x99   :  { %334 = vrot.lane.b32.xlu0 %v307_v52, %s6233_s9  ;;  %336 = vrot.lane.b32.xlu1 %v308_v53, %s6233_s9  ;;  %v446_v52 = vmul.f32 %v444_v20, %v6487_v46  ;;  %v382_v53 = vmul.f32 %v371_v56, %v6489_v48  ;;  %v6506_v56 = vperm.slane %v6070_v19, 3 }
  0x9a   :  { %332 = vrot.lane.b32.xlu2 %v306_v54, %s6233_s9  ;;  %v6496_v54 = vperm.slane %v6070_v19, 2 }
  0x9b   :  { %12977 = vst [vmem:[#allocation29_spill] sm:$0xff] %v6506_v56 }
  0x9c   :  { %12974 = vst [vmem:[#allocation26_spill] sm:$0xff] %v6496_v54 }
  0xa1   :  { %401 = vrot.lane.b32.xlu0 %v377_v61, %s6233_s9  ;;  %393 = vrot.lane.b32.xlu1 %v373_v62, %s6233_s9  ;;  %v448_v61 = vmul.f32 %v444_v20, %v6496_v54  ;;  %v447_v62 = vmul.f32 %v444_v20, %v6498_v55 }
  0xa2   :  { %338 = vrot.lane.b32.xlu2 %v309_v63, %s6233_s9  ;;  %v6504_v63 = vperm.slane %v6070_v19, 5 }
  0xa4   :  { %12976 = vst [vmem:[#allocation28_spill] sm:$0xff] %v6504_v63 }
  0xa9   :  { %407 = vrot.lane.b32.xlu0 %v380_v13, %s6233_s9  ;;  %397 = vrot.lane.b32.xlu1 %v375_v14, %s6233_s9  ;;  %v451_v13 = vmul.f32 %v444_v20, %v6504_v63  ;;  %v449_v14 = vmul.f32 %v444_v20, %v6506_v56 }
  0xaa   :  { %395 = vrot.lane.b32.xlu2 %v374_v15, %s6233_s9  ;;  %v6071_v15 = vld [vmem:[%s12313_s0 + $0x23] ss:$4 sm:$0x3] }
  0xb1   :  { %474 = vrot.lane.b32.xlu0 %v450_v22, %s6233_s9  ;;  %403 = vrot.lane.b32.xlu1 %v378_v28, %s6233_s9  ;;  %v6515_v22 = vperm.slane %v6071_v15, 0  ;;  %v6517_v28 = vperm.slane %v6070_v19, 6 }
  0xb2   :  { %399 = vrot.lane.b32.xlu2 %v376_v31, %s6233_s9 }
  0xb3   :  { %12978 = vst [vmem:[#allocation30_spill] sm:$0xff] %v6515_v22  ;;  %v454_v31 = vmul.f32 %v444_v20, %v6515_v22  ;;  %v452_v33 = vmul.f32 %v444_v20, %v6517_v28 }
  0xb4   :  { %12979 = vst [vmem:[#allocation31_spill] sm:$0xff] %v6517_v28 }
  0xb9   :  { %480 = vrot.lane.b32.xlu0 %v453_v40, %s6233_s9  ;;  %409 = vrot.lane.b32.xlu1 %v381_v44, %s6233_s9  ;;  %v6523_v40 = vperm.slane %v6071_v15, 1 }
  0xba   :  { %405 = vrot.lane.b32.xlu2 %v379_v45, %s6233_s9 }
  0xbb   :  { %12980 = vst [vmem:[#allocation32_spill] sm:$0xff] %v6523_v40  ;;  %v455_v45 = vmul.f32 %v444_v20, %v6523_v40 }
  0xc1   :  { %516 = vperm.xlu0 %6141, %v6322_v2   ;;  %466 = vrot.lane.b32.xlu1 %v446_v52, %s6233_s9 }
  0xc2   :  { %411 = vrot.lane.b32.xlu2 %v382_v53, %s6233_s9 }
  0xc9   :  { %470 = vrot.lane.b32.xlu1 %v448_v61, %s6233_s9 }
  0xca   :  { %468 = vrot.lane.b32.xlu2 %v447_v62, %s6233_s9 }
  0xd1   :  { %476 = vrot.lane.b32.xlu1 %v451_v13, %s6233_s9  ;;  %v6525_v44 = vpop.permute.xlu0 %252 }
  0xd2   :  { %472 = vrot.lane.b32.xlu2 %v449_v14, %s6233_s9  ;;  %12981 = vst [vmem:[#allocation33_spill] sm:$0xff] %v6525_v44 }
  0xd9   :  { %482 = vrot.lane.b32.xlu1 %v454_v31, %s6233_s9  ;;  %v6529_v52 = vpop.permute.xlu0 %258  ;;  %v12324_v31 = vmov 9  }
  0xda   :  { %478 = vrot.lane.b32.xlu2 %v452_v33, %s6233_s9  ;;  %12982 = vst [vmem:[#allocation34_spill] sm:$0xff] %v6529_v52  ;;  %6142 = vset.pattern.permute.xlu0 %v12324_v31 }
  0xe1   :  { %v6531_v19 = vpop.permute.xlu0 %264 }
  0xe2   :  { %484 = vrot.lane.b32.xlu2 %v455_v45, %s6233_s9  ;;  %12983 = vst [vmem:[#allocation35_spill] sm:$0xff] %v6531_v19 }
  0xfb   :  { %v6533_v53 = vpop.permute.xlu0 %322 }
  0xfc   :  { %12984 = vst [vmem:[#allocation36_spill] sm:$0xff] %v6533_v53 }
 0x103   :  { %v6535_v61 = vpop.permute.xlu0 %328 }
 0x104   :  { %12985 = vst [vmem:[#allocation37_spill] sm:$0xff] %v6535_v61 }
 0x10b   :  { %v6537_v62 = vpop.permute.xlu0 %334 }
 0x10c   :  { %12986 = vst [vmem:[#allocation38_spill] sm:$0xff] %v6537_v62 }
 0x113   :  { %v6539_v13 = vpop.permute.xlu0 %401 }
 0x114   :  { %12987 = vst [vmem:[#allocation39_spill] sm:$0xff] %v6539_v13 }
 0x11b   :  { %v6541_v14 = vpop.permute.xlu0 %407 }
 0x11c   :  { %12988 = vst [vmem:[#allocation40_spill] sm:$0xff] %v6541_v14 }
 0x123   :  { %v6543_v15 = vpop.permute.xlu0 %474 }
 0x124   :  { %12989 = vst [vmem:[#allocation41_spill] sm:$0xff] %v6543_v15 }
 0x12b   :  { %v6546_v20 = vpop.permute.xlu0 %480 }
 0x12c   :  { %12990 = vst [vmem:[#allocation42_spill] sm:$0xff] %v6546_v20 }
 0x133   :  { %v517_v33 = vpop.permute.xlu0 %516 }
 0x134   :  { %v523_v45 = vmul.f32 %v517_v33, %v6351_v17  ;;  %v519_v59 = vmul.f32 %v517_v33, %v6342_v11  ;;  %v520_v5 = vmul.f32 %v517_v33, %v6340_v10  ;;  %v526_v0 = vmul.f32 %v517_v33, %v6366_v24 }
 0x135   :  { %v521_v31 = vmul.f32 %v517_v33, %v6354_v18  ;;  %v522_v1 = vmul.f32 %v517_v33, %v6338_v9  ;;  %v524_v7 = vmul.f32 %v517_v33, %v6369_v25 }
 0x136   :  { %547 = vrot.lane.b32.xlu0 %v523_v45, %s6236_s24  ;;  %539 = vrot.lane.b32.xlu1 %v519_v59, %s6236_s24  ;;  %v525_v45 = vmul.f32 %v517_v33, %v6349_v16  ;;  %v528_v59 = vmul.f32 %v517_v33, %v6364_v23 }
 0x137   :  { %541 = vrot.lane.b32.xlu2 %v520_v5, %s6236_s24  ;;  %v527_v5 = vmul.f32 %v517_v33, %v6377_v29 }
 0x13e   :  { %553 = vrot.lane.b32.xlu0 %v526_v0, %s6236_s24  ;;  %543 = vrot.lane.b32.xlu1 %v521_v31, %s6236_s24  ;;  %v12329_v0 = vmov 10  }
 0x13f   :  { %545 = vrot.lane.b32.xlu2 %v522_v1, %s6236_s24 }
 0x146   :  { %590 = vperm.xlu0 %6142, %v6322_v2   ;;  %549 = vrot.lane.b32.xlu1 %v524_v7, %s6236_s24 }
 0x147   :  { %551 = vrot.lane.b32.xlu2 %v525_v45, %s6236_s24 }
 0x14e   :  { %555 = vrot.lane.b32.xlu1 %v527_v5, %s6236_s24  ;;  %6143 = vset.pattern.permute.xlu0 %v12329_v0 }
 0x14f   :  { %557 = vrot.lane.b32.xlu2 %v528_v59, %s6236_s24 }
 0x1a8   :  { %v6570_v1 = vpop.permute.xlu0 %547 }
 0x1a9   :  { %12991 = vst [vmem:[#allocation43_spill] sm:$0xff] %v6570_v1 }
 0x1b0   :  { %v6572_v31 = vpop.permute.xlu0 %553 }
 0x1b1   :  { %12992 = vst [vmem:[#allocation44_spill] sm:$0xff] %v6572_v31 }
 0x1b8   :  { %v591_v6 = vpop.permute.xlu0 %590 }
 0x1b9   :  { %v597_v7 = vmul.f32 %v591_v6, %v6400_v41  ;;  %v593_v45 = vmul.f32 %v591_v6, %v6392_v36  ;;  %v594_v3 = vmul.f32 %v591_v6, %v6388_v34  ;;  %v600_v33 = vmul.f32 %v591_v6, %v6417_v49 }
 0x1ba   :  { %v595_v5 = vmul.f32 %v591_v6, %v6390_v35  ;;  %v596_v59 = vmul.f32 %v591_v6, %v6404_v43  ;;  %v598_v0 = vmul.f32 %v591_v6, %v6402_v42 }
 0x1bb   :  { %621 = vrot.lane.b32.xlu0 %v597_v7, %s6236_s24  ;;  %613 = vrot.lane.b32.xlu1 %v593_v45, %s6236_s24  ;;  %v599_v7 = vmul.f32 %v591_v6, %v6421_v51  ;;  %v602_v45 = vmul.f32 %v591_v6, %v6437_v60 }
 0x1bc   :  { %615 = vrot.lane.b32.xlu2 %v594_v3, %s6236_s24  ;;  %v601_v3 = vmul.f32 %v591_v6, %v6419_v50 }
 0x1c3   :  { %627 = vrot.lane.b32.xlu0 %v600_v33, %s6236_s24  ;;  %617 = vrot.lane.b32.xlu1 %v595_v5, %s6236_s24  ;;  %v12332_v33 = vmov 11  }
 0x1c4   :  { %619 = vrot.lane.b32.xlu2 %v596_v59, %s6236_s24 }
 0x1cb   :  { %663 = vperm.xlu0 %6143, %v6322_v2   ;;  %623 = vrot.lane.b32.xlu1 %v598_v0, %s6236_s24 }
 0x1cc   :  { %625 = vrot.lane.b32.xlu2 %v599_v7, %s6236_s24 }
 0x1d3   :  { %629 = vrot.lane.b32.xlu1 %v601_v3, %s6236_s24  ;;  %6144 = vset.pattern.permute.xlu0 %v12332_v33 }
 0x1d4   :  { %631 = vrot.lane.b32.xlu2 %v602_v45, %s6236_s24 }
 0x22d   :  { %v6596_v5 = vpop.permute.xlu0 %621 }
 0x22e   :  { %12993 = vst [vmem:[#allocation45_spill] sm:$0xff] %v6596_v5 }
 0x235   :  { %v6598_v59 = vpop.permute.xlu0 %627 }
 0x236   :  { %12994 = vst [vmem:[#allocation46_spill] sm:$0xff] %v6598_v59 }
 0x23d   :  { %v664_v31 = vpop.permute.xlu0 %663 }
 0x23e   :  { %v670_v0 = vmul.f32 %v664_v31, %v6432_v57  ;;  %v666_v7 = vmul.f32 %v664_v31, %v6434_v58  ;;  %v667_v1 = vmul.f32 %v664_v31, %v6449_v12  ;;  %v673_v6 = vmul.f32 %v664_v31, %v6445_v4 }
 0x23f   :  { %v668_v3 = vmul.f32 %v664_v31, %v6447_v8  ;;  %v669_v45 = vmul.f32 %v664_v31, %v6465_v27  ;;  %v671_v33 = vmul.f32 %v664_v31, %v6463_v26 }
 0x240   :  { %694 = vrot.lane.b32.xlu0 %v670_v0, %s6236_s24  ;;  %686 = vrot.lane.b32.xlu1 %v666_v7, %s6236_s24  ;;  %v672_v0 = vmul.f32 %v664_v31, %v6479_v39  ;;  %v675_v7 = vmul.f32 %v664_v31, %v6489_v48 }
 0x241   :  { %688 = vrot.lane.b32.xlu2 %v667_v1, %s6236_s24  ;;  %v674_v1 = vmul.f32 %v664_v31, %v6477_v38 }
 0x248   :  { %700 = vrot.lane.b32.xlu0 %v673_v6, %s6236_s24  ;;  %690 = vrot.lane.b32.xlu1 %v668_v3, %s6236_s24  ;;  %v12335_v6 = vmov 12  }
 0x249   :  { %692 = vrot.lane.b32.xlu2 %v669_v45, %s6236_s24 }
 0x250   :  { %736 = vperm.xlu0 %6144, %v6322_v2   ;;  %696 = vrot.lane.b32.xlu1 %v671_v33, %s6236_s24 }
 0x251   :  { %698 = vrot.lane.b32.xlu2 %v672_v0, %s6236_s24 }
 0x258   :  { %702 = vrot.lane.b32.xlu1 %v674_v1, %s6236_s24  ;;  %6145 = vset.pattern.permute.xlu0 %v12335_v6 }
 0x259   :  { %704 = vrot.lane.b32.xlu2 %v675_v7, %s6236_s24 }
 0x2b2   :  { %v6622_v3 = vpop.permute.xlu0 %694 }
 0x2b3   :  { %12995 = vst [vmem:[#allocation47_spill] sm:$0xff] %v6622_v3 }
 0x2ba   :  { %v6624_v45 = vpop.permute.xlu0 %700 }
 0x2bb   :  { %12996 = vst [vmem:[#allocation48_spill] sm:$0xff] %v6624_v45 }
 0x2c2   :  { %v737_v59 = vpop.permute.xlu0 %736 }
 0x2c3   :  { %v743_v33 = vmul.f32 %v737_v59, %v6460_v21  ;;  %v739_v0 = vmul.f32 %v737_v59, %v6487_v46  ;;  %v740_v5 = vmul.f32 %v737_v59, %v6498_v55  ;;  %v746_v31 = vmul.f32 %v737_v59, %v6475_v37 }
 0x2c4   :  { %v741_v1 = vmul.f32 %v737_v59, %v6496_v54  ;;  %v742_v7 = vmul.f32 %v737_v59, %v6506_v56  ;;  %v744_v6 = vmul.f32 %v737_v59, %v6504_v63 }
 0x2c5   :  { %767 = vrot.lane.b32.xlu0 %v743_v33, %s6236_s24  ;;  %759 = vrot.lane.b32.xlu1 %v739_v0, %s6236_s24  ;;  %v745_v33 = vmul.f32 %v737_v59, %v6517_v28  ;;  %v748_v0 = vmul.f32 %v737_v59, %v6523_v40 }
 0x2c6   :  { %761 = vrot.lane.b32.xlu2 %v740_v5, %s6236_s24  ;;  %v747_v5 = vmul.f32 %v737_v59, %v6515_v22 }
 0x2cd   :  { %773 = vrot.lane.b32.xlu0 %v746_v31, %s6236_s24  ;;  %763 = vrot.lane.b32.xlu1 %v741_v1, %s6236_s24  ;;  %v12338_v31 = vmov 13  }
 0x2ce   :  { %765 = vrot.lane.b32.xlu2 %v742_v7, %s6236_s24 }
 0x2d5   :  { %809 = vperm.xlu0 %6145, %v6322_v2   ;;  %769 = vrot.lane.b32.xlu1 %v744_v6, %s6236_s24 }
 0x2d6   :  { %771 = vrot.lane.b32.xlu2 %v745_v33, %s6236_s24 }
 0x2dd   :  { %775 = vrot.lane.b32.xlu1 %v747_v5, %s6236_s24  ;;  %6146 = vset.pattern.permute.xlu0 %v12338_v31 }
 0x2de   :  { %777 = vrot.lane.b32.xlu2 %v748_v0, %s6236_s24 }
 0x337   :  { %v6648_v1 = vpop.permute.xlu0 %767 }
 0x338   :  { %12997 = vst [vmem:[#allocation49_spill] sm:$0xff] %v6648_v1 }
 0x33f   :  { %v6650_v7 = vpop.permute.xlu0 %773 }
 0x340   :  { %12998 = vst [vmem:[#allocation50_spill] sm:$0xff] %v6650_v7 }
 0x347   :  { %v810_v45 = vpop.permute.xlu0 %809 }
 0x348   :  { %v816_v6 = vmul.f32 %v810_v45, %v6351_v17  ;;  %v812_v33 = vmul.f32 %v810_v45, %v6342_v11  ;;  %v813_v3 = vmul.f32 %v810_v45, %v6340_v10  ;;  %v819_v59 = vmul.f32 %v810_v45, %v6366_v24 }
 0x349   :  { %v814_v5 = vmul.f32 %v810_v45, %v6354_v18  ;;  %v815_v0 = vmul.f32 %v810_v45, %v6338_v9  ;;  %v817_v31 = vmul.f32 %v810_v45, %v6369_v25 }
 0x34a   :  { %840 = vrot.lane.b32.xlu0 %v816_v6, %s6241_s25  ;;  %832 = vrot.lane.b32.xlu1 %v812_v33, %s6241_s25  ;;  %v818_v6 = vmul.f32 %v810_v45, %v6349_v16  ;;  %v821_v33 = vmul.f32 %v810_v45, %v6364_v23 }
 0x34b   :  { %834 = vrot.lane.b32.xlu2 %v813_v3, %s6241_s25  ;;  %v820_v3 = vmul.f32 %v810_v45, %v6377_v29 }
 0x352   :  { %846 = vrot.lane.b32.xlu0 %v819_v59, %s6241_s25  ;;  %836 = vrot.lane.b32.xlu1 %v814_v5, %s6241_s25  ;;  %v12341_v59 = vmov 14  }
 0x353   :  { %838 = vrot.lane.b32.xlu2 %v815_v0, %s6241_s25 }
 0x35a   :  { %883 = vperm.xlu0 %6146, %v6322_v2   ;;  %842 = vrot.lane.b32.xlu1 %v817_v31, %s6241_s25 }
 0x35b   :  { %844 = vrot.lane.b32.xlu2 %v818_v6, %s6241_s25 }
 0x362   :  { %848 = vrot.lane.b32.xlu1 %v820_v3, %s6241_s25  ;;  %6147 = vset.pattern.permute.xlu0 %v12341_v59 }
 0x363   :  { %850 = vrot.lane.b32.xlu2 %v821_v33, %s6241_s25 }
 0x3bc   :  { %v6674_v5 = vpop.permute.xlu0 %840 }
 0x3bd   :  { %12999 = vst [vmem:[#allocation51_spill] sm:$0xff] %v6674_v5 }
 0x3c4   :  { %v6676_v0 = vpop.permute.xlu0 %846 }
 0x3c5   :  { %13000 = vst [vmem:[#allocation52_spill] sm:$0xff] %v6676_v0 }
 0x3cc   :  { %v884_v24 = vpop.permute.xlu0 %883 }
 0x3cd   :  { %v890_v31 = vmul.f32 %v884_v24, %v6400_v41  ;;  %v886_v6 = vmul.f32 %v884_v24, %v6392_v36  ;;  %v887_v29 = vmul.f32 %v884_v24, %v6388_v34  ;;  %v893_v45 = vmul.f32 %v884_v24, %v6417_v49 }
 0x3ce   :  { %v888_v3 = vmul.f32 %v884_v24, %v6390_v35  ;;  %v889_v33 = vmul.f32 %v884_v24, %v6404_v43  ;;  %v891_v59 = vmul.f32 %v884_v24, %v6402_v42  ;;  %v12492_v41 = vmov 25  }
 0x3cf   :  { %914 = vrot.lane.b32.xlu0 %v890_v31, %s6241_s25  ;;  %906 = vrot.lane.b32.xlu1 %v886_v6, %s6241_s25  ;;  %v892_v31 = vmul.f32 %v884_v24, %v6421_v51  ;;  %v895_v6 = vmul.f32 %v884_v24, %v6437_v60 }
 0x3d0   :  { %908 = vrot.lane.b32.xlu2 %v887_v29, %s6241_s25  ;;  %v894_v29 = vmul.f32 %v884_v24, %v6419_v50 }
 0x3d7   :  { %920 = vrot.lane.b32.xlu0 %v893_v45, %s6241_s25  ;;  %910 = vrot.lane.b32.xlu1 %v888_v3, %s6241_s25  ;;  %v6699_v45 = vpop.permute.xlu2 %246 }
 0x3d8   :  { %912 = vrot.lane.b32.xlu2 %v889_v33, %s6241_s25  ;;  %13001 = vst [vmem:[#allocation53_spill] sm:$0xff] %v6699_v45 }
 0x3df   :  { %956 = vperm.xlu0 %6147, %v6322_v2   ;;  %916 = vrot.lane.b32.xlu1 %v891_v59, %s6241_s25  ;;  %v6701_v3 = vpop.permute.xlu2 %250 }
 0x3e0   :  { %918 = vrot.lane.b32.xlu2 %v892_v31, %s6241_s25  ;;  %13002 = vst [vmem:[#allocation54_spill] sm:$0xff] %v6701_v3 }
 0x3e7   :  { %922 = vrot.lane.b32.xlu1 %v894_v29, %s6241_s25  ;;  %v6703_v33 = vpop.permute.xlu2 %256  ;;  %v12352_v29 = vmov 15  }
 0x3e8   :  { %924 = vrot.lane.b32.xlu2 %v895_v6, %s6241_s25  ;;  %13003 = vst [vmem:[#allocation55_spill] sm:$0xff] %v6703_v33  ;;  %6148 = vset.pattern.permute.xlu0 %v12352_v29 }
 0x3ef   :  { %v6705_v23 = vpop.permute.xlu2 %262 }
 0x3f0   :  { %13004 = vst [vmem:[#allocation56_spill] sm:$0xff] %v6705_v23 }
 0x3f7   :  { %v6707_v25 = vpop.permute.xlu2 %320 }
 0x3f8   :  { %13005 = vst [vmem:[#allocation57_spill] sm:$0xff] %v6707_v25  ;;  %v12445_v25 = vmov 22  }
 0x3ff   :  { %v6709_v59 = vpop.permute.xlu2 %326 }
 0x400   :  { %13006 = vst [vmem:[#allocation58_spill] sm:$0xff] %v6709_v59 }
 0x407   :  { %v6711_v31 = vpop.permute.xlu2 %332 }
 0x408   :  { %13007 = vst [vmem:[#allocation59_spill] sm:$0xff] %v6711_v31 }
 0x40f   :  { %v6713_v17 = vpop.permute.xlu2 %338 }
 0x410   :  { %13008 = vst [vmem:[#allocation60_spill] sm:$0xff] %v6713_v17 }
 0x417   :  { %v6715_v24 = vpop.permute.xlu2 %395 }
 0x418   :  { %13009 = vst [vmem:[#allocation61_spill] sm:$0xff] %v6715_v24 }
 0x41f   :  { %v6720_v18 = vpop.permute.xlu2 %399 }
 0x420   :  { %13011 = vst [vmem:[#allocation63_spill] sm:$0xff] %v6720_v18 }
 0x427   :  { %v6724_v10 = vpop.permute.xlu2 %405 }
 0x428   :  { %13013 = vst [vmem:[#allocation65_spill] sm:$0xff] %v6724_v10 }
 0x42f   :  { %v6732_v29 = vpop.permute.xlu2 %411 }
 0x430   :  { %13014 = vst [vmem:[#allocation66_spill] sm:$0xff] %v6732_v29 }
 0x437   :  { %v6741_v1 = vpop.permute.xlu2 %468 }
 0x438   :  { %13015 = vst [vmem:[#allocation67_spill] sm:$0xff] %v6741_v1 }
 0x441   :  { %v6718_v6 = vpop.permute.xlu0 %914 }
 0x442   :  { %13010 = vst [vmem:[#allocation62_spill] sm:$0xff] %v6718_v6 }
 0x449   :  { %v6722_v16 = vpop.permute.xlu0 %920 }
 0x44a   :  { %13012 = vst [vmem:[#allocation64_spill] sm:$0xff] %v6722_v16 }
 0x451   :  { %v957_v9 = vpop.permute.xlu0 %956 }
 0x452   :  { %v963_v11 = vmul.f32 %v957_v9, %v6432_v57  ;;  %v959_v0 = vmul.f32 %v957_v9, %v6434_v58  ;;  %v960_v5 = vmul.f32 %v957_v9, %v6449_v12  ;;  %v966_v6 = vmul.f32 %v957_v9, %v6445_v4 }
 0x453   :  { %v961_v16 = vmul.f32 %v957_v9, %v6447_v8  ;;  %v962_v7 = vmul.f32 %v957_v9, %v6465_v27 }
 0x454   :  { %987 = vrot.lane.b32.xlu0 %v963_v11, %s6241_s25  ;;  %979 = vrot.lane.b32.xlu1 %v959_v0, %s6241_s25  ;;  %v964_v11 = vmul.f32 %v957_v9, %v6463_v26  ;;  %v967_v0 = vmul.f32 %v957_v9, %v6477_v38 }
 0x455   :  { %981 = vrot.lane.b32.xlu2 %v960_v5, %s6241_s25  ;;  %v965_v5 = vmul.f32 %v957_v9, %v6479_v39 }
 0x45c   :  { %993 = vrot.lane.b32.xlu0 %v966_v6, %s6241_s25  ;;  %983 = vrot.lane.b32.xlu1 %v961_v16, %s6241_s25  ;;  %v968_v6 = vmul.f32 %v957_v9, %v6489_v48  ;;  %v6750_v16 = vpop.permute.xlu2 %472 }
 0x45d   :  { %985 = vrot.lane.b32.xlu2 %v962_v7, %s6241_s25  ;;  %13016 = vst [vmem:[#allocation68_spill] sm:$0xff] %v6750_v16  ;;  %v12369_v16 = vmov 16  }
 0x464   :  { %1029 = vperm.xlu0 %6148, %v6322_v2   ;;  %989 = vrot.lane.b32.xlu1 %v964_v11, %s6241_s25  ;;  %v6753_v7 = vpop.permute.xlu2 %478 }
 0x465   :  { %991 = vrot.lane.b32.xlu2 %v965_v5, %s6241_s25  ;;  %13017 = vst [vmem:[#allocation69_spill] sm:$0xff] %v6753_v7 }
 0x46c   :  { %995 = vrot.lane.b32.xlu1 %v967_v0, %s6241_s25  ;;  %v6755_v20 = vpop.permute.xlu2 %484  ;;  %6149 = vset.pattern.permute.xlu0 %v12369_v16 }
 0x46d   :  { %997 = vrot.lane.b32.xlu2 %v968_v6, %s6241_s25  ;;  %13018 = vst [vmem:[#allocation70_spill] sm:$0xff] %v6755_v20 }
 0x474   :  { %v6757_v1 = vpop.permute.xlu2 %541 }
 0x475   :  { %13019 = vst [vmem:[#allocation71_spill] sm:$0xff] %v6757_v1 }
 0x47c   :  { %v6759_v15 = vpop.permute.xlu2 %545 }
 0x47d   :  { %13020 = vst [vmem:[#allocation72_spill] sm:$0xff] %v6759_v15 }
 0x484   :  { %v6761_v11 = vpop.permute.xlu2 %551 }
 0x485   :  { %13021 = vst [vmem:[#allocation73_spill] sm:$0xff] %v6761_v11 }
 0x48c   :  { %v6763_v5 = vpop.permute.xlu2 %557 }
 0x48d   :  { %13022 = vst [vmem:[#allocation74_spill] sm:$0xff] %v6763_v5 }
 0x494   :  { %v6765_v29 = vpop.permute.xlu2 %615 }
 0x495   :  { %13023 = vst [vmem:[#allocation75_spill] sm:$0xff] %v6765_v29 }
 0x49c   :  { %v6767_v9 = vpop.permute.xlu2 %619 }
 0x49d   :  { %13024 = vst [vmem:[#allocation76_spill] sm:$0xff] %v6767_v9 }
 0x4a4   :  { %v6769_v0 = vpop.permute.xlu2 %625 }
 0x4a5   :  { %13025 = vst [vmem:[#allocation77_spill] sm:$0xff] %v6769_v0 }
 0x4ac   :  { %v6774_v20 = vpop.permute.xlu2 %631 }
 0x4ad   :  { %13027 = vst [vmem:[#allocation79_spill] sm:$0xff] %v6774_v20 }
 0x4b4   :  { %v6778_v15 = vpop.permute.xlu2 %688 }
 0x4b5   :  { %13029 = vst [vmem:[#allocation81_spill] sm:$0xff] %v6778_v15 }
 0x4bc   :  { %v6786_v16 = vpop.permute.xlu2 %692 }
 0x4bd   :  { %13030 = vst [vmem:[#allocation82_spill] sm:$0xff] %v6786_v16 }
 0x4c4   :  { %v6796_v20 = vpop.permute.xlu2 %698 }
 0x4c5   :  { %13031 = vst [vmem:[#allocation83_spill] sm:$0xff] %v6796_v20 }
 0x4c6   :  { %v6772_v6 = vpop.permute.xlu0 %987 }
 0x4c7   :  { %13026 = vst [vmem:[#allocation78_spill] sm:$0xff] %v6772_v6 }
 0x4ce   :  { %v6776_v1 = vpop.permute.xlu0 %993 }
 0x4cf   :  { %13028 = vst [vmem:[#allocation80_spill] sm:$0xff] %v6776_v1 }
 0x4d6   :  { %v1030_v11 = vpop.permute.xlu0 %1029 }
 0x4d7   :  { %v1036_v5 = vmul.f32 %v1030_v11, %v6460_v21  ;;  %v1032_v29 = vmul.f32 %v1030_v11, %v6487_v46  ;;  %v1033_v9 = vmul.f32 %v1030_v11, %v6498_v55  ;;  %v1039_v6 = vmul.f32 %v1030_v11, %v6475_v37 }
 0x4d8   :  { %v1034_v1 = vmul.f32 %v1030_v11, %v6496_v54  ;;  %v1035_v15 = vmul.f32 %v1030_v11, %v6506_v56  ;;  %v12476_v46 = vmov 24  }
 0x4d9   :  { %1060 = vrot.lane.b32.xlu0 %v1036_v5, %s6241_s25  ;;  %1052 = vrot.lane.b32.xlu1 %v1032_v29, %s6241_s25  ;;  %v1037_v5 = vmul.f32 %v1030_v11, %v6504_v63  ;;  %v1038_v29 = vmul.f32 %v1030_v11, %v6517_v28 }
 0x4da   :  { %1054 = vrot.lane.b32.xlu2 %v1033_v9, %s6241_s25  ;;  %v1040_v9 = vmul.f32 %v1030_v11, %v6515_v22 }
 0x4e1   :  { %1066 = vrot.lane.b32.xlu0 %v1039_v6, %s6241_s25  ;;  %1056 = vrot.lane.b32.xlu1 %v1034_v1, %s6241_s25  ;;  %v1041_v6 = vmul.f32 %v1030_v11, %v6523_v40  ;;  %v12460_v40 = vmov 23  }
 0x4e2   :  { %1058 = vrot.lane.b32.xlu2 %v1035_v15, %s6241_s25  ;;  %v6805_v15 = vpop.permute.xlu2 %704 }
 0x4e3   :  { %13032 = vst [vmem:[#allocation84_spill] sm:$0xff] %v6805_v15  ;;  %v12390_v15 = vmov 17  }
 0x4e4   :  { %6150 = vset.pattern.permute.xlu2 %v12390_v15 }
 0x4e9   :  { %1106 = vperm.xlu0 %6149, %v6322_v2   ;;  %1062 = vrot.lane.b32.xlu1 %v1037_v5, %s6241_s25 }
 0x4ea   :  { %1064 = vrot.lane.b32.xlu2 %v1038_v29, %s6241_s25  ;;  %v6807_v1 = vpop.permute.xlu2 %761 }
 0x4eb   :  { %13033 = vst [vmem:[#allocation85_spill] sm:$0xff] %v6807_v1 }
 0x4f1   :  { %1068 = vrot.lane.b32.xlu1 %v1040_v9, %s6241_s25 }
 0x4f2   :  { %1070 = vrot.lane.b32.xlu2 %v1041_v6, %s6241_s25  ;;  %v6809_v16 = vpop.permute.xlu2 %765 }
 0x4f3   :  { %13034 = vst [vmem:[#allocation86_spill] sm:$0xff] %v6809_v16 }
 0x4fa   :  { %v6811_v20 = vpop.permute.xlu2 %771 }
 0x4fb   :  { %13035 = vst [vmem:[#allocation87_spill] sm:$0xff] %v6811_v20 }
 0x502   :  { %v6813_v0 = vpop.permute.xlu2 %777 }
 0x503   :  { %13036 = vst [vmem:[#allocation88_spill] sm:$0xff] %v6813_v0 }
 0x50a   :  { %v6815_v5 = vpop.permute.xlu2 %834 }
 0x50b   :  { %13037 = vst [vmem:[#allocation89_spill] sm:$0xff] %v6815_v5  ;;  %v6072_v5 = vld [vmem:[%s12313_s0 + $0x4] ss:$4 sm:$0xff] }
 0x50c   :  { %v1111_v0 = vperm.slane %v6072_v5, 0  ;;  %v1118_v15 = vperm.slane %v6072_v5, 7 }
 0x512   :  { %v6817_v29 = vpop.permute.xlu2 %838 }
 0x513   :  { %13038 = vst [vmem:[#allocation90_spill] sm:$0xff] %v6817_v29  ;;  %v1115_v29 = vperm.slane %v6072_v5, 4 }
 0x51a   :  { %v6819_v7 = vpop.permute.xlu2 %844 }
 0x51b   :  { %13039 = vst [vmem:[#allocation91_spill] sm:$0xff] %v6819_v7  ;;  %v1112_v7 = vperm.slane %v6072_v5, 1 }
 0x522   :  { %v6821_v11 = vpop.permute.xlu2 %850 }
 0x523   :  { %13040 = vst [vmem:[#allocation92_spill] sm:$0xff] %v6821_v11 }
 0x52a   :  { %v6823_v9 = vpop.permute.xlu2 %908 }
 0x52b   :  { %13041 = vst [vmem:[#allocation93_spill] sm:$0xff] %v6823_v9 }
 0x532   :  { %v6828_v1 = vpop.permute.xlu2 %912 }
 0x533   :  { %13043 = vst [vmem:[#allocation95_spill] sm:$0xff] %v6828_v1  ;;  %v1114_v1 = vperm.slane %v6072_v5, 3 }
 0x53a   :  { %v6835_v16 = vpop.permute.xlu2 %918 }
 0x53b   :  { %13045 = vst [vmem:[#allocation97_spill] sm:$0xff] %v6835_v16 }
 0x542   :  { %v6840_v18 = vpop.permute.xlu2 %924 }
 0x543   :  { %13046 = vst [vmem:[#allocation98_spill] sm:$0xff] %v6840_v18 }
 0x54b   :  { %v6825_v6 = vpop.permute.xlu0 %1060 }
 0x54c   :  { %13042 = vst [vmem:[#allocation94_spill] sm:$0xff] %v6825_v6 }
 0x553   :  { %v6830_v20 = vpop.permute.xlu0 %1066 }
 0x554   :  { %13044 = vst [vmem:[#allocation96_spill] sm:$0xff] %v6830_v20  ;;  %v1113_v20 = vperm.slane %v6072_v5, 2 }
 0x55b   :  { %v1107_v11 = vpop.permute.xlu0 %1106 }
 0x55c   :  { %v1133_v9 = vmul.f32 %v1115_v29, %v1107_v11  ;;  %v1129_v10 = vmul.f32 %v1111_v0, %v1107_v11  ;;  %v1130_v6 = vmul.f32 %v1112_v7, %v1107_v11  ;;  %v1136_v14 = vmul.f32 %v1118_v15, %v1107_v11 }
 0x55d   :  { %v1131_v24 = vmul.f32 %v1113_v20, %v1107_v11  ;;  %v1132_v13 = vmul.f32 %v1114_v1, %v1107_v11  ;;  %v1116_v7 = vperm.slane %v6072_v5, 5  ;;  %v1117_v0 = vperm.slane %v6072_v5, 6  ;;  %v6209_v20 = vld [vmem:[%s12313_s0 + $0x24] ss:$0 sm:$0xff] }
 0x55e   :  { %1155 = vrot.lane.b32.xlu0 %v1133_v9, %s6246_s28  ;;  %1147 = vrot.lane.b32.xlu1 %v1129_v10, %s6246_s28  ;;  %v6845_v10 = vpop.permute.xlu2 %981  ;;  %v1137_v15 = vmul.f32 %v6209_v20, %v1107_v11  ;;  %v12405_v20 = vmov 18  }
 0x55f   :  { %1149 = vrot.lane.b32.xlu2 %v1130_v6, %s6246_s28  ;;  %v1134_v29 = vmul.f32 %v1116_v7, %v1107_v11  ;;  %13047 = vst [vmem:[#allocation99_spill] sm:$0xff] %v6845_v10  ;;  %v1135_v9 = vmul.f32 %v1117_v0, %v1107_v11  ;;  %6151 = vset.pattern.permute.xlu0 %v12405_v20 }
 0x566   :  { %1161 = vrot.lane.b32.xlu0 %v1136_v14, %s6246_s28  ;;  %1151 = vrot.lane.b32.xlu1 %v1131_v24, %s6246_s28  ;;  %v6852_v14 = vpop.permute.xlu1 %248 }
 0x567   :  { %1153 = vrot.lane.b32.xlu2 %v1132_v13, %s6246_s28  ;;  %13048 = vst [vmem:[#allocation100_spill] sm:$0xff] %v6852_v14  ;;  %v6855_v13 = vpop.permute.xlu2 %985 }
 0x568   :  { %13049 = vst [vmem:[#allocation101_spill] sm:$0xff] %v6855_v13 }
 0x56e   :  { %1157 = vrot.lane.b32.xlu1 %v1134_v29, %s6246_s28 }
 0x56f   :  { %1159 = vrot.lane.b32.xlu2 %v1135_v9, %s6246_s28  ;;  %v6858_v24 = vpop.permute.xlu2 %991 }
 0x570   :  { %13050 = vst [vmem:[#allocation102_spill] sm:$0xff] %v6858_v24 }
 0x576   :  { %1163 = vrot.lane.b32.xlu1 %v1137_v15, %s6246_s28  ;;  %v6074_v15 = vld [vmem:[%s12313_s0 + $0x5] ss:$4 sm:$0xff] }
 0x577   :  { %1199 = vperm.xlu2 %6150, %v6322_v2   ;;  %v6860_v1 = vpop.permute.xlu2 %997  ;;  %v1209_v20 = vperm.slane %v6074_v15, 5 }
 0x578   :  { %13051 = vst [vmem:[#allocation103_spill] sm:$0xff] %v6860_v1  ;;  %v1205_v1 = vperm.slane %v6074_v15, 1 }
 0x57f   :  { %v6862_v5 = vpop.permute.xlu2 %1054 }
 0x580   :  { %13052 = vst [vmem:[#allocation104_spill] sm:$0xff] %v6862_v5  ;;  %v1206_v5 = vperm.slane %v6074_v15, 2 }
 0x587   :  { %v6864_v6 = vpop.permute.xlu2 %1058 }
 0x588   :  { %13053 = vst [vmem:[#allocation105_spill] sm:$0xff] %v6864_v6  ;;  %v1204_v6 = vperm.slane %v6074_v15, 0 }
 0x58f   :  { %v6866_v7 = vpop.permute.xlu2 %1064 }
 0x590   :  { %13054 = vst [vmem:[#allocation106_spill] sm:$0xff] %v6866_v7  ;;  %v6880_v7 = vpop.permute.xlu1 %254 }
 0x591   :  { %13059 = vst [vmem:[#allocation111_spill] sm:$0xff] %v6880_v7 }
 0x597   :  { %v6868_v0 = vpop.permute.xlu2 %1070 }
 0x598   :  { %13055 = vst [vmem:[#allocation107_spill] sm:$0xff] %v6868_v0  ;;  %v6885_v17 = vpop.permute.xlu1 %260 }
 0x599   :  { %13060 = vst [vmem:[#allocation112_spill] sm:$0xff] %v6885_v17 }
 0x5b9   :  { %v6870_v11 = vpop.permute.xlu2 %1149 }
 0x5ba   :  { %13056 = vst [vmem:[#allocation108_spill] sm:$0xff] %v6870_v11 }
 0x5c1   :  { %v6872_v29 = vpop.permute.xlu2 %1153 }
 0x5c2   :  { %13057 = vst [vmem:[#allocation109_spill] sm:$0xff] %v6872_v29  ;;  %v1207_v29 = vperm.slane %v6074_v15, 3 }
 0x5c9   :  { %v6874_v9 = vpop.permute.xlu2 %1159 }
 0x5ca   :  { %13058 = vst [vmem:[#allocation110_spill] sm:$0xff] %v6874_v9  ;;  %v1208_v9 = vperm.slane %v6074_v15, 4 }
 0x5d1   :  { %v1200_v24 = vpop.permute.xlu2 %1199 }
 0x5d2   :  { %v1224_v0 = vmul.f32 %v1206_v5, %v1200_v24  ;;  %v1223_v10 = vmul.f32 %v1205_v1, %v1200_v24  ;;  %v1222_v11 = vmul.f32 %v1204_v6, %v1200_v24  ;;  %v1227_v13 = vmul.f32 %v1209_v20, %v1200_v24  ;;  %v6893_v20 = vpop.permute.xlu1 %324 }
 0x5d3   :  { %v1226_v18 = vmul.f32 %v1208_v9, %v1200_v24  ;;  %v1225_v16 = vmul.f32 %v1207_v29, %v1200_v24  ;;  %v1211_v1 = vperm.slane %v6074_v15, 7  ;;  %v1210_v5 = vperm.slane %v6074_v15, 6  ;;  %13061 = vst [vmem:[#allocation113_spill] sm:$0xff] %v6893_v20  ;;  %v6076_v15 = vld [vmem:[%s12313_s0 + $0x6] ss:$4 sm:$0xff] }
 0x5d4   :  { %1244 = vrot.lane.b32.xlu2 %v1224_v0, %s6246_s28  ;;  %1242 = vrot.lane.b32.xlu1 %v1223_v10, %s6246_s28  ;;  %v6210_v10 = vld [vmem:[%s12313_s0 + $0x25] ss:$0 sm:$0xff]  ;;  %v12413_v9 = vmov 19  }
 0x5d5   :  { %1240 = vrot.lane.b32.xlu0 %v1222_v11, %s6246_s28  ;;  %v1230_v6 = vmul.f32 %v6210_v10, %v1200_v24  ;;  %v1229_v0 = vmul.f32 %v1211_v1, %v1200_v24  ;;  %v1228_v11 = vmul.f32 %v1210_v5, %v1200_v24  ;;  %6152 = vset.pattern.permute.xlu2 %v12413_v9  ;;  %v1300_v10 = vperm.slane %v6076_v15, 4 }
 0x5d6   :  { %v1297_v1 = vperm.slane %v6076_v15, 1  ;;  %v1303_v9 = vperm.slane %v6076_v15, 7 }
 0x5da   :  { %v6913_v5 = vpop.permute.xlu1 %330 }
 0x5db   :  { %13067 = vst [vmem:[#allocation119_spill] sm:$0xff] %v6913_v5 }
 0x5dc   :  { %1250 = vrot.lane.b32.xlu2 %v1227_v13, %s6246_s28  ;;  %1248 = vrot.lane.b32.xlu1 %v1226_v18, %s6246_s28  ;;  %v6899_v18 = vpop.permute.xlu0 %1155 }
 0x5dd   :  { %1246 = vrot.lane.b32.xlu0 %v1225_v16, %s6246_s28  ;;  %13062 = vst [vmem:[#allocation114_spill] sm:$0xff] %v6899_v18 }
 0x5e4   :  { %1256 = vrot.lane.b32.xlu2 %v1230_v6, %s6246_s28  ;;  %1254 = vrot.lane.b32.xlu1 %v1229_v0, %s6246_s28  ;;  %v6901_v16 = vpop.permute.xlu0 %1161 }
 0x5e5   :  { %1252 = vrot.lane.b32.xlu0 %v1228_v11, %s6246_s28  ;;  %13063 = vst [vmem:[#allocation115_spill] sm:$0xff] %v6901_v16  ;;  %v6918_v16 = vpop.permute.xlu1 %336 }
 0x5e6   :  { %13068 = vst [vmem:[#allocation120_spill] sm:$0xff] %v6918_v16 }
 0x5ed   :  { %1291 = vperm.xlu0 %6151, %v6322_v2   ;;  %v1296_v2 = vperm.slane %v6076_v15, 0 }
 0x647   :  { %v6903_v13 = vpop.permute.xlu0 %1240 }
 0x648   :  { %13064 = vst [vmem:[#allocation116_spill] sm:$0xff] %v6903_v13 }
 0x64f   :  { %v6905_v29 = vpop.permute.xlu0 %1246 }
 0x650   :  { %13065 = vst [vmem:[#allocation117_spill] sm:$0xff] %v6905_v29  ;;  %v1298_v29 = vperm.slane %v6076_v15, 2 }
 0x657   :  { %v6908_v24 = vpop.permute.xlu0 %1252 }
 0x658   :  { %13066 = vst [vmem:[#allocation118_spill] sm:$0xff] %v6908_v24  ;;  %v1299_v24 = vperm.slane %v6076_v15, 3 }
 0x65f   :  { %v1292_v6 = vpop.permute.xlu0 %1291 }
 0x660   :  { %v1318_v0 = vmul.f32 %v1300_v10, %v1292_v6  ;;  %v1315_v11 = vmul.f32 %v1297_v1, %v1292_v6  ;;  %v1314_v13 = vmul.f32 %v1296_v2, %v1292_v6  ;;  %v1321_v18 = vmul.f32 %v1303_v9, %v1292_v6 }
 0x661   :  { %v1317_v62 = vmul.f32 %v1299_v24, %v1292_v6  ;;  %v1316_v31 = vmul.f32 %v1298_v29, %v1292_v6  ;;  %v1302_v10 = vperm.slane %v6076_v15, 6  ;;  %v1301_v1 = vperm.slane %v6076_v15, 5  ;;  %v6211_v29 = vld [vmem:[%s12313_s0 + $0x26] ss:$0 sm:$0xff] }
 0x662   :  { %1340 = vrot.lane.b32.xlu0 %v1318_v0, %s6246_s28  ;;  %1334 = vrot.lane.b32.xlu2 %v1315_v11, %s6246_s28  ;;  %v6923_v0 = vpop.permute.xlu1 %393  ;;  %v1322_v9 = vmul.f32 %v6211_v29, %v1292_v6 }
 0x663   :  { %1332 = vrot.lane.b32.xlu1 %v1314_v13, %s6246_s28  ;;  %v1320_v2 = vmul.f32 %v1302_v10, %v1292_v6  ;;  %13069 = vst [vmem:[#allocation121_spill] sm:$0xff] %v6923_v0  ;;  %v1319_v13 = vmul.f32 %v1301_v1, %v1292_v6  ;;  %v6078_v1 = vld [vmem:[%s12313_s0 + $0x7] ss:$4 sm:$0xff] }
 0x664   :  { %v1388_v29 = vperm.slane %v6078_v1, 0  ;;  %v1392_v0 = vperm.slane %v6078_v1, 4 }
 0x66a   :  { %1346 = vrot.lane.b32.xlu0 %v1321_v18, %s6246_s28  ;;  %1338 = vrot.lane.b32.xlu2 %v1317_v62, %s6246_s28  ;;  %v6933_v62 = vld [vmem:[%s12312_s2] sm:$0xf]  ;;  %v6939_v18 = vpop.permute.xlu2 %1244 }
 0x66b   :  { %1336 = vrot.lane.b32.xlu1 %v1316_v31, %s6246_s28  ;;  %v6936_v31 = vpop.permute.xlu1 %397  ;;  %13071 = vst [vmem:[#allocation123_spill] sm:$0xff] %v6939_v18 }
 0x66c   :  { %13070 = vst [vmem:[#allocation122_spill] sm:$0xff] %v6936_v31 }
 0x672   :  { %1344 = vrot.lane.b32.xlu2 %v1320_v2, %s6246_s28  ;;  %v6941_v24 = vpop.permute.xlu2 %1250  ;;  %v12428_v2 = vmov 20  }
 0x673   :  { %1342 = vrot.lane.b32.xlu1 %v1319_v13, %s6246_s28  ;;  %13072 = vst [vmem:[#allocation124_spill] sm:$0xff] %v6941_v24  ;;  %6153 = vset.pattern.permute.xlu0 %v12428_v2  ;;  %v1390_v13 = vperm.slane %v6078_v1, 2  ;;  %v6955_v18 = vpop.permute.xlu1 %403 }
 0x674   :  { %13077 = vst [vmem:[#allocation129_spill] sm:$0xff] %v6955_v18 }
 0x67a   :  { %1383 = vperm.xlu2 %6152, %v6933_v62   ;;  %v6943_v15 = vpop.permute.xlu2 %1256 }
 0x67b   :  { %1348 = vrot.lane.b32.xlu1 %v1322_v9, %s6246_s28  ;;  %13073 = vst [vmem:[#allocation125_spill] sm:$0xff] %v6943_v15  ;;  %v1389_v9 = vperm.slane %v6078_v1, 1  ;;  %v6960_v5 = vpop.permute.xlu1 %409 }
 0x67c   :  { %13078 = vst [vmem:[#allocation130_spill] sm:$0xff] %v6960_v5 }
 0x6bc   :  { %v6945_v11 = vpop.permute.xlu2 %1334 }
 0x6bd   :  { %13074 = vst [vmem:[#allocation126_spill] sm:$0xff] %v6945_v11 }
 0x6c4   :  { %v6947_v6 = vpop.permute.xlu2 %1338 }
 0x6c5   :  { %13075 = vst [vmem:[#allocation127_spill] sm:$0xff] %v6947_v6  ;;  %v1391_v6 = vperm.slane %v6078_v1, 3 }
 0x6cc   :  { %v6949_v10 = vpop.permute.xlu2 %1344 }
 0x6cd   :  { %13076 = vst [vmem:[#allocation128_spill] sm:$0xff] %v6949_v10  ;;  %v1393_v10 = vperm.slane %v6078_v1, 5 }
 0x6d4   :  { %v1384_v24 = vpop.permute.xlu2 %1383 }
 0x6d5   :  { %v1408_v15 = vmul.f32 %v1390_v13, %v1384_v24  ;;  %v1406_v31 = vmul.f32 %v1388_v29, %v1384_v24  ;;  %v1407_v11 = vmul.f32 %v1389_v9, %v1384_v24  ;;  %v1411_v16 = vmul.f32 %v1393_v10, %v1384_v24 }
 0x6d6   :  { %v1409_v2 = vmul.f32 %v1391_v6, %v1384_v24  ;;  %v1410_v61 = vmul.f32 %v1392_v0, %v1384_v24  ;;  %v6970_v0 = vpop.permute.xlu1 %466  ;;  %v12431_v10 = vmov 21  }
 0x6d7   :  { %1428 = vrot.lane.b32.xlu2 %v1408_v15, %s6246_s28  ;;  %1424 = vrot.lane.b32.xlu0 %v1406_v31, %s6246_s28  ;;  %v6212_v31 = vld [vmem:[%s12313_s0 + $0x27] ss:$0 sm:$0xff]  ;;  %v1394_v15 = vperm.slane %v6078_v1, 6  ;;  %13079 = vst [vmem:[#allocation131_spill] sm:$0xff] %v6970_v0 }
 0x6d8   :  { %1426 = vrot.lane.b32.xlu1 %v1407_v11, %s6246_s28  ;;  %v1395_v11 = vperm.slane %v6078_v1, 7  ;;  %v1414_v13 = vmul.f32 %v6212_v31, %v1384_v24 }
 0x6d9   :  { %v1412_v29 = vmul.f32 %v1394_v15, %v1384_v24 }
 0x6da   :  { %v1413_v9 = vmul.f32 %v1395_v11, %v1384_v24 }
 0x6df   :  { %1434 = vrot.lane.b32.xlu2 %v1411_v16, %s6246_s28  ;;  %1430 = vrot.lane.b32.xlu0 %v1409_v2, %s6246_s28  ;;  %v6080_v2 = vld [vmem:[%s12313_s0 + $0x4] ss:$4 sm:$0xff] }
 0x6e0   :  { %1432 = vrot.lane.b32.xlu1 %v1410_v61, %s6246_s28  ;;  %v6974_v61 = vpop.permute.xlu0 %1340  ;;  %v6988_v31 = vperm.slane %v6080_v2, 4  ;;  %v6990_v15 = vperm.slane %v6080_v2, 1  ;;  %v6992_v11 = vperm.slane %v6080_v2, 0 }
 0x6e1   :  { %13080 = vst [vmem:[#allocation132_spill] sm:$0xff] %v6974_v61 }
 0x6e7   :  { %1440 = vrot.lane.b32.xlu2 %v1414_v13, %s6246_s28  ;;  %1436 = vrot.lane.b32.xlu0 %v1412_v29, %s6246_s28  ;;  %v6994_v13 = vpop.permute.xlu1 %470 }
 0x6e8   :  { %1438 = vrot.lane.b32.xlu1 %v1413_v9, %s6246_s28  ;;  %v6976_v16 = vpop.permute.xlu0 %1346  ;;  %13085 = vst [vmem:[#allocation137_spill] sm:$0xff] %v6994_v13 }
 0x6e9   :  { %13081 = vst [vmem:[#allocation133_spill] sm:$0xff] %v6976_v16  ;;  %v7006_v16 = vperm.slane %v6080_v2, 2 }
 0x6ef   :  { %1475 = vperm.xlu0 %6153, %v6933_v62   ;;  %v7010_v0 = vpop.permute.xlu1 %476 }
 0x6f0   :  { %13086 = vst [vmem:[#allocation138_spill] sm:$0xff] %v7010_v0  ;;  %v6081_v0 = vld [vmem:[%s12313_s0 + $0x24] ss:$4 sm:$0x3] }
 0x6f7   :  { %6154 = vset.pattern.permute.xlu0 %v12431_v10 }
 0x749   :  { %v6978_v6 = vpop.permute.xlu0 %1424 }
 0x74a   :  { %13082 = vst [vmem:[#allocation134_spill] sm:$0xff] %v6978_v6  ;;  %v7004_v6 = vperm.slane %v6080_v2, 3 }
 0x751   :  { %v6981_v24 = vpop.permute.xlu0 %1430 }
 0x752   :  { %13083 = vst [vmem:[#allocation135_spill] sm:$0xff] %v6981_v24 }
 0x759   :  { %v6983_v1 = vpop.permute.xlu0 %1436 }
 0x75a   :  { %13084 = vst [vmem:[#allocation136_spill] sm:$0xff] %v6983_v1  ;;  %v7002_v1 = vperm.slane %v6080_v2, 7 }
 0x761   :  { %v1476_v29 = vpop.permute.xlu0 %1475 }
 0x762   :  { %v1504_v9 = vmul.f32 %v6988_v31, %v1476_v29  ;;  %v1501_v10 = vmul.f32 %v6990_v15, %v1476_v29  ;;  %v1500_v24 = vmul.f32 %v6992_v11, %v1476_v29  ;;  %v1507_v61 = vmul.f32 %v7002_v1, %v1476_v29 }
 0x763   :  { %v1503_v13 = vmul.f32 %v7004_v6, %v1476_v29  ;;  %v1502_v5 = vmul.f32 %v7006_v16, %v1476_v29 }
 0x764   :  { %1528 = vrot.lane.b32.xlu0 %v1504_v9, %s6251_s29  ;;  %1522 = vrot.lane.b32.xlu2 %v1501_v10, %s6251_s29  ;;  %v7016_v10 = vperm.slane %v6080_v2, 6 }
 0x765   :  { %1520 = vrot.lane.b32.xlu1 %v1500_v24, %s6251_s29  ;;  %v7018_v24 = vperm.slane %v6080_v2, 5  ;;  %v7032_v2 = vperm.slane %v6081_v0, 0 }
 0x766   :  { %v1506_v9 = vmul.f32 %v7016_v10, %v1476_v29 }
 0x767   :  { %v1505_v18 = vmul.f32 %v7018_v24, %v1476_v29  ;;  %v1508_v59 = vmul.f32 %v7032_v2, %v1476_v29 }
 0x76c   :  { %1534 = vrot.lane.b32.xlu0 %v1507_v61, %s6251_s29  ;;  %1526 = vrot.lane.b32.xlu2 %v1503_v13, %s6251_s29  ;;  %v7027_v61 = vpop.permute.xlu1 %482 }
 0x76d   :  { %1524 = vrot.lane.b32.xlu1 %v1502_v5, %s6251_s29  ;;  %13087 = vst [vmem:[#allocation139_spill] sm:$0xff] %v7027_v61  ;;  %v7030_v5 = vperm.slane %v6081_v0, 1  ;;  %v6082_v0 = vld [vmem:[%s12313_s0 + $0x5] ss:$4 sm:$0xff] }
 0x76e   :  { %v7048_v61 = vperm.slane %v6082_v0, 4  ;;  %v7064_v17 = vperm.slane %v6082_v0, 3  ;;  %v7066_v23 = vperm.slane %v6082_v0, 2 }
 0x76f   :  { %v1509_v13 = vmul.f32 %v7030_v5, %v1476_v29  ;;  %v7050_v29 = vperm.slane %v6082_v0, 1 }
 0x774   :  { %1575 = vperm.xlu0 %6154, %v6933_v62   ;;  %1532 = vrot.lane.b32.xlu2 %v1506_v9, %s6251_s29  ;;  %v7037_v20 = vpop.permute.xlu1 %539 }
 0x775   :  { %1530 = vrot.lane.b32.xlu1 %v1505_v18, %s6251_s29  ;;  %13088 = vst [vmem:[#allocation140_spill] sm:$0xff] %v7037_v20 }
 0x77c   :  { %1538 = vrot.lane.b32.xlu2 %v1509_v13, %s6251_s29  ;;  %6155 = vset.pattern.permute.xlu0 %v12445_v25  ;;  %v7052_v13 = vperm.slane %v6082_v0, 0  ;;  %v7054_v20 = vpop.permute.xlu1 %543 }
 0x77d   :  { %1536 = vrot.lane.b32.xlu1 %v1508_v59, %s6251_s29  ;;  %13091 = vst [vmem:[#allocation143_spill] sm:$0xff] %v7054_v20 }
 0x784   :  { %v7070_v7 = vpop.permute.xlu1 %549 }
 0x785   :  { %13092 = vst [vmem:[#allocation144_spill] sm:$0xff] %v7070_v7  ;;  %v6083_v7 = vld [vmem:[%s12313_s0 + $0x25] ss:$4 sm:$0x3] }
 0x7d6   :  { %v7041_v9 = vpop.permute.xlu0 %1528 }
 0x7d7   :  { %13089 = vst [vmem:[#allocation141_spill] sm:$0xff] %v7041_v9 }
 0x7de   :  { %v7043_v18 = vpop.permute.xlu0 %1534 }
 0x7df   :  { %13090 = vst [vmem:[#allocation142_spill] sm:$0xff] %v7043_v18  ;;  %v7062_v18 = vperm.slane %v6082_v0, 7 }
 0x7e6   :  { %v1576_v59 = vpop.permute.xlu0 %1575 }
 0x7e7   :  { %v1604_v53 = vmul.f32 %v7048_v61, %v1576_v59  ;;  %v1601_v25 = vmul.f32 %v7050_v29, %v1576_v59  ;;  %v1600_v9 = vmul.f32 %v7052_v13, %v1576_v59  ;;  %v1607_v20 = vmul.f32 %v7062_v18, %v1576_v59 }
 0x7e8   :  { %v1603_v19 = vmul.f32 %v7064_v17, %v1576_v59  ;;  %v1602_v33 = vmul.f32 %v7066_v23, %v1576_v59 }
 0x7e9   :  { %1628 = vrot.lane.b32.xlu0 %v1604_v53, %s6251_s29  ;;  %1622 = vrot.lane.b32.xlu2 %v1601_v25, %s6251_s29  ;;  %v7076_v25 = vperm.slane %v6082_v0, 6  ;;  %v7078_v53 = vperm.slane %v6082_v0, 5 }
 0x7ea   :  { %1620 = vrot.lane.b32.xlu1 %v1600_v9, %s6251_s29 }
 0x7eb   :  { %v1606_v9 = vmul.f32 %v7076_v25, %v1576_v59  ;;  %v1605_v52 = vmul.f32 %v7078_v53, %v1576_v59 }
 0x7f1   :  { %1634 = vrot.lane.b32.xlu0 %v1607_v20, %s6251_s29  ;;  %1626 = vrot.lane.b32.xlu2 %v1603_v19, %s6251_s29  ;;  %v7087_v20 = vpop.permute.xlu1 %555  ;;  %v7090_v19 = vperm.slane %v6083_v7, 1 }
 0x7f2   :  { %1624 = vrot.lane.b32.xlu1 %v1602_v33, %s6251_s29  ;;  %13093 = vst [vmem:[#allocation145_spill] sm:$0xff] %v7087_v20  ;;  %v7092_v33 = vperm.slane %v6083_v7, 0  ;;  %v6084_v7 = vld [vmem:[%s12313_s0 + $0x6] ss:$4 sm:$0xff] }
 0x7f3   :  { %v1609_v0 = vmul.f32 %v7090_v19, %v1576_v59  ;;  %v7108_v20 = vperm.slane %v6084_v7, 4  ;;  %v7124_v22 = vperm.slane %v6084_v7, 3  ;;  %v7126_v3 = vperm.slane %v6084_v7, 2 }
 0x7f4   :  { %v1608_v45 = vmul.f32 %v7092_v33, %v1576_v59  ;;  %v7110_v59 = vperm.slane %v6084_v7, 1 }
 0x7f9   :  { %1674 = vperm.xlu0 %6155, %v6933_v62   ;;  %1632 = vrot.lane.b32.xlu2 %v1606_v9, %s6251_s29  ;;  %v7097_v14 = vpop.permute.xlu1 %613 }
 0x7fa   :  { %1630 = vrot.lane.b32.xlu1 %v1605_v52, %s6251_s29  ;;  %13094 = vst [vmem:[#allocation146_spill] sm:$0xff] %v7097_v14 }
 0x801   :  { %1638 = vrot.lane.b32.xlu2 %v1609_v0, %s6251_s29  ;;  %6156 = vset.pattern.permute.xlu0 %v12460_v40  ;;  %v7112_v0 = vperm.slane %v6084_v7, 0  ;;  %v7114_v14 = vpop.permute.xlu1 %617 }
 0x802   :  { %1636 = vrot.lane.b32.xlu1 %v1608_v45, %s6251_s29  ;;  %13097 = vst [vmem:[#allocation149_spill] sm:$0xff] %v7114_v14 }
 0x809   :  { %v7130_v56 = vpop.permute.xlu1 %623 }
 0x80a   :  { %13098 = vst [vmem:[#allocation150_spill] sm:$0xff] %v7130_v56  ;;  %v6085_v56 = vld [vmem:[%s12313_s0 + $0x26] ss:$4 sm:$0x3] }
 0x85b   :  { %v7101_v9 = vpop.permute.xlu0 %1628 }
 0x85c   :  { %13095 = vst [vmem:[#allocation147_spill] sm:$0xff] %v7101_v9 }
 0x863   :  { %v7103_v52 = vpop.permute.xlu0 %1634 }
 0x864   :  { %13096 = vst [vmem:[#allocation148_spill] sm:$0xff] %v7103_v52  ;;  %v7122_v52 = vperm.slane %v6084_v7, 7 }
 0x86b   :  { %v1675_v45 = vpop.permute.xlu0 %1674 }
 0x86c   :  { %v1703_v28 = vmul.f32 %v7108_v20, %v1675_v45  ;;  %v1700_v40 = vmul.f32 %v7110_v59, %v1675_v45  ;;  %v1699_v9 = vmul.f32 %v7112_v0, %v1675_v45  ;;  %v1706_v14 = vmul.f32 %v7122_v52, %v1675_v45 }
 0x86d   :  { %v1702_v44 = vmul.f32 %v7124_v22, %v1675_v45  ;;  %v1701_v63 = vmul.f32 %v7126_v3, %v1675_v45 }
 0x86e   :  { %1727 = vrot.lane.b32.xlu0 %v1703_v28, %s6251_s29  ;;  %1721 = vrot.lane.b32.xlu2 %v1700_v40, %s6251_s29  ;;  %v7136_v28 = vperm.slane %v6084_v7, 6  ;;  %v7138_v40 = vperm.slane %v6084_v7, 5 }
 0x86f   :  { %1719 = vrot.lane.b32.xlu1 %v1699_v9, %s6251_s29 }
 0x870   :  { %v1705_v9 = vmul.f32 %v7136_v28, %v1675_v45  ;;  %v1704_v55 = vmul.f32 %v7138_v40, %v1675_v45 }
 0x876   :  { %1733 = vrot.lane.b32.xlu0 %v1706_v14, %s6251_s29  ;;  %1725 = vrot.lane.b32.xlu2 %v1702_v44, %s6251_s29  ;;  %v7147_v14 = vpop.permute.xlu1 %629  ;;  %v7152_v44 = vperm.slane %v6085_v56, 0 }
 0x877   :  { %1723 = vrot.lane.b32.xlu1 %v1701_v63, %s6251_s29  ;;  %13099 = vst [vmem:[#allocation151_spill] sm:$0xff] %v7147_v14  ;;  %v7150_v63 = vperm.slane %v6085_v56, 1  ;;  %v6086_v56 = vld [vmem:[%s12313_s0 + $0x7] ss:$4 sm:$0xff] }
 0x878   :  { %v1707_v54 = vmul.f32 %v7152_v44, %v1675_v45  ;;  %v7168_v14 = vperm.slane %v6086_v56, 4  ;;  %v7184_v21 = vperm.slane %v6086_v56, 3  ;;  %v7186_v32 = vperm.slane %v6086_v56, 2 }
 0x879   :  { %v1708_v7 = vmul.f32 %v7150_v63, %v1675_v45  ;;  %v7170_v45 = vperm.slane %v6086_v56, 1 }
 0x87e   :  { %1773 = vperm.xlu0 %6156, %v6933_v62   ;;  %1731 = vrot.lane.b32.xlu2 %v1705_v9, %s6251_s29  ;;  %v7157_v48 = vpop.permute.xlu1 %686 }
 0x87f   :  { %1729 = vrot.lane.b32.xlu1 %v1704_v55, %s6251_s29  ;;  %13100 = vst [vmem:[#allocation152_spill] sm:$0xff] %v7157_v48 }
 0x886   :  { %1737 = vrot.lane.b32.xlu2 %v1708_v7, %s6251_s29  ;;  %6157 = vset.pattern.permute.xlu0 %v12476_v46  ;;  %v7172_v7 = vperm.slane %v6086_v56, 0  ;;  %v7174_v48 = vpop.permute.xlu1 %690 }
 0x887   :  { %1735 = vrot.lane.b32.xlu1 %v1707_v54, %s6251_s29  ;;  %13103 = vst [vmem:[#allocation155_spill] sm:$0xff] %v7174_v48 }
 0x88e   :  { %v7190_v60 = vpop.permute.xlu1 %696 }
 0x88f   :  { %13104 = vst [vmem:[#allocation156_spill] sm:$0xff] %v7190_v60  ;;  %v6087_v60 = vld [vmem:[%s12313_s0 + $0x27] ss:$4 sm:$0x3] }
 0x8e0   :  { %v7161_v9 = vpop.permute.xlu0 %1727 }
 0x8e1   :  { %13101 = vst [vmem:[#allocation153_spill] sm:$0xff] %v7161_v9 }
 0x8e8   :  { %v7163_v55 = vpop.permute.xlu0 %1733 }
 0x8e9   :  { %13102 = vst [vmem:[#allocation154_spill] sm:$0xff] %v7163_v55  ;;  %v7182_v55 = vperm.slane %v6086_v56, 7 }
 0x8f0   :  { %v1774_v54 = vpop.permute.xlu0 %1773 }
 0x8f1   :  { %v1802_v37 = vmul.f32 %v7168_v14, %v1774_v54  ;;  %v1799_v46 = vmul.f32 %v7170_v45, %v1774_v54  ;;  %v1798_v9 = vmul.f32 %v7172_v7, %v1774_v54  ;;  %v1805_v48 = vmul.f32 %v7182_v55, %v1774_v54 }
 0x8f2   :  { %v1801_v39 = vmul.f32 %v7184_v21, %v1774_v54  ;;  %v1800_v51 = vmul.f32 %v7186_v32, %v1774_v54 }
 0x8f3   :  { %1826 = vrot.lane.b32.xlu0 %v1802_v37, %s6251_s29  ;;  %1820 = vrot.lane.b32.xlu2 %v1799_v46, %s6251_s29  ;;  %v7196_v37 = vperm.slane %v6086_v56, 6  ;;  %v7198_v46 = vperm.slane %v6086_v56, 5 }
 0x8f4   :  { %1818 = vrot.lane.b32.xlu1 %v1798_v9, %s6251_s29 }
 0x8f5   :  { %v1804_v9 = vmul.f32 %v7196_v37, %v1774_v54  ;;  %v1803_v50 = vmul.f32 %v7198_v46, %v1774_v54 }
 0x8fb   :  { %1832 = vrot.lane.b32.xlu0 %v1805_v48, %s6251_s29  ;;  %1824 = vrot.lane.b32.xlu2 %v1801_v39, %s6251_s29  ;;  %v7207_v48 = vpop.permute.xlu1 %702  ;;  %v7212_v39 = vperm.slane %v6087_v60, 0 }
 0x8fc   :  { %1822 = vrot.lane.b32.xlu1 %v1800_v51, %s6251_s29  ;;  %13105 = vst [vmem:[#allocation157_spill] sm:$0xff] %v7207_v48  ;;  %v7210_v51 = vperm.slane %v6087_v60, 1 }
 0x8fd   :  { %v1806_v49 = vmul.f32 %v7212_v39, %v1774_v54 }
 0x8fe   :  { %13106 = vst [vmem:[#allocation158_spill] sm:$0xff] %v7210_v51  ;;  %v1807_v56 = vmul.f32 %v7210_v51, %v1774_v54 }
 0x903   :  { %1868 = vperm.xlu0 %6157, %v6933_v62   ;;  %1830 = vrot.lane.b32.xlu2 %v1804_v9, %s6251_s29  ;;  %v7217_v42 = vpop.permute.xlu1 %759 }
 0x904   :  { %1828 = vrot.lane.b32.xlu1 %v1803_v50, %s6251_s29  ;;  %13107 = vst [vmem:[#allocation159_spill] sm:$0xff] %v7217_v42 }
 0x90b   :  { %1836 = vrot.lane.b32.xlu2 %v1807_v56, %s6251_s29  ;;  %6158 = vset.pattern.permute.xlu0 %v12492_v41  ;;  %v7225_v48 = vpop.permute.xlu1 %763 }
 0x90c   :  { %1834 = vrot.lane.b32.xlu1 %v1806_v49, %s6251_s29  ;;  %13110 = vst [vmem:[#allocation162_spill] sm:$0xff] %v7225_v48 }
 0x965   :  { %v7221_v9 = vpop.permute.xlu0 %1826 }
 0x966   :  { %13108 = vst [vmem:[#allocation160_spill] sm:$0xff] %v7221_v9 }
 0x96d   :  { %v7223_v50 = vpop.permute.xlu0 %1832 }
 0x96e   :  { %13109 = vst [vmem:[#allocation161_spill] sm:$0xff] %v7223_v50  ;;  %v7235_v50 = vpop.permute.xlu1 %769 }
 0x96f   :  { %13111 = vst [vmem:[#allocation163_spill] sm:$0xff] %v7235_v50 }
 0x975   :  { %v1869_v60 = vpop.permute.xlu0 %1868 }
 0x976   :  { %v1875_v43 = vmul.f32 %v1869_v60, %v6988_v31  ;;  %v1872_v54 = vmul.f32 %v1869_v60, %v6990_v15  ;;  %v1871_v56 = vmul.f32 %v1869_v60, %v6992_v11  ;;  %v1878_v49 = vmul.f32 %v1869_v60, %v7002_v1 }
 0x977   :  { %v1874_v41 = vmul.f32 %v1869_v60, %v7004_v6  ;;  %v1873_v9 = vmul.f32 %v1869_v60, %v7006_v16  ;;  %v1880_v50 = vmul.f32 %v1869_v60, %v7030_v5 }
 0x978   :  { %1899 = vrot.lane.b32.xlu0 %v1875_v43, %s6256_s23  ;;  %1893 = vrot.lane.b32.xlu2 %v1872_v54, %s6256_s23  ;;  %v1877_v43 = vmul.f32 %v1869_v60, %v7016_v10  ;;  %v1876_v54 = vmul.f32 %v1869_v60, %v7018_v24 }
 0x979   :  { %1891 = vrot.lane.b32.xlu1 %v1871_v56, %s6256_s23  ;;  %v7245_v56 = vpop.permute.xlu1 %775 }
 0x97a   :  { %13112 = vst [vmem:[#allocation164_spill] sm:$0xff] %v7245_v56 }
 0x980   :  { %1905 = vrot.lane.b32.xlu0 %v1878_v49, %s6256_s23  ;;  %1897 = vrot.lane.b32.xlu2 %v1874_v41, %s6256_s23  ;;  %v1879_v49 = vmul.f32 %v1869_v60, %v7032_v2 }
 0x981   :  { %1895 = vrot.lane.b32.xlu1 %v1873_v9, %s6256_s23  ;;  %v7251_v41 = vpop.permute.xlu1 %832  ;;  %v12498_v9 = vmov 26  }
 0x982   :  { %13113 = vst [vmem:[#allocation165_spill] sm:$0xff] %v7251_v41 }
 0x988   :  { %1942 = vperm.xlu0 %6158, %v6933_v62   ;;  %1903 = vrot.lane.b32.xlu2 %v1877_v43, %s6256_s23 }
 0x989   :  { %1901 = vrot.lane.b32.xlu1 %v1876_v54, %s6256_s23  ;;  %v7259_v56 = vpop.permute.xlu1 %836 }
 0x98a   :  { %13116 = vst [vmem:[#allocation168_spill] sm:$0xff] %v7259_v56 }
 0x990   :  { %1909 = vrot.lane.b32.xlu2 %v1880_v50, %s6256_s23  ;;  %6159 = vset.pattern.permute.xlu0 %v12498_v9 }
 0x991   :  { %1907 = vrot.lane.b32.xlu1 %v1879_v49, %s6256_s23 }
 0x9ea   :  { %v7255_v48 = vpop.permute.xlu0 %1899 }
 0x9eb   :  { %13114 = vst [vmem:[#allocation166_spill] sm:$0xff] %v7255_v48 }
 0x9f2   :  { %v7257_v43 = vpop.permute.xlu0 %1905 }
 0x9f3   :  { %13115 = vst [vmem:[#allocation167_spill] sm:$0xff] %v7257_v43  ;;  %v7269_v43 = vpop.permute.xlu1 %842 }
 0x9f4   :  { %13117 = vst [vmem:[#allocation169_spill] sm:$0xff] %v7269_v43 }
 0x9fa   :  { %v1943_v54 = vpop.permute.xlu0 %1942 }
 0x9fb   :  { %v1949_v42 = vmul.f32 %v1943_v54, %v7048_v61  ;;  %v1946_v60 = vmul.f32 %v1943_v54, %v7050_v29  ;;  %v1945_v50 = vmul.f32 %v1943_v54, %v7052_v13  ;;  %v1952_v49 = vmul.f32 %v1943_v54, %v7062_v18 }
 0x9fc   :  { %v1948_v9 = vmul.f32 %v1943_v54, %v7064_v17  ;;  %v1947_v48 = vmul.f32 %v1943_v54, %v7066_v23  ;;  %v1954_v43 = vmul.f32 %v1943_v54, %v7090_v19 }
 0x9fd   :  { %1973 = vrot.lane.b32.xlu0 %v1949_v42, %s6256_s23  ;;  %1967 = vrot.lane.b32.xlu2 %v1946_v60, %s6256_s23  ;;  %v1951_v42 = vmul.f32 %v1943_v54, %v7076_v25  ;;  %v1950_v60 = vmul.f32 %v1943_v54, %v7078_v53 }
 0x9fe   :  { %1965 = vrot.lane.b32.xlu1 %v1945_v50, %s6256_s23  ;;  %v7279_v50 = vpop.permute.xlu1 %848 }
 0x9ff   :  { %13118 = vst [vmem:[#allocation170_spill] sm:$0xff] %v7279_v50 }
 0xa05   :  { %1979 = vrot.lane.b32.xlu0 %v1952_v49, %s6256_s23  ;;  %1971 = vrot.lane.b32.xlu2 %v1948_v9, %s6256_s23  ;;  %v1953_v49 = vmul.f32 %v1943_v54, %v7092_v33 }
 0xa06   :  { %1969 = vrot.lane.b32.xlu1 %v1947_v48, %s6256_s23  ;;  %v7285_v9 = vpop.permute.xlu1 %906  ;;  %v12504_v48 = vmov 27  }
 0xa07   :  { %13119 = vst [vmem:[#allocation171_spill] sm:$0xff] %v7285_v9 }
 0xa0d   :  { %2015 = vperm.xlu0 %6159, %v6933_v62   ;;  %1977 = vrot.lane.b32.xlu2 %v1951_v42, %s6256_s23 }
 0xa0e   :  { %1975 = vrot.lane.b32.xlu1 %v1950_v60, %s6256_s23  ;;  %v7293_v50 = vpop.permute.xlu1 %910 }
 0xa0f   :  { %13122 = vst [vmem:[#allocation174_spill] sm:$0xff] %v7293_v50 }
 0xa15   :  { %1983 = vrot.lane.b32.xlu2 %v1954_v43, %s6256_s23  ;;  %6160 = vset.pattern.permute.xlu0 %v12504_v48 }
 0xa16   :  { %1981 = vrot.lane.b32.xlu1 %v1953_v49, %s6256_s23 }
 0xa6f   :  { %v7289_v56 = vpop.permute.xlu0 %1973 }
 0xa70   :  { %13120 = vst [vmem:[#allocation172_spill] sm:$0xff] %v7289_v56 }
 0xa77   :  { %v7291_v42 = vpop.permute.xlu0 %1979 }
 0xa78   :  { %13121 = vst [vmem:[#allocation173_spill] sm:$0xff] %v7291_v42  ;;  %v7303_v42 = vpop.permute.xlu1 %916 }
 0xa79   :  { %13123 = vst [vmem:[#allocation175_spill] sm:$0xff] %v7303_v42 }
 0xa7f   :  { %v2016_v60 = vpop.permute.xlu0 %2015 }
 0xa80   :  { %v2022_v41 = vmul.f32 %v2016_v60, %v7108_v20  ;;  %v2019_v54 = vmul.f32 %v2016_v60, %v7110_v59  ;;  %v2018_v43 = vmul.f32 %v2016_v60, %v7112_v0  ;;  %v2025_v49 = vmul.f32 %v2016_v60, %v7122_v52 }
 0xa81   :  { %v2021_v48 = vmul.f32 %v2016_v60, %v7124_v22  ;;  %v2020_v56 = vmul.f32 %v2016_v60, %v7126_v3  ;;  %v2027_v42 = vmul.f32 %v2016_v60, %v7150_v63 }
 0xa82   :  { %2046 = vrot.lane.b32.xlu0 %v2022_v41, %s6256_s23  ;;  %2040 = vrot.lane.b32.xlu2 %v2019_v54, %s6256_s23  ;;  %v2024_v41 = vmul.f32 %v2016_v60, %v7136_v28  ;;  %v2023_v54 = vmul.f32 %v2016_v60, %v7138_v40 }
 0xa83   :  { %2038 = vrot.lane.b32.xlu1 %v2018_v43, %s6256_s23  ;;  %v7313_v43 = vpop.permute.xlu1 %922 }
 0xa84   :  { %13124 = vst [vmem:[#allocation176_spill] sm:$0xff] %v7313_v43 }
 0xa8a   :  { %2052 = vrot.lane.b32.xlu0 %v2025_v49, %s6256_s23  ;;  %2044 = vrot.lane.b32.xlu2 %v2021_v48, %s6256_s23  ;;  %v2026_v49 = vmul.f32 %v2016_v60, %v7152_v44 }
 0xa8b   :  { %2042 = vrot.lane.b32.xlu1 %v2020_v56, %s6256_s23  ;;  %v7319_v48 = vpop.permute.xlu1 %979  ;;  %v12510_v56 = vmov 28  }
 0xa8c   :  { %13125 = vst [vmem:[#allocation177_spill] sm:$0xff] %v7319_v48 }
 0xa92   :  { %2088 = vperm.xlu0 %6160, %v6933_v62   ;;  %2050 = vrot.lane.b32.xlu2 %v2024_v41, %s6256_s23 }
 0xa93   :  { %2048 = vrot.lane.b32.xlu1 %v2023_v54, %s6256_s23  ;;  %v7327_v43 = vpop.permute.xlu1 %983 }
 0xa94   :  { %13128 = vst [vmem:[#allocation180_spill] sm:$0xff] %v7327_v43 }
 0xa9a   :  { %2056 = vrot.lane.b32.xlu2 %v2027_v42, %s6256_s23  ;;  %6161 = vset.pattern.permute.xlu0 %v12510_v56 }
 0xa9b   :  { %2054 = vrot.lane.b32.xlu1 %v2026_v49, %s6256_s23 }
 0xaf4   :  { %v7323_v50 = vpop.permute.xlu0 %2046 }
 0xaf5   :  { %13126 = vst [vmem:[#allocation178_spill] sm:$0xff] %v7323_v50 }
 0xafc   :  { %v7325_v41 = vpop.permute.xlu0 %2052 }
 0xafd   :  { %13127 = vst [vmem:[#allocation179_spill] sm:$0xff] %v7325_v41  ;;  %v7337_v41 = vpop.permute.xlu1 %989 }
 0xafe   :  { %13129 = vst [vmem:[#allocation181_spill] sm:$0xff] %v7337_v41 }
 0xb04   :  { %v2089_v54 = vpop.permute.xlu0 %2088 }
 0xb05   :  { %v2095_v9 = vmul.f32 %v2089_v54, %v7168_v14  ;;  %v2092_v60 = vmul.f32 %v2089_v54, %v7170_v45  ;;  %v2091_v42 = vmul.f32 %v2089_v54, %v7172_v7  ;;  %v2098_v49 = vmul.f32 %v2089_v54, %v7182_v55 }
 0xb06   :  { %v2094_v56 = vmul.f32 %v2089_v54, %v7184_v21  ;;  %v2093_v50 = vmul.f32 %v2089_v54, %v7186_v32  ;;  %v2100_v41 = vmul.f32 %v2089_v54, %v7210_v51 }
 0xb07   :  { %2119 = vrot.lane.b32.xlu0 %v2095_v9, %s6256_s23  ;;  %2113 = vrot.lane.b32.xlu2 %v2092_v60, %s6256_s23  ;;  %v2097_v9 = vmul.f32 %v2089_v54, %v7196_v37  ;;  %v2096_v60 = vmul.f32 %v2089_v54, %v7198_v46 }
 0xb08   :  { %2111 = vrot.lane.b32.xlu1 %v2091_v42, %s6256_s23  ;;  %v7347_v42 = vpop.permute.xlu1 %995 }
 0xb09   :  { %13130 = vst [vmem:[#allocation182_spill] sm:$0xff] %v7347_v42 }
 0xb0f   :  { %2125 = vrot.lane.b32.xlu0 %v2098_v49, %s6256_s23  ;;  %2117 = vrot.lane.b32.xlu2 %v2094_v56, %s6256_s23  ;;  %v2099_v49 = vmul.f32 %v2089_v54, %v7212_v39 }
 0xb10   :  { %2115 = vrot.lane.b32.xlu1 %v2093_v50, %s6256_s23  ;;  %v7353_v56 = vpop.permute.xlu1 %1052  ;;  %v12516_v50 = vmov 29  }
 0xb11   :  { %13131 = vst [vmem:[#allocation183_spill] sm:$0xff] %v7353_v56 }
 0xb17   :  { %2161 = vperm.xlu0 %6161, %v6933_v62   ;;  %2123 = vrot.lane.b32.xlu2 %v2097_v9, %s6256_s23 }
 0xb18   :  { %2121 = vrot.lane.b32.xlu1 %v2096_v60, %s6256_s23  ;;  %v7361_v42 = vpop.permute.xlu1 %1056 }
 0xb19   :  { %13134 = vst [vmem:[#allocation186_spill] sm:$0xff] %v7361_v42 }
 0xb1f   :  { %2129 = vrot.lane.b32.xlu2 %v2100_v41, %s6256_s23  ;;  %6162 = vset.pattern.permute.xlu0 %v12516_v50 }
 0xb20   :  { %2127 = vrot.lane.b32.xlu1 %v2099_v49, %s6256_s23 }
 0xb79   :  { %v7357_v43 = vpop.permute.xlu0 %2119 }
 0xb7a   :  { %13132 = vst [vmem:[#allocation184_spill] sm:$0xff] %v7357_v43 }
 0xb81   :  { %v7359_v9 = vpop.permute.xlu0 %2125 }
 0xb82   :  { %13133 = vst [vmem:[#allocation185_spill] sm:$0xff] %v7359_v9  ;;  %v7371_v9 = vpop.permute.xlu1 %1062 }
 0xb83   :  { %13135 = vst [vmem:[#allocation187_spill] sm:$0xff] %v7371_v9 }
 0xb89   :  { %v2162_v60 = vpop.permute.xlu0 %2161 }
 0xb8a   :  { %v2168_v48 = vmul.f32 %v2162_v60, %v6988_v31  ;;  %v2165_v54 = vmul.f32 %v2162_v60, %v6990_v15  ;;  %v2164_v41 = vmul.f32 %v2162_v60, %v6992_v11  ;;  %v2171_v49 = vmul.f32 %v2162_v60, %v7002_v1 }
 0xb8b   :  { %v2167_v50 = vmul.f32 %v2162_v60, %v7004_v6  ;;  %v2166_v43 = vmul.f32 %v2162_v60, %v7006_v16  ;;  %v2173_v9 = vmul.f32 %v2162_v60, %v7030_v5 }
 0xb8c   :  { %2192 = vrot.lane.b32.xlu0 %v2168_v48, %s6261_s26  ;;  %2186 = vrot.lane.b32.xlu2 %v2165_v54, %s6261_s26  ;;  %v2170_v48 = vmul.f32 %v2162_v60, %v7016_v10  ;;  %v2169_v54 = vmul.f32 %v2162_v60, %v7018_v24 }
 0xb8d   :  { %2184 = vrot.lane.b32.xlu1 %v2164_v41, %s6261_s26  ;;  %v7381_v41 = vpop.permute.xlu1 %1068 }
 0xb8e   :  { %13136 = vst [vmem:[#allocation188_spill] sm:$0xff] %v7381_v41 }
 0xb94   :  { %2198 = vrot.lane.b32.xlu0 %v2171_v49, %s6261_s26  ;;  %2190 = vrot.lane.b32.xlu2 %v2167_v50, %s6261_s26  ;;  %v2172_v49 = vmul.f32 %v2162_v60, %v7032_v2 }
 0xb95   :  { %2188 = vrot.lane.b32.xlu1 %v2166_v43, %s6261_s26  ;;  %v7387_v50 = vpop.permute.xlu1 %1147  ;;  %v12522_v43 = vmov 30  }
 0xb96   :  { %13137 = vst [vmem:[#allocation189_spill] sm:$0xff] %v7387_v50 }
 0xb9c   :  { %2235 = vperm.xlu0 %6162, %v6933_v62   ;;  %2196 = vrot.lane.b32.xlu2 %v2170_v48, %s6261_s26 }
 0xb9d   :  { %2194 = vrot.lane.b32.xlu1 %v2169_v54, %s6261_s26  ;;  %v7395_v41 = vpop.permute.xlu1 %1151 }
 0xb9e   :  { %13140 = vst [vmem:[#allocation192_spill] sm:$0xff] %v7395_v41 }
 0xba4   :  { %2202 = vrot.lane.b32.xlu2 %v2173_v9, %s6261_s26  ;;  %6163 = vset.pattern.permute.xlu0 %v12522_v43 }
 0xba5   :  { %2200 = vrot.lane.b32.xlu1 %v2172_v49, %s6261_s26 }
 0xbfe   :  { %v7391_v42 = vpop.permute.xlu0 %2192 }
 0xbff   :  { %13138 = vst [vmem:[#allocation190_spill] sm:$0xff] %v7391_v42 }
 0xc06   :  { %v7393_v48 = vpop.permute.xlu0 %2198 }
 0xc07   :  { %13139 = vst [vmem:[#allocation191_spill] sm:$0xff] %v7393_v48  ;;  %v7405_v48 = vpop.permute.xlu1 %1157 }
 0xc08   :  { %13141 = vst [vmem:[#allocation193_spill] sm:$0xff] %v7405_v48 }
 0xc0e   :  { %v2236_v54 = vpop.permute.xlu0 %2235 }
 0xc0f   :  { %v2242_v56 = vmul.f32 %v2236_v54, %v7048_v61  ;;  %v2239_v60 = vmul.f32 %v2236_v54, %v7050_v29  ;;  %v2238_v9 = vmul.f32 %v2236_v54, %v7052_v13  ;;  %v2245_v49 = vmul.f32 %v2236_v54, %v7062_v18 }
 0xc10   :  { %v2241_v43 = vmul.f32 %v2236_v54, %v7064_v17  ;;  %v2240_v42 = vmul.f32 %v2236_v54, %v7066_v23  ;;  %v2247_v48 = vmul.f32 %v2236_v54, %v7090_v19 }
 0xc11   :  { %2266 = vrot.lane.b32.xlu0 %v2242_v56, %s6261_s26  ;;  %2260 = vrot.lane.b32.xlu2 %v2239_v60, %s6261_s26  ;;  %v2244_v56 = vmul.f32 %v2236_v54, %v7076_v25  ;;  %v2243_v60 = vmul.f32 %v2236_v54, %v7078_v53 }
 0xc12   :  { %2258 = vrot.lane.b32.xlu1 %v2238_v9, %s6261_s26  ;;  %v7415_v9 = vpop.permute.xlu1 %1163 }
 0xc13   :  { %13142 = vst [vmem:[#allocation194_spill] sm:$0xff] %v7415_v9 }
 0xc19   :  { %2272 = vrot.lane.b32.xlu0 %v2245_v49, %s6261_s26  ;;  %2264 = vrot.lane.b32.xlu2 %v2241_v43, %s6261_s26  ;;  %v2246_v49 = vmul.f32 %v2236_v54, %v7092_v33 }
 0xc1a   :  { %2262 = vrot.lane.b32.xlu1 %v2240_v42, %s6261_s26  ;;  %v7421_v43 = vpop.permute.xlu1 %1242  ;;  %v12529_v42 = vmov 31  }
 0xc1b   :  { %13143 = vst [vmem:[#allocation195_spill] sm:$0xff] %v7421_v43 }
 0xc21   :  { %2308 = vperm.xlu0 %6163, %v6933_v62   ;;  %2270 = vrot.lane.b32.xlu2 %v2244_v56, %s6261_s26 }
 0xc22   :  { %2268 = vrot.lane.b32.xlu1 %v2243_v60, %s6261_s26  ;;  %v7429_v9 = vpop.permute.xlu1 %1248 }
 0xc23   :  { %13146 = vst [vmem:[#allocation198_spill] sm:$0xff] %v7429_v9 }
 0xc29   :  { %2276 = vrot.lane.b32.xlu2 %v2247_v48, %s6261_s26  ;;  %6164 = vset.pattern.permute.xlu0 %v12529_v42 }
 0xc2a   :  { %2274 = vrot.lane.b32.xlu1 %v2246_v49, %s6261_s26 }
 0xc83   :  { %v7425_v41 = vpop.permute.xlu0 %2266 }
 0xc84   :  { %13144 = vst [vmem:[#allocation196_spill] sm:$0xff] %v7425_v41 }
 0xc8b   :  { %v7427_v56 = vpop.permute.xlu0 %2272 }
 0xc8c   :  { %13145 = vst [vmem:[#allocation197_spill] sm:$0xff] %v7427_v56  ;;  %v7439_v56 = vpop.permute.xlu1 %1254 }
 0xc8d   :  { %13147 = vst [vmem:[#allocation199_spill] sm:$0xff] %v7439_v56 }
 0xc93   :  { %v2309_v60 = vpop.permute.xlu0 %2308 }
 0xc94   :  { %v2315_v50 = vmul.f32 %v2309_v60, %v7108_v20  ;;  %v2312_v54 = vmul.f32 %v2309_v60, %v7110_v59  ;;  %v2311_v48 = vmul.f32 %v2309_v60, %v7112_v0  ;;  %v2318_v49 = vmul.f32 %v2309_v60, %v7122_v52  ;;  %v7446_v9 = vpop.permute.xlu1 %1332 }
 0xc95   :  { %v2314_v42 = vmul.f32 %v2309_v60, %v7124_v22  ;;  %v2313_v41 = vmul.f32 %v2309_v60, %v7126_v3  ;;  %13148 = vst [vmem:[#allocation200_spill] sm:$0xff] %v7446_v9 }
 0xc96   :  { %2339 = vrot.lane.b32.xlu0 %v2315_v50, %s6261_s26  ;;  %2333 = vrot.lane.b32.xlu2 %v2312_v54, %s6261_s26  ;;  %v2317_v50 = vmul.f32 %v2309_v60, %v7136_v28  ;;  %v2316_v54 = vmul.f32 %v2309_v60, %v7138_v40 }
 0xc97   :  { %2331 = vrot.lane.b32.xlu1 %v2311_v48, %s6261_s26  ;;  %v2320_v48 = vmul.f32 %v2309_v60, %v7150_v63 }
 0xc9e   :  { %2345 = vrot.lane.b32.xlu0 %v2318_v49, %s6261_s26  ;;  %2337 = vrot.lane.b32.xlu2 %v2314_v42, %s6261_s26  ;;  %v2319_v49 = vmul.f32 %v2309_v60, %v7152_v44  ;;  %v7455_v42 = vpop.permute.xlu1 %1336 }
 0xc9f   :  { %2335 = vrot.lane.b32.xlu1 %v2313_v41, %s6261_s26  ;;  %13149 = vst [vmem:[#allocation201_spill] sm:$0xff] %v7455_v42  ;;  %v12536_v41 = vmov 32  }
 0xca6   :  { %2381 = vperm.xlu0 %6164, %v6933_v62   ;;  %2343 = vrot.lane.b32.xlu2 %v2317_v50, %s6261_s26  ;;  %v7463_v50 = vpop.permute.xlu1 %1342 }
 0xca7   :  { %2341 = vrot.lane.b32.xlu1 %v2316_v54, %s6261_s26  ;;  %13152 = vst [vmem:[#allocation204_spill] sm:$0xff] %v7463_v50  ;;  %v7479_v50 = vpop.permute.xlu2 %1428 }
 0xca8   :  { %13154 = vst [vmem:[#allocation206_spill] sm:$0xff] %v7479_v50 }
 0xcae   :  { %2349 = vrot.lane.b32.xlu2 %v2320_v48, %s6261_s26  ;;  %6165 = vset.pattern.permute.xlu0 %v12536_v41 }
 0xcaf   :  { %2347 = vrot.lane.b32.xlu1 %v2319_v49, %s6261_s26 }
 0xd08   :  { %v7459_v9 = vpop.permute.xlu0 %2339 }
 0xd09   :  { %13150 = vst [vmem:[#allocation202_spill] sm:$0xff] %v7459_v9 }
 0xd10   :  { %v7461_v56 = vpop.permute.xlu0 %2345 }
 0xd11   :  { %13151 = vst [vmem:[#allocation203_spill] sm:$0xff] %v7461_v56  ;;  %v7473_v56 = vpop.permute.xlu1 %1348 }
 0xd12   :  { %13153 = vst [vmem:[#allocation205_spill] sm:$0xff] %v7473_v56  ;;  %v7490_v56 = vpop.permute.xlu2 %1434 }
 0xd13   :  { %13156 = vst [vmem:[#allocation208_spill] sm:$0xff] %v7490_v56 }
 0xd18   :  { %v2382_v54 = vpop.permute.xlu0 %2381 }
 0xd19   :  { %v2388_v43 = vmul.f32 %v2382_v54, %v7168_v14  ;;  %v2385_v60 = vmul.f32 %v2382_v54, %v7170_v45  ;;  %v2384_v48 = vmul.f32 %v2382_v54, %v7172_v7  ;;  %v2391_v49 = vmul.f32 %v2382_v54, %v7182_v55 }
 0xd1a   :  { %v2387_v41 = vmul.f32 %v2382_v54, %v7184_v21  ;;  %v2386_v9 = vmul.f32 %v2382_v54, %v7186_v32  ;;  %v7496_v50 = vpop.permute.xlu2 %1440 }
 0xd1b   :  { %2412 = vrot.lane.b32.xlu0 %v2388_v43, %s6261_s26  ;;  %2406 = vrot.lane.b32.xlu2 %v2385_v60, %s6261_s26  ;;  %v2390_v43 = vmul.f32 %v2382_v54, %v7196_v37  ;;  %v7482_v60 = vpop.permute.xlu1 %1426  ;;  %13158 = vst [vmem:[#allocation210_spill] sm:$0xff] %v7496_v50 }
 0xd1c   :  { %2404 = vrot.lane.b32.xlu1 %v2384_v48, %s6261_s26  ;;  %13155 = vst [vmem:[#allocation207_spill] sm:$0xff] %v7482_v60  ;;  %v2389_v48 = vmul.f32 %v2382_v54, %v7198_v46 }
 0xd22   :  { %v7498_v60 = vpop.permute.xlu2 %1522 }
 0xd23   :  { %2418 = vrot.lane.b32.xlu0 %v2391_v49, %s6261_s26  ;;  %2410 = vrot.lane.b32.xlu2 %v2387_v41, %s6261_s26  ;;  %v2393_v49 = vmul.f32 %v2382_v54, %v7210_v51  ;;  %v2392_v41 = vmul.f32 %v2382_v54, %v7212_v39  ;;  %13159 = vst [vmem:[#allocation211_spill] sm:$0xff] %v7498_v60 }
 0xd24   :  { %2408 = vrot.lane.b32.xlu1 %v2386_v9, %s6261_s26  ;;  %v7493_v9 = vpop.permute.xlu1 %1432 }
 0xd25   :  { %13157 = vst [vmem:[#allocation209_spill] sm:$0xff] %v7493_v9 }
 0xd2a   :  { %v7500_v42 = vpop.permute.xlu2 %1526 }
 0xd2b   :  { %2454 = vperm.xlu0 %6165, %v6933_v62   ;;  %2416 = vrot.lane.b32.xlu2 %v2390_v43, %s6261_s26  ;;  %13160 = vst [vmem:[#allocation212_spill] sm:$0xff] %v7500_v42  ;;  %v12559_v42 = vmov 33  }
 0xd2c   :  { %2414 = vrot.lane.b32.xlu1 %v2389_v48, %s6261_s26  ;;  %v7502_v43 = vpop.permute.xlu1 %1438 }
 0xd2d   :  { %13161 = vst [vmem:[#allocation213_spill] sm:$0xff] %v7502_v43 }
 0xd32   :  { %v7504_v48 = vpop.permute.xlu2 %1532 }
 0xd33   :  { %2422 = vrot.lane.b32.xlu2 %v2393_v49, %s6261_s26  ;;  %13162 = vst [vmem:[#allocation214_spill] sm:$0xff] %v7504_v48  ;;  %6166 = vset.pattern.permute.xlu0 %v12559_v42 }
 0xd34   :  { %2420 = vrot.lane.b32.xlu1 %v2392_v41, %s6261_s26  ;;  %v7506_v51 = vpop.permute.xlu1 %1520 }
 0xd35   :  { %13163 = vst [vmem:[#allocation215_spill] sm:$0xff] %v7506_v51 }
 0xd3a   :  { %v7508_v54 = vpop.permute.xlu2 %1538 }
 0xd3b   :  { %13164 = vst [vmem:[#allocation216_spill] sm:$0xff] %v7508_v54 }
 0xd3c   :  { %v7510_v56 = vpop.permute.xlu1 %1524 }
 0xd3d   :  { %13165 = vst [vmem:[#allocation217_spill] sm:$0xff] %v7510_v56 }
 0xd42   :  { %v7512_v49 = vpop.permute.xlu2 %1622 }
 0xd43   :  { %13166 = vst [vmem:[#allocation218_spill] sm:$0xff] %v7512_v49 }
 0xd44   :  { %v7514_v9 = vpop.permute.xlu1 %1530 }
 0xd45   :  { %13167 = vst [vmem:[#allocation219_spill] sm:$0xff] %v7514_v9 }
 0xd4a   :  { %v7516_v41 = vpop.permute.xlu2 %1626 }
 0xd4b   :  { %13168 = vst [vmem:[#allocation220_spill] sm:$0xff] %v7516_v41 }
 0xd4c   :  { %v7518_v50 = vpop.permute.xlu1 %1536 }
 0xd4d   :  { %13169 = vst [vmem:[#allocation221_spill] sm:$0xff] %v7518_v50 }
 0xd52   :  { %v7520_v60 = vpop.permute.xlu2 %1632 }
 0xd53   :  { %13170 = vst [vmem:[#allocation222_spill] sm:$0xff] %v7520_v60 }
 0xd54   :  { %v7525_v51 = vpop.permute.xlu1 %1620 }
 0xd55   :  { %13172 = vst [vmem:[#allocation224_spill] sm:$0xff] %v7525_v51 }
 0xd5a   :  { %v7527_v54 = vpop.permute.xlu2 %1638 }
 0xd5b   :  { %13173 = vst [vmem:[#allocation225_spill] sm:$0xff] %v7527_v54  ;;  %v13314_v54 = vld [vmem:[#allocation120_spill] sm:$0xff] }
 0xd5c   :  { %v7531_v49 = vpop.permute.xlu1 %1624 }
 0xd5d   :  { %13175 = vst [vmem:[#allocation227_spill] sm:$0xff] %v7531_v49  ;;  %v13321_v49 = vld [vmem:[#allocation121_spill] sm:$0xff] }
 0xd62   :  { %v7533_v9 = vpop.permute.xlu2 %1721 }
 0xd63   :  { %13176 = vst [vmem:[#allocation228_spill] sm:$0xff] %v7533_v9 }
 0xd64   :  { %v7541_v42 = vpop.permute.xlu1 %1630 }
 0xd65   :  { %13177 = vst [vmem:[#allocation229_spill] sm:$0xff] %v7541_v42  ;;  %v13320_v42 = vld [vmem:[#allocation61_spill] sm:$0xff] }
 0xd8d   :  { %v7523_v48 = vpop.permute.xlu0 %2412 }
 0xd8e   :  { %13171 = vst [vmem:[#allocation223_spill] sm:$0xff] %v7523_v48 }
 0xd95   :  { %v7529_v56 = vpop.permute.xlu0 %2418 }
 0xd96   :  { %13174 = vst [vmem:[#allocation226_spill] sm:$0xff] %v7529_v56  ;;  %v7543_v56 = vpop.permute.xlu2 %1725 }
 0xd97   :  { %13178 = vst [vmem:[#allocation230_spill] sm:$0xff] %v7543_v56  ;;  %v13313_v56 = vld [vmem:[#allocation38_spill] sm:$0xff] }
 0xd9d   :  { %v2455_v41 = vpop.permute.xlu0 %2454 }
 0xd9e   :  { %v2461_v50 = vmul.f32 %v2455_v41, %v6988_v31  ;;  %v2458_v60 = vmul.f32 %v2455_v41, %v6990_v15  ;;  %v2457_v43 = vmul.f32 %v2455_v41, %v6992_v11  ;;  %v2464_v48 = vmul.f32 %v2455_v41, %v7002_v1  ;;  %v7551_v15 = vpop.permute.xlu1 %1636 }
 0xd9f   :  { %v2460_v9 = vmul.f32 %v2455_v41, %v7004_v6  ;;  %v2459_v31 = vmul.f32 %v2455_v41, %v7006_v16  ;;  %13179 = vst [vmem:[#allocation231_spill] sm:$0xff] %v7551_v15  ;;  %v2463_v11 = vmul.f32 %v2455_v41, %v7016_v10  ;;  %v2466_v6 = vmul.f32 %v2455_v41, %v7030_v5  ;;  %v13319_v15 = vld [vmem:[#allocation63_spill] sm:$0xff] }
 0xda0   :  { %2485 = vrot.lane.b32.xlu0 %v2461_v50, %s6266_s27  ;;  %2479 = vrot.lane.b32.xlu2 %v2458_v60, %s6266_s27  ;;  %v7554_v50 = vpop.permute.xlu2 %1731  ;;  %v2462_v60 = vmul.f32 %v2455_v41, %v7018_v24  ;;  %v2465_v1 = vmul.f32 %v2455_v41, %v7032_v2 }
 0xda1   :  { %2477 = vrot.lane.b32.xlu1 %v2457_v43, %s6266_s27  ;;  %13180 = vst [vmem:[#allocation232_spill] sm:$0xff] %v7554_v50  ;;  %v13306_v50 = vld [vmem:[#allocation113_spill] sm:$0xff] }
 0xda6   :  { %v7560_v16 = vpop.permute.xlu1 %1719 }
 0xda7   :  { %13181 = vst [vmem:[#allocation233_spill] sm:$0xff] %v7560_v16  ;;  %v13308_v16 = vld [vmem:[#allocation37_spill] sm:$0xff] }
 0xda8   :  { %2491 = vrot.lane.b32.xlu0 %v2464_v48, %s6266_s27  ;;  %2483 = vrot.lane.b32.xlu2 %v2460_v9, %s6266_s27  ;;  %v7565_v9 = vpop.permute.xlu2 %1737 }
 0xda9   :  { %2481 = vrot.lane.b32.xlu1 %v2459_v31, %s6266_s27  ;;  %13182 = vst [vmem:[#allocation234_spill] sm:$0xff] %v7565_v9 }
 0xdae   :  { %v7568_v10 = vpop.permute.xlu1 %1723 }
 0xdaf   :  { %13183 = vst [vmem:[#allocation235_spill] sm:$0xff] %v7568_v10  ;;  %v13304_v10 = vld [vmem:[#allocation36_spill] sm:$0xff] }
 0xdb0   :  { %2528 = vperm.xlu0 %6166, %v6933_v62   ;;  %2489 = vrot.lane.b32.xlu2 %v2463_v11, %s6266_s27  ;;  %v7570_v24 = vpop.permute.xlu2 %1820 }
 0xdb1   :  { %2487 = vrot.lane.b32.xlu1 %v2462_v60, %s6266_s27  ;;  %13184 = vst [vmem:[#allocation236_spill] sm:$0xff] %v7570_v24 }
 0xdb6   :  { %v7572_v62 = vpop.permute.xlu1 %1729 }
 0xdb7   :  { %13185 = vst [vmem:[#allocation237_spill] sm:$0xff] %v7572_v62 }
 0xdb8   :  { %2495 = vrot.lane.b32.xlu2 %v2466_v6, %s6266_s27  ;;  %v7574_v43 = vpop.permute.xlu2 %1824 }
 0xdb9   :  { %2493 = vrot.lane.b32.xlu1 %v2465_v1, %s6266_s27  ;;  %13186 = vst [vmem:[#allocation238_spill] sm:$0xff] %v7574_v43 }
 0xdbe   :  { %v7576_v48 = vpop.permute.xlu1 %1735 }
 0xdbf   :  { %13187 = vst [vmem:[#allocation239_spill] sm:$0xff] %v7576_v48 }
 0xdc0   :  { %v7578_v31 = vpop.permute.xlu2 %1830 }
 0xdc1   :  { %13188 = vst [vmem:[#allocation240_spill] sm:$0xff] %v7578_v31 }
 0xdc6   :  { %v7580_v5 = vpop.permute.xlu1 %1818 }
 0xdc7   :  { %13189 = vst [vmem:[#allocation241_spill] sm:$0xff] %v7580_v5 }
 0xdc8   :  { %v7582_v2 = vpop.permute.xlu2 %1836 }
 0xdc9   :  { %13190 = vst [vmem:[#allocation242_spill] sm:$0xff] %v7582_v2  ;;  %v12576_v2 = vmov 34  }
 0xdca   :  { %6167 = vset.pattern.permute.xlu0 %v12576_v2 }
 0xdce   :  { %v7584_v41 = vpop.permute.xlu1 %1822 }
 0xdcf   :  { %13191 = vst [vmem:[#allocation243_spill] sm:$0xff] %v7584_v41 }
 0xdd0   :  { %v7586_v11 = vpop.permute.xlu2 %1893 }
 0xdd1   :  { %13192 = vst [vmem:[#allocation244_spill] sm:$0xff] %v7586_v11 }
 0xdd6   :  { %v7588_v60 = vpop.permute.xlu1 %1828 }
 0xdd7   :  { %13193 = vst [vmem:[#allocation245_spill] sm:$0xff] %v7588_v60 }
 0xdd8   :  { %v7590_v6 = vpop.permute.xlu2 %1897 }
 0xdd9   :  { %13194 = vst [vmem:[#allocation246_spill] sm:$0xff] %v7590_v6 }
 0xdde   :  { %v7592_v1 = vpop.permute.xlu1 %1834 }
 0xddf   :  { %13195 = vst [vmem:[#allocation247_spill] sm:$0xff] %v7592_v1 }
 0xde0   :  { %v7594_v24 = vpop.permute.xlu2 %1903 }
 0xde1   :  { %13196 = vst [vmem:[#allocation248_spill] sm:$0xff] %v7594_v24 }
 0xde6   :  { %v7596_v43 = vpop.permute.xlu1 %1891 }
 0xde7   :  { %13197 = vst [vmem:[#allocation249_spill] sm:$0xff] %v7596_v43 }
 0xde8   :  { %v7598_v9 = vpop.permute.xlu2 %1909 }
 0xde9   :  { %13198 = vst [vmem:[#allocation250_spill] sm:$0xff] %v7598_v9 }
 0xdee   :  { %v7600_v31 = vpop.permute.xlu1 %1895 }
 0xdef   :  { %13199 = vst [vmem:[#allocation251_spill] sm:$0xff] %v7600_v31 }
 0xdf0   :  { %v7602_v5 = vpop.permute.xlu2 %1967 }
 0xdf1   :  { %13200 = vst [vmem:[#allocation252_spill] sm:$0xff] %v7602_v5 }
 0xdf6   :  { %v7607_v60 = vpop.permute.xlu1 %1901 }
 0xdf7   :  { %13202 = vst [vmem:[#allocation254_spill] sm:$0xff] %v7607_v60  ;;  %v13299_v60 = vld [vmem:[#allocation56_spill] sm:$0xff] }
 0xdf8   :  { %v7609_v6 = vpop.permute.xlu2 %1971 }
 0xdf9   :  { %13203 = vst [vmem:[#allocation255_spill] sm:$0xff] %v7609_v6  ;;  %v13296_v6 = vld [vmem:[#allocation55_spill] sm:$0xff] }
 0xdfe   :  { %v7613_v24 = vpop.permute.xlu1 %1907 }
 0xdff   :  { %13205 = vst [vmem:[#allocation257_spill] sm:$0xff] %v7613_v24 }
 0xe00   :  { %v7615_v43 = vpop.permute.xlu2 %1977 }
 0xe01   :  { %13206 = vst [vmem:[#allocation258_spill] sm:$0xff] %v7615_v43 }
 0xe06   :  { %v7622_v2 = vpop.permute.xlu1 %1965 }
 0xe07   :  { %13207 = vst [vmem:[#allocation259_spill] sm:$0xff] %v7622_v2 }
 0xe12   :  { %v7605_v11 = vpop.permute.xlu0 %2485 }
 0xe13   :  { %13201 = vst [vmem:[#allocation253_spill] sm:$0xff] %v7605_v11 }
 0xe1a   :  { %v7611_v1 = vpop.permute.xlu0 %2491 }
 0xe1b   :  { %13204 = vst [vmem:[#allocation256_spill] sm:$0xff] %v7611_v1  ;;  %v7625_v1 = vpop.permute.xlu2 %1983 }
 0xe1c   :  { %13208 = vst [vmem:[#allocation260_spill] sm:$0xff] %v7625_v1 }
 0xe22   :  { %v2529_v9 = vpop.permute.xlu0 %2528 }
 0xe23   :  { %v2535_v31 = vmul.f32 %v2529_v9, %v7048_v61  ;;  %v2532_v5 = vmul.f32 %v2529_v9, %v7050_v29  ;;  %v2531_v41 = vmul.f32 %v2529_v9, %v7052_v13  ;;  %v2538_v11 = vmul.f32 %v2529_v9, %v7062_v18  ;;  %v7633_v29 = vpop.permute.xlu1 %1969  ;;  %v7635_v13 = vpop.permute.xlu2 %2040 }
 0xe24   :  { %v2534_v43 = vmul.f32 %v2529_v9, %v7064_v17  ;;  %v2533_v61 = vmul.f32 %v2529_v9, %v7066_v23  ;;  %13209 = vst [vmem:[#allocation261_spill] sm:$0xff] %v7633_v29  ;;  %v7642_v17 = vld [vmem:[%s12312_s2] sm:$0xf]  ;;  %v2540_v18 = vmul.f32 %v2529_v9, %v7090_v19  ;;  %v13294_v29 = vld [vmem:[#allocation53_spill] sm:$0xff] }
 0xe25   :  { %2559 = vrot.lane.b32.xlu0 %v2535_v31, %s6266_s27  ;;  %2553 = vrot.lane.b32.xlu2 %v2532_v5, %s6266_s27  ;;  %13210 = vst [vmem:[#allocation262_spill] sm:$0xff] %v7635_v13  ;;  %v2537_v31 = vmul.f32 %v2529_v9, %v7076_v25  ;;  %v2536_v5 = vmul.f32 %v2529_v9, %v7078_v53 }
 0xe26   :  { %2551 = vrot.lane.b32.xlu1 %v2531_v41, %s6266_s27 }
 0xe2b   :  { %v7647_v23 = vpop.permute.xlu1 %1975  ;;  %v7651_v25 = vpop.permute.xlu2 %2044 }
 0xe2c   :  { %13211 = vst [vmem:[#allocation263_spill] sm:$0xff] %v7647_v23 }
 0xe2d   :  { %2565 = vrot.lane.b32.xlu0 %v2538_v11, %s6266_s27  ;;  %2557 = vrot.lane.b32.xlu2 %v2534_v43, %s6266_s27  ;;  %v2539_v43 = vmul.f32 %v2529_v9, %v7092_v33  ;;  %13212 = vst [vmem:[#allocation264_spill] sm:$0xff] %v7651_v25 }
 0xe2e   :  { %2555 = vrot.lane.b32.xlu1 %v2533_v61, %s6266_s27 }
 0xe33   :  { %v7655_v53 = vpop.permute.xlu1 %1981  ;;  %v7657_v41 = vpop.permute.xlu2 %2050 }
 0xe34   :  { %13213 = vst [vmem:[#allocation265_spill] sm:$0xff] %v7655_v53 }
 0xe35   :  { %2601 = vperm.xlu0 %6167, %v7642_v17   ;;  %2563 = vrot.lane.b32.xlu2 %v2537_v31, %s6266_s27  ;;  %13214 = vst [vmem:[#allocation266_spill] sm:$0xff] %v7657_v41 }
 0xe36   :  { %2561 = vrot.lane.b32.xlu1 %v2536_v5, %s6266_s27 }
 0xe3b   :  { %v7659_v11 = vpop.permute.xlu1 %2038  ;;  %v7661_v61 = vpop.permute.xlu2 %2056 }
 0xe3c   :  { %13215 = vst [vmem:[#allocation267_spill] sm:$0xff] %v7659_v11 }
 0xe3d   :  { %2569 = vrot.lane.b32.xlu2 %v2540_v18, %s6266_s27  ;;  %13216 = vst [vmem:[#allocation268_spill] sm:$0xff] %v7661_v61 }
 0xe3e   :  { %2567 = vrot.lane.b32.xlu1 %v2539_v43, %s6266_s27 }
 0xe43   :  { %v7663_v31 = vpop.permute.xlu1 %2042  ;;  %v7665_v5 = vpop.permute.xlu2 %2113 }
 0xe44   :  { %13217 = vst [vmem:[#allocation269_spill] sm:$0xff] %v7663_v31 }
 0xe45   :  { %13218 = vst [vmem:[#allocation270_spill] sm:$0xff] %v7665_v5 }
 0xe4b   :  { %v7667_v19 = vpop.permute.xlu1 %2048  ;;  %v7669_v33 = vpop.permute.xlu2 %2117 }
 0xe4c   :  { %13219 = vst [vmem:[#allocation271_spill] sm:$0xff] %v7667_v19 }
 0xe4d   :  { %13220 = vst [vmem:[#allocation272_spill] sm:$0xff] %v7669_v33  ;;  %v12595_v33 = vmov 35  }
 0xe4e   :  { %6168 = vset.pattern.permute.xlu0 %v12595_v33 }
 0xe53   :  { %v7671_v9 = vpop.permute.xlu1 %2054  ;;  %v7673_v18 = vpop.permute.xlu2 %2123 }
 0xe54   :  { %13221 = vst [vmem:[#allocation273_spill] sm:$0xff] %v7671_v9 }
 0xe55   :  { %13222 = vst [vmem:[#allocation274_spill] sm:$0xff] %v7673_v18 }
 0xe5b   :  { %v7675_v43 = vpop.permute.xlu1 %2111  ;;  %v7677_v13 = vpop.permute.xlu2 %2129 }
 0xe5c   :  { %13223 = vst [vmem:[#allocation275_spill] sm:$0xff] %v7675_v43 }
 0xe5d   :  { %13224 = vst [vmem:[#allocation276_spill] sm:$0xff] %v7677_v13  ;;  %v12597_v13 = vmov 0  }
 0xe5e   :  { %6170 = vset.pattern.permute.xlu2 %v12597_v13 }
 0xe63   :  { %v7679_v41 = vpop.permute.xlu1 %2115  ;;  %v7681_v11 = vpop.permute.xlu2 %2186 }
 0xe64   :  { %13225 = vst [vmem:[#allocation277_spill] sm:$0xff] %v7679_v41 }
 0xe65   :  { %13226 = vst [vmem:[#allocation278_spill] sm:$0xff] %v7681_v11 }
 0xe6b   :  { %v7683_v61 = vpop.permute.xlu1 %2121  ;;  %v7685_v31 = vpop.permute.xlu2 %2190 }
 0xe6c   :  { %13227 = vst [vmem:[#allocation279_spill] sm:$0xff] %v7683_v61 }
 0xe6d   :  { %13228 = vst [vmem:[#allocation280_spill] sm:$0xff] %v7685_v31 }
 0xe73   :  { %v7687_v5 = vpop.permute.xlu1 %2127  ;;  %v7689_v19 = vpop.permute.xlu2 %2196 }
 0xe74   :  { %13229 = vst [vmem:[#allocation281_spill] sm:$0xff] %v7687_v5 }
 0xe75   :  { %13230 = vst [vmem:[#allocation282_spill] sm:$0xff] %v7689_v19 }
 0xe7b   :  { %v7694_v43 = vpop.permute.xlu1 %2184  ;;  %v7697_v41 = vpop.permute.xlu2 %2202 }
 0xe7c   :  { %13232 = vst [vmem:[#allocation284_spill] sm:$0xff] %v7694_v43  ;;  %v13284_v43 = vld [vmem:[#allocation29_spill] sm:$0xff] }
 0xe7d   :  { %13233 = vst [vmem:[#allocation285_spill] sm:$0xff] %v7697_v41 }
 0xe83   :  { %v7701_v61 = vpop.permute.xlu1 %2188  ;;  %v7703_v31 = vpop.permute.xlu2 %2260 }
 0xe84   :  { %13235 = vst [vmem:[#allocation287_spill] sm:$0xff] %v7701_v61  ;;  %v13283_v61 = vld [vmem:[#allocation28_spill] sm:$0xff] }
 0xe85   :  { %13236 = vst [vmem:[#allocation288_spill] sm:$0xff] %v7703_v31 }
 0xe8b   :  { %v7711_v13 = vpop.permute.xlu1 %2194 }
 0xe8c   :  { %13237 = vst [vmem:[#allocation289_spill] sm:$0xff] %v7711_v13 }
 0xe97   :  { %v7692_v18 = vpop.permute.xlu0 %2559 }
 0xe98   :  { %13231 = vst [vmem:[#allocation283_spill] sm:$0xff] %v7692_v18 }
 0xe9f   :  { %v7699_v11 = vpop.permute.xlu0 %2565 }
 0xea0   :  { %13234 = vst [vmem:[#allocation286_spill] sm:$0xff] %v7699_v11  ;;  %v7713_v11 = vpop.permute.xlu2 %2264 }
 0xea1   :  { %13238 = vst [vmem:[#allocation290_spill] sm:$0xff] %v7713_v11 }
 0xea7   :  { %v2602_v5 = vpop.permute.xlu0 %2601 }
 0xea8   :  { %v2608_v19 = vmul.f32 %v2602_v5, %v7108_v20  ;;  %v2605_v33 = vmul.f32 %v2602_v5, %v7110_v59  ;;  %v2604_v18 = vmul.f32 %v2602_v5, %v7112_v0  ;;  %v2611_v41 = vmul.f32 %v2602_v5, %v7122_v52  ;;  %v7721_v59 = vpop.permute.xlu1 %2200 }
 0xea9   :  { %v2607_v31 = vmul.f32 %v2602_v5, %v7124_v22  ;;  %v2606_v20 = vmul.f32 %v2602_v5, %v7126_v3  ;;  %13239 = vst [vmem:[#allocation291_spill] sm:$0xff] %v7721_v59  ;;  %v2610_v0 = vmul.f32 %v2602_v5, %v7136_v28  ;;  %v2613_v3 = vmul.f32 %v2602_v5, %v7150_v63 }
 0xeaa   :  { %2632 = vrot.lane.b32.xlu0 %v2608_v19, %s6266_s27  ;;  %2626 = vrot.lane.b32.xlu2 %v2605_v33, %s6266_s27  ;;  %v7724_v19 = vpop.permute.xlu2 %2270  ;;  %v2609_v33 = vmul.f32 %v2602_v5, %v7138_v40  ;;  %v2612_v52 = vmul.f32 %v2602_v5, %v7152_v44 }
 0xeab   :  { %2624 = vrot.lane.b32.xlu1 %v2604_v18, %s6266_s27  ;;  %13240 = vst [vmem:[#allocation292_spill] sm:$0xff] %v7724_v19  ;;  %v13275_v19 = vld [vmem:[#allocation21_spill] sm:$0xff] }
 0xeb0   :  { %v7730_v22 = vpop.permute.xlu1 %2258 }
 0xeb1   :  { %13241 = vst [vmem:[#allocation293_spill] sm:$0xff] %v7730_v22 }
 0xeb2   :  { %2638 = vrot.lane.b32.xlu0 %v2611_v41, %s6266_s27  ;;  %2630 = vrot.lane.b32.xlu2 %v2607_v31, %s6266_s27  ;;  %v13242_v41 = vmov 0   ;;  %v7736_v28 = vpop.permute.xlu2 %2276 }
 0xeb3   :  { %2628 = vrot.lane.b32.xlu1 %v2606_v20, %s6266_s27  ;;  %13243 = vst [vmem:[#allocation294_spill] sm:$0xff] %v7736_v28 }
 0xeb8   :  { %v7740_v40 = vpop.permute.xlu1 %2262 }
 0xeb9   :  { %13244 = vst [vmem:[#allocation295_spill] sm:$0xff] %v7740_v40 }
 0xeba   :  { %2674 = vperm.xlu0 %6168, %v7642_v17   ;;  %2636 = vrot.lane.b32.xlu2 %v2610_v0, %s6266_s27  ;;  %v7742_v31 = vpop.permute.xlu2 %2333 }
 0xebb   :  { %2634 = vrot.lane.b32.xlu1 %v2609_v33, %s6266_s27  ;;  %13245 = vst [vmem:[#allocation296_spill] sm:$0xff] %v7742_v31 }
 0xec0   :  { %v7744_v18 = vpop.permute.xlu1 %2268 }
 0xec1   :  { %13246 = vst [vmem:[#allocation297_spill] sm:$0xff] %v7744_v18  ;;  %v13272_v18 = vld [vmem:[#allocation23_spill] sm:$0xff] }
 0xec2   :  { %6169 = vset.pattern.permute.xlu0 %v13242_v41  ;;  %2642 = vrot.lane.b32.xlu2 %v2613_v3, %s6266_s27  ;;  %v7746_v20 = vpop.permute.xlu2 %2337 }
 0xec3   :  { %2640 = vrot.lane.b32.xlu1 %v2612_v52, %s6266_s27  ;;  %37 = vperm.xlu0 %6169, %v7642_v17   ;;  %13247 = vst [vmem:[#allocation298_spill] sm:$0xff] %v7746_v20 }
 0xec8   :  { %v7748_v63 = vpop.permute.xlu1 %2274 }
 0xec9   :  { %13248 = vst [vmem:[#allocation299_spill] sm:$0xff] %v7748_v63 }
 0xeca   :  { %v7750_v44 = vpop.permute.xlu2 %2343 }
 0xecb   :  { %13249 = vst [vmem:[#allocation300_spill] sm:$0xff] %v7750_v44 }
 0xed0   :  { %v7752_v5 = vpop.permute.xlu1 %2331 }
 0xed1   :  { %13250 = vst [vmem:[#allocation301_spill] sm:$0xff] %v7752_v5  ;;  %v13270_v5 = vld [vmem:[#allocation20_spill] sm:$0xff] }
 0xed2   :  { %v7754_v0 = vpop.permute.xlu2 %2349 }
 0xed3   :  { %13251 = vst [vmem:[#allocation302_spill] sm:$0xff] %v7754_v0  ;;  %v7778_v0 = vmul.f32 %v6432_v57, %v6379_v30  ;;  %v7798_v57 = vmul.f32 %v6463_v26, %v6379_v30  ;;  %v7818_v26 = vmul.f32 %v6390_v35, %v6409_v47 }
 0xed8   :  { %v7756_v33 = vpop.permute.xlu1 %2335 }
 0xed9   :  { %13252 = vst [vmem:[#allocation303_spill] sm:$0xff] %v7756_v33  ;;  %v13267_v33 = vld [vmem:[#allocation18_spill] sm:$0xff] }
 0xeda   :  { %v7758_v3 = vpop.permute.xlu2 %2406  ;;  %v7838_v35 = vmul.f32 %v13267_v33, %v6409_v47  ;;  %v13276_v33 = vld [vmem:[#allocation22_spill] sm:$0xff] }
 0xedb   :  { %13253 = vst [vmem:[#allocation304_spill] sm:$0xff] %v7758_v3  ;;  %v7782_v3 = vmul.f32 %v6434_v58, %v6379_v30  ;;  %v7802_v58 = vmul.f32 %v6465_v27, %v6379_v30 }
 0xee0   :  { %v7760_v17 = vpop.permute.xlu1 %2341 }
 0xee1   :  { %13254 = vst [vmem:[#allocation305_spill] sm:$0xff] %v7760_v17  ;;  %v13266_v17 = vld [vmem:[#allocation17_spill] sm:$0xff] }
 0xee2   :  { %v7762_v52 = vpop.permute.xlu2 %2410 }
 0xee3   :  { %13255 = vst [vmem:[#allocation306_spill] sm:$0xff] %v7762_v52  ;;  %v7786_v52 = vmul.f32 %v6445_v4, %v6379_v30  ;;  %v7806_v4 = vmul.f32 %v6477_v38, %v6379_v30 }
 0xee5   :  { %13262 = vst [vmem:[#allocation313_spill] sm:$0xff] %v7806_v4  ;;  %v13323_v4 = vld [vmem:[#allocation65_spill] sm:$0xff] }
 0xee8   :  { %v7764_v41 = vpop.permute.xlu1 %2347 }
 0xee9   :  { %13256 = vst [vmem:[#allocation307_spill] sm:$0xff] %v7764_v41  ;;  %v13265_v41 = vld [vmem:[#allocation15_spill] sm:$0xff] }
 0xeea   :  { %v7766_v31 = vpop.permute.xlu2 %2416 }
 0xeeb   :  { %13257 = vst [vmem:[#allocation308_spill] sm:$0xff] %v7766_v31  ;;  %v7790_v31 = vmul.f32 %v6447_v8, %v6379_v30  ;;  %v7810_v8 = vmul.f32 %v6392_v36, %v6409_v47  ;;  %v7830_v36 = vmul.f32 %v13265_v41, %v6409_v47  ;;  %v7850_v41 = vmul.f32 %v13272_v18, %v6379_v30  ;;  %v13281_v18 = vld [vmem:[#allocation26_spill] sm:$0xff] }
 0xef0   :  { %v7768_v20 = vpop.permute.xlu1 %2404 }
 0xef1   :  { %13258 = vst [vmem:[#allocation309_spill] sm:$0xff] %v7768_v20  ;;  %v13269_v20 = vld [vmem:[#allocation19_spill] sm:$0xff] }
 0xef2   :  { %v7770_v28 = vpop.permute.xlu2 %2422 }
 0xef3   :  { %13259 = vst [vmem:[#allocation310_spill] sm:$0xff] %v7770_v28  ;;  %v7794_v28 = vmul.f32 %v6449_v12, %v6379_v30  ;;  %v7814_v12 = vmul.f32 %v6388_v34, %v6409_v47  ;;  %v7834_v34 = vmul.f32 %v13266_v17, %v6409_v47  ;;  %v13274_v17 = vld [vmem:[#allocation13_spill] sm:$0xff] }
 0xef4   :  { %v7856_v22 = vmul.f32 %v13275_v19, %v13274_v17  ;;  %v7860_v11 = vmul.f32 %v13276_v33, %v13274_v17  ;;  %v7872_v13 = vmul.f32 %v13281_v18, %v13274_v17  ;;  %v7880_v33 = vmul.f32 %v13283_v61, %v13274_v17  ;;  %v13288_v18 = vld [vmem:[#allocation30_spill] sm:$0xff]  ;;  %v13291_v61 = vld [vmem:[#allocation32_spill] sm:$0xff] }
 0xef5   :  { %v7895_v1 = vmul.f32 %v13288_v18, %v13274_v17  ;;  %v7903_v23 = vmul.f32 %v13291_v61, %v13274_v17  ;;  %v13295_v18 = vld [vmem:[#allocation34_spill] sm:$0xff]  ;;  %v13298_v61 = vld [vmem:[#allocation35_spill] sm:$0xff] }
 0xef6   :  { %13277 = vst [vmem:[#allocation17_spill] sm:$0xff] %v7860_v11  ;;  %v7918_v24 = vsel %vm266_vm0, %v13296_v6, %v13295_v18  ;;  %v13362_v11 = vld [vmem:[#allocation143_spill] sm:$0xff] }
 0xef7   :  { %13289 = vst [vmem:[#allocation20_spill] sm:$0xff] %v7895_v1  ;;  %v13318_v1 = vld [vmem:[#allocation39_spill] sm:$0xff] }
 0xef8   :  { %v7772_v44 = vpop.permute.xlu1 %2408  ;;  %13292 = vst [vmem:[#allocation23_spill] sm:$0xff] %v7903_v23  ;;  %v13316_v23 = vld [vmem:[#allocation60_spill] sm:$0xff] }
 0xef9   :  { %13260 = vst [vmem:[#allocation311_spill] sm:$0xff] %v7772_v44  ;;  %v13264_v44 = vld [vmem:[#allocation14_spill] sm:$0xff] }
 0xefa   :  { %v7774_v63 = vpop.permute.xlu2 %2479  ;;  %v7826_v38 = vmul.f32 %v13264_v44, %v6409_v47  ;;  %v7846_v44 = vmul.f32 %v13270_v5, %v6409_v47 }
 0xefb   :  { %13261 = vst [vmem:[#allocation312_spill] sm:$0xff] %v7774_v63  ;;  %v13263_v63 = vld [vmem:[#allocation16_spill] sm:$0xff] }
 0xefc   :  { %v7822_v27 = vmul.f32 %v13263_v63, %v6409_v47  ;;  %13268 = vst [vmem:[#allocation16_spill] sm:$0xff] %v7838_v35  ;;  %v7842_v63 = vmul.f32 %v13269_v20, %v6409_v47  ;;  %v13278_v20 = vld [vmem:[#allocation24_spill] sm:$0xff]  ;;  %v13279_v47 = vld [vmem:[#allocation25_spill] sm:$0xff] }
 0xefd   :  { %13271 = vst [vmem:[#allocation14_spill] sm:$0xff] %v7846_v44  ;;  %v7864_v59 = vmul.f32 %v13278_v20, %v13274_v17  ;;  %v7868_v5 = vmul.f32 %v13279_v47, %v6379_v30  ;;  %v7884_v20 = vmul.f32 %v13284_v43, %v13274_v17  ;;  %v13286_v30 = vld [vmem:[#allocation33_spill] sm:$0xff]  ;;  %v13287_v47 = vld [vmem:[#allocation54_spill] sm:$0xff]  ;;  %v13293_v43 = vld [vmem:[#allocation100_spill] sm:$0xff] }
 0xefe   :  { %v7891_v25 = vsel %vm266_vm0, %v13287_v47, %v13286_v30  ;;  %v7913_v2 = vsel %vm266_vm0, %v13293_v43, %v13287_v47  ;;  %v7933_v47 = vsel %vm266_vm0, %v13299_v60, %v13298_v61  ;;  %v7955_v61 = vsel %vm266_vm0, %v13304_v10, %v13306_v50  ;;  %v13326_v44 = vld [vmem:[#allocation122_spill] sm:$0xff] }
 0xeff   :  { %13280 = vst [vmem:[#allocation18_spill] sm:$0xff] %v7868_v5  ;;  %v13322_v5 = vld [vmem:[#allocation40_spill] sm:$0xff] }
 0xf00   :  { %v7886_v9 = vpop.permute.xlu1 %2414  ;;  %13300 = vst [vmem:[#allocation13_spill] sm:$0xff] %v7933_v47  ;;  %v13307_v47 = vld [vmem:[#allocation58_spill] sm:$0xff] }
 0xf01   :  { %13285 = vst [vmem:[#allocation19_spill] sm:$0xff] %v7886_v9  ;;  %v7908_v9 = vsel %vm266_vm0, %v13294_v29, %v13293_v43  ;;  %v13301_v43 = vld [vmem:[#allocation112_spill] sm:$0xff] }
 0xf02   :  { %v7938_v48 = vsel %vm266_vm0, %v13295_v18, %v13301_v43  ;;  %v7945_v62 = vpop.permute.xlu2 %2483  ;;  %v7960_v18 = vsel %vm266_vm0, %v13306_v50, %v13307_v47 }
 0xf03   :  { %13303 = vst [vmem:[#allocation22_spill] sm:$0xff] %v7945_v62  ;;  %v13311_v62 = vld [vmem:[#allocation59_spill] sm:$0xff] }
 0xf04   :  { %v7980_v50 = vsel %vm266_vm0, %v13311_v62, %v13313_v56 }
 0xf1c   :  { %v7852_v40 = vpop.permute.xlu0 %2632 }
 0xf1d   :  { %13273 = vst [vmem:[#allocation15_spill] sm:$0xff] %v7852_v40  ;;  %v13282_v40 = vld [vmem:[#allocation27_spill] sm:$0xff] }
 0xf1e   :  { %v7876_v19 = vmul.f32 %v13282_v40, %v13274_v17  ;;  %v13290_v40 = vld [vmem:[#allocation31_spill] sm:$0xff] }
 0xf1f   :  { %v7899_v53 = vmul.f32 %v13290_v40, %v13274_v17  ;;  %v13297_v40 = vld [vmem:[#allocation111_spill] sm:$0xff] }
 0xf20   :  { %v7923_v17 = vsel %vm266_vm0, %v13286_v30, %v13297_v40  ;;  %v7928_v29 = vsel %vm266_vm0, %v13297_v40, %v13296_v6  ;;  %v7943_v30 = vsel %vm266_vm0, %v13301_v43, %v13299_v60  ;;  %v13305_v6 = vld [vmem:[#allocation57_spill] sm:$0xff]  ;;  %v7965_v60 = vsel %vm266_vm0, %v13307_v47, %v13308_v16  ;;  %v13309_v43 = vld [vmem:[#allocation119_spill] sm:$0xff] }
 0xf21   :  { %13302 = vst [vmem:[#allocation21_spill] sm:$0xff] %v7943_v30  ;;  %v7950_v40 = vsel %vm266_vm0, %v13305_v6, %v13304_v10  ;;  %v7970_v6 = vsel %vm266_vm0, %v13308_v16, %v13309_v43  ;;  %v7975_v10 = vsel %vm266_vm0, %v13309_v43, %v13311_v62  ;;  %v7985_v47 = vsel %vm266_vm0, %v13313_v56, %v13314_v54  ;;  %v13337_v30 = vld [vmem:[#allocation68_spill] sm:$0xff] }
 0xf22   :  { %13310 = vst [vmem:[#allocation24_spill] sm:$0xff] %v7970_v6  ;;  %v7990_v16 = vsel %vm266_vm0, %v13314_v54, %v13316_v23  ;;  %v7995_v43 = vsel %vm266_vm0, %v13319_v15, %v13318_v1  ;;  %v8000_v62 = vsel %vm266_vm0, %v13321_v49, %v13320_v42  ;;  %v8005_v56 = vsel %vm266_vm0, %v13323_v4, %v13322_v5 }
 0xf23   :  { %13312 = vst [vmem:[#allocation25_spill] sm:$0xff] %v7975_v10  ;;  %v8012_v54 = vsel %vm266_vm0, %v13320_v42, %v13326_v44  ;;  %v8017_v23 = vsel %vm266_vm0, %v13326_v44, %v13319_v15  ;;  %v13336_v44 = vld [vmem:[#allocation41_spill] sm:$0xff]  ;;  %v13339_v10 = vld [vmem:[#allocation131_spill] sm:$0xff] }
 0xf24   :  { %13315 = vst [vmem:[#allocation26_spill] sm:$0xff] %v7985_v47  ;;  %v8007_v51 = vpop.permute.xlu0 %2638  ;;  %v13334_v47 = vld [vmem:[#allocation66_spill] sm:$0xff] }
 0xf25   :  { %13317 = vst [vmem:[#allocation27_spill] sm:$0xff] %v7990_v16  ;;  %v13329_v16 = vld [vmem:[#allocation129_spill] sm:$0xff] }
 0xf26   :  { %13324 = vst [vmem:[#allocation28_spill] sm:$0xff] %v8005_v56  ;;  %v8022_v49 = vsel %vm266_vm0, %v13318_v1, %v13329_v16  ;;  %v8027_v35 = vsel %vm266_vm0, %v13329_v16, %v13323_v4  ;;  %v8042_v1 = vsel %vm266_vm0, %v13337_v30, %v13336_v44  ;;  %v13340_v16 = vld [vmem:[#allocation42_spill] sm:$0xff] }
 0xf27   :  { %13325 = vst [vmem:[#allocation29_spill] sm:$0xff] %v8007_v51  ;;  %v13332_v51 = vld [vmem:[#allocation130_spill] sm:$0xff] }
 0xf28   :  { %13327 = vst [vmem:[#allocation33_spill] sm:$0xff] %v8012_v54  ;;  %v8032_v42 = vsel %vm266_vm0, %v13322_v5, %v13332_v51  ;;  %v8037_v15 = vsel %vm266_vm0, %v13332_v51, %v13334_v47  ;;  %v13376_v54 = vld [vmem:[#allocation146_spill] sm:$0xff] }
 0xf29   :  { %13328 = vst [vmem:[#allocation54_spill] sm:$0xff] %v8017_v23  ;;  %v13357_v23 = vld [vmem:[#allocation71_spill] sm:$0xff] }
 0xf2a   :  { %13330 = vst [vmem:[#allocation30_spill] sm:$0xff] %v8022_v49  ;;  %v13338_v49 = vld [vmem:[#allocation67_spill] sm:$0xff] }
 0xf2b   :  { %13331 = vst [vmem:[#allocation31_spill] sm:$0xff] %v8027_v35  ;;  %v8047_v4 = vsel %vm266_vm0, %v13339_v10, %v13338_v49  ;;  %v13341_v35 = vld [vmem:[#allocation69_spill] sm:$0xff] }
 0xf2c   :  { %13333 = vst [vmem:[#allocation32_spill] sm:$0xff] %v8032_v42  ;;  %v8052_v5 = vsel %vm266_vm0, %v13341_v35, %v13340_v16  ;;  %v13343_v42 = vld [vmem:[#allocation137_spill] sm:$0xff] }
 0xf2d   :  { %13335 = vst [vmem:[#allocation100_spill] sm:$0xff] %v8037_v15  ;;  %v8057_v51 = vsel %vm266_vm0, %v13338_v49, %v13343_v42  ;;  %v8062_v47 = vsel %vm266_vm0, %v13343_v42, %v13337_v30  ;;  %v13346_v15 = vld [vmem:[#allocation138_spill] sm:$0xff]  ;;  %v8084_v42 = vpop.permute.xlu1 %2420 }
 0xf2e   :  { %13342 = vst [vmem:[#allocation53_spill] sm:$0xff] %v8052_v5  ;;  %v8067_v10 = vsel %vm266_vm0, %v13336_v44, %v13346_v15  ;;  %v8072_v6 = vsel %vm266_vm0, %v13346_v15, %v13341_v35  ;;  %v13349_v5 = vld [vmem:[#allocation139_spill] sm:$0xff]  ;;  %v13355_v44 = vld [vmem:[#allocation72_spill] sm:$0xff] }
 0xf2f   :  { %13344 = vst [vmem:[#allocation34_spill] sm:$0xff] %v8057_v51  ;;  %v8077_v49 = vsel %vm266_vm0, %v13340_v16, %v13349_v5  ;;  %v13351_v51 = vld [vmem:[#allocation70_spill] sm:$0xff]  ;;  %v13358_v35 = vld [vmem:[#allocation140_spill] sm:$0xff]  ;;  %v13360_v16 = vld [vmem:[#allocation73_spill] sm:$0xff] }
 0xf30   :  { %13345 = vst [vmem:[#allocation55_spill] sm:$0xff] %v8062_v47  ;;  %v8082_v30 = vsel %vm266_vm0, %v13349_v5, %v13351_v51  ;;  %v13354_v47 = vld [vmem:[#allocation43_spill] sm:$0xff]  ;;  %v8094_v15 = vsel %vm559_vm1, %v13358_v35, %v13357_v23  ;;  %v8104_v5 = vsel %vm559_vm1, %v13357_v23, %v13362_v11  ;;  %v13365_v51 = vld [vmem:[#allocation144_spill] sm:$0xff] }
 0xf31   :  { %13347 = vst [vmem:[#allocation111_spill] sm:$0xff] %v8067_v10  ;;  %v8089_v10 = vsel %vm559_vm1, %v13355_v44, %v13354_v47  ;;  %v8114_v35 = vsel %vm559_vm1, %v13354_v47, %v13365_v51 }
 0xf32   :  { %13348 = vst [vmem:[#allocation56_spill] sm:$0xff] %v8072_v6  ;;  %v13359_v6 = vld [vmem:[#allocation44_spill] sm:$0xff] }
 0xf33   :  { %13350 = vst [vmem:[#allocation112_spill] sm:$0xff] %v8077_v49  ;;  %v8099_v49 = vsel %vm559_vm1, %v13360_v16, %v13359_v6 }
 0xf34   :  { %13352 = vst [vmem:[#allocation36_spill] sm:$0xff] %v8082_v30  ;;  %v8119_v30 = vsel %vm559_vm1, %v13365_v51, %v13360_v16  ;;  %v13377_v16 = vld [vmem:[#allocation46_spill] sm:$0xff] }
 0xf35   :  { %13353 = vst [vmem:[#allocation57_spill] sm:$0xff] %v8084_v42  ;;  %v8109_v42 = vsel %vm559_vm1, %v13362_v11, %v13355_v44  ;;  %v13372_v44 = vld [vmem:[#allocation45_spill] sm:$0xff] }
 0xf36   :  { %13356 = vst [vmem:[#allocation113_spill] sm:$0xff] %v8089_v10  ;;  %v13381_v10 = vld [vmem:[#allocation149_spill] sm:$0xff] }
 0xf37   :  { %13361 = vst [vmem:[#allocation58_spill] sm:$0xff] %v8099_v49  ;;  %v13368_v49 = vld [vmem:[#allocation145_spill] sm:$0xff] }
 0xf38   :  { %13363 = vst [vmem:[#allocation37_spill] sm:$0xff] %v8104_v5  ;;  %v8124_v23 = vsel %vm559_vm1, %v13359_v6, %v13368_v49  ;;  %v13370_v5 = vld [vmem:[#allocation74_spill] sm:$0xff] }
 0xf39   :  { %13364 = vst [vmem:[#allocation119_spill] sm:$0xff] %v8109_v42  ;;  %v8129_v11 = vsel %vm559_vm1, %v13368_v49, %v13370_v5  ;;  %v13373_v42 = vld [vmem:[#allocation76_spill] sm:$0xff] }
 0xf3a   :  { %13366 = vst [vmem:[#allocation59_spill] sm:$0xff] %v8114_v35  ;;  %v8134_v47 = vsel %vm559_vm1, %v13373_v42, %v13372_v44  ;;  %v13375_v35 = vld [vmem:[#allocation75_spill] sm:$0xff]  ;;  %v8156_v5 = vsel %vm559_vm1, %v13381_v10, %v13373_v42 }
 0xf3b   :  { %13367 = vst [vmem:[#allocation38_spill] sm:$0xff] %v8119_v30  ;;  %v8139_v51 = vsel %vm559_vm1, %v13376_v54, %v13375_v35  ;;  %v13378_v30 = vld [vmem:[#allocation77_spill] sm:$0xff]  ;;  %v8151_v49 = vsel %vm559_vm1, %v13375_v35, %v13381_v10 }
 0xf3c   :  { %13369 = vst [vmem:[#allocation120_spill] sm:$0xff] %v8124_v23  ;;  %v8144_v6 = vsel %vm559_vm1, %v13378_v30, %v13377_v16  ;;  %v8146_v23 = vpop.permute.xlu2 %2489 }
 0xf3d   :  { %13371 = vst [vmem:[#allocation39_spill] sm:$0xff] %v8129_v11  ;;  %v13384_v11 = vld [vmem:[#allocation150_spill] sm:$0xff] }
 0xf3e   :  { %13374 = vst [vmem:[#allocation63_spill] sm:$0xff] %v8134_v47  ;;  %v8161_v54 = vsel %vm559_vm1, %v13372_v44, %v13384_v11  ;;  %v13387_v47 = vld [vmem:[#allocation151_spill] sm:$0xff] }
 0xf3f   :  { %13379 = vst [vmem:[#allocation61_spill] sm:$0xff] %v8144_v6  ;;  %v8166_v6 = vsel %vm559_vm1, %v13384_v11, %v13378_v30  ;;  %v8173_v35 = vsel %vm559_vm1, %v13377_v16, %v13387_v47  ;;  %v13391_v11 = vld [vmem:[#allocation47_spill] sm:$0xff]  ;;  %v13394_v16 = vld [vmem:[#allocation81_spill] sm:$0xff] }
 0xf40   :  { %13380 = vst [vmem:[#allocation121_spill] sm:$0xff] %v8146_v23  ;;  %v8168_v23 = vpop.permute.xlu0 %2674 }
 0xf41   :  { %13382 = vst [vmem:[#allocation40_spill] sm:$0xff] %v8151_v49  ;;  %v2681_v10 = vmul.f32 %v8168_v23, %v7168_v14  ;;  %v2678_v42 = vmul.f32 %v8168_v23, %v7170_v45  ;;  %v2677_v44 = vmul.f32 %v8168_v23, %v7172_v7  ;;  %v13397_v49 = vld [vmem:[#allocation48_spill] sm:$0xff]  ;;  %v13398_v45 = vld [vmem:[#allocation83_spill] sm:$0xff] }
 0xf42   :  { %13383 = vst [vmem:[#allocation65_spill] sm:$0xff] %v8156_v5  ;;  %v8199_v56 = vsel %vm559_vm1, %v13398_v45, %v13397_v49  ;;  %v13400_v7 = vld [vmem:[#allocation155_spill] sm:$0xff] }
 0xf43   :  { %13385 = vst [vmem:[#allocation122_spill] sm:$0xff] %v8161_v54  ;;  %v13389_v54 = vld [vmem:[#allocation79_spill] sm:$0xff]  ;;  %2705 = vrot.lane.b32.xlu0 %v2681_v10, %s6266_s27  ;;  %2699 = vrot.lane.b32.xlu2 %v2678_v42, %s6266_s27  ;;  %v13411_v10 = vld [vmem:[#allocation49_spill] sm:$0xff]  ;;  %v13412_v42 = vld [vmem:[#allocation86_spill] sm:$0xff] }
 0xf44   :  { %13386 = vst [vmem:[#allocation129_spill] sm:$0xff] %v8166_v6  ;;  %v8184_v30 = vsel %vm559_vm1, %v13387_v47, %v13389_v54  ;;  %v13392_v6 = vld [vmem:[#allocation82_spill] sm:$0xff]  ;;  %v8204_v47 = vsel %vm559_vm1, %v13394_v16, %v13400_v7  ;;  %2697 = vrot.lane.b32.xlu1 %v2677_v44, %s6266_s27 }
 0xf45   :  { %13388 = vst [vmem:[#allocation130_spill] sm:$0xff] %v8173_v35  ;;  %v8189_v5 = vsel %vm559_vm1, %v13392_v6, %v13391_v11  ;;  %v13395_v35 = vld [vmem:[#allocation152_spill] sm:$0xff]  ;;  %v8209_v54 = vsel %vm559_vm1, %v13400_v7, %v13392_v6 }
 0xf46   :  { %13390 = vst [vmem:[#allocation41_spill] sm:$0xff] %v8184_v30  ;;  %v8194_v14 = vsel %vm559_vm1, %v13395_v35, %v13394_v16  ;;  %v13403_v30 = vld [vmem:[#allocation156_spill] sm:$0xff]  ;;  %v13406_v16 = vld [vmem:[#allocation157_spill] sm:$0xff] }
 0xf47   :  { %13393 = vst [vmem:[#allocation68_spill] sm:$0xff] %v8189_v5  ;;  %v8214_v35 = vsel %vm559_vm1, %v13391_v11, %v13403_v30  ;;  %v13408_v6 = vld [vmem:[#allocation84_spill] sm:$0xff]  ;;  %v8233_v11 = vpop.permute.xlu1 %2477 }
 0xf48   :  { %13396 = vst [vmem:[#allocation67_spill] sm:$0xff] %v8194_v14  ;;  %v8231_v7 = vsel %vm559_vm1, %v13406_v16, %v13408_v6  ;;  %v13420_v6 = vld [vmem:[#allocation162_spill] sm:$0xff]  ;;  %v8333_v5 = vpop.permute.xlu0 %37 }
 0xf49   :  { %13399 = vst [vmem:[#allocation131_spill] sm:$0xff] %v8199_v56  ;;  %v8221_v56 = vsel %vm559_vm1, %v13403_v30, %v13398_v45  ;;  %v8239_v30 = vsel %vm559_vm1, %v13412_v42, %v13411_v10  ;;  %v13414_v45 = vld [vmem:[#allocation85_spill] sm:$0xff]  ;;  %v8259_v44 = vsel %vm559_vm1, %v13420_v6, %v13412_v42  ;;  %v13430_v42 = vld [vmem:[#allocation51_spill] sm:$0xff] }
 0xf4a   :  { %13401 = vst [vmem:[#allocation42_spill] sm:$0xff] %v8204_v47  ;;  %v8226_v47 = vsel %vm559_vm1, %v13397_v49, %v13406_v16 }
 0xf4b   :  { %13402 = vst [vmem:[#allocation69_spill] sm:$0xff] %v8209_v54 }
 0xf4c   :  { %13404 = vst [vmem:[#allocation137_spill] sm:$0xff] %v8214_v35  ;;  %v13418_v35 = vld [vmem:[#allocation87_spill] sm:$0xff] }
 0xf4d   :  { %13405 = vst [vmem:[#allocation138_spill] sm:$0xff] %v8221_v56  ;;  %v13415_v56 = vld [vmem:[#allocation159_spill] sm:$0xff] }
 0xf4e   :  { %13407 = vst [vmem:[#allocation139_spill] sm:$0xff] %v8226_v47  ;;  %v8244_v49 = vsel %vm559_vm1, %v13415_v56, %v13414_v45  ;;  %v13417_v47 = vld [vmem:[#allocation50_spill] sm:$0xff] }
 0xf4f   :  { %13409 = vst [vmem:[#allocation43_spill] sm:$0xff] %v8231_v7  ;;  %v8249_v16 = vsel %vm559_vm1, %v13418_v35, %v13417_v47  ;;  %v13423_v7 = vld [vmem:[#allocation163_spill] sm:$0xff] }
 0xf50   :  { %13410 = vst [vmem:[#allocation72_spill] sm:$0xff] %v8233_v11  ;;  %v8254_v11 = vsel %vm559_vm1, %v13414_v45, %v13420_v6  ;;  %v8264_v56 = vsel %vm559_vm1, %v13411_v10, %v13423_v7  ;;  %v8269_v54 = vsel %vm559_vm1, %v13423_v7, %v13418_v35  ;;  %v13436_v7 = vld [vmem:[#allocation52_spill] sm:$0xff] }
 0xf51   :  { %13413 = vst [vmem:[#allocation71_spill] sm:$0xff] %v8239_v30  ;;  %v13434_v30 = vld [vmem:[#allocation165_spill] sm:$0xff] }
 0xf52   :  { %13416 = vst [vmem:[#allocation140_spill] sm:$0xff] %v8244_v49 }
 0xf53   :  { %13419 = vst [vmem:[#allocation44_spill] sm:$0xff] %v8249_v16  ;;  %v13426_v16 = vld [vmem:[#allocation164_spill] sm:$0xff] }
 0xf54   :  { %13421 = vst [vmem:[#allocation73_spill] sm:$0xff] %v8254_v11  ;;  %v8274_v45 = vsel %vm559_vm1, %v13417_v47, %v13426_v16  ;;  %v13428_v11 = vld [vmem:[#allocation88_spill] sm:$0xff] }
 0xf55   :  { %13422 = vst [vmem:[#allocation143_spill] sm:$0xff] %v8259_v44  ;;  %v8279_v6 = vsel %vm559_vm1, %v13426_v16, %v13428_v11  ;;  %v13431_v44 = vld [vmem:[#allocation90_spill] sm:$0xff] }
 0xf56   :  { %13424 = vst [vmem:[#allocation144_spill] sm:$0xff] %v8264_v56  ;;  %v8284_v10 = vsel %vm852_vm2, %v13431_v44, %v13430_v42  ;;  %v13433_v56 = vld [vmem:[#allocation89_spill] sm:$0xff] }
 0xf57   :  { %13425 = vst [vmem:[#allocation145_spill] sm:$0xff] %v8269_v54  ;;  %v8289_v35 = vsel %vm852_vm2, %v13434_v30, %v13433_v56  ;;  %v13437_v54 = vld [vmem:[#allocation91_spill] sm:$0xff] }
 0xf58   :  { %13427 = vst [vmem:[#allocation45_spill] sm:$0xff] %v8274_v45  ;;  %v8294_v47 = vsel %vm852_vm2, %v13437_v54, %v13436_v7  ;;  %v13439_v45 = vld [vmem:[#allocation168_spill] sm:$0xff] }
 0xf59   :  { %13429 = vst [vmem:[#allocation76_spill] sm:$0xff] %v8279_v6  ;;  %v8299_v16 = vsel %vm852_vm2, %v13433_v56, %v13439_v45  ;;  %v8304_v11 = vsel %vm852_vm2, %v13439_v45, %v13431_v44  ;;  %v13442_v6 = vld [vmem:[#allocation169_spill] sm:$0xff]  ;;  %v13449_v45 = vld [vmem:[#allocation62_spill] sm:$0xff] }
 0xf5a   :  { %13432 = vst [vmem:[#allocation75_spill] sm:$0xff] %v8284_v10  ;;  %v8309_v30 = vsel %vm852_vm2, %v13430_v42, %v13442_v6  ;;  %v8314_v10 = vsel %vm852_vm2, %v13442_v6, %v13437_v54  ;;  %v2684_v54 = vmul.f32 %v8168_v23, %v7182_v55  ;;  %v13453_v6 = vld [vmem:[#allocation93_spill] sm:$0xff] }
 0xf5b   :  { %13435 = vst [vmem:[#allocation146_spill] sm:$0xff] %v8289_v35  ;;  %v13460_v35 = vld [vmem:[#allocation174_spill] sm:$0xff] }
 0xf5c   :  { %13438 = vst [vmem:[#allocation46_spill] sm:$0xff] %v8294_v47  ;;  %v13445_v47 = vld [vmem:[#allocation170_spill] sm:$0xff]  ;;  %v8354_v55 = vsel %vm852_vm2, %v13453_v6, %v13460_v35  ;;  %2711 = vrot.lane.b32.xlu0 %v2684_v54, %s6266_s27 }
 0xf5d   :  { %13440 = vst [vmem:[#allocation77_spill] sm:$0xff] %v8299_v16  ;;  %v8319_v56 = vsel %vm852_vm2, %v13436_v7, %v13445_v47  ;;  %v13447_v16 = vld [vmem:[#allocation92_spill] sm:$0xff]  ;;  %v13454_v7 = vld [vmem:[#allocation171_spill] sm:$0xff] }
 0xf5e   :  { %13441 = vst [vmem:[#allocation149_spill] sm:$0xff] %v8304_v11  ;;  %v8324_v44 = vsel %vm852_vm2, %v13445_v47, %v13447_v16  ;;  %v13450_v11 = vld [vmem:[#allocation95_spill] sm:$0xff]  ;;  %v13457_v47 = vld [vmem:[#allocation97_spill] sm:$0xff] }
 0xf5f   :  { %13443 = vst [vmem:[#allocation150_spill] sm:$0xff] %v8309_v30  ;;  %v8329_v42 = vsel %vm852_vm2, %v13450_v11, %v13449_v45  ;;  %v8331_v30 = vpop.permute.xlu2 %2495 }
 0xf60   :  { %13444 = vst [vmem:[#allocation151_spill] sm:$0xff] %v8314_v10  ;;  %v13456_v10 = vld [vmem:[#allocation64_spill] sm:$0xff] }
 0xf61   :  { %13446 = vst [vmem:[#allocation47_spill] sm:$0xff] %v8319_v56  ;;  %v8340_v56 = vsel %vm852_vm2, %v13454_v7, %v13453_v6  ;;  %v8345_v16 = vsel %vm852_vm2, %v13457_v47, %v13456_v10  ;;  %v8359_v7 = vsel %vm852_vm2, %v13460_v35, %v13450_v11  ;;  %v13467_v11 = vld [vmem:[#allocation4_spill] sm:$0xff] }
 0xf62   :  { %13448 = vst [vmem:[#allocation82_spill] sm:$0xff] %v8324_v44  ;;  %v13459_v44 = vld [vmem:[#allocation5_spill] sm:$0xff]  ;;  %v63_v35 = vmul.f32 %v13467_v11, %v8333_v5 }
 0xf63   :  { %13451 = vst [vmem:[#allocation81_spill] sm:$0xff] %v8329_v42  ;;  %v62_v42 = vmul.f32 %v13459_v44, %v8333_v5  ;;  %v2679_v44 = vmul.f32 %v8168_v23, %v7186_v32  ;;  %v8384_v32 = vld [vmem:[%s12314_s1] sm:$0xff] }
 0xf64   :  { %13452 = vst [vmem:[#allocation152_spill] sm:$0xff] %v8331_v30  ;;  %v2680_v30 = vmul.f32 %v8168_v23, %v7184_v21 }
 0xf65   :  { %13455 = vst [vmem:[#allocation48_spill] sm:$0xff] %v8340_v56  ;;  %v13463_v56 = vld [vmem:[#allocation3_spill] sm:$0xff]  ;;  %v112_v11 = vadd.f32 %v7810_v8, %v62_v42  ;;  %2701 = vrot.lane.b32.xlu1 %v2679_v44, %s6266_s27  ;;  %v13480_v8 = vld [vmem:[#allocation80_spill] sm:$0xff]  ;;  %v13481_v42 = vld [vmem:[#allocation102_spill] sm:$0xff] }
 0xf66   :  { %13458 = vst [vmem:[#allocation83_spill] sm:$0xff] %v8345_v16  ;;  %v65_v49 = vmul.f32 %v13463_v56, %v8333_v5  ;;  %v13464_v16 = vld [vmem:[#allocation175_spill] sm:$0xff]  ;;  %v13468_v56 = vld [vmem:[#allocation6_spill] sm:$0xff]  ;;  %2703 = vrot.lane.b32.xlu2 %v2680_v30, %s6266_s27  ;;  %v13484_v44 = vld [vmem:[#allocation180_spill] sm:$0xff] }
 0xf67   :  { %13461 = vst [vmem:[#allocation155_spill] sm:$0xff] %v8354_v55  ;;  %v8369_v21 = vsel %vm852_vm2, %v13449_v45, %v13464_v16  ;;  %v8374_v6 = vsel %vm852_vm2, %v13464_v16, %v13457_v47  ;;  %v13469_v45 = vld [vmem:[#allocation176_spill] sm:$0xff]  ;;  %v13472_v30 = vld [vmem:[#allocation98_spill] sm:$0xff]  ;;  %v13475_v55 = vld [vmem:[#allocation101_spill] sm:$0xff] }
 0xf68   :  { %13462 = vst [vmem:[#allocation156_spill] sm:$0xff] %v8359_v7  ;;  %v68_v7 = vmul.f32 %v13468_v56, %v8333_v5  ;;  %v8389_v54 = vsel %vm852_vm2, %v13456_v10, %v13469_v45  ;;  %v13471_v16 = vld [vmem:[#allocation8_spill] sm:$0xff]  ;;  %v8399_v56 = vsel %vm852_vm2, %v13469_v45, %v13472_v30  ;;  %v13477_v10 = vld [vmem:[#allocation99_spill] sm:$0xff] }
 0xf69   :  { %13465 = vst [vmem:[#allocation157_spill] sm:$0xff] %v8369_v21  ;;  %v64_v47 = vmul.f32 %v13471_v16, %v8333_v5  ;;  %v13474_v21 = vld [vmem:[#allocation78_spill] sm:$0xff]  ;;  %v8421_v45 = vsel %vm852_vm2, %v13477_v10, %v13484_v44 }
 0xf6a   :  { %13466 = vst [vmem:[#allocation49_spill] sm:$0xff] %v8374_v6  ;;  %v115_v6 = vadd.f32 %v7822_v27, %v65_v49  ;;  %v8404_v14 = vsel %vm852_vm2, %v13475_v55, %v13474_v21  ;;  %v8414_v27 = vsel %vm852_vm2, %v13481_v42, %v13480_v8  ;;  %v8416_v49 = vpop.permute.xlu1 %2481  ;;  %v118_v30 = vadd.f32 %v7842_v63, %v68_v7  ;;  %v13486_v63 = vld [vmem:[#allocation182_spill] sm:$0xff] }
 0xf6b   :  { %13470 = vst [vmem:[#allocation86_spill] sm:$0xff] %v8389_v54  ;;  %v13478_v54 = vld [vmem:[#allocation177_spill] sm:$0xff]  ;;  %v8446_v7 = vsel %vm852_vm2, %v13480_v8, %v13486_v63  ;;  %v2683_v8 = vmul.f32 %v8168_v23, %v7196_v37  ;;  %v13497_v37 = vld [vmem:[#allocation96_spill] sm:$0xff] }
 0xf6c   :  { %13473 = vst [vmem:[#allocation85_spill] sm:$0xff] %v8399_v56  ;;  %v8409_v16 = vsel %vm852_vm2, %v13478_v54, %v13477_v10  ;;  %v162_v56 = vadd.f32 %v7782_v3, %v112_v11  ;;  %v8429_v54 = vsel %vm852_vm2, %v13484_v44, %v13475_v55  ;;  %v165_v10 = vadd.f32 %v7802_v58, %v115_v6  ;;  %v13488_v55 = vld [vmem:[#allocation103_spill] sm:$0xff]  ;;  %v13493_v44 = vld [vmem:[#allocation105_spill] sm:$0xff] }
 0xf6d   :  { %13476 = vst [vmem:[#allocation159_spill] sm:$0xff] %v8404_v14  ;;  %v2748_v14 = vperm.slane %v8384_v32, 0  ;;  %v8451_v11 = vsel %vm852_vm2, %v13486_v63, %v13488_v55  ;;  %v13491_v58 = vld [vmem:[#allocation7_spill] sm:$0xff] }
 0xf6e   :  { %13479 = vst [vmem:[#allocation50_spill] sm:$0xff] %v8409_v16  ;;  %v13485_v16 = vld [vmem:[#allocation181_spill] sm:$0xff]  ;;  %v66_v6 = vmul.f32 %v13491_v58, %v8333_v5  ;;  %v13494_v63 = vld [vmem:[#allocation11_spill] sm:$0xff]  ;;  %2709 = vrot.lane.b32.xlu2 %v2683_v8, %s6266_s27 }
 0xf6f   :  { %13482 = vst [vmem:[#allocation87_spill] sm:$0xff] %v8414_v27  ;;  %v113_v27 = vadd.f32 %v7814_v12, %v63_v35  ;;  %v8441_v3 = vsel %vm852_vm2, %v13485_v16, %v13481_v42  ;;  %v114_v12 = vadd.f32 %v7818_v26, %v64_v47  ;;  %v212_v35 = vadd.f32 %v7864_v59, %v162_v56  ;;  %v13492_v42 = vld [vmem:[#allocation94_spill] sm:$0xff]  ;;  %v13495_v47 = vld [vmem:[#allocation104_spill] sm:$0xff] }
 0xf70   :  { %13483 = vst [vmem:[#allocation162_spill] sm:$0xff] %v8416_v49  ;;  %v8434_v49 = vsel %vm852_vm2, %v13474_v21, %v13485_v16  ;;  %v8453_v21 = vpop.permute.xlu2 %2553  ;;  %v215_v16 = vadd.f32 %v7884_v20, %v165_v10  ;;  %v168_v26 = vadd.f32 %v7850_v41, %v118_v30  ;;  %2757 = vrot.lane.b32.xlu0 %v2748_v14, %s6246_s28  ;;  %v13496_v20 = vld [vmem:[#allocation183_spill] sm:$0xff]  ;;  %v13498_v10 = vld [vmem:[#allocation106_spill] sm:$0xff] }
 0xf71   :  { %13487 = vst [vmem:[#allocation163_spill] sm:$0xff] %v8446_v7  ;;  %v8465_v7 = vsel %vm852_vm2, %v13493_v44, %v13492_v42  ;;  %v2682_v59 = vmul.f32 %v8168_v23, %v7198_v46  ;;  %v8476_v56 = vsel %vm852_vm2, %v13496_v20, %v13495_v47  ;;  %v8481_v58 = vsel %vm852_vm2, %v13498_v10, %v13497_v37  ;;  %v13499_v41 = vld [vmem:[#allocation186_spill] sm:$0xff] }
 0xf72   :  { %13489 = vst [vmem:[#allocation164_spill] sm:$0xff] %v8451_v11  ;;  %v163_v55 = vadd.f32 %v7794_v28, %v113_v27  ;;  %v8489_v46 = vsel %vm852_vm2, %v13495_v47, %v13499_v41  ;;  %v8494_v14 = vsel %vm852_vm2, %v13499_v41, %v13493_v44  ;;  %v164_v30 = vadd.f32 %v7790_v31, %v114_v12  ;;  %v13500_v28 = vld [vmem:[#allocation187_spill] sm:$0xff] }
 0xf73   :  { %13490 = vst [vmem:[#allocation51_spill] sm:$0xff] %v8453_v21  ;;  %v67_v21 = vmul.f32 %v13494_v63, %v8333_v5  ;;  %v286_v63 = vadd.f32 %v7908_v9, %v212_v35  ;;  %v289_v20 = vadd.f32 %v7923_v17, %v215_v16  ;;  %2707 = vrot.lane.b32.xlu1 %v2682_v59, %s6266_s27  ;;  %v2751_v35 = vperm.slane %v8384_v32, 3  ;;  %v13501_v16 = vld [vmem:[#allocation188_spill] sm:$0xff] }
 0xf74   :  { %v8502_v9 = vsel %vm852_vm2, %v13492_v42, %v13500_v28  ;;  %v116_v27 = vadd.f32 %v7826_v38, %v66_v6  ;;  %v218_v44 = vadd.f32 %v7899_v53, %v168_v26  ;;  %v8513_v12 = vsel %vm852_vm2, %v13500_v28, %v13498_v10  ;;  %v13502_v38 = vld [vmem:[#allocation107_spill] sm:$0xff]  ;;  %v8525_v53 = vpop.permute.xlu1 %2487  ;;  %v13507_v26 = vld [vmem:[#allocation10_spill] sm:$0xff]  ;;  %v13508_v10 = vld [vmem:[#allocation108_spill] sm:$0xff] }
 0xf75   :  { %v117_v8 = vadd.f32 %v7830_v36, %v67_v21  ;;  %v359_v31 = vadd.f32 %v7950_v40, %v286_v63  ;;  %v362_v17 = vadd.f32 %v7965_v60, %v289_v20  ;;  %v8518_v42 = vsel %vm852_vm2, %v13497_v37, %v13501_v16  ;;  %13504 = vst [vmem:[#allocation89_spill] sm:$0xff] %v8525_v53  ;;  %v13505_v60 = vld [vmem:[#allocation114_spill] sm:$0xff]  ;;  %v13506_v21 = vld [vmem:[#allocation109_spill] sm:$0xff]  ;;  %v13510_v20 = vld [vmem:[#allocation115_spill] sm:$0xff] }
 0xf76   :  { %v8523_v36 = vsel %vm852_vm2, %v13501_v16, %v13502_v38  ;;  %v213_v40 = vadd.f32 %v7876_v19, %v163_v55  ;;  %v8531_v6 = vsel %vm1165_vm3, %v13506_v21, %v13505_v60  ;;  %v69_v59 = vmul.f32 %v13507_v26, %v8333_v5  ;;  %v13509_v63 = vld [vmem:[#allocation189_spill] sm:$0xff]  ;;  %v13511_v28 = vld [vmem:[#allocation110_spill] sm:$0xff]  ;;  %v13515_v38 = vld [vmem:[#allocation192_spill] sm:$0xff] }
 0xf77   :  { %13503 = vst [vmem:[#allocation90_spill] sm:$0xff] %v8523_v36  ;;  %v214_v47 = vadd.f32 %v7872_v13, %v164_v30  ;;  %v432_v37 = vadd.f32 %v8000_v62, %v359_v31  ;;  %v8540_v41 = vsel %vm1165_vm3, %v13509_v63, %v13508_v10  ;;  %v8545_v19 = vsel %vm1165_vm3, %v13511_v28, %v13510_v20  ;;  %v13513_v16 = vld [vmem:[#allocation158_spill] sm:$0xff] }
 0xf78   :  { %13512 = vst [vmem:[#allocation165_spill] sm:$0xff] %v8545_v19  ;;  %v166_v55 = vadd.f32 %v7778_v0, %v116_v27  ;;  %v2686_v53 = vmul.f32 %v8168_v23, %v13513_v16  ;;  %v8550_v26 = vpop.permute.xlu2 %2557  ;;  %v167_v13 = vadd.f32 %v7798_v57, %v117_v8  ;;  %v292_v62 = vadd.f32 %v7938_v48, %v218_v44  ;;  %v13519_v44 = vld [vmem:[#allocation123_spill] sm:$0xff] }
 0xf79   :  { %13514 = vst [vmem:[#allocation52_spill] sm:$0xff] %v8550_v26  ;;  %v435_v30 = vadd.f32 %v7995_v43, %v362_v17  ;;  %2763 = vrot.lane.b32.xlu0 %v2751_v35, %s6246_s28  ;;  %v2685_v31 = vmul.f32 %v8168_v23, %v7212_v39  ;;  %v8561_v0 = vsel %vm1165_vm3, %v13508_v10, %v13515_v38  ;;  %v13516_v43 = vld [vmem:[#allocation193_spill] sm:$0xff]  ;;  %v13520_v17 = vld [vmem:[#allocation195_spill] sm:$0xff]  ;;  %v13523_v10 = vld [vmem:[#allocation198_spill] sm:$0xff] }
 0xf7a   :  { %v8566_v27 = vsel %vm1165_vm3, %v13515_v38, %v13506_v21  ;;  %v287_v57 = vadd.f32 %v7913_v2, %v213_v40  ;;  %v505_v48 = vadd.f32 %v8047_v4, %v432_v37  ;;  %2715 = vrot.lane.b32.xlu2 %v2686_v53, %s6266_s27  ;;  %v8574_v39 = vsel %vm1165_vm3, %v13505_v60, %v13516_v43  ;;  %v13517_v2 = vld [vmem:[#allocation194_spill] sm:$0xff]  ;;  %v13522_v37 = vld [vmem:[#allocation124_spill] sm:$0xff]  ;;  %v13599_v19 = vld [vmem:[#allocation215_spill] sm:$0xff] }
 0xf7b   :  { %v8579_v23 = vsel %vm1165_vm3, %v13516_v43, %v13511_v28  ;;  %v119_v35 = vadd.f32 %v7834_v34, %v69_v59  ;;  %v288_v8 = vadd.f32 %v7891_v25, %v214_v47  ;;  %2713 = vrot.lane.b32.xlu1 %v2685_v31, %s6266_s27  ;;  %v8587_v4 = vsel %vm1165_vm3, %v13510_v20, %v13517_v2  ;;  %v13521_v59 = vld [vmem:[#allocation116_spill] sm:$0xff] }
 0xf7c   :  { %13518 = vst [vmem:[#allocation91_spill] sm:$0xff] %v8587_v4  ;;  %v8592_v38 = vsel %vm1165_vm3, %v13520_v17, %v13519_v44  ;;  %v216_v53 = vadd.f32 %v7856_v22, %v166_v55  ;;  %v579_v40 = vadd.f32 %v8094_v15, %v505_v48  ;;  %v217_v34 = vadd.f32 %v7880_v33, %v167_v13  ;;  %v13525_v55 = vld [vmem:[#allocation117_spill] sm:$0xff]  ;;  %v13532_v48 = vld [vmem:[#allocation28_spill] sm:$0xff] }
 0xf7d   :  { %v365_v25 = vadd.f32 %v7980_v50, %v292_v62  ;;  %v508_v60 = vadd.f32 %v8042_v1, %v435_v30  ;;  %v2754_v21 = vperm.slane %v8384_v32, 6  ;;  %v8603_v47 = vsel %vm1165_vm3, %v13521_v59, %v13520_v17  ;;  %v13528_v62 = vld [vmem:[#allocation199_spill] sm:$0xff]  ;;  %v13531_v30 = vld [vmem:[#allocation118_spill] sm:$0xff]  ;;  %v13535_v17 = vld [vmem:[#allocation132_spill] sm:$0xff] }
 0xf7e   :  { %v8608_v20 = vsel %vm1165_vm3, %v13523_v10, %v13522_v37  ;;  %v360_v22 = vadd.f32 %v7955_v61, %v287_v57  ;;  %v2750_v33 = vperm.slane %v8384_v32, 2  ;;  %v169_v50 = vadd.f32 %v7786_v52, %v119_v35  ;;  %v13527_v61 = vld [vmem:[#allocation125_spill] sm:$0xff] }
 0xf7f   :  { %13524 = vst [vmem:[#allocation168_spill] sm:$0xff] %v8608_v20  ;;  %v361_v1 = vadd.f32 %v7960_v18, %v288_v8  ;;  %v652_v15 = vadd.f32 %v8139_v51, %v579_v40  ;;  %v2749_v28 = vperm.slane %v8384_v32, 1  ;;  %v8619_v16 = vsel %vm1165_vm3, %v13519_v44, %v13525_v55  ;;  %v8631_v18 = vpop.permute.xlu1 %2493  ;;  %v13533_v35 = vld [vmem:[#allocation113_spill] sm:$0xff] }
 0xf80   :  { %v8624_v13 = vsel %vm1165_vm3, %v13525_v55, %v13523_v10  ;;  %v8629_v52 = vsel %vm1165_vm3, %v13528_v62, %v13527_v61  ;;  %13530 = vst [vmem:[#allocation62_spill] sm:$0xff] %v8631_v18  ;;  %v290_v51 = vadd.f32 %v7928_v29, %v216_v53  ;;  %v8637_v31 = vsel %vm1165_vm3, %v13522_v37, %v13531_v30  ;;  %v13536_v29 = vld [vmem:[#allocation127_spill] sm:$0xff]  ;;  %v13538_v40 = vld [vmem:[#allocation33_spill] sm:$0xff]  ;;  %v13543_v55 = vld [vmem:[#allocation128_spill] sm:$0xff] }
 0xf81   :  { %13526 = vst [vmem:[#allocation169_spill] sm:$0xff] %v8624_v13  ;;  %v291_v57 = vadd.f32 %v7918_v24, %v217_v34  ;;  %v438_v43 = vadd.f32 %v13532_v48, %v365_v25  ;;  %v582_v8 = vadd.f32 %v13533_v35, %v508_v60  ;;  %2769 = vrot.lane.b32.xlu0 %v2754_v21, %s6246_s28  ;;  %v13539_v24 = vld [vmem:[#allocation67_spill] sm:$0xff]  ;;  %v13540_v25 = vld [vmem:[#allocation126_spill] sm:$0xff]  ;;  %v13541_v60 = vld [vmem:[#allocation200_spill] sm:$0xff] }
 0xf82   :  { %13529 = vst [vmem:[#allocation170_spill] sm:$0xff] %v8629_v52  ;;  %v8646_v44 = vsel %vm1165_vm3, %v13531_v30, %v13528_v62  ;;  %v8651_v53 = vsel %vm1165_vm3, %v13536_v29, %v13535_v17  ;;  %v433_v37 = vadd.f32 %v13538_v40, %v360_v22  ;;  %2761 = vrot.lane.b32.xlu2 %v2750_v33, %s6246_s28  ;;  %v13542_v10 = vld [vmem:[#allocation133_spill] sm:$0xff]  ;;  %v8666_v30 = vpop.permute.xlu2 %2563  ;;  %v13547_v18 = vld [vmem:[#allocation54_spill] sm:$0xff]  ;;  %v13551_v61 = vld [vmem:[#allocation140_spill] sm:$0xff] }
 0xf83   :  { %13534 = vst [vmem:[#allocation95_spill] sm:$0xff] %v8646_v44  ;;  %v725_v34 = vadd.f32 %v13539_v24, %v652_v15  ;;  %v8659_v21 = vsel %vm1165_vm3, %v13541_v60, %v13540_v25  ;;  %v8664_v62 = vsel %vm1165_vm3, %v13543_v55, %v13542_v10  ;;  %v13546_v48 = vld [vmem:[#allocation17_spill] sm:$0xff]  ;;  %v434_v22 = vadd.f32 %v13547_v18, %v361_v1  ;;  %v13550_v24 = vld [vmem:[#allocation24_spill] sm:$0xff]  ;;  %v13613_v13 = vld [vmem:[#allocation219_spill] sm:$0xff] }
 0xf84   :  { %13537 = vst [vmem:[#allocation93_spill] sm:$0xff] %v8651_v53  ;;  %v219_v35 = vadd.f32 %v13546_v48, %v169_v50  ;;  %2759 = vrot.lane.b32.xlu1 %v2749_v28, %s6246_s28  ;;  %v13548_v33 = vld [vmem:[#allocation201_spill] sm:$0xff]  ;;  %v363_v26 = vadd.f32 %v13550_v24, %v290_v51  ;;  %v13552_v52 = vld [vmem:[#allocation204_spill] sm:$0xff]  ;;  %v13559_v51 = vld [vmem:[#allocation34_spill] sm:$0xff] }
 0xf85   :  { %13544 = vst [vmem:[#allocation171_spill] sm:$0xff] %v8664_v62  ;;  %v8674_v15 = vsel %vm1165_vm3, %v13540_v25, %v13548_v33  ;;  %v8679_v40 = vsel %vm1165_vm3, %v13548_v33, %v13536_v29  ;;  %v8686_v50 = vsel %vm1165_vm3, %v13535_v17, %v13552_v52  ;;  %v13554_v1 = vld [vmem:[#allocation25_spill] sm:$0xff]  ;;  %v13556_v25 = vld [vmem:[#allocation63_spill] sm:$0xff]  ;;  %v8694_v29 = vsel %vm1165_vm3, %v13552_v52, %v13543_v55  ;;  %v13565_v55 = vld [vmem:[#allocation206_spill] sm:$0xff] }
 0xf86   :  { %13545 = vst [vmem:[#allocation64_spill] sm:$0xff] %v8666_v30  ;;  %v798_v30 = vadd.f32 %v13551_v61, %v725_v34  ;;  %v364_v28 = vadd.f32 %v13554_v1, %v291_v57  ;;  %v13555_v18 = vld [vmem:[#allocation53_spill] sm:$0xff]  ;;  %v655_v2 = vadd.f32 %v13556_v25, %v582_v8  ;;  %v506_v34 = vadd.f32 %v13559_v51, %v433_v37  ;;  %v13560_v24 = vld [vmem:[#allocation207_spill] sm:$0xff]  ;;  %v13561_v57 = vld [vmem:[#allocation134_spill] sm:$0xff] }
 0xf87   :  { %13549 = vst [vmem:[#allocation97_spill] sm:$0xff] %v8674_v15  ;;  %v511_v48 = vadd.f32 %v13555_v18, %v438_v43  ;;  %v13557_v33 = vld [vmem:[#allocation205_spill] sm:$0xff]  ;;  %v2753_v17 = vperm.slane %v8384_v32, 5  ;;  %v8706_v43 = vsel %vm1165_vm3, %v13561_v57, %v13560_v24  ;;  %v13564_v18 = vld [vmem:[#allocation55_spill] sm:$0xff]  ;;  %v2752_v52 = vperm.slane %v8384_v32, 4  ;;  %v8721_v51 = vpop.permute.xlu1 %2551  ;;  %v13570_v62 = vld [vmem:[#allocation146_spill] sm:$0xff] }
 0xf88   :  { %13553 = vst [vmem:[#allocation5_spill] sm:$0xff] %v8686_v50  ;;  %v8699_v61 = vsel %vm1165_vm3, %v13542_v10, %v13557_v33  ;;  %v13563_v8 = vld [vmem:[#allocation21_spill] sm:$0xff]  ;;  %v507_v25 = vadd.f32 %v13564_v18, %v434_v22  ;;  %v8714_v10 = vsel %vm1165_vm3, %v13560_v24, %v13565_v55  ;;  %v13567_v33 = vld [vmem:[#allocation135_spill] sm:$0xff]  ;;  %v13574_v24 = vld [vmem:[#allocation58_spill] sm:$0xff] }
 0xf89   :  { %13558 = vst [vmem:[#allocation174_spill] sm:$0xff] %v8699_v61  ;;  %v293_v1 = vadd.f32 %v13563_v8, %v219_v35  ;;  %v8719_v37 = vsel %vm1165_vm3, %v13565_v55, %v13567_v33  ;;  %v13569_v61 = vld [vmem:[#allocation30_spill] sm:$0xff]  ;;  %v872_v35 = vadd.f32 %v13570_v62, %v798_v30  ;;  %v13571_v8 = vld [vmem:[#allocation209_spill] sm:$0xff]  ;;  %v13573_v18 = vld [vmem:[#allocation31_spill] sm:$0xff]  ;;  %v585_v11 = vadd.f32 %v13574_v24, %v511_v48 }
 0xf8a   :  { %13562 = vst [vmem:[#allocation3_spill] sm:$0xff] %v8706_v43  ;;  %v436_v4 = vadd.f32 %v13569_v61, %v363_v26  ;;  %v8728_v22 = vsel %vm1165_vm3, %v13567_v33, %v13571_v8  ;;  %v437_v36 = vadd.f32 %v13573_v18, %v364_v28  ;;  %v13575_v44 = vld [vmem:[#allocation68_spill] sm:$0xff]  ;;  %v13580_v62 = vld [vmem:[#allocation37_spill] sm:$0xff]  ;;  %2767 = vrot.lane.b32.xlu2 %v2753_v17, %s6246_s28  ;;  %v13585_v33 = vld [vmem:[#allocation26_spill] sm:$0xff] }
 0xf8b   :  { %13566 = vst [vmem:[#allocation175_spill] sm:$0xff] %v8714_v10  ;;  %v728_v50 = vadd.f32 %v13575_v44, %v655_v2  ;;  %v13576_v53 = vld [vmem:[#allocation208_spill] sm:$0xff]  ;;  %v580_v30 = vadd.f32 %v13580_v62, %v506_v34  ;;  %v13581_v28 = vld [vmem:[#allocation213_spill] sm:$0xff]  ;;  %v13583_v2 = vld [vmem:[#allocation210_spill] sm:$0xff]  ;;  %v366_v61 = vadd.f32 %v13585_v33, %v293_v1  ;;  %v8769_v1 = vpop.permute.xlu2 %2569 }
 0xf8c   :  { %13568 = vst [vmem:[#allocation4_spill] sm:$0xff] %v8721_v51  ;;  %v8736_v55 = vsel %vm1165_vm3, %v13571_v8, %v13576_v53  ;;  %v13578_v51 = vld [vmem:[#allocation136_spill] sm:$0xff]  ;;  %v8753_v44 = vsel %vm1165_vm3, %v13581_v28, %v13583_v2  ;;  %v13586_v8 = vld [vmem:[#allocation119_spill] sm:$0xff]  ;;  %2765 = vrot.lane.b32.xlu1 %v2752_v52, %s6246_s28  ;;  %v13588_v17 = vld [vmem:[#allocation9_spill] sm:$0xff] }
 0xf8d   :  { %13572 = vst [vmem:[#allocation6_spill] sm:$0xff] %v8728_v22  ;;  %v8741_v26 = vsel %vm1165_vm3, %v13576_v53, %v13578_v51  ;;  %v8748_v48 = vsel %vm1165_vm3, %v13578_v51, %v13581_v28  ;;  %v581_v53 = vadd.f32 %v13586_v8, %v507_v25  ;;  %v13587_v34 = vld [vmem:[#allocation12_spill] sm:$0xff]  ;;  %v71_v24 = vmul.f32 %v13588_v17, %v8333_v5  ;;  %v13589_v62 = vld [vmem:[#allocation111_spill] sm:$0xff]  ;;  %v13591_v22 = vld [vmem:[#allocation141_spill] sm:$0xff] }
 0xf8e   :  { %13577 = vst [vmem:[#allocation176_spill] sm:$0xff] %v8736_v55  ;;  %v70_v18 = vmul.f32 %v13587_v34, %v8333_v5  ;;  %v509_v51 = vadd.f32 %v13589_v62, %v436_v4  ;;  %v13592_v10 = vld [vmem:[#allocation212_spill] sm:$0xff]  ;;  %v13596_v52 = vld [vmem:[#allocation61_spill] sm:$0xff]  ;;  %v13597_v2 = vld [vmem:[#allocation71_spill] sm:$0xff]  ;;  %v8808_v15 = vsel %vm1540_vm4, %v13591_v22, %v13613_v13 }
 0xf8f   :  { %13579 = vst [vmem:[#allocation8_spill] sm:$0xff] %v8741_v26  ;;  %v8767_v28 = vsel %vm1540_vm4, %v13592_v10, %v13591_v22  ;;  %v13595_v25 = vld [vmem:[#allocation56_spill] sm:$0xff]  ;;  %v658_v8 = vadd.f32 %v13596_v52, %v585_v11  ;;  %v801_v34 = vadd.f32 %v13597_v2, %v728_v50  ;;  %v13601_v4 = vld [vmem:[#allocation142_spill] sm:$0xff]  ;;  %v13604_v17 = vld [vmem:[#allocation217_spill] sm:$0xff] }
 0xf90   :  { %13582 = vst [vmem:[#allocation78_spill] sm:$0xff] %v8748_v48  ;;  %v13590_v48 = vld [vmem:[#allocation48_spill] sm:$0xff]  ;;  %v510_v33 = vadd.f32 %v13595_v25, %v437_v36  ;;  %v6213_v11 = vld [vmem:[%s12314_s1 + $0x8] ss:$0 sm:$0xff]  ;;  %v8796_v50 = vsel %vm1540_vm4, %v13604_v17, %v13592_v10  ;;  %v13612_v26 = vld [vmem:[#allocation50_spill] sm:$0xff]  ;;  %s6270_s1 = smov 33  }
 0xf91   :  { %13584 = vst [vmem:[#allocation101_spill] sm:$0xff] %v8753_v44  ;;  %v945_v55 = vadd.f32 %v13590_v48, %v872_v35  ;;  %v13598_v44 = vld [vmem:[#allocation211_spill] sm:$0xff]  ;;  %v13602_v35 = vld [vmem:[#allocation214_spill] sm:$0xff]  ;;  %v13606_v36 = vld [vmem:[#allocation40_spill] sm:$0xff] }
 0xf92   :  { %13593 = vst [vmem:[#allocation99_spill] sm:$0xff] %v8767_v28  ;;  %v8777_v5 = vsel %vm1540_vm4, %v13599_v19, %v13598_v44  ;;  %v8782_v48 = vsel %vm1540_vm4, %v13602_v35, %v13601_v4  ;;  %v8787_v62 = vsel %vm1540_vm4, %v13598_v44, %v13604_v17  ;;  %v653_v25 = vadd.f32 %v13606_v36, %v580_v30  ;;  %v13607_v2 = vld [vmem:[#allocation32_spill] sm:$0xff]  ;;  %v13611_v30 = vld [vmem:[#allocation59_spill] sm:$0xff]  ;;  %v13615_v10 = vld [vmem:[#allocation38_spill] sm:$0xff] }
 0xf93   :  { %13594 = vst [vmem:[#allocation177_spill] sm:$0xff] %v8769_v1  ;;  %v439_v52 = vadd.f32 %v13607_v2, %v366_v61  ;;  %v13608_v1 = vld [vmem:[#allocation65_spill] sm:$0xff]  ;;  %v2755_v28 = vperm.slane %v8384_v32, 7  ;;  %v583_v36 = vadd.f32 %v13611_v30, %v509_v51  ;;  %v1018_v20 = vadd.f32 %v13612_v26, %v945_v55  ;;  %v13616_v61 = vld [vmem:[#allocation75_spill] sm:$0xff]  ;;  %v13620_v26 = vld [vmem:[#allocation216_spill] sm:$0xff]  ;;  %2773 = vrot.lane.b32.xlu2 %v6213_v11, %s6246_s28 }
 0xf94   :  { %13600 = vst [vmem:[#allocation80_spill] sm:$0xff] %v8777_v5  ;;  %v13609_v5 = vld [vmem:[#allocation16_spill] sm:$0xff]  ;;  %v584_v17 = vadd.f32 %v13615_v10, %v510_v33  ;;  %v875_v2 = vadd.f32 %v13616_v61, %v801_v34  ;;  %v8816_v32 = vsel %vm1540_vm4, %v13613_v13, %v13602_v35  ;;  %v13623_v51 = vld [vmem:[#allocation42_spill] sm:$0xff]  ;;  %v13631_v10 = vld [vmem:[#allocation69_spill] sm:$0xff] }
 0xf95   :  { %13603 = vst [vmem:[#allocation102_spill] sm:$0xff] %v8782_v48  ;;  %v654_v48 = vadd.f32 %v13608_v1, %v581_v53  ;;  %v120_v44 = vadd.f32 %v13609_v5, %v70_v18  ;;  %v13617_v53 = vld [vmem:[#allocation131_spill] sm:$0xff]  ;;  %v13618_v18 = vld [vmem:[#allocation221_spill] sm:$0xff]  ;;  %v726_v33 = vadd.f32 %v13623_v51, %v653_v25  ;;  %v13625_v34 = vld [vmem:[#allocation220_spill] sm:$0xff]  ;;  %2771 = vrot.lane.b32.xlu1 %v2755_v28, %s6246_s28 }
 0xf96   :  { %13605 = vst [vmem:[#allocation180_spill] sm:$0xff] %v8787_v62  ;;  %v13610_v62 = vld [vmem:[#allocation14_spill] sm:$0xff]  ;;  %v731_v1 = vadd.f32 %v13617_v53, %v658_v8  ;;  %v8821_v55 = vsel %vm1540_vm4, %v13601_v4, %v13618_v18  ;;  %v8826_v22 = vsel %vm1540_vm4, %v13618_v18, %v13620_v26  ;;  %v13624_v8 = vld [vmem:[#allocation147_spill] sm:$0xff]  ;;  %v13628_v35 = vld [vmem:[#allocation224_spill] sm:$0xff] }
 0xf97   :  { %v121_v43 = vadd.f32 %v13610_v62, %v71_v24  ;;  %13614 = vst [vmem:[#allocation181_spill] sm:$0xff] %v8808_v15  ;;  %v8828_v24 = vpop.permute.xlu1 %2555  ;;  %v8835_v13 = vsel %vm1540_vm4, %v13625_v34, %v13624_v8  ;;  %v13627_v5 = vld [vmem:[#allocation218_spill] sm:$0xff]  ;;  %v13630_v62 = vld [vmem:[#allocation112_spill] sm:$0xff]  ;;  %v727_v61 = vadd.f32 %v13631_v10, %v654_v48  ;;  %v13632_v53 = vld [vmem:[#allocation313_spill] sm:$0xff]  ;;  %v8854_v15 = vpop.permute.xlu2 %2626 }
 0xf98   :  { %13619 = vst [vmem:[#allocation182_spill] sm:$0xff] %v8821_v55  ;;  %v8840_v4 = vsel %vm1540_vm4, %v13628_v35, %v13627_v5  ;;  %v512_v30 = vadd.f32 %v13630_v62, %v439_v52  ;;  %v170_v11 = vadd.f32 %v13632_v53, %v120_v44  ;;  %v13633_v18 = vld [vmem:[#allocation18_spill] sm:$0xff]  ;;  %v13635_v55 = vld [vmem:[#allocation148_spill] sm:$0xff]  ;;  %v13639_v52 = vld [vmem:[#allocation129_spill] sm:$0xff] }
 0xf99   :  { %13621 = vst [vmem:[#allocation7_spill] sm:$0xff] %v8826_v22  ;;  %v171_v25 = vadd.f32 %v13633_v18, %v121_v43  ;;  %v13634_v26 = vld [vmem:[#allocation122_spill] sm:$0xff]  ;;  %v657_v62 = vadd.f32 %v13639_v52, %v584_v17  ;;  %v13640_v28 = vld [vmem:[#allocation81_spill] sm:$0xff]  ;;  %v13641_v48 = vld [vmem:[#allocation44_spill] sm:$0xff] }
 0xf9a   :  { %13622 = vst [vmem:[#allocation94_spill] sm:$0xff] %v8828_v24  ;;  %v656_v51 = vadd.f32 %v13634_v26, %v583_v36  ;;  %v1091_v24 = vadd.f32 %v8476_v56, %v1018_v20  ;;  %v13636_v22 = vld [vmem:[#allocation222_spill] sm:$0xff]  ;;  %v804_v10 = vadd.f32 %v13641_v48, %v731_v1  ;;  %v13642_v44 = vld [vmem:[#allocation227_spill] sm:$0xff]  ;;  %v13644_v20 = vld [vmem:[#allocation229_spill] sm:$0xff] }
 0xf9b   :  { %13626 = vst [vmem:[#allocation105_spill] sm:$0xff] %v8835_v13  ;;  %v8852_v13 = vsel %vm1540_vm4, %v13636_v22, %v13635_v55  ;;  %v8862_v43 = vsel %vm1540_vm4, %v13627_v5, %v13642_v44  ;;  %v8867_v56 = vsel %vm1540_vm4, %v13642_v44, %v13625_v34  ;;  %v8872_v36 = vsel %vm1540_vm4, %v13624_v8, %v13644_v20  ;;  %v13646_v17 = vld [vmem:[#allocation73_spill] sm:$0xff]  ;;  %v13648_v1 = vld [vmem:[#allocation231_spill] sm:$0xff]  ;;  %v13650_v18 = vld [vmem:[#allocation120_spill] sm:$0xff] }
 0xf9c   :  { %13629 = vst [vmem:[#allocation11_spill] sm:$0xff] %v8840_v4  ;;  %v948_v4 = vadd.f32 %v13640_v28, %v875_v2  ;;  %v799_v53 = vadd.f32 %v13646_v17, %v726_v33  ;;  %v8878_v2 = vsel %vm1540_vm4, %v13644_v20, %v13636_v22  ;;  %v8883_v5 = vsel %vm1540_vm4, %v13635_v55, %v13648_v1  ;;  %v13651_v26 = vld [vmem:[#allocation143_spill] sm:$0xff]  ;;  %v13652_v28 = vld [vmem:[#allocation20_spill] sm:$0xff] }
 0xf9d   :  { %13637 = vst [vmem:[#allocation104_spill] sm:$0xff] %v8852_v13  ;;  %v586_v34 = vadd.f32 %v13650_v18, %v512_v30  ;;  %v800_v52 = vadd.f32 %v13651_v26, %v727_v61  ;;  %v220_v48 = vadd.f32 %v13652_v28, %v170_v11  ;;  %v13653_v8 = vld [vmem:[#allocation23_spill] sm:$0xff]  ;;  %v1184_v17 = vadd.f32 %v13509_v63, %v1091_v24  ;;  %v13655_v13 = vld [vmem:[#allocation225_spill] sm:$0xff]  ;;  %v13659_v30 = vld [vmem:[#allocation46_spill] sm:$0xff] }
 0xf9e   :  { %13638 = vst [vmem:[#allocation183_spill] sm:$0xff] %v8854_v15  ;;  %v221_v44 = vadd.f32 %v13653_v8, %v171_v25  ;;  %v13654_v15 = vld [vmem:[#allocation137_spill] sm:$0xff]  ;;  %v8894_v22 = vsel %vm1540_vm4, %v13648_v1, %v13655_v13  ;;  %v13657_v20 = vld [vmem:[#allocation159_spill] sm:$0xff]  ;;  %v878_v18 = vadd.f32 %v13659_v30, %v804_v10  ;;  %v13661_v26 = vld [vmem:[#allocation230_spill] sm:$0xff] }
 0xf9f   :  { %13643 = vst [vmem:[#allocation96_spill] sm:$0xff] %v8862_v43  ;;  %v729_v33 = vadd.f32 %v13654_v15, %v656_v51  ;;  %v1021_v55 = vadd.f32 %v13657_v20, %v948_v4  ;;  %v13660_v61 = vld [vmem:[#allocation153_spill] sm:$0xff]  ;;  %v13663_v25 = vld [vmem:[#allocation228_spill] sm:$0xff]  ;;  %v13666_v24 = vld [vmem:[#allocation154_spill] sm:$0xff] }
 0xfa0   :  { %13645 = vst [vmem:[#allocation106_spill] sm:$0xff] %v8872_v36  ;;  %v8902_v11 = vsel %vm1540_vm4, %v13661_v26, %v13660_v61  ;;  %v13664_v15 = vld [vmem:[#allocation233_spill] sm:$0xff]  ;;  %v13667_v51 = vld [vmem:[#allocation232_spill] sm:$0xff]  ;;  %v13672_v28 = vld [vmem:[#allocation130_spill] sm:$0xff] }
 0xfa1   :  { %13647 = vst [vmem:[#allocation186_spill] sm:$0xff] %v8878_v2  ;;  %v8907_v63 = vsel %vm1540_vm4, %v13664_v15, %v13663_v25  ;;  %v8912_v13 = vsel %vm1540_vm4, %v13667_v51, %v13666_v24  ;;  %v13669_v4 = vld [vmem:[#allocation77_spill] sm:$0xff]  ;;  %v659_v8 = vadd.f32 %v13672_v28, %v586_v34 }
 0xfa2   :  { %13649 = vst [vmem:[#allocation187_spill] sm:$0xff] %v8883_v5  ;;  %v13658_v5 = vld [vmem:[#allocation138_spill] sm:$0xff]  ;;  %v873_v1 = vadd.f32 %v13669_v4, %v799_v53  ;;  %v13673_v20 = vld [vmem:[#allocation149_spill] sm:$0xff]  ;;  %v13677_v4 = vld [vmem:[#allocation144_spill] sm:$0xff] }
 0xfa3   :  { %13656 = vst [vmem:[#allocation188_spill] sm:$0xff] %v8894_v22  ;;  %v730_v36 = vadd.f32 %v13658_v5, %v657_v62  ;;  %v13670_v62 = vld [vmem:[#allocation235_spill] sm:$0xff]  ;;  %v874_v30 = vadd.f32 %v13673_v20, %v800_v52  ;;  %v8927_v22 = vpop.permute.xlu1 %2561  ;;  %v802_v43 = vadd.f32 %v13677_v4, %v729_v33  ;;  %v13680_v34 = vld [vmem:[#allocation145_spill] sm:$0xff]  ;;  %v13685_v33 = vld [vmem:[#allocation234_spill] sm:$0xff] }
 0xfa4   :  { %13662 = vst [vmem:[#allocation114_spill] sm:$0xff] %v8902_v11  ;;  %v8918_v10 = vsel %vm1540_vm4, %v13663_v25, %v13670_v62  ;;  %v8923_v5 = vsel %vm1540_vm4, %v13670_v62, %v13661_v26  ;;  %v13675_v11 = vld [vmem:[#allocation13_spill] sm:$0xff]  ;;  %v1276_v25 = vadd.f32 %v13521_v59, %v1184_v17  ;;  %v1094_v26 = vadd.f32 %v8465_v7, %v1021_v55  ;;  %v13681_v52 = vld [vmem:[#allocation83_spill] sm:$0xff]  ;;  %v13696_v4 = vld [vmem:[#allocation156_spill] sm:$0xff] }
 0xfa5   :  { %13665 = vst [vmem:[#allocation109_spill] sm:$0xff] %v8907_v63  ;;  %v13676_v63 = vld [vmem:[#allocation35_spill] sm:$0xff]  ;;  %v803_v62 = vadd.f32 %v13680_v34, %v730_v36  ;;  %v951_v28 = vadd.f32 %v13681_v52, %v878_v18  ;;  %v13688_v36 = vld [vmem:[#allocation160_spill] sm:$0xff]  ;;  %v947_v34 = vadd.f32 %v13696_v4, %v874_v30 }
 0xfa6   :  { %13668 = vst [vmem:[#allocation10_spill] sm:$0xff] %v8912_v13  ;;  %v294_v13 = vadd.f32 %v13675_v11, %v220_v48  ;;  %v295_v53 = vadd.f32 %v13676_v63, %v221_v44  ;;  %v13683_v44 = vld [vmem:[#allocation239_spill] sm:$0xff]  ;;  %v13691_v11 = vld [vmem:[#allocation236_spill] sm:$0xff]  ;;  %v13692_v63 = vld [vmem:[#allocation241_spill] sm:$0xff] }
 0xfa7   :  { %13671 = vst [vmem:[#allocation108_spill] sm:$0xff] %v8918_v10  ;;  %v13678_v10 = vld [vmem:[#allocation237_spill] sm:$0xff]  ;;  %v8949_v59 = vsel %vm1540_vm4, %v13666_v24, %v13683_v44  ;;  %v8954_v17 = vsel %vm1540_vm4, %v13683_v44, %v13685_v33  ;;  %v13687_v7 = vld [vmem:[#allocation155_spill] sm:$0xff]  ;;  %v13698_v33 = vld [vmem:[#allocation60_spill] sm:$0xff] }
 0xfa8   :  { %13674 = vst [vmem:[#allocation189_spill] sm:$0xff] %v8927_v22  ;;  %v8936_v2 = vsel %vm1540_vm4, %v13660_v61, %v13678_v10  ;;  %v8944_v48 = vsel %vm1540_vm4, %v13678_v10, %v13667_v51  ;;  %v946_v55 = vadd.f32 %v13687_v7, %v873_v1  ;;  %v13689_v61 = vld [vmem:[#allocation238_spill] sm:$0xff]  ;;  %v8965_v51 = vsel %vm1540_vm4, %v13692_v63, %v13691_v11  ;;  %v8967_v10 = vpop.permute.xlu2 %2630  ;;  %v13695_v24 = vld [vmem:[#allocation139_spill] sm:$0xff] }
 0xfa9   :  { %13679 = vst [vmem:[#allocation115_spill] sm:$0xff] %v8936_v2  ;;  %v8960_v18 = vsel %vm1540_vm4, %v13689_v61, %v13688_v36  ;;  %v732_v20 = vadd.f32 %v13695_v24, %v659_v8  ;;  %v13697_v52 = vld [vmem:[#allocation27_spill] sm:$0xff]  ;;  %v368_v1 = vadd.f32 %v13698_v33, %v295_v53  ;;  %v13699_v7 = vld [vmem:[#allocation150_spill] sm:$0xff] }
 0xfaa   :  { %13682 = vst [vmem:[#allocation110_spill] sm:$0xff] %v8944_v48  ;;  %v367_v44 = vadd.f32 %v13697_v52, %v294_v13  ;;  %v876_v22 = vadd.f32 %v13699_v7, %v802_v43  ;;  %v13703_v8 = vld [vmem:[#allocation87_spill] sm:$0xff]  ;;  %v13705_v43 = vld [vmem:[#allocation245_spill] sm:$0xff] }
 0xfab   :  { %13684 = vst [vmem:[#allocation158_spill] sm:$0xff] %v8949_v59  ;;  %v1368_v59 = vadd.f32 %v13541_v60, %v1276_v25  ;;  %v1024_v24 = vadd.f32 %v13703_v8, %v951_v28  ;;  %v13704_v30 = vld [vmem:[#allocation243_spill] sm:$0xff]  ;;  %v8996_v53 = vsel %vm1540_vm4, %v13688_v36, %v13705_v43  ;;  %v1020_v28 = vadd.f32 %v8429_v54, %v947_v34  ;;  %v13709_v52 = vld [vmem:[#allocation157_spill] sm:$0xff]  ;;  %v13712_v54 = vld [vmem:[#allocation242_spill] sm:$0xff] }
 0xfac   :  { %13686 = vst [vmem:[#allocation192_spill] sm:$0xff] %v8954_v17  ;;  %v13700_v17 = vld [vmem:[#allocation161_spill] sm:$0xff]  ;;  %v8986_v13 = vsel %vm1540_vm4, %v13691_v11, %v13704_v30  ;;  %v8991_v60 = vsel %vm1540_vm4, %v13704_v30, %v13689_v61  ;;  %v13707_v11 = vld [vmem:[#allocation100_spill] sm:$0xff]  ;;  %v949_v33 = vadd.f32 %v13709_v52, %v876_v22  ;;  %v13710_v7 = vld [vmem:[#allocation247_spill] sm:$0xff] }
 0xfad   :  { %13690 = vst [vmem:[#allocation193_spill] sm:$0xff] %v8960_v18  ;;  %v13701_v18 = vld [vmem:[#allocation240_spill] sm:$0xff]  ;;  %v440_v61 = vadd.f32 %v13707_v11, %v367_v44  ;;  %v1460_v36 = vadd.f32 %v13561_v57, %v1368_v59  ;;  %v9021_v34 = vsel %vm1540_vm4, %v13710_v7, %v13712_v54  ;;  %v13713_v44 = vld [vmem:[#allocation166_spill] sm:$0xff]  ;;  %v13721_v30 = vld [vmem:[#allocation251_spill] sm:$0xff] }
 0xfae   :  { %13693 = vst [vmem:[#allocation123_spill] sm:$0xff] %v8965_v51  ;;  %v8978_v2 = vsel %vm1540_vm4, %v13701_v18, %v13700_v17  ;;  %v1187_v51 = vadd.f32 %v8566_v27, %v1094_v26  ;;  %v1019_v27 = vadd.f32 %v8421_v45, %v946_v55  ;;  %v9002_v25 = vsel %vm1540_vm4, %v13705_v43, %v13701_v18  ;;  %v13706_v26 = vld [vmem:[#allocation45_spill] sm:$0xff]  ;;  %v13714_v22 = vld [vmem:[#allocation246_spill] sm:$0xff]  ;;  %v13715_v59 = vld [vmem:[#allocation244_spill] sm:$0xff] }
 0xfaf   :  { %13694 = vst [vmem:[#allocation195_spill] sm:$0xff] %v8967_v10  ;;  %v13702_v10 = vld [vmem:[#allocation151_spill] sm:$0xff]  ;;  %v9013_v45 = vsel %vm1540_vm4, %v13700_v17, %v13710_v7  ;;  %v13711_v18 = vld [vmem:[#allocation49_spill] sm:$0xff]  ;;  %v9026_v57 = vsel %vm1911_vm5, %v13714_v22, %v13713_v44  ;;  %v9044_v43 = vsel %vm1911_vm5, %v13715_v59, %v13721_v30  ;;  %v13723_v52 = vld [vmem:[#allocation36_spill] sm:$0xff] }
 0xfb0   :  { %v877_v48 = vadd.f32 %v13702_v10, %v803_v62  ;;  %v805_v62 = vadd.f32 %v13706_v26, %v732_v20  ;;  %v13708_v10 = vld [vmem:[#allocation66_spill] sm:$0xff]  ;;  %v1279_v55 = vadd.f32 %v8619_v16, %v1187_v51  ;;  %v1097_v20 = vadd.f32 %v8481_v58, %v1024_v24  ;;  %v9033_v16 = vpop.permute.xlu1 %2567  ;;  %v13718_v58 = vld [vmem:[#allocation167_spill] sm:$0xff]  ;;  %v13719_v51 = vld [vmem:[#allocation248_spill] sm:$0xff] }
 0xfb1   :  { %v441_v4 = vadd.f32 %v13708_v10, %v368_v1  ;;  %v13716_v1 = vld [vmem:[#allocation249_spill] sm:$0xff]  ;;  %13717 = vst [vmem:[#allocation116_spill] sm:$0xff] %v9033_v16  ;;  %v9039_v24 = vsel %vm1911_vm5, %v13719_v51, %v13718_v58  ;;  %v13722_v26 = vld [vmem:[#allocation47_spill] sm:$0xff]  ;;  %v1093_v10 = vadd.f32 %v8494_v14, %v1020_v28  ;;  %v513_v7 = vadd.f32 %v13723_v52, %v440_v61  ;;  %v13726_v28 = vld [vmem:[#allocation254_spill] sm:$0xff] }
 0xfb2   :  { %v950_v8 = vadd.f32 %v13711_v18, %v877_v48  ;;  %v9031_v17 = vsel %vm1911_vm5, %v13716_v1, %v13715_v59  ;;  %v1092_v48 = vadd.f32 %v8489_v46, %v1019_v27  ;;  %13720 = vst [vmem:[#allocation124_spill] sm:$0xff] %v9039_v24  ;;  %v879_v11 = vadd.f32 %v13722_v26, %v805_v62  ;;  %v13724_v18 = vld [vmem:[#allocation70_spill] sm:$0xff]  ;;  %v9057_v24 = vpop.permute.xlu2 %2636  ;;  %v13734_v26 = vld [vmem:[#allocation252_spill] sm:$0xff]  ;;  %v13735_v52 = vld [vmem:[#allocation259_spill] sm:$0xff] }
 0xfb3   :  { %v514_v54 = vadd.f32 %v13724_v18, %v441_v4  ;;  %v1022_v46 = vadd.f32 %v8434_v49, %v949_v33  ;;  %v1560_v27 = vadd.f32 %v13599_v19, %v1460_v36  ;;  %v9055_v16 = vsel %vm1911_vm5, %v13721_v30, %v13714_v22  ;;  %13725 = vst [vmem:[#allocation198_spill] sm:$0xff] %v9057_v24  ;;  %v13727_v19 = vld [vmem:[#allocation257_spill] sm:$0xff]  ;;  %v13729_v33 = vld [vmem:[#allocation172_spill] sm:$0xff]  ;;  %v13730_v36 = vld [vmem:[#allocation255_spill] sm:$0xff] }
 0xfb4   :  { %v1371_v59 = vadd.f32 %v8679_v40, %v1279_v55  ;;  %v1023_v62 = vadd.f32 %v8441_v3, %v950_v8  ;;  %v1190_v14 = vadd.f32 %v8579_v23, %v1097_v20  ;;  %v9065_v61 = vsel %vm1911_vm5, %v13713_v44, %v13726_v28  ;;  %v13728_v3 = vld [vmem:[#allocation250_spill] sm:$0xff]  ;;  %v13732_v22 = vld [vmem:[#allocation39_spill] sm:$0xff] }
 0xfb5   :  { %v9070_v49 = vsel %vm1911_vm5, %v13726_v28, %v13719_v51  ;;  %v9075_v4 = vsel %vm1911_vm5, %v13718_v58, %v13727_v19  ;;  %v1185_v40 = vadd.f32 %v8540_v41, %v1092_v48  ;;  %v9081_v23 = vsel %vm1911_vm5, %v13727_v19, %v13728_v3  ;;  %v13731_v8 = vld [vmem:[#allocation86_spill] sm:$0xff]  ;;  %v13743_v3 = vld [vmem:[#allocation41_spill] sm:$0xff] }
 0xfb6   :  { %v9086_v55 = vsel %vm1911_vm5, %v13730_v36, %v13729_v33  ;;  %v952_v20 = vadd.f32 %v13731_v8, %v879_v11  ;;  %v1186_v44 = vadd.f32 %v8561_v0, %v1093_v10  ;;  %v587_v51 = vadd.f32 %v13732_v22, %v513_v7  ;;  %v13733_v58 = vld [vmem:[#allocation74_spill] sm:$0xff]  ;;  %v13736_v0 = vld [vmem:[#allocation173_spill] sm:$0xff]  ;;  %v13744_v8 = vld [vmem:[#allocation79_spill] sm:$0xff] }
 0xfb7   :  { %v588_v30 = vadd.f32 %v13733_v58, %v514_v54  ;;  %v1095_v41 = vadd.f32 %v8502_v9, %v1022_v46  ;;  %v1659_v48 = vadd.f32 %v13628_v35, %v1560_v27  ;;  %v9097_v18 = vsel %vm1911_vm5, %v13735_v52, %v13734_v26  ;;  %v13737_v10 = vld [vmem:[#allocation258_spill] sm:$0xff]  ;;  %v13739_v54 = vld [vmem:[#allocation261_spill] sm:$0xff] }
 0xfb8   :  { %v1463_v28 = vadd.f32 %v8719_v37, %v1371_v59  ;;  %v1096_v19 = vadd.f32 %v8513_v12, %v1023_v62  ;;  %v1282_v11 = vadd.f32 %v8637_v31, %v1190_v14  ;;  %v9105_v7 = vsel %vm1911_vm5, %v13737_v10, %v13736_v0  ;;  %v9117_v37 = vpop.permute.xlu1 %2624  ;;  %v13741_v31 = vld [vmem:[#allocation263_spill] sm:$0xff]  ;;  %v13745_v58 = vld [vmem:[#allocation265_spill] sm:$0xff] }
 0xfb9   :  { %13738 = vst [vmem:[#allocation117_spill] sm:$0xff] %v9105_v7  ;;  %v9110_v9 = vsel %vm1911_vm5, %v13734_v26, %v13739_v54  ;;  %v9115_v35 = vsel %vm1911_vm5, %v13739_v54, %v13730_v36  ;;  %v1277_v12 = vadd.f32 %v8603_v47, %v1185_v40  ;;  %v9123_v46 = vsel %vm1911_vm5, %v13729_v33, %v13741_v31  ;;  %v13742_v59 = vld [vmem:[#allocation163_spill] sm:$0xff] }
 0xfba   :  { %13740 = vst [vmem:[#allocation199_spill] sm:$0xff] %v9117_v37  ;;  %v9128_v27 = vsel %vm1911_vm5, %v13741_v31, %v13737_v10  ;;  %v1025_v62 = vadd.f32 %v13742_v59, %v952_v20  ;;  %v1278_v14 = vadd.f32 %v8592_v38, %v1186_v44  ;;  %v660_v36 = vadd.f32 %v13743_v3, %v587_v51  ;;  %v13747_v38 = vld [vmem:[#allocation260_spill] sm:$0xff]  ;;  %v13748_v51 = vld [vmem:[#allocation178_spill] sm:$0xff]  ;;  %v13757_v31 = vld [vmem:[#allocation97_spill] sm:$0xff] }
 0xfbb   :  { %v661_v22 = vadd.f32 %v13744_v8, %v588_v30  ;;  %v1188_v47 = vadd.f32 %v8531_v6, %v1095_v41  ;;  %v1758_v40 = vadd.f32 %v13664_v15, %v1659_v48  ;;  %v9139_v33 = vsel %vm1911_vm5, %v13736_v0, %v13745_v58  ;;  %v13749_v6 = vld [vmem:[#allocation264_spill] sm:$0xff]  ;;  %v13750_v30 = vld [vmem:[#allocation262_spill] sm:$0xff]  ;;  %v13751_v41 = vld [vmem:[#allocation267_spill] sm:$0xff]  ;;  %v9170_v0 = vpop.permute.xlu2 %2642 }
 0xfbc   :  { %13746 = vst [vmem:[#allocation118_spill] sm:$0xff] %v9139_v33  ;;  %v1563_v26 = vadd.f32 %v8796_v50, %v1463_v28  ;;  %v1189_v10 = vadd.f32 %v8574_v39, %v1096_v19  ;;  %v1374_v20 = vadd.f32 %v8694_v29, %v1282_v11  ;;  %v9147_v44 = vsel %vm1911_vm5, %v13745_v58, %v13747_v38  ;;  %v13752_v39 = vld [vmem:[#allocation179_spill] sm:$0xff]  ;;  %v13753_v28 = vld [vmem:[#allocation266_spill] sm:$0xff]  ;;  %v13755_v19 = vld [vmem:[#allocation269_spill] sm:$0xff] }
 0xfbd   :  { %v9152_v15 = vsel %vm1911_vm5, %v13749_v6, %v13748_v51  ;;  %v9157_v48 = vsel %vm1911_vm5, %v13751_v41, %v13750_v30  ;;  %v1369_v50 = vadd.f32 %v8659_v21, %v1277_v12  ;;  %v9163_v29 = vsel %vm1911_vm5, %v13753_v28, %v13752_v39  ;;  %13756 = vst [vmem:[#allocation113_spill] sm:$0xff] %v9170_v0  ;;  %v13758_v3 = vld [vmem:[#allocation169_spill] sm:$0xff]  ;;  %v13759_v12 = vld [vmem:[#allocation43_spill] sm:$0xff]  ;;  %v13760_v38 = vld [vmem:[#allocation84_spill] sm:$0xff] }
 0xfbe   :  { %13754 = vst [vmem:[#allocation28_spill] sm:$0xff] %v9163_v29  ;;  %v9168_v11 = vsel %vm1911_vm5, %v13750_v30, %v13755_v19  ;;  %v1098_v54 = vadd.f32 %v8518_v42, %v1025_v62  ;;  %v1370_v59 = vadd.f32 %v13757_v31, %v1278_v14  ;;  %v1280_v8 = vadd.f32 %v13758_v3, %v1188_v47  ;;  %v13761_v0 = vld [vmem:[#allocation168_spill] sm:$0xff]  ;;  %v13763_v14 = vld [vmem:[#allocation271_spill] sm:$0xff]  ;;  %v13794_v33 = vld [vmem:[#allocation277_spill] sm:$0xff] }
 0xfbf   :  { %v1857_v21 = vadd.f32 %v13692_v63, %v1758_v40  ;;  %v733_v58 = vadd.f32 %v13759_v12, %v660_v36  ;;  %v734_v24 = vadd.f32 %v13760_v38, %v661_v22  ;;  %v9181_v29 = vsel %vm1911_vm5, %v13755_v19, %v13749_v6  ;;  %v13762_v42 = vld [vmem:[#allocation8_spill] sm:$0xff]  ;;  %v13764_v63 = vld [vmem:[#allocation3_spill] sm:$0xff] }
 0xfc0   :  { %v1662_v30 = vadd.f32 %v8867_v56, %v1563_v26  ;;  %v1281_v37 = vadd.f32 %v13761_v0, %v1189_v10  ;;  %v1466_v62 = vadd.f32 %v13762_v42, %v1374_v20  ;;  %v9189_v47 = vsel %vm1911_vm5, %v13748_v51, %v13763_v14  ;;  %v13765_v40 = vld [vmem:[#allocation76_spill] sm:$0xff]  ;;  %v13767_v56 = vld [vmem:[#allocation273_spill] sm:$0xff]  ;;  %v13770_v51 = vld [vmem:[#allocation175_spill] sm:$0xff]  ;;  %v9206_v0 = vpop.permute.xlu1 %2628 }
 0xfc1   :  { %v1461_v36 = vadd.f32 %v13764_v63, %v1369_v50  ;;  %v806_v22 = vadd.f32 %v13765_v40, %v733_v58  ;;  %v13766_v31 = vld [vmem:[#allocation88_spill] sm:$0xff]  ;;  %v9197_v6 = vsel %vm1911_vm5, %v13763_v14, %v13753_v28  ;;  %v9202_v26 = vsel %vm1911_vm5, %v13752_v39, %v13767_v56  ;;  %v13769_v10 = vld [vmem:[#allocation165_spill] sm:$0xff]  ;;  %13771 = vst [vmem:[#allocation127_spill] sm:$0xff] %v9206_v0  ;;  %v13773_v58 = vld [vmem:[#allocation82_spill] sm:$0xff] }
 0xfc2   :  { %v807_v3 = vadd.f32 %v13766_v31, %v734_v24  ;;  %13768 = vst [vmem:[#allocation132_spill] sm:$0xff] %v9202_v26  ;;  %v1191_v20 = vadd.f32 %v13769_v10, %v1098_v54  ;;  %v1462_v19 = vadd.f32 %v13770_v51, %v1370_v59  ;;  %v13772_v50 = vld [vmem:[#allocation93_spill] sm:$0xff]  ;;  %v1931_v24 = vadd.f32 %v13716_v1, %v1857_v21  ;;  %v13774_v42 = vld [vmem:[#allocation92_spill] sm:$0xff]  ;;  %v13782_v51 = vld [vmem:[#allocation98_spill] sm:$0xff] }
 0xfc3   :  { %v1372_v12 = vadd.f32 %v13772_v50, %v1280_v8  ;;  %v880_v38 = vadd.f32 %v13773_v58, %v806_v22  ;;  %v13775_v14 = vld [vmem:[#allocation268_spill] sm:$0xff]  ;;  %v1761_v39 = vadd.f32 %v8923_v5, %v1662_v30  ;;  %v13776_v54 = vld [vmem:[#allocation5_spill] sm:$0xff]  ;;  %v1566_v59 = vadd.f32 %v8816_v32, %v1466_v62  ;;  %v13783_v58 = vld [vmem:[#allocation270_spill] sm:$0xff]  ;;  %v9238_v30 = vpop.permute.xlu2 %2699 }
 0xfc4   :  { %v881_v28 = vadd.f32 %v13774_v42, %v807_v3  ;;  %v9215_v63 = vsel %vm1911_vm5, %v13767_v56, %v13775_v14  ;;  %v1373_v40 = vadd.f32 %v13776_v54, %v1281_v37  ;;  %v13777_v31 = vld [vmem:[#allocation184_spill] sm:$0xff]  ;;  %v13781_v22 = vld [vmem:[#allocation85_spill] sm:$0xff]  ;;  %v13784_v56 = vld [vmem:[#allocation275_spill] sm:$0xff]  ;;  %13788 = vst [vmem:[#allocation126_spill] sm:$0xff] %v9238_v30  ;;  %v9249_v7 = vsel %vm1911_vm5, %v13783_v58, %v13794_v33 }
 0xfc5   :  { %v13778_v10 = vld [vmem:[#allocation272_spill] sm:$0xff]  ;;  %v953_v3 = vadd.f32 %v13781_v22, %v880_v38  ;;  %v9231_v42 = vsel %vm1911_vm5, %v13784_v56, %v13783_v58  ;;  %v13785_v5 = vld [vmem:[#allocation185_spill] sm:$0xff]  ;;  %v13786_v37 = vld [vmem:[#allocation274_spill] sm:$0xff] }
 0xfc6   :  { %v9223_v8 = vsel %vm1911_vm5, %v13778_v10, %v13777_v31  ;;  %v13780_v1 = vld [vmem:[#allocation80_spill] sm:$0xff]  ;;  %v954_v50 = vadd.f32 %v13782_v51, %v881_v28  ;;  %v9236_v32 = vsel %vm1911_vm5, %v13786_v37, %v13785_v5  ;;  %v13789_v62 = vld [vmem:[#allocation95_spill] sm:$0xff]  ;;  %v2004_v28 = vadd.f32 %v13735_v52, %v1931_v24  ;;  %v13798_v24 = vld [vmem:[#allocation90_spill] sm:$0xff] }
 0xfc7   :  { %13779 = vst [vmem:[#allocation33_spill] sm:$0xff] %v9223_v8  ;;  %v1561_v21 = vadd.f32 %v13780_v1, %v1461_v36  ;;  %v1283_v14 = vadd.f32 %v13789_v62, %v1191_v20  ;;  %v13790_v54 = vld [vmem:[#allocation180_spill] sm:$0xff]  ;;  %v13791_v1 = vld [vmem:[#allocation6_spill] sm:$0xff]  ;;  %v13793_v0 = vld [vmem:[#allocation103_spill] sm:$0xff] }
 0xfc8   :  { %13787 = vst [vmem:[#allocation67_spill] sm:$0xff] %v9236_v32  ;;  %v1562_v36 = vadd.f32 %v13790_v54, %v1462_v19  ;;  %v1464_v38 = vadd.f32 %v13791_v1, %v1372_v12  ;;  %v13792_v22 = vld [vmem:[#allocation164_spill] sm:$0xff]  ;;  %v1027_v26 = vadd.f32 %v13793_v0, %v954_v50  ;;  %v1860_v32 = vadd.f32 %v8991_v60, %v1761_v39  ;;  %v13796_v20 = vld [vmem:[#allocation186_spill] sm:$0xff]  ;;  %v13797_v52 = vld [vmem:[#allocation11_spill] sm:$0xff] }
 0xfc9   :  { %v1026_v51 = vadd.f32 %v13792_v22, %v953_v3  ;;  %v13795_v30 = vld [vmem:[#allocation176_spill] sm:$0xff]  ;;  %v1665_v62 = vadd.f32 %v13796_v20, %v1566_v59  ;;  %v9257_v19 = vsel %vm1911_vm5, %v13794_v33, %v13778_v10  ;;  %v1660_v12 = vadd.f32 %v13797_v52, %v1561_v21  ;;  %v13799_v3 = vld [vmem:[#allocation107_spill] sm:$0xff]  ;;  %v13805_v22 = vld [vmem:[#allocation194_spill] sm:$0xff] }
 0xfca   :  { %v1465_v8 = vadd.f32 %v13795_v30, %v1373_v40  ;;  %v1100_v50 = vadd.f32 %v13799_v3, %v1027_v26  ;;  %v13800_v54 = vld [vmem:[#allocation279_spill] sm:$0xff]  ;;  %v13802_v40 = vld [vmem:[#allocation96_spill] sm:$0xff]  ;;  %v2077_v33 = vadd.f32 %v13751_v41, %v2004_v28  ;;  %v13806_v20 = vld [vmem:[#allocation181_spill] sm:$0xff]  ;;  %v9286_v41 = vpop.permute.xlu1 %2634 }
 0xfcb   :  { %v1099_v0 = vadd.f32 %v13798_v24, %v1026_v51  ;;  %v9265_v58 = vsel %vm1911_vm5, %v13777_v31, %v13800_v54  ;;  %v13801_v60 = vld [vmem:[#allocation171_spill] sm:$0xff]  ;;  %v1661_v59 = vadd.f32 %v13802_v40, %v1562_v36  ;;  %v9276_v26 = vsel %vm1911_vm5, %v13800_v54, %v13786_v37  ;;  %v13808_v36 = vld [vmem:[#allocation281_spill] sm:$0xff]  ;;  %13810 = vst [vmem:[#allocation133_spill] sm:$0xff] %v9286_v41  ;;  %v13812_v3 = vld [vmem:[#allocation170_spill] sm:$0xff] }
 0xfcc   :  { %v1375_v39 = vadd.f32 %v13801_v60, %v1283_v14  ;;  %v13803_v30 = vld [vmem:[#allocation99_spill] sm:$0xff]  ;;  %v1193_v51 = vadd.f32 %v13805_v22, %v1100_v50  ;;  %v1934_v31 = vadd.f32 %v9055_v16, %v1860_v32  ;;  %v1565_v52 = vadd.f32 %v13806_v20, %v1465_v8  ;;  %v13807_v14 = vld [vmem:[#allocation110_spill] sm:$0xff]  ;;  %v13811_v28 = vld [vmem:[#allocation109_spill] sm:$0xff]  ;;  %v9303_v22 = vpop.permute.xlu2 %2703 }
 0xfcd   :  { %v1564_v1 = vadd.f32 %v13803_v30, %v1464_v38  ;;  %v13804_v10 = vld [vmem:[#allocation91_spill] sm:$0xff]  ;;  %v1764_v24 = vadd.f32 %v13807_v14, %v1665_v62  ;;  %v9284_v38 = vsel %vm1911_vm5, %v13785_v5, %v13808_v36  ;;  %v13813_v60 = vld [vmem:[#allocation125_spill] sm:$0xff]  ;;  %v13814_v54 = vld [vmem:[#allocation276_spill] sm:$0xff]  ;;  %13819 = vst [vmem:[#allocation128_spill] sm:$0xff] %v9303_v22 }
 0xfce   :  { %v1192_v21 = vadd.f32 %v13804_v10, %v1099_v0  ;;  %13809 = vst [vmem:[#allocation200_spill] sm:$0xff] %v9284_v38  ;;  %v1759_v0 = vadd.f32 %v13811_v28, %v1660_v12  ;;  %v1285_v37 = vadd.f32 %v13813_v60, %v1193_v51  ;;  %v9294_v16 = vsel %vm1911_vm5, %v13808_v36, %v13814_v54  ;;  %v13815_v8 = vld [vmem:[#allocation190_spill] sm:$0xff]  ;;  %v13816_v32 = vld [vmem:[#allocation280_spill] sm:$0xff]  ;;  %v13820_v12 = vld [vmem:[#allocation105_spill] sm:$0xff] }
 0xfcf   :  { %v9299_v62 = vsel %vm2204_vm6, %v13816_v32, %v13815_v8  ;;  %v13817_v5 = vld [vmem:[#allocation78_spill] sm:$0xff]  ;;  %v13818_v30 = vld [vmem:[#allocation108_spill] sm:$0xff]  ;;  %v2150_v51 = vadd.f32 %v13784_v56, %v2077_v33  ;;  %v13822_v28 = vld [vmem:[#allocation205_spill] sm:$0xff]  ;;  %v2007_v41 = vadd.f32 %v9115_v35, %v1934_v31 }
 0xfd0   :  { %v1284_v50 = vadd.f32 %v13812_v3, %v1192_v21  ;;  %v1467_v40 = vadd.f32 %v13817_v5, %v1375_v39  ;;  %v1760_v10 = vadd.f32 %v13818_v30, %v1661_v59  ;;  %v1663_v21 = vadd.f32 %v13820_v12, %v1564_v1  ;;  %v13821_v20 = vld [vmem:[#allocation174_spill] sm:$0xff]  ;;  %v13824_v60 = vld [vmem:[#allocation284_spill] sm:$0xff]  ;;  %v13826_v30 = vld [vmem:[#allocation191_spill] sm:$0xff] }
 0xfd1   :  { %v1377_v36 = vadd.f32 %v13822_v28, %v1285_v37  ;;  %v13823_v3 = vld [vmem:[#allocation278_spill] sm:$0xff]  ;;  %v1863_v59 = vadd.f32 %v9002_v25, %v1764_v24  ;;  %v13829_v56 = vld [vmem:[#allocation123_spill] sm:$0xff]  ;;  %v13833_v35 = vld [vmem:[#allocation289_spill] sm:$0xff] }
 0xfd2   :  { %v1376_v14 = vadd.f32 %v13821_v20, %v1284_v50  ;;  %v9312_v54 = vsel %vm2204_vm6, %v13824_v60, %v13823_v3  ;;  %v13825_v39 = vld [vmem:[#allocation106_spill] sm:$0xff]  ;;  %v1858_v33 = vadd.f32 %v13829_v56, %v1759_v0  ;;  %v13830_v50 = vld [vmem:[#allocation101_spill] sm:$0xff]  ;;  %v13832_v28 = vld [vmem:[#allocation287_spill] sm:$0xff]  ;;  %v9336_v31 = vsel %vm2204_vm6, %v13815_v8, %v13833_v35 }
 0xfd3   :  { %v1664_v5 = vadd.f32 %v13825_v39, %v1565_v52  ;;  %v13827_v22 = vld [vmem:[#allocation282_spill] sm:$0xff]  ;;  %v9328_v38 = vsel %vm2204_vm6, %v13823_v3, %v13832_v28  ;;  %v2207_v25 = vsel %vm2204_vm6, %v13832_v28, %v13816_v32  ;;  %v1859_v52 = vadd.f32 %v8986_v13, %v1760_v10  ;;  %v13836_v56 = vld [vmem:[#allocation7_spill] sm:$0xff] }
 0xfd4   :  { %v9320_v1 = vsel %vm2204_vm6, %v13827_v22, %v13826_v30  ;;  %v1468_v37 = vadd.f32 %v13830_v50, %v1376_v14  ;;  %v13831_v12 = vld [vmem:[#allocation210_spill] sm:$0xff]  ;;  %v2224_v14 = vadd.f32 %v13824_v60, %v2150_v51  ;;  %v9346_v50 = vsel %vm2204_vm6, %v13833_v35, %v13827_v22  ;;  %v13838_v13 = vld [vmem:[#allocation291_spill] sm:$0xff]  ;;  %v13841_v60 = vld [vmem:[#allocation188_spill] sm:$0xff] }
 0xfd5   :  { %13828 = vst [vmem:[#allocation17_spill] sm:$0xff] %v9320_v1  ;;  %v1469_v20 = vadd.f32 %v13831_v12, %v1377_v36  ;;  %v13834_v24 = vld [vmem:[#allocation114_spill] sm:$0xff]  ;;  %v2080_v32 = vadd.f32 %v9181_v29, %v2007_v41  ;;  %v13837_v12 = vld [vmem:[#allocation115_spill] sm:$0xff]  ;;  %v1937_v28 = vadd.f32 %v9070_v49, %v1863_v59  ;;  %v9354_v10 = vsel %vm2204_vm6, %v13826_v30, %v13838_v13  ;;  %v13843_v29 = vld [vmem:[#allocation196_spill] sm:$0xff] }
 0xfd6   :  { %v1762_v0 = vadd.f32 %v13834_v24, %v1663_v21  ;;  %v13835_v36 = vld [vmem:[#allocation102_spill] sm:$0xff]  ;;  %v1763_v8 = vadd.f32 %v13837_v12, %v1664_v5  ;;  %13839 = vst [vmem:[#allocation54_spill] sm:$0xff] %v9354_v10  ;;  %v13842_v24 = vld [vmem:[#allocation285_spill] sm:$0xff]  ;;  %v13845_v5 = vld [vmem:[#allocation288_spill] sm:$0xff] }
 0xfd7   :  { %v1567_v39 = vadd.f32 %v13835_v36, %v1467_v40  ;;  %v1569_v3 = vadd.f32 %v13836_v56, %v1469_v20  ;;  %v1932_v40 = vadd.f32 %v9031_v17, %v1858_v33  ;;  %v13840_v21 = vld [vmem:[#allocation182_spill] sm:$0xff]  ;;  %v9362_v22 = vsel %vm2204_vm6, %v13838_v13, %v13842_v24  ;;  %v13846_v59 = vld [vmem:[#allocation293_spill] sm:$0xff]  ;;  %v9375_v33 = vpop.permute.xlu1 %2640  ;;  %v13848_v56 = vld [vmem:[#allocation104_spill] sm:$0xff] }
 0xfd8   :  { %v1568_v51 = vadd.f32 %v13840_v21, %v1468_v37  ;;  %v13844_v41 = vld [vmem:[#allocation290_spill] sm:$0xff]  ;;  %v9372_v30 = vsel %vm2204_vm6, %v13846_v59, %v13845_v5  ;;  %v1933_v17 = vadd.f32 %v9044_v43, %v1859_v52  ;;  %v13847_v37 = vld [vmem:[#allocation193_spill] sm:$0xff]  ;;  %v2297_v36 = vadd.f32 %v13846_v59, %v2224_v14  ;;  %v13849_v12 = vld [vmem:[#allocation192_spill] sm:$0xff]  ;;  %v9394_v14 = vpop.permute.xlu2 %2709 }
 0xfd9   :  { %v1668_v20 = vadd.f32 %v13841_v60, %v1569_v3  ;;  %v9367_v49 = vsel %vm2204_vm6, %v13844_v41, %v13843_v29  ;;  %v1861_v35 = vadd.f32 %v13847_v37, %v1762_v0  ;;  %v1666_v3 = vadd.f32 %v13848_v56, %v1567_v39  ;;  %v13850_v21 = vld [vmem:[#allocation197_spill] sm:$0xff]  ;;  %v13851_v60 = vld [vmem:[#allocation292_spill] sm:$0xff]  ;;  %v13852_v52 = vld [vmem:[#allocation295_spill] sm:$0xff] }
 0xfda   :  { %v9384_v24 = vsel %vm2204_vm6, %v13851_v60, %v13850_v21  ;;  %v2153_v10 = vadd.f32 %v9257_v19, %v2080_v32  ;;  %v1862_v1 = vadd.f32 %v8996_v53, %v1763_v8  ;;  %v2010_v43 = vadd.f32 %v9128_v27, %v1937_v28  ;;  %v13854_v53 = vld [vmem:[#allocation297_spill] sm:$0xff] }
 0xfdb   :  { %v1767_v13 = vadd.f32 %v13849_v12, %v1668_v20  ;;  %v9392_v0 = vsel %vm2204_vm6, %v13845_v5, %v13852_v52  ;;  %v2005_v39 = vadd.f32 %v9097_v18, %v1932_v40  ;;  %v13853_v20 = vld [vmem:[#allocation187_spill] sm:$0xff]  ;;  %v2280_v19 = vsel %vm2204_vm6, %v13852_v52, %v13844_v41  ;;  %v13855_v28 = vld [vmem:[#allocation301_spill] sm:$0xff] }
 0xfdc   :  { %v1667_v59 = vadd.f32 %v13853_v20, %v1568_v51  ;;  %v9405_v27 = vsel %vm2204_vm6, %v13843_v29, %v13854_v53  ;;  %v2283_v32 = vsel %vm2204_vm6, %v13854_v53, %v13851_v60  ;;  %v2006_v8 = vadd.f32 %v9110_v9, %v1933_v17  ;;  %v13857_v41 = vld [vmem:[#allocation299_spill] sm:$0xff]  ;;  %v13858_v60 = vld [vmem:[#allocation294_spill] sm:$0xff]  ;;  %v13865_v52 = vld [vmem:[#allocation309_spill] sm:$0xff] }
 0xfdd   :  { %v1866_v37 = vadd.f32 %v9021_v34, %v1767_v13  ;;  %v1935_v18 = vadd.f32 %v9026_v57, %v1861_v35  ;;  %v2370_v40 = vadd.f32 %v13855_v28, %v2297_v36  ;;  %v13856_v34 = vld [vmem:[#allocation10_spill] sm:$0xff]  ;;  %v9418_v56 = vsel %vm2204_vm6, %v13850_v21, %v13857_v41  ;;  %v13866_v53 = vld [vmem:[#allocation303_spill] sm:$0xff] }
 0xfde   :  { %v1765_v51 = vadd.f32 %v13856_v34, %v1666_v3  ;;  %v2227_v29 = vadd.f32 %v2207_v25, %v2153_v10  ;;  %v1936_v12 = vadd.f32 %v9065_v61, %v1862_v1  ;;  %v2083_v13 = vadd.f32 %v9197_v6, %v2010_v43  ;;  %v13859_v17 = vld [vmem:[#allocation158_spill] sm:$0xff]  ;;  %v13862_v25 = vld [vmem:[#allocation296_spill] sm:$0xff]  ;;  %v13863_v6 = vld [vmem:[#allocation203_spill] sm:$0xff] }
 0xfdf   :  { %v1940_v5 = vadd.f32 %v9081_v23, %v1866_v37  ;;  %v2286_v57 = vsel %vm2204_vm6, %v13857_v41, %v13858_v60  ;;  %v2078_v9 = vadd.f32 %v9157_v48, %v2005_v39  ;;  %v1766_v35 = vadd.f32 %v13859_v17, %v1667_v59  ;;  %v13860_v36 = vld [vmem:[#allocation202_spill] sm:$0xff]  ;;  %v13864_v1 = vld [vmem:[#allocation300_spill] sm:$0xff]  ;;  %v9443_v48 = vpop.permute.xlu0 %2705  ;;  %v9448_v20 = vpop.permute.xlu1 %2697 }
 0xfe0   :  { %v13861_v3 = vld [vmem:[#allocation298_spill] sm:$0xff]  ;;  %v9436_v61 = vsel %vm2204_vm6, %v13855_v28, %v13862_v25  ;;  %v9441_v10 = vsel %vm2204_vm6, %v13864_v1, %v13863_v6  ;;  %v2079_v43 = vadd.f32 %v9168_v11, %v2006_v8  ;;  %v2443_v39 = vadd.f32 %v13865_v52, %v2370_v40  ;;  %v9483_v41 = vpop.permute.xlu2 %2715 }
 0xfe1   :  { %v2013_v23 = vadd.f32 %v9147_v44, %v1940_v5  ;;  %v9431_v21 = vsel %vm2204_vm6, %v13861_v3, %v13860_v36  ;;  %v2008_v44 = vadd.f32 %v9086_v55, %v1935_v18  ;;  %v1864_v59 = vadd.f32 %v8978_v2, %v1765_v51  ;;  %v13867_v18 = vld [vmem:[#allocation305_spill] sm:$0xff]  ;;  %v13869_v51 = vld [vmem:[#allocation302_spill] sm:$0xff] }
 0xfe2   :  { %v9455_v28 = vsel %vm2204_vm6, %v13862_v25, %v13866_v53  ;;  %v2300_v34 = vadd.f32 %v2280_v19, %v2227_v29  ;;  %v2009_v5 = vadd.f32 %v9123_v46, %v1936_v12  ;;  %v2156_v11 = vadd.f32 %v9276_v26, %v2083_v13  ;;  %v13868_v26 = vld [vmem:[#allocation307_spill] sm:$0xff]  ;;  %v13870_v29 = vld [vmem:[#allocation72_spill] sm:$0xff] }
 0xfe3   :  { %v2086_v37 = vadd.f32 %v9215_v63, %v2013_v23  ;;  %v2353_v55 = vsel %vm2204_vm6, %v13866_v53, %v13861_v3  ;;  %v2151_v8 = vadd.f32 %v9231_v42, %v2078_v9  ;;  %v1865_v2 = vadd.f32 %v9013_v45, %v1766_v35  ;;  %v13871_v13 = vld [vmem:[#allocation124_spill] sm:$0xff] }
 0xfe4   :  { %v9468_v40 = vsel %vm2204_vm6, %v13860_v36, %v13867_v18  ;;  %v2356_v46 = vsel %vm2204_vm6, %v13867_v18, %v13864_v1  ;;  %v9476_v19 = vsel %vm2204_vm6, %v13863_v6, %v13868_v26  ;;  %v2152_v42 = vadd.f32 %v9249_v7, %v2079_v43  ;;  %v13872_v7 = vld [vmem:[#allocation223_spill] sm:$0xff]  ;;  %v13873_v36 = vld [vmem:[#allocation306_spill] sm:$0xff]  ;;  %v13874_v25 = vld [vmem:[#allocation304_spill] sm:$0xff] }
 0xfe5   :  { %v2159_v63 = vadd.f32 %v9294_v16, %v2086_v37  ;;  %v2359_v45 = vsel %vm2204_vm6, %v13868_v26, %v13869_v51  ;;  %v2081_v16 = vadd.f32 %v9152_v15, %v2008_v44  ;;  %v2517_v12 = vadd.f32 %v13870_v29, %v2443_v39  ;;  %v13875_v43 = vld [vmem:[#allocation226_spill] sm:$0xff]  ;;  %v13876_v44 = vld [vmem:[#allocation308_spill] sm:$0xff]  ;;  %v13881_v18 = vld [vmem:[#allocation19_spill] sm:$0xff] }
 0xfe6   :  { %v1938_v60 = vadd.f32 %v13871_v13, %v1864_v59  ;;  %v2373_v9 = vadd.f32 %v2353_v55, %v2300_v34  ;;  %v2082_v17 = vadd.f32 %v9189_v47, %v2009_v5  ;;  %v2230_v35 = vadd.f32 %v9346_v50, %v2156_v11  ;;  %v13877_v50 = vld [vmem:[#allocation311_spill] sm:$0xff]  ;;  %v13879_v37 = vld [vmem:[#allocation4_spill] sm:$0xff]  ;;  %v13880_v34 = vld [vmem:[#allocation117_spill] sm:$0xff] }
 0xfe7   :  { %v2233_v23 = vadd.f32 %v9362_v22, %v2159_v63  ;;  %v9493_v3 = vsel %vm2204_vm6, %v13873_v36, %v13872_v7  ;;  %v2424_v15 = vsel %vm2204_vm6, %v13865_v52, %v13874_v25  ;;  %v2225_v6 = vadd.f32 %v9312_v54, %v2151_v8  ;;  %v9511_v59 = vpop.permute.xlu0 %2711  ;;  %v13878_v54 = vld [vmem:[#allocation33_spill] sm:$0xff]  ;;  %v9517_v55 = vpop.permute.xlu1 %2701  ;;  %v13882_v51 = vld [vmem:[#allocation118_spill] sm:$0xff] }
 0xfe8   :  { %v1939_v1 = vadd.f32 %v9075_v4, %v1865_v2  ;;  %v9503_v47 = vsel %vm2204_vm6, %v13876_v44, %v13875_v43  ;;  %v2425_v22 = vsel %vm2204_vm6, %v13874_v25, %v13877_v50  ;;  %v2426_v39 = vsel %vm2204_vm6, %v13877_v50, %v13873_v36  ;;  %v13889_v25 = vld [vmem:[#allocation28_spill] sm:$0xff] }
 0xfe9   :  { %v2226_v52 = vadd.f32 %v9328_v38, %v2152_v42  ;;  %v2154_v4 = vadd.f32 %v13878_v54, %v2081_v16  ;;  %v2590_v53 = vadd.f32 %v13879_v37, %v2517_v12  ;;  %v2011_v5 = vadd.f32 %v13880_v34, %v1938_v60  ;;  %v13883_v12 = vld [vmem:[#allocation57_spill] sm:$0xff]  ;;  %v13886_v60 = vld [vmem:[#allocation22_spill] sm:$0xff]  ;;  %v13890_v54 = vld [vmem:[#allocation312_spill] sm:$0xff] }
 0xfea   :  { %v2446_v11 = vadd.f32 %v2426_v39, %v2373_v9  ;;  %v2155_v8 = vadd.f32 %v9265_v58, %v2082_v17  ;;  %v2303_v2 = vadd.f32 %v2283_v32, %v2230_v35  ;;  %v2306_v63 = vadd.f32 %v2286_v57, %v2233_v23  ;;  %v13884_v58 = vld [vmem:[#allocation310_spill] sm:$0xff]  ;;  %v13885_v57 = vld [vmem:[#allocation253_spill] sm:$0xff] }
 0xfeb   :  { %v9523_v26 = vsel %vm2204_vm6, %v13872_v7, %v13881_v18  ;;  %v2429_v38 = vsel %vm2204_vm6, %v13881_v18, %v13876_v44  ;;  %v2298_v42 = vadd.f32 %v9372_v30, %v2225_v6  ;;  %v2012_v16 = vadd.f32 %v13882_v51, %v1939_v1  ;;  %v13887_v30 = vld [vmem:[#allocation162_spill] sm:$0xff]  ;;  %v13888_v7 = vld [vmem:[#allocation199_spill] sm:$0xff]  ;;  %v9550_v1 = vpop.permute.xlu2 %2761 }
 0xfec   :  { %v9533_v13 = vsel %vm2204_vm6, %v13875_v43, %v13883_v12  ;;  %v2432_v32 = vsel %vm2204_vm6, %v13883_v12, %v13884_v58  ;;  %v9541_v9 = vsel %vm2497_vm7, %v13886_v60, %v13885_v57  ;;  %v2299_v17 = vadd.f32 %v9392_v0, %v2226_v52 }
 0xfed   :  { %v2500_v35 = vsel %vm2497_vm7, %v13887_v30, %v13886_v60  ;;  %v2228_v23 = vadd.f32 %v9299_v62, %v2154_v4  ;;  %v2663_v36 = vadd.f32 %v13888_v7, %v2590_v53  ;;  %v2084_v6 = vadd.f32 %v13889_v25, %v2011_v5  ;;  %v13891_v62 = vld [vmem:[#allocation132_spill] sm:$0xff]  ;;  %v13893_v5 = vld [vmem:[#allocation121_spill] sm:$0xff]  ;;  %v13901_v25 = vld [vmem:[#allocation62_spill] sm:$0xff] }
 0xfee   :  { %v2520_v43 = vadd.f32 %v2500_v35, %v2446_v11  ;;  %v2229_v44 = vadd.f32 %v9336_v31, %v2155_v8  ;;  %v2376_v50 = vadd.f32 %v2356_v46, %v2303_v2  ;;  %v2379_v39 = vadd.f32 %v2359_v45, %v2306_v63  ;;  %v13892_v53 = vld [vmem:[#allocation256_spill] sm:$0xff]  ;;  %v13894_v46 = vld [vmem:[#allocation89_spill] sm:$0xff]  ;;  %v13897_v8 = vld [vmem:[#allocation94_spill] sm:$0xff] }
 0xfef   :  { %v2498_v0 = vsel %vm2497_vm7, %v13870_v29, %v13890_v54  ;;  %v2371_v52 = vadd.f32 %v9436_v61, %v2298_v42  ;;  %v9558_v34 = vadd.f32 %v9448_v20, %v2663_v36  ;;  %v2085_v4 = vadd.f32 %v13891_v62, %v2012_v16  ;;  %v9573_v29 = vpop.permute.xlu0 %2757  ;;  %v13896_v11 = vld [vmem:[#allocation52_spill] sm:$0xff]  ;;  %v13898_v42 = vld [vmem:[#allocation67_spill] sm:$0xff] }
 0xff0   :  { %v9564_v18 = vsel %vm2497_vm7, %v13893_v5, %v13892_v53  ;;  %v2499_v31 = vsel %vm2497_vm7, %v13890_v54, %v13887_v30  ;;  %v2502_v45 = vsel %vm2497_vm7, %v13885_v57, %v13894_v46  ;;  %v2372_v61 = vadd.f32 %v9455_v28, %v2299_v17  ;;  %13895 = vst [vmem:[#allocation201_spill] sm:$0xff] %v9573_v29  ;;  %v9583_v57 = vpop.permute.xlu1 %2707  ;;  %v13899_v36 = vld [vmem:[#allocation200_spill] sm:$0xff]  ;;  %v13902_v54 = vld [vmem:[#allocation195_spill] sm:$0xff] }
 0xff1   :  { %v2573_v2 = vsel %vm2497_vm7, %v13897_v8, %v13896_v11  ;;  %v2301_v63 = vadd.f32 %v9367_v49, %v2228_v23  ;;  %v2157_v51 = vadd.f32 %v13898_v42, %v2084_v6  ;;  %v2793_v16 = vmul.f32 %v9573_v29, %v9558_v34  ;;  %v13900_v23 = vld [vmem:[#allocation152_spill] sm:$0xff] }
 0xff2   :  { %v2593_v12 = vadd.f32 %v2573_v2, %v2520_v43  ;;  %v2302_v58 = vadd.f32 %v9405_v27, %v2229_v44  ;;  %v2449_v60 = vadd.f32 %v2429_v38, %v2376_v50  ;;  %v2452_v28 = vadd.f32 %v2432_v32, %v2379_v39  ;;  %v13903_v43 = vld [vmem:[#allocation127_spill] sm:$0xff]  ;;  %v13904_v44 = vld [vmem:[#allocation17_spill] sm:$0xff]  ;;  %v13905_v39 = vld [vmem:[#allocation128_spill] sm:$0xff] }
 0xff3   :  { %v2503_v17 = vsel %vm2497_vm7, %v13894_v46, %v13893_v5  ;;  %v2444_v30 = vadd.f32 %v2424_v15, %v2371_v52  ;;  %v2803_v35 = vmul.f32 %v2793_v16, %v2793_v16  ;;  %v2158_v49 = vadd.f32 %v13899_v36, %v2085_v4  ;;  %v13906_v2 = vld [vmem:[#allocation51_spill] sm:$0xff]  ;;  %v13909_v36 = vld [vmem:[#allocation189_spill] sm:$0xff] }
 0xff4   :  { %v2506_v6 = vsel %vm2497_vm7, %v13901_v25, %v13900_v23  ;;  %v2646_v27 = vsel %vm2497_vm7, %v13903_v43, %v13902_v54  ;;  %v2445_v38 = vadd.f32 %v2425_v22, %v2372_v61  ;;  %v2374_v32 = vadd.f32 %v9431_v21, %v2301_v63  ;;  %v9604_v61 = vpop.permute.xlu2 %2767  ;;  %v13907_v63 = vld [vmem:[#allocation54_spill] sm:$0xff] }
 0xff5   :  { %v2231_v50 = vadd.f32 %v13904_v44, %v2157_v51  ;;  %v2719_v15 = vsel %vm2497_vm7, %v9517_v55, %v13905_v39  ;;  %v2823_v52 = vrot.slane %v2803_v35, 4  ;;  %v2666_v62 = vadd.f32 %v2646_v27, %v2593_v12  ;;  %v13908_v12 = vld [vmem:[#allocation64_spill] sm:$0xff] }
 0xff6   :  { %v2375_v4 = vadd.f32 %v9468_v40, %v2302_v58  ;;  %v2523_v5 = vadd.f32 %v2503_v17, %v2449_v60  ;;  %v2526_v46 = vadd.f32 %v2506_v6, %v2452_v28  ;;  %v2571_v42 = vsel %vm2497_vm7, %v13879_v37, %v13906_v2  ;;  %v13910_v37 = vld [vmem:[#allocation177_spill] sm:$0xff] }
 0xff7   :  { %v2518_v22 = vadd.f32 %v2498_v0, %v2444_v30  ;;  %v2844_v21 = vsel %vm2843_vm8, %v2793_v16, %v2823_v52  ;;  %v2232_v51 = vadd.f32 %v13907_v63, %v2158_v49  ;;  %v2572_v35 = vsel %vm2497_vm7, %v13906_v2, %v13897_v8  ;;  %v9616_v28 = vpop.permute.xlu0 %2763  ;;  %v13911_v0 = vld [vmem:[#allocation116_spill] sm:$0xff]  ;;  %v13916_v52 = vld [vmem:[#allocation113_spill] sm:$0xff] }
 0xff8   :  { %v2576_v40 = vsel %vm2497_vm7, %v13909_v36, %v13908_v12  ;;  %v2519_v58 = vadd.f32 %v2499_v31, %v2445_v38  ;;  %v9614_v60 = vadd.f32 %v2719_v15, %v2666_v62  ;;  %2864 = vrot.lane.b32.xlu0 %v2844_v21, %s6270_s1  ;;  %v2579_v16 = vsel %vm2497_vm7, %v13911_v0, %v13910_v37  ;;  %v9632_v27 = vpop.permute.xlu1 %2713  ;;  %v13913_v38 = vld [vmem:[#allocation183_spill] sm:$0xff] }
 0xff9   :  { %v2447_v17 = vadd.f32 %v9493_v3, %v2374_v32  ;;  %v2304_v8 = vadd.f32 %v9384_v24, %v2231_v50  ;;  %v9627_v30 = vsel %vm1165_vm3, %v9550_v1, %v9616_v28  ;;  %v2448_v31 = vadd.f32 %v9523_v26, %v2375_v4  ;;  %v13914_v50 = vld [vmem:[#allocation198_spill] sm:$0xff]  ;;  %v13915_v26 = vld [vmem:[#allocation133_spill] sm:$0xff] }
 0xffa   :  { %13912 = vst [vmem:[#allocation24_spill] sm:$0xff] %v9627_v30  ;;  %v2596_v49 = vadd.f32 %v2576_v40, %v2523_v5  ;;  %v2796_v23 = vmul.f32 %v9627_v30, %v9614_v60  ;;  %v2599_v6 = vadd.f32 %v2579_v16, %v2526_v46  ;;  %v2644_v3 = vsel %vm2497_vm7, %v13888_v7, %v13913_v38  ;;  %v13918_v16 = vld [vmem:[#allocation283_spill] sm:$0xff] }
 0xffb   :  { %v2645_v24 = vsel %vm2497_vm7, %v13913_v38, %v13903_v43  ;;  %v2591_v32 = vadd.f32 %v2571_v42, %v2518_v22  ;;  %v2305_v44 = vadd.f32 %v9418_v56, %v2232_v51  ;;  %v2649_v15 = vsel %vm2497_vm7, %v13915_v26, %v13914_v50  ;;  %v13917_v51 = vld [vmem:[#allocation126_spill] sm:$0xff] }
 0xffc   :  { %v2652_v62 = vsel %vm2497_vm7, %v9375_v33, %v13916_v52  ;;  %v2592_v4 = vadd.f32 %v2572_v35, %v2519_v58  ;;  %v2806_v5 = vmul.f32 %v2796_v23, %v2796_v23  ;;  %v2521_v46 = vadd.f32 %v9541_v9, %v2447_v17  ;;  %v13923_v52 = vld [vmem:[#allocation15_spill] sm:$0xff] }
 0xffd   :  { %v2377_v7 = vadd.f32 %v9441_v10, %v2304_v8  ;;  %v2722_v43 = vsel %vm2497_vm7, %v9583_v57, %v9394_v14  ;;  %v2725_v56 = vsel %vm2497_vm7, %v9632_v27, %v9483_v41  ;;  %v2522_v2 = vadd.f32 %v2502_v45, %v2448_v31 }
 0xffe   :  { %v2669_v42 = vadd.f32 %v2649_v15, %v2596_v49  ;;  %v2672_v22 = vadd.f32 %v2652_v62, %v2599_v6  ;;  %v2826_v21 = vrot.slane %v2806_v5, 4  ;;  %v2664_v63 = vadd.f32 %v2644_v3, %v2591_v32 }
 0xfff   :  { %v2717_v35 = vsel %vm2497_vm7, %v9448_v20, %v13917_v51  ;;  %v2718_v10 = vsel %vm2497_vm7, %v13917_v51, %v9517_v55  ;;  %v2378_v9 = vadd.f32 %v9476_v19, %v2305_v44  ;;  %v2665_v40 = vadd.f32 %v2645_v24, %v2592_v4  ;;  %v9666_v41 = vpop.permute.xlu0 %2769  ;;  %v9676_v19 = vpop.permute.xlu2 %2773 }
0x1000   :  { %v9662_v58 = vadd.f32 %v2722_v43, %v2669_v42  ;;  %v9664_v37 = vadd.f32 %v2725_v56, %v2672_v22  ;;  %v2847_v45 = vsel %vm2843_vm8, %v2796_v23, %v2826_v21  ;;  %v2574_v17 = vsel %vm2497_vm7, %v13896_v11, %v13918_v16  ;;  %13919 = vst [vmem:[#allocation140_spill] sm:$0xff] %v9676_v19 }
0x1001   :  { %v2575_v20 = vsel %vm2497_vm7, %v13918_v16, %v13909_v36  ;;  %v2450_v55 = vadd.f32 %v9503_v47, %v2377_v7  ;;  %v9681_v8 = vsel %vm1165_vm3, %v9604_v61, %v9666_v41  ;;  %2870 = vrot.lane.b32.xlu0 %v2847_v45, %s6270_s1  ;;  %v2594_v31 = vadd.f32 %v2574_v17, %v2521_v46  ;;  %v2760_v36 = vpop.permute.xlu1 %2759  ;;  %v13927_v17 = vld [vmem:[#allocation29_spill] sm:$0xff] }
0x1002   :  { %13920 = vst [vmem:[#allocation204_spill] sm:$0xff] %v9681_v8  ;;  %v9684_v49 = vadd.f32 %v2717_v35, %v2664_v63  ;;  %v9686_v23 = vadd.f32 %v2718_v10, %v2665_v40  ;;  %v2799_v11 = vmul.f32 %v9681_v8, %v9662_v58  ;;  %v2595_v6 = vadd.f32 %v2575_v20, %v2522_v2 }
0x1003   :  { %v2451_v47 = vadd.f32 %v9533_v13, %v2378_v9  ;;  %v9693_v38 = vsel %vm1165_vm3, %v9573_v29, %v2760_v36  ;;  %v9697_v3 = vsel %vm1165_vm3, %v2760_v36, %v9550_v1  ;;  %v2802_v15 = vmul.f32 %v9676_v19, %v9664_v37 }
0x1004   :  { %13921 = vst [vmem:[#allocation25_spill] sm:$0xff] %v9693_v38  ;;  %v2809_v24 = vmul.f32 %v2799_v11, %v2799_v11  ;;  %v2794_v32 = vmul.f32 %v9693_v38, %v9684_v49  ;;  %v2795_v44 = vmul.f32 %v9697_v3, %v9686_v23  ;;  %v2505_v13 = vsel %vm2497_vm7, %v13892_v53, %v13901_v25 }
0x1005   :  { %13922 = vst [vmem:[#allocation53_spill] sm:$0xff] %v9697_v3  ;;  %v2647_v62 = vsel %vm2497_vm7, %v13902_v54, %v13923_v52  ;;  %v2648_v1 = vsel %vm2497_vm7, %v13923_v52, %v13915_v26  ;;  %v2524_v4 = vadd.f32 %v9564_v18, %v2450_v55  ;;  %v2720_v56 = vsel %vm2497_vm7, %v13905_v39, %v9443_v48  ;;  %v13924_v18 = vld [vmem:[#allocation286_spill] sm:$0xff] }
0x1006   :  { %v2667_v5 = vadd.f32 %v2647_v62, %v2594_v31  ;;  %v2804_v46 = vmul.f32 %v2794_v32, %v2794_v32  ;;  %v2805_v7 = vmul.f32 %v2795_v44, %v2795_v44  ;;  %v2829_v43 = vrot.slane %v2809_v24, 4 }
0x1007   :  { %v2668_v2 = vadd.f32 %v2648_v1, %v2595_v6  ;;  %v2721_v53 = vsel %vm2497_vm7, %v9443_v48, %v9583_v57  ;;  %v2525_v25 = vadd.f32 %v2505_v13, %v2451_v47  ;;  %v2812_v22 = vmul.f32 %v2802_v15, %v2802_v15 }
0x1008   :  { %v2850_v54 = vsel %vm2843_vm8, %v2799_v11, %v2829_v43  ;;  %v2825_v42 = vrot.slane %v2805_v7, 4  ;;  %v2824_v26 = vrot.slane %v2804_v46, 4  ;;  %v2577_v21 = vsel %vm2497_vm7, %v13908_v12, %v13924_v18 }
0x1009   :  { %v2578_v63 = vsel %vm2497_vm7, %v13924_v18, %v13911_v0  ;;  %2876 = vrot.lane.b32.xlu0 %v2850_v54, %s6270_s1  ;;  %v9729_v39 = vadd.f32 %v2720_v56, %v2667_v5  ;;  %v9731_v51 = vadd.f32 %v2721_v53, %v2668_v2  ;;  %v2766_v48 = vpop.permute.xlu1 %2765  ;;  %v2597_v10 = vadd.f32 %v2577_v21, %v2524_v4 }
0x100a   :  { %v2846_v57 = vsel %vm2843_vm8, %v2795_v44, %v2825_v42  ;;  %v2845_v35 = vsel %vm2843_vm8, %v2794_v32, %v2824_v26  ;;  %v9737_v9 = vsel %vm1165_vm3, %v9616_v28, %v2766_v48  ;;  %v9741_v12 = vsel %vm1165_vm3, %v2766_v48, %v9604_v61 }
0x100b   :  { %13925 = vst [vmem:[#allocation63_spill] sm:$0xff] %v9737_v9  ;;  %2868 = vrot.lane.b32.xlu2 %v2846_v57, %s6270_s1  ;;  %2866 = vrot.lane.b32.xlu1 %v2845_v35, %s6270_s1  ;;  %v2598_v0 = vadd.f32 %v2578_v63, %v2525_v25  ;;  %v2797_v40 = vmul.f32 %v9737_v9, %v9729_v39  ;;  %v2832_v16 = vrot.slane %v2812_v22, 4 }
0x100c   :  { %13926 = vst [vmem:[#allocation34_spill] sm:$0xff] %v9741_v12  ;;  %v2798_v45 = vmul.f32 %v9741_v12, %v9731_v51  ;;  %v2650_v28 = vsel %vm2497_vm7, %v13914_v50, %v13927_v17  ;;  %v2651_v61 = vsel %vm2497_vm7, %v13927_v17, %v9375_v33  ;;  %v2723_v11 = vsel %vm2497_vm7, %v9394_v14, %v9511_v59 }
0x100d   :  { %v2807_v20 = vmul.f32 %v2797_v40, %v2797_v40  ;;  %v2670_v31 = vadd.f32 %v2650_v28, %v2597_v10  ;;  %v2724_v36 = vsel %vm2497_vm7, %v9511_v59, %v9632_v27  ;;  %v2671_v6 = vadd.f32 %v2651_v61, %v2598_v0 }
0x100e   :  { %v2808_v55 = vmul.f32 %v2798_v45, %v2798_v45  ;;  %v2853_v47 = vsel %vm2843_vm8, %v2802_v15, %v2832_v16 }
0x100f   :  { %v2827_v50 = vrot.slane %v2807_v20, 4  ;;  %v9763_v32 = vadd.f32 %v2723_v11, %v2670_v31  ;;  %v9765_v44 = vadd.f32 %v2724_v36, %v2671_v6 }
0x1010   :  { %v2828_v24 = vrot.slane %v2808_v55, 4 }
0x1011   :  { %2882 = vrot.lane.b32.xlu0 %v2853_v47, %s6270_s1  ;;  %v2772_v33 = vpop.permute.xlu1 %2771  ;;  %v2848_v14 = vsel %vm2843_vm8, %v2797_v40, %v2827_v50 }
0x1012   :  { %v2849_v13 = vsel %vm2843_vm8, %v2798_v45, %v2828_v24  ;;  %v9771_v52 = vsel %vm1165_vm3, %v9666_v41, %v2772_v33  ;;  %v9775_v59 = vsel %vm1165_vm3, %v2772_v33, %v9676_v19 }
0x1013   :  { %13928 = vst [vmem:[#allocation207_spill] sm:$0xff] %v9771_v52  ;;  %2874 = vrot.lane.b32.xlu2 %v2849_v13, %s6270_s1  ;;  %2872 = vrot.lane.b32.xlu1 %v2848_v14, %s6270_s1  ;;  %v2800_v27 = vmul.f32 %v9771_v52, %v9763_v32  ;;  %v2801_v15 = vmul.f32 %v9775_v59, %v9765_v44 }
0x1014   :  { %13929 = vst [vmem:[#allocation134_spill] sm:$0xff] %v9775_v59 }
0x1015   :  { %v2810_v62 = vmul.f32 %v2800_v27, %v2800_v27  ;;  %v2811_v1 = vmul.f32 %v2801_v15, %v2801_v15 }
0x1017   :  { %v2831_v4 = vrot.slane %v2811_v1, 4  ;;  %v2830_v5 = vrot.slane %v2810_v62, 4  ;;  %v2919_v1 = vld [vmem:[%s12315_s3] sm:$0xf] }
0x1019   :  { %v2852_v41 = vsel %vm2843_vm8, %v2801_v15, %v2831_v4  ;;  %v2851_v46 = vsel %vm2843_vm8, %v2800_v27, %v2830_v5 }
0x101b   :  { %2880 = vrot.lane.b32.xlu2 %v2852_v41, %s6270_s1  ;;  %2878 = vrot.lane.b32.xlu1 %v2851_v46, %s6270_s1  ;;  %v2935_v46 = vld [vmem:[%s12316_s4] sm:$0xf] }
0x1065   :  { %v2869_v43 = vpop.permute.xlu2 %2868 }
0x106a   :  { %v2865_v7 = vpop.permute.xlu0 %2864 }
0x106d   :  { %v2875_v42 = vpop.permute.xlu2 %2874 }
0x1073   :  { %v2871_v56 = vpop.permute.xlu0 %2870 }
0x1074   :  { %v2887_v26 = vsel %vm2884_vm9, %v2869_v43, %v2871_v56 }
0x1075   :  { %v2881_v16 = vpop.permute.xlu2 %2880 }
0x107b   :  { %v2877_v22 = vpop.permute.xlu0 %2876 }
0x107c   :  { %v2890_v10 = vsel %vm2884_vm9, %v2875_v42, %v2877_v22 }
0x107d   :  { %v2867_v2 = vpop.permute.xlu1 %2866 }
0x107e   :  { %v2885_v53 = vsel %vm2884_vm9, %v2865_v7, %v2867_v2  ;;  %v2886_v25 = vsel %vm2884_vm9, %v2867_v2, %v2869_v43  ;;  %v9806_v2 = vld [vmem:[%s12317_s5] sm:$0xf] }
0x107f   :  { %v2903_v54 = vadd.f32 %v2886_v25, %v2885_v53 }
0x1081   :  { %v2904_v18 = vadd.f32 %v2903_v54, %v2887_v26 }
0x1083   :  { %v2883_v17 = vpop.permute.xlu0 %2882 }
0x1084   :  { %v2893_v61 = vsel %vm2884_vm9, %v2881_v16, %v2883_v17 }
0x1085   :  { %v2873_v21 = vpop.permute.xlu1 %2872 }
0x1086   :  { %v2888_v63 = vsel %vm2884_vm9, %v2871_v56, %v2873_v21  ;;  %v2889_v57 = vsel %vm2884_vm9, %v2873_v21, %v2875_v42  ;;  %v13930_v56 = vmov 1  }
0x1087   :  { %v2905_v48 = vadd.f32 %v2904_v18, %v2888_v63 }
0x1089   :  { %v2906_v35 = vadd.f32 %v2905_v48, %v2889_v57 }
0x108b   :  { %v2907_v0 = vadd.f32 %v2906_v35, %v2890_v10 }
0x108d   :  { %v2879_v40 = vpop.permute.xlu1 %2878 }
0x108e   :  { %v2891_v45 = vsel %vm2884_vm9, %v2877_v22, %v2879_v40  ;;  %v2892_v20 = vsel %vm2884_vm9, %v2879_v40, %v2881_v16 }
0x108f   :  { %v2908_v28 = vadd.f32 %v2907_v0, %v2891_v45 }
0x1091   :  { %v2909_v55 = vadd.f32 %v2908_v28, %v2892_v20 }
0x1093   :  { %v2910_v31 = vadd.f32 %v2909_v55, %v2893_v61 }
0x1095   :  { %2911 = vadd.xlane.f32.xlu1 %v2910_v31 }
0x10ae   :  { %3190 = vperm.xlu1 %6173, %v9806_v2  }
0x1108   :  { %v2912_v11 = vpop.xlane.xlu1 %2911 }
0x1109   :  { %v2913_v36 = vmul.f32 0.001953125, %v2912_v11 }
0x110b   :  { %v2914_v6 = vmul.f32 %v2913_v36, %v2913_v36 }
0x110d   :  { %v2916_v47 = vrot.slane %v2914_v6, 4 }
0x110f   :  { %v2918_v24 = vsub.f32 %v2913_v36, %v2916_v47 }
0x1111   :  { %v2920_v50 = vadd.f32 1e-05, %v2918_v24 }
0x1113   :  { %6218 = vrsqrt.f32 %v2920_v50  ;;  %vm2927_vm11 = vweird.f32 %v2920_v50 }
0x1119   :  { %v6219_v33 = vpop.eup %6218 }
0x111a   :  { %v2922_v13 = vmul.f32 %v6219_v33, %v2920_v50  ;;  %vm2928_vm10 = vweird.f32 %v6219_v33 }
0x111b   :  { %vm2929_vm12 = vmor %vm2927_vm11, %vm2928_vm10 }
0x111c   :  { %v2923_v14 = vmul.f32 %v6219_v33, %v2922_v13 }
0x111e   :  { %v2924_v27 = vmul.f32 0.5, %v2923_v14 }
0x1120   :  { %v2925_v15 = vsub.f32 1.5, %v2924_v27 }
0x1122   :  { %v2926_v62 = vmul.f32 %v6219_v33, %v2925_v15 }
0x1124   :  { %v2930_v4 = vsel %vm2929_vm12, %v6219_v33, %v2926_v62 }
0x1125   :  { %v2932_v5 = vrot.slane %v2930_v4, 4 }
0x1127   :  { %v2934_v41 = vmul.f32 %v2932_v5, %v2919_v1 }
0x1129   :  { %v2936_v7 = vmul.f32 %v2934_v41, %v2913_v36  ;;  %2940 = vperm.xlu2 %6170, %v2934_v41  }
0x112b   :  { %v2937_v43 = vsub.f32 %v2935_v46, %v2936_v7 }
0x112d   :  { %2955 = vperm.xlu0 %6169, %v2937_v43  }
0x1135   :  { %6171 = vset.pattern.permute.xlu0 %v13930_v56 }
0x1183   :  { %v2941_v53 = vpop.permute.xlu2 %2940 }
0x1184   :  { %v2947_v25 = vmul.f32 %v2941_v53, %v9729_v39  ;;  %v2948_v54 = vmul.f32 %v2941_v53, %v9731_v51  ;;  %v2943_v42 = vmul.f32 %v2941_v53, %v9558_v34  ;;  %v2944_v26 = vmul.f32 %v2941_v53, %v9684_v49 }
0x1185   :  { %v2952_v18 = vmul.f32 %v2941_v53, %v9664_v37  ;;  %v2946_v21 = vmul.f32 %v2941_v53, %v9614_v60  ;;  %v13931_v51 = vmov 5   ;;  %v2951_v34 = vmul.f32 %v2941_v53, %v9765_v44 }
0x1186   :  { %6175 = vset.pattern.permute.xlu1 %v13931_v51  ;;  %v2945_v17 = vmul.f32 %v2941_v53, %v9686_v23  ;;  %v2950_v61 = vmul.f32 %v2941_v53, %v9763_v32  ;;  %v2949_v27 = vmul.f32 %v2941_v53, %v9662_v58  ;;  %v13932_v53 = vmov 7  }
0x119f   :  { %v2956_v22 = vpop.permute.xlu0 %2955 }
0x11a0   :  { %v2962_v63 = vadd.f32 %v2956_v22, %v2947_v25  ;;  %v2963_v48 = vadd.f32 %v2956_v22, %v2948_v54  ;;  %v2958_v57 = vadd.f32 %v2956_v22, %v2943_v42  ;;  %v2959_v35 = vadd.f32 %v2956_v22, %v2944_v26 }
0x11a1   :  { %v2967_v10 = vadd.f32 %v2956_v22, %v2952_v18  ;;  %v2961_v0 = vadd.f32 %v2956_v22, %v2946_v21  ;;  %v2966_v20 = vadd.f32 %v2956_v22, %v2951_v34  ;;  %v2960_v55 = vadd.f32 %v2956_v22, %v2945_v17 }
0x11a2   :  { %v2972_v40 = vmax.f32 %v2962_v63, 0.0  ;;  %v2973_v45 = vmax.f32 %v2963_v48, 0.0  ;;  %v2968_v39 = vmax.f32 %v2958_v57, 0.0  ;;  %v2969_v16 = vmax.f32 %v2959_v35, 0.0 }
0x11a3   :  { %v2977_v49 = vmax.f32 %v2967_v10, 0.0  ;;  %v2971_v28 = vmax.f32 %v2961_v0, 0.0  ;;  %v2965_v50 = vadd.f32 %v2956_v22, %v2950_v61  ;;  %v2976_v32 = vmax.f32 %v2966_v20, 0.0 }
0x11a4   :  { %v2985_v37 = vmul.f32 %v2973_v45, %v9741_v12  ;;  %v2981_v60 = vmul.f32 %v2969_v16, %v9693_v38  ;;  %v2984_v31 = vmul.f32 %v2972_v40, %v9737_v9  ;;  %v2980_v36 = vmul.f32 %v2968_v39, %v9573_v29 }
0x11a5   :  { %v2989_v44 = vmul.f32 %v2977_v49, %v9676_v19  ;;  %v2983_v24 = vmul.f32 %v2971_v28, %v9627_v30  ;;  %v2970_v33 = vmax.f32 %v2960_v55, 0.0  ;;  %v2975_v15 = vmax.f32 %v2965_v50, 0.0 }
0x11a6   :  { %v3002_v11 = vrot.slane %v2985_v37, 4  ;;  %v3000_v6 = vrot.slane %v2981_v60, 4  ;;  %v2988_v62 = vmul.f32 %v2976_v32, %v9775_v59  ;;  %v2964_v4 = vadd.f32 %v2956_v22, %v2949_v27 }
0x11a7   :  { %v3004_v13 = vrot.slane %v2989_v44, 4  ;;  %v3001_v14 = vrot.slane %v2983_v24, 4  ;;  %v2982_v1 = vmul.f32 %v2970_v33, %v9697_v3  ;;  %v2987_v46 = vmul.f32 %v2975_v15, %v9771_v52 }
0x11a8   :  { %v3007_v47 = vsel %vm2843_vm8, %v2984_v31, %v3002_v11  ;;  %v3005_v23 = vsel %vm2843_vm8, %v2980_v36, %v3000_v6  ;;  %v2974_v7 = vmax.f32 %v2964_v4, 0.0  ;;  %v13933_v25 = vmov 2  }
0x11a9   :  { %3014 = vrot.lane.b32.xlu0 %v3007_v47, %s6270_s1  ;;  %3010 = vrot.lane.b32.xlu2 %v3005_v23, %s6270_s1  ;;  %v3009_v5 = vsel %vm2843_vm8, %v2988_v62, %v3004_v13  ;;  %v3006_v41 = vsel %vm2843_vm8, %v2982_v1, %v3001_v14  ;;  %v3003_v43 = vrot.slane %v2987_v46, 4  ;;  %v13934_v54 = vmov 4  }
0x11aa   :  { %v2986_v58 = vmul.f32 %v2974_v7, %v9681_v8  ;;  %v13935_v42 = vmov 6   ;;  %v6271_v48 = vmov 0.0   ;;  %v13943_v7 = vmov 17  }
0x11ab   :  { %2978 = vst [vmem:[#allocation2] sm:$0xf] %v6271_v48 }
0x11ac   :  { %v3008_v56 = vsel %vm2843_vm8, %v2986_v58, %v3003_v43  ;;  %2979 = vst [vmem:[#allocation2 + $0x28] sm:$0xf] %v6271_v48  ;;  %v9903_v43 = vpop.permute.xlu1 %3190 }
0x11b1   :  { %3018 = vrot.lane.b32.xlu0 %v3009_v5, %s6270_s1  ;;  %3012 = vrot.lane.b32.xlu2 %v3006_v41, %s6270_s1 }
0x11b9   :  { %3016 = vrot.lane.b32.xlu2 %v3008_v56, %s6270_s1  ;;  %3090 = vperm.xlu0 %6171, %v9806_v2  }
0x11c1   :  { %3050 = vperm.xlu2 %6170, %v9806_v2   ;;  %6177 = vset.pattern.permute.xlu0 %v13932_v53 }
0x11c9   :  { %6172 = vset.pattern.permute.xlu2 %v13933_v25 }
0x11ca   :  { %3140 = vperm.xlu2 %6172, %v9806_v2  }
0x11d2   :  { %6174 = vset.pattern.permute.xlu2 %v13934_v54 }
0x11d3   :  { %3236 = vperm.xlu2 %6174, %v9806_v2  }
0x11db   :  { %6176 = vset.pattern.permute.xlu2 %v13935_v42 }
0x1203   :  { %v3011_v26 = vpop.permute.xlu2 %3010 }
0x1204   :  { %v3020_v18 = vrot.slane %v3011_v26, 4 }
0x120b   :  { %v3013_v22 = vpop.permute.xlu2 %3012 }
0x120c   :  { %v3021_v21 = vrot.slane %v3013_v22, 4 }
0x120e   :  { %v3025_v63 = vsel %vm2843_vm8, %v3020_v18, %v3021_v21 }
0x120f   :  { %v3026_v57 = vsel %vm2884_vm9, %v3011_v26, %v3025_v63 }
0x1210   :  { %3039 = vst [vmem:[#allocation2 + $0x4] sm:$0xff] %v3026_v57 }
0x1213   :  { %v3017_v35 = vpop.permute.xlu2 %3016 }
0x1214   :  { %v3023_v0 = vrot.slane %v3017_v35, 4 }
0x121b   :  { %v3015_v10 = vpop.permute.xlu0 %3014  ;;  %v9850_v45 = vpop.permute.xlu2 %3050 }
0x121c   :  { %v3022_v40 = vrot.slane %v3015_v10, 4  ;;  %13936 = vst [vmem:[#allocation21_spill] sm:$0xff] %v9850_v45 }
0x121e   :  { %v3027_v39 = vsel %vm2843_vm8, %v3021_v21, %v3022_v40  ;;  %v3029_v16 = vsel %vm2843_vm8, %v3022_v40, %v3023_v0 }
0x121f   :  { %v3028_v51 = vsel %vm2884_vm9, %v3013_v22, %v3027_v39  ;;  %v3030_v34 = vsel %vm2884_vm9, %v3015_v10, %v3029_v16 }
0x1220   :  { %3040 = vst [vmem:[#allocation2 + $0xc] sm:$0xff] %v3028_v51 }
0x1221   :  { %3041 = vst [vmem:[#allocation2 + $0x14] sm:$0xff] %v3030_v34 }
0x1223   :  { %v3019_v49 = vpop.permute.xlu0 %3018 }
0x1224   :  { %v3024_v17 = vrot.slane %v3019_v49, 4  ;;  %v9856_v37 = vpop.permute.xlu2 %3140 }
0x1226   :  { %v3031_v60 = vsel %vm2843_vm8, %v3023_v0, %v3024_v17  ;;  %v3033_v28 = vsel %vm2884_vm9, %v3019_v49, %v3024_v17 }
0x1227   :  { %v3032_v20 = vsel %vm2884_vm9, %v3017_v35, %v3031_v60  ;;  %3043 = vst [vmem:[#allocation2 + $0x24] sm:$0xf] %v3033_v28 }
0x1228   :  { %3042 = vst [vmem:[#allocation2 + $0x1c] sm:$0xff] %v3032_v20  ;;  %v13951_v20 = vmov 31  }
0x122d   :  { %v3237_v55 = vpop.permute.xlu2 %3236 }
0x122f   :  { %v3044_v61 = vld [vmem:[#allocation2] ss:$4 sm:$0xff]  ;;  %v3086_v53 = vld [vmem:[#allocation2 + $0x1] ss:$4 sm:$0xff]  ;;  %v3186_v59 = vld [vmem:[#allocation2 + $0x3] ss:$4 sm:$0xff] }
0x1230   :  { %v9861_v31 = vperm.slane %v3044_v61, 4  ;;  %v9863_v11 = vperm.slane %v3044_v61, 1  ;;  %v9865_v36 = vperm.slane %v3044_v61, 0  ;;  %v9873_v23 = vperm.slane %v3044_v61, 7 }
0x1231   :  { %v9875_v24 = vperm.slane %v3044_v61, 3  ;;  %v9877_v50 = vperm.slane %v3044_v61, 2  ;;  %v9885_v14 = vperm.slane %v3044_v61, 6  ;;  %v9887_v27 = vperm.slane %v3044_v61, 5 }
0x1232   :  { %13937 = vst [vmem:[#allocation55_spill] sm:$0xff] %v9863_v11  ;;  %v3243_v6 = vmul.f32 %v3237_v55, %v9861_v31  ;;  %v3240_v44 = vmul.f32 %v3237_v55, %v9863_v11  ;;  %v3239_v47 = vmul.f32 %v3237_v55, %v9865_v36  ;;  %v3246_v32 = vmul.f32 %v3237_v55, %v9873_v23  ;;  %v3046_v1 = vld [vmem:[#allocation2 + $0x20] ss:$4 sm:$0x3] }
0x1233   :  { %13938 = vst [vmem:[#allocation206_spill] sm:$0xff] %v9865_v36  ;;  %v3242_v33 = vmul.f32 %v3237_v55, %v9875_v24  ;;  %v3241_v13 = vmul.f32 %v3237_v55, %v9877_v50  ;;  %v3245_v15 = vmul.f32 %v3237_v55, %v9885_v14  ;;  %v3244_v62 = vmul.f32 %v3237_v55, %v9887_v27  ;;  %v3088_v40 = vld [vmem:[#allocation2 + $0x21] ss:$4 sm:$0x3] }
0x1234   :  { %3267 = vrot.lane.b32.xlu1 %v3243_v6, %s6233_s9  ;;  %3261 = vrot.lane.b32.xlu2 %v3240_v44, %s6233_s9  ;;  %13939 = vst [vmem:[#allocation135_spill] sm:$0xff] %v9875_v24  ;;  %v9894_v4 = vperm.slane %v3046_v1, 1  ;;  %v9896_v5 = vperm.slane %v3046_v1, 0  ;;  %v9909_v25 = vperm.slane %v3086_v53, 0  ;;  %v9911_v54 = vperm.slane %v3086_v53, 1 }
0x1235   :  { %3259 = vrot.lane.b32.xlu0 %v3239_v47, %s6233_s9  ;;  %13940 = vst [vmem:[#allocation30_spill] sm:$0xff] %v9877_v50  ;;  %v9913_v42 = vperm.slane %v3086_v53, 2  ;;  %v9921_v63 = vperm.slane %v3086_v53, 4  ;;  %v9923_v48 = vperm.slane %v3086_v53, 5  ;;  %v9925_v57 = vperm.slane %v3086_v53, 3 }
0x1236   :  { %13941 = vst [vmem:[#allocation146_spill] sm:$0xff] %v9885_v14  ;;  %v3248_v41 = vmul.f32 %v3237_v55, %v9894_v4  ;;  %v3247_v46 = vmul.f32 %v3237_v55, %v9896_v5  ;;  %v9933_v39 = vperm.slane %v3086_v53, 7  ;;  %v9935_v16 = vperm.slane %v3088_v40, 0 }
0x1237   :  { %13942 = vst [vmem:[#allocation209_spill] sm:$0xff] %v9894_v4  ;;  %v9937_v51 = vperm.slane %v3086_v53, 6  ;;  %v9945_v60 = vperm.slane %v3088_v40, 1  ;;  %v10031_v52 = vperm.slane %v3186_v59, 0  ;;  %v10033_v8 = vperm.slane %v3186_v59, 1 }
0x1238   :  { %13945 = vst [vmem:[#allocation58_spill] sm:$0xff] %v9909_v25  ;;  %v10035_v12 = vperm.slane %v3186_v59, 4  ;;  %v10043_v3 = vperm.slane %v3186_v59, 3 }
0x1239   :  { %13946 = vst [vmem:[#allocation68_spill] sm:$0xff] %v9911_v54 }
0x123a   :  { %13947 = vst [vmem:[#allocation208_spill] sm:$0xff] %v9913_v42 }
0x123b   :  { %13948 = vst [vmem:[#allocation136_spill] sm:$0xff] %v9925_v57 }
0x123c   :  { %3273 = vrot.lane.b32.xlu1 %v3246_v32, %s6233_s9  ;;  %3265 = vrot.lane.b32.xlu2 %v3242_v33, %s6233_s9  ;;  %13949 = vst [vmem:[#allocation37_spill] sm:$0xff] %v9937_v51 }
0x123d   :  { %3263 = vrot.lane.b32.xlu0 %v3241_v13, %s6233_s9  ;;  %13950 = vst [vmem:[#allocation213_spill] sm:$0xff] %v9945_v60  ;;  %v3136_v13 = vld [vmem:[#allocation2 + $0x2] ss:$4 sm:$0xff] }
0x123e   :  { %v9969_v1 = vperm.slane %v3136_v13, 2  ;;  %v9989_v40 = vperm.slane %v3136_v13, 6  ;;  %13972 = vst [vmem:[#allocation16_spill] sm:$0xff] %v10031_v52 }
0x123f   :  { %13973 = vst [vmem:[#allocation14_spill] sm:$0xff] %v10033_v8 }
0x1240   :  { %13959 = vst [vmem:[#allocation212_spill] sm:$0xff] %v9969_v1 }
0x1241   :  { %13961 = vst [vmem:[#allocation61_spill] sm:$0xff] %v9989_v40 }
0x1242   :  { %13974 = vst [vmem:[#allocation59_spill] sm:$0xff] %v10043_v3 }
0x1244   :  { %3309 = vperm.xlu1 %6175, %v9806_v2   ;;  %3271 = vrot.lane.b32.xlu2 %v3245_v15, %s6233_s9  ;;  %v9965_v15 = vperm.slane %v3136_v13, 0 }
0x1245   :  { %3269 = vrot.lane.b32.xlu0 %v3244_v62, %s6233_s9  ;;  %v9967_v62 = vperm.slane %v3136_v13, 1 }
0x1246   :  { %13957 = vst [vmem:[#allocation48_spill] sm:$0xff] %v9965_v15 }
0x1247   :  { %13958 = vst [vmem:[#allocation141_spill] sm:$0xff] %v9967_v62 }
0x124c   :  { %3277 = vrot.lane.b32.xlu2 %v3248_v41, %s6233_s9  ;;  %6187 = vset.pattern.permute.xlu1 %v13943_v7 }
0x124d   :  { %3275 = vrot.lane.b32.xlu0 %v3247_v46, %s6233_s9 }
0x128e   :  { %v9951_v55 = vpop.permute.xlu2 %3261 }
0x128f   :  { %13952 = vst [vmem:[#allocation26_spill] sm:$0xff] %v9951_v55  ;;  %v3188_v55 = vld [vmem:[#allocation2 + $0x23] ss:$4 sm:$0x3] }
0x1296   :  { %v9953_v61 = vpop.permute.xlu2 %3265 }
0x1297   :  { %13953 = vst [vmem:[#allocation119_spill] sm:$0xff] %v9953_v61 }
0x129e   :  { %v9955_v6 = vpop.permute.xlu2 %3271 }
0x12a6   :  { %v9905_v58 = vpop.permute.xlu1 %3267  ;;  %v9957_v44 = vpop.permute.xlu2 %3277 }
0x12a7   :  { %13954 = vst [vmem:[#allocation12_spill] sm:$0xff] %v9957_v44 }
0x12ae   :  { %v9907_v56 = vpop.permute.xlu1 %3273 }
0x12af   :  { %13944 = vst [vmem:[#allocation31_spill] sm:$0xff] %v9907_v56 }
0x12b6   :  { %v3310_v26 = vpop.permute.xlu1 %3309 }
0x12b7   :  { %v3314_v22 = vmul.f32 %v3310_v26, %v9913_v42  ;;  %v3313_v18 = vmul.f32 %v3310_v26, %v9911_v54  ;;  %v3312_v21 = vmul.f32 %v3310_v26, %v9909_v25  ;;  %v3317_v35 = vmul.f32 %v3310_v26, %v9923_v48 }
0x12b8   :  { %v3316_v10 = vmul.f32 %v3310_v26, %v9921_v63  ;;  %v3315_v0 = vmul.f32 %v3310_v26, %v9925_v57  ;;  %v3320_v34 = vmul.f32 %v3310_v26, %v9935_v16  ;;  %v3319_v49 = vmul.f32 %v3310_v26, %v9933_v39 }
0x12b9   :  { %3336 = vrot.lane.b32.xlu1 %v3314_v22, %s6233_s9  ;;  %3334 = vrot.lane.b32.xlu2 %v3313_v18, %s6233_s9  ;;  %v3318_v17 = vmul.f32 %v3310_v26, %v9937_v51  ;;  %v3321_v28 = vmul.f32 %v3310_v26, %v9945_v60  ;;  %v9977_v26 = vperm.slane %v3136_v13, 3  ;;  %v9979_v22 = vperm.slane %v3136_v13, 5 }
0x12ba   :  { %3332 = vrot.lane.b32.xlu0 %v3312_v21, %s6233_s9  ;;  %v9981_v18 = vperm.slane %v3136_v13, 4 }
0x12bb   :  { %13960 = vst [vmem:[#allocation56_spill] sm:$0xff] %v9977_v26 }
0x12c1   :  { %3342 = vrot.lane.b32.xlu1 %v3317_v35, %s6233_s9  ;;  %3340 = vrot.lane.b32.xlu2 %v3316_v10, %s6233_s9 }
0x12c2   :  { %3338 = vrot.lane.b32.xlu0 %v3315_v0, %s6233_s9  ;;  %v3138_v0 = vld [vmem:[#allocation2 + $0x22] ss:$4 sm:$0x3] }
0x12c9   :  { %3348 = vrot.lane.b32.xlu1 %v3320_v34, %s6233_s9  ;;  %3346 = vrot.lane.b32.xlu2 %v3319_v49, %s6233_s9  ;;  %v9991_v34 = vperm.slane %v3138_v0, 0  ;;  %v9993_v49 = vperm.slane %v3136_v13, 7  ;;  %v10006_v13 = vpop.permute.xlu0 %3090 }
0x12ca   :  { %3344 = vrot.lane.b32.xlu0 %v3318_v17, %s6233_s9  ;;  %13963 = vst [vmem:[#allocation211_spill] sm:$0xff] %v10006_v13 }
0x12d1   :  { %3382 = vperm.xlu2 %6176, %v9806_v2  }
0x12d2   :  { %3350 = vrot.lane.b32.xlu0 %v3321_v28, %s6233_s9 }
0x12d9   :  { %6201 = vset.pattern.permute.xlu2 %v13951_v20 }
0x1313   :  { %v9959_v47 = vpop.permute.xlu2 %3334 }
0x1314   :  { %13955 = vst [vmem:[#allocation9_spill] sm:$0xff] %v9959_v47 }
0x131b   :  { %v9961_v32 = vpop.permute.xlu2 %3340 }
0x1323   :  { %v9963_v33 = vpop.permute.xlu2 %3346 }
0x1324   :  { %13956 = vst [vmem:[#allocation111_spill] sm:$0xff] %v9963_v33 }
0x132b   :  { %v3383_v41 = vpop.permute.xlu2 %3382 }
0x132c   :  { %v3387_v46 = vmul.f32 %v3383_v41, %v9969_v1  ;;  %v3385_v7 = vmul.f32 %v3383_v41, %v9965_v15  ;;  %v3386_v53 = vmul.f32 %v3383_v41, %v9967_v62  ;;  %v3390_v21 = vmul.f32 %v3383_v41, %v9979_v22 }
0x132d   :  { %v3388_v35 = vmul.f32 %v3383_v41, %v9977_v26  ;;  %v3389_v10 = vmul.f32 %v3383_v41, %v9981_v18  ;;  %v3393_v17 = vmul.f32 %v3383_v41, %v9991_v34  ;;  %v3391_v28 = vmul.f32 %v3383_v41, %v9989_v40 }
0x132e   :  { %3409 = vrot.lane.b32.xlu2 %v3387_v46, %s6233_s9  ;;  %3405 = vrot.lane.b32.xlu1 %v3385_v7, %s6233_s9  ;;  %v3392_v20 = vmul.f32 %v3383_v41, %v9993_v49  ;;  %v10001_v46 = vperm.slane %v3138_v0, 1 }
0x132f   :  { %3407 = vrot.lane.b32.xlu0 %v3386_v53, %s6233_s9  ;;  %v13964_v53 = vmov 8  }
0x1330   :  { %13962 = vst [vmem:[#allocation71_spill] sm:$0xff] %v10001_v46  ;;  %v3394_v7 = vmul.f32 %v3383_v41, %v10001_v46 }
0x1336   :  { %3415 = vrot.lane.b32.xlu2 %v3390_v21, %s6233_s9  ;;  %3411 = vrot.lane.b32.xlu1 %v3388_v35, %s6233_s9  ;;  %v10009_v21 = vpop.permute.xlu0 %3259 }
0x1337   :  { %3413 = vrot.lane.b32.xlu0 %v3389_v10, %s6233_s9  ;;  %13965 = vst [vmem:[#allocation215_spill] sm:$0xff] %v10009_v21  ;;  %v10047_v21 = vperm.slane %v3186_v59, 2 }
0x1339   :  { %13975 = vst [vmem:[#allocation50_spill] sm:$0xff] %v10047_v21 }
0x133e   :  { %3421 = vrot.lane.b32.xlu2 %v3393_v17, %s6233_s9  ;;  %3417 = vrot.lane.b32.xlu1 %v3391_v28, %s6233_s9  ;;  %v10011_v35 = vpop.permute.xlu0 %3263 }
0x133f   :  { %3419 = vrot.lane.b32.xlu0 %v3392_v20, %s6233_s9  ;;  %13966 = vst [vmem:[#allocation142_spill] sm:$0xff] %v10011_v35  ;;  %v13978_v35 = vmov 9  }
0x1346   :  { %3423 = vrot.lane.b32.xlu1 %v3394_v7, %s6233_s9  ;;  %v10013_v10 = vpop.permute.xlu0 %3269 }
0x1347   :  { %3455 = vperm.xlu0 %6177, %v9806_v2  }
0x134e   :  { %v10015_v17 = vpop.permute.xlu0 %3275 }
0x134f   :  { %6178 = vset.pattern.permute.xlu0 %v13964_v53 }
0x1356   :  { %v10017_v0 = vpop.permute.xlu0 %3332 }
0x1357   :  { %13967 = vst [vmem:[#allocation214_spill] sm:$0xff] %v10017_v0  ;;  %v10045_v0 = vperm.slane %v3186_v59, 7 }
0x135e   :  { %v10019_v28 = vpop.permute.xlu0 %3338 }
0x135f   :  { %13968 = vst [vmem:[#allocation217_spill] sm:$0xff] %v10019_v28 }
0x1366   :  { %v10021_v41 = vpop.permute.xlu0 %3344 }
0x136e   :  { %v10023_v20 = vpop.permute.xlu0 %3350 }
0x136f   :  { %13969 = vst [vmem:[#allocation40_spill] sm:$0xff] %v10023_v20 }
0x13a1   :  { %v10025_v7 = vpop.permute.xlu0 %3407 }
0x13a2   :  { %13970 = vst [vmem:[#allocation32_spill] sm:$0xff] %v10025_v7 }
0x13a9   :  { %v10027_v19 = vpop.permute.xlu0 %3413 }
0x13b1   :  { %v10029_v53 = vpop.permute.xlu0 %3419 }
0x13b2   :  { %13971 = vst [vmem:[#allocation65_spill] sm:$0xff] %v10029_v53 }
0x13b9   :  { %v3456_v9 = vpop.permute.xlu0 %3455 }
0x13ba   :  { %v3462_v30 = vmul.f32 %v3456_v9, %v10035_v12  ;;  %v3459_v38 = vmul.f32 %v3456_v9, %v10033_v8  ;;  %v3458_v29 = vmul.f32 %v3456_v9, %v10031_v52  ;;  %v3465_v7 = vmul.f32 %v3456_v9, %v10045_v0 }
0x13bb   :  { %v3461_v28 = vmul.f32 %v3456_v9, %v10043_v3  ;;  %v3460_v47 = vmul.f32 %v3456_v9, %v10047_v21 }
0x13bc   :  { %3486 = vrot.lane.b32.xlu0 %v3462_v30, %s6233_s9  ;;  %3480 = vrot.lane.b32.xlu1 %v3459_v38, %s6233_s9  ;;  %v10055_v30 = vperm.slane %v3186_v59, 6 }
0x13bd   :  { %3478 = vrot.lane.b32.xlu2 %v3458_v29, %s6233_s9  ;;  %v10057_v29 = vperm.slane %v3186_v59, 5 }
0x13be   :  { %13976 = vst [vmem:[#allocation219_spill] sm:$0xff] %v10055_v30  ;;  %v3464_v38 = vmul.f32 %v3456_v9, %v10055_v30 }
0x13bf   :  { %v3463_v61 = vmul.f32 %v3456_v9, %v10057_v29 }
0x13c4   :  { %3492 = vrot.lane.b32.xlu0 %v3465_v7, %s6233_s9  ;;  %3484 = vrot.lane.b32.xlu1 %v3461_v28, %s6233_s9  ;;  %v10064_v7 = vperm.slane %v3188_v55, 1  ;;  %v10066_v28 = vperm.slane %v3188_v55, 0 }
0x13c5   :  { %3482 = vrot.lane.b32.xlu2 %v3460_v47, %s6233_s9 }
0x13c6   :  { %13977 = vst [vmem:[#allocation38_spill] sm:$0xff] %v10064_v7  ;;  %v3467_v47 = vmul.f32 %v3456_v9, %v10064_v7  ;;  %v3466_v59 = vmul.f32 %v3456_v9, %v10066_v28 }
0x13cc   :  { %3528 = vperm.xlu0 %6178, %v9806_v2   ;;  %3490 = vrot.lane.b32.xlu1 %v3464_v38, %s6233_s9 }
0x13cd   :  { %3488 = vrot.lane.b32.xlu2 %v3463_v61, %s6233_s9 }
0x13d4   :  { %3496 = vrot.lane.b32.xlu1 %v3467_v47, %s6233_s9  ;;  %6179 = vset.pattern.permute.xlu0 %v13978_v35 }
0x13d5   :  { %3494 = vrot.lane.b32.xlu2 %v3466_v59, %s6233_s9 }
0x142e   :  { %v10073_v53 = vpop.permute.xlu0 %3486 }
0x142f   :  { %13979 = vst [vmem:[#allocation75_spill] sm:$0xff] %v10073_v53 }
0x1436   :  { %v10075_v38 = vpop.permute.xlu0 %3492 }
0x1437   :  { %13980 = vst [vmem:[#allocation131_spill] sm:$0xff] %v10075_v38 }
0x143e   :  { %v3529_v33 = vpop.permute.xlu0 %3528 }
0x143f   :  { %v3535_v61 = vmul.f32 %v3529_v33, %v9861_v31  ;;  %v3532_v55 = vmul.f32 %v3529_v33, %v9863_v11  ;;  %v3531_v56 = vmul.f32 %v3529_v33, %v9865_v36  ;;  %v3538_v9 = vmul.f32 %v3529_v33, %v9873_v23 }
0x1440   :  { %v3534_v35 = vmul.f32 %v3529_v33, %v9875_v24  ;;  %v3533_v47 = vmul.f32 %v3529_v33, %v9877_v50  ;;  %v3537_v59 = vmul.f32 %v3529_v33, %v9885_v14 }
0x1441   :  { %3559 = vrot.lane.b32.xlu0 %v3535_v61, %s6236_s24  ;;  %3553 = vrot.lane.b32.xlu1 %v3532_v55, %s6236_s24  ;;  %v3536_v61 = vmul.f32 %v3529_v33, %v9887_v27  ;;  %v3539_v55 = vmul.f32 %v3529_v33, %v9896_v5 }
0x1442   :  { %3551 = vrot.lane.b32.xlu2 %v3531_v56, %s6236_s24  ;;  %v3540_v56 = vmul.f32 %v3529_v33, %v9894_v4 }
0x1449   :  { %3565 = vrot.lane.b32.xlu0 %v3538_v9, %s6236_s24  ;;  %3557 = vrot.lane.b32.xlu1 %v3534_v35, %s6236_s24  ;;  %v13981_v9 = vmov 10  }
0x144a   :  { %3555 = vrot.lane.b32.xlu2 %v3533_v47, %s6236_s24 }
0x1451   :  { %3601 = vperm.xlu0 %6179, %v9806_v2   ;;  %3563 = vrot.lane.b32.xlu1 %v3537_v59, %s6236_s24 }
0x1452   :  { %3561 = vrot.lane.b32.xlu2 %v3536_v61, %s6236_s24 }
0x1459   :  { %3569 = vrot.lane.b32.xlu1 %v3540_v56, %s6236_s24  ;;  %6180 = vset.pattern.permute.xlu0 %v13981_v9 }
0x145a   :  { %3567 = vrot.lane.b32.xlu2 %v3539_v55, %s6236_s24 }
0x14b3   :  { %v10099_v35 = vpop.permute.xlu0 %3559 }
0x14b4   :  { %13982 = vst [vmem:[#allocation221_spill] sm:$0xff] %v10099_v35 }
0x14bb   :  { %v10101_v47 = vpop.permute.xlu0 %3565 }
0x14bc   :  { %13983 = vst [vmem:[#allocation216_spill] sm:$0xff] %v10101_v47 }
0x14c3   :  { %v3602_v38 = vpop.permute.xlu0 %3601 }
0x14c4   :  { %v3608_v53 = vmul.f32 %v3602_v38, %v9921_v63  ;;  %v3605_v59 = vmul.f32 %v3602_v38, %v9911_v54  ;;  %v3604_v61 = vmul.f32 %v3602_v38, %v9909_v25  ;;  %v3611_v33 = vmul.f32 %v3602_v38, %v9933_v39 }
0x14c5   :  { %v3607_v56 = vmul.f32 %v3602_v38, %v9925_v57  ;;  %v3606_v55 = vmul.f32 %v3602_v38, %v9913_v42  ;;  %v3610_v9 = vmul.f32 %v3602_v38, %v9937_v51 }
0x14c6   :  { %3632 = vrot.lane.b32.xlu0 %v3608_v53, %s6236_s24  ;;  %3626 = vrot.lane.b32.xlu1 %v3605_v59, %s6236_s24  ;;  %v3609_v53 = vmul.f32 %v3602_v38, %v9923_v48  ;;  %v3613_v59 = vmul.f32 %v3602_v38, %v9945_v60 }
0x14c7   :  { %3624 = vrot.lane.b32.xlu2 %v3604_v61, %s6236_s24  ;;  %v3612_v61 = vmul.f32 %v3602_v38, %v9935_v16 }
0x14ce   :  { %3638 = vrot.lane.b32.xlu0 %v3611_v33, %s6236_s24  ;;  %3630 = vrot.lane.b32.xlu1 %v3607_v56, %s6236_s24  ;;  %v13984_v33 = vmov 11  }
0x14cf   :  { %3628 = vrot.lane.b32.xlu2 %v3606_v55, %s6236_s24 }
0x14d6   :  { %3674 = vperm.xlu0 %6180, %v9806_v2   ;;  %3636 = vrot.lane.b32.xlu1 %v3610_v9, %s6236_s24 }
0x14d7   :  { %3634 = vrot.lane.b32.xlu2 %v3609_v53, %s6236_s24 }
0x14de   :  { %3642 = vrot.lane.b32.xlu1 %v3613_v59, %s6236_s24  ;;  %6181 = vset.pattern.permute.xlu0 %v13984_v33 }
0x14df   :  { %3640 = vrot.lane.b32.xlu2 %v3612_v61, %s6236_s24 }
0x1538   :  { %v10125_v56 = vpop.permute.xlu0 %3632 }
0x1539   :  { %13985 = vst [vmem:[#allocation42_spill] sm:$0xff] %v10125_v56 }
0x1540   :  { %v10127_v55 = vpop.permute.xlu0 %3638 }
0x1541   :  { %13986 = vst [vmem:[#allocation147_spill] sm:$0xff] %v10127_v55 }
0x1548   :  { %v3675_v47 = vpop.permute.xlu0 %3674 }
0x1549   :  { %v3681_v35 = vmul.f32 %v3675_v47, %v9981_v18  ;;  %v3678_v9 = vmul.f32 %v3675_v47, %v9967_v62  ;;  %v3677_v53 = vmul.f32 %v3675_v47, %v9965_v15  ;;  %v3684_v38 = vmul.f32 %v3675_v47, %v9993_v49 }
0x154a   :  { %v3680_v59 = vmul.f32 %v3675_v47, %v9977_v26  ;;  %v3679_v61 = vmul.f32 %v3675_v47, %v9969_v1  ;;  %v3683_v33 = vmul.f32 %v3675_v47, %v9989_v40 }
0x154b   :  { %3705 = vrot.lane.b32.xlu0 %v3681_v35, %s6236_s24  ;;  %3699 = vrot.lane.b32.xlu1 %v3678_v9, %s6236_s24  ;;  %v3682_v35 = vmul.f32 %v3675_v47, %v9979_v22  ;;  %v3686_v9 = vmul.f32 %v3675_v47, %v10001_v46 }
0x154c   :  { %3697 = vrot.lane.b32.xlu2 %v3677_v53, %s6236_s24  ;;  %v3685_v53 = vmul.f32 %v3675_v47, %v9991_v34 }
0x1553   :  { %3711 = vrot.lane.b32.xlu0 %v3684_v38, %s6236_s24  ;;  %3703 = vrot.lane.b32.xlu1 %v3680_v59, %s6236_s24  ;;  %v13987_v38 = vmov 12  }
0x1554   :  { %3701 = vrot.lane.b32.xlu2 %v3679_v61, %s6236_s24 }
0x155b   :  { %3747 = vperm.xlu0 %6181, %v9806_v2   ;;  %3709 = vrot.lane.b32.xlu1 %v3683_v33, %s6236_s24 }
0x155c   :  { %3707 = vrot.lane.b32.xlu2 %v3682_v35, %s6236_s24 }
0x1563   :  { %3715 = vrot.lane.b32.xlu1 %v3686_v9, %s6236_s24  ;;  %6182 = vset.pattern.permute.xlu0 %v13987_v38 }
0x1564   :  { %3713 = vrot.lane.b32.xlu2 %v3685_v53, %s6236_s24 }
0x15bd   :  { %v10151_v59 = vpop.permute.xlu0 %3705 }
0x15be   :  { %13988 = vst [vmem:[#allocation220_spill] sm:$0xff] %v10151_v59 }
0x15c5   :  { %v10153_v61 = vpop.permute.xlu0 %3711 }
0x15c6   :  { %13989 = vst [vmem:[#allocation218_spill] sm:$0xff] %v10153_v61 }
0x15cd   :  { %v3748_v55 = vpop.permute.xlu0 %3747 }
0x15ce   :  { %v3754_v56 = vmul.f32 %v3748_v55, %v10035_v12  ;;  %v3751_v33 = vmul.f32 %v3748_v55, %v10033_v8  ;;  %v3750_v35 = vmul.f32 %v3748_v55, %v10031_v52  ;;  %v3757_v47 = vmul.f32 %v3748_v55, %v10045_v0 }
0x15cf   :  { %v3753_v9 = vmul.f32 %v3748_v55, %v10043_v3  ;;  %v3752_v53 = vmul.f32 %v3748_v55, %v10047_v21  ;;  %v3756_v38 = vmul.f32 %v3748_v55, %v10055_v30 }
0x15d0   :  { %3778 = vrot.lane.b32.xlu0 %v3754_v56, %s6236_s24  ;;  %3772 = vrot.lane.b32.xlu1 %v3751_v33, %s6236_s24  ;;  %v3755_v56 = vmul.f32 %v3748_v55, %v10057_v29  ;;  %v3759_v33 = vmul.f32 %v3748_v55, %v10064_v7 }
0x15d1   :  { %3770 = vrot.lane.b32.xlu2 %v3750_v35, %s6236_s24  ;;  %v3758_v35 = vmul.f32 %v3748_v55, %v10066_v28 }
0x15d8   :  { %3784 = vrot.lane.b32.xlu0 %v3757_v47, %s6236_s24  ;;  %3776 = vrot.lane.b32.xlu1 %v3753_v9, %s6236_s24  ;;  %v13990_v47 = vmov 13  }
0x15d9   :  { %3774 = vrot.lane.b32.xlu2 %v3752_v53, %s6236_s24 }
0x15e0   :  { %3820 = vperm.xlu0 %6182, %v9806_v2   ;;  %3782 = vrot.lane.b32.xlu1 %v3756_v38, %s6236_s24 }
0x15e1   :  { %3780 = vrot.lane.b32.xlu2 %v3755_v56, %s6236_s24 }
0x15e8   :  { %3788 = vrot.lane.b32.xlu1 %v3759_v33, %s6236_s24  ;;  %6183 = vset.pattern.permute.xlu0 %v13990_v47 }
0x15e9   :  { %3786 = vrot.lane.b32.xlu2 %v3758_v35, %s6236_s24 }
0x1642   :  { %v10177_v9 = vpop.permute.xlu0 %3778 }
0x1643   :  { %13991 = vst [vmem:[#allocation224_spill] sm:$0xff] %v10177_v9 }
0x164a   :  { %v10179_v53 = vpop.permute.xlu0 %3784 }
0x164b   :  { %13992 = vst [vmem:[#allocation112_spill] sm:$0xff] %v10179_v53 }
0x1652   :  { %v3821_v61 = vpop.permute.xlu0 %3820 }
0x1653   :  { %v3827_v59 = vmul.f32 %v3821_v61, %v9861_v31  ;;  %v3824_v38 = vmul.f32 %v3821_v61, %v9863_v11  ;;  %v3823_v56 = vmul.f32 %v3821_v61, %v9865_v36  ;;  %v3830_v55 = vmul.f32 %v3821_v61, %v9873_v23 }
0x1654   :  { %v3826_v33 = vmul.f32 %v3821_v61, %v9875_v24  ;;  %v3825_v35 = vmul.f32 %v3821_v61, %v9877_v50  ;;  %v3829_v47 = vmul.f32 %v3821_v61, %v9885_v14 }
0x1655   :  { %3851 = vrot.lane.b32.xlu0 %v3827_v59, %s6241_s25  ;;  %3845 = vrot.lane.b32.xlu1 %v3824_v38, %s6241_s25  ;;  %v3828_v59 = vmul.f32 %v3821_v61, %v9887_v27  ;;  %v3832_v38 = vmul.f32 %v3821_v61, %v9894_v4 }
0x1656   :  { %3843 = vrot.lane.b32.xlu2 %v3823_v56, %s6241_s25  ;;  %v3831_v56 = vmul.f32 %v3821_v61, %v9896_v5 }
0x165d   :  { %3857 = vrot.lane.b32.xlu0 %v3830_v55, %s6241_s25  ;;  %3849 = vrot.lane.b32.xlu1 %v3826_v33, %s6241_s25  ;;  %v13993_v55 = vmov 14  }
0x165e   :  { %3847 = vrot.lane.b32.xlu2 %v3825_v35, %s6241_s25 }
0x1665   :  { %3893 = vperm.xlu0 %6183, %v9806_v2   ;;  %3855 = vrot.lane.b32.xlu1 %v3829_v47, %s6241_s25 }
0x1666   :  { %3853 = vrot.lane.b32.xlu2 %v3828_v59, %s6241_s25 }
0x166d   :  { %3861 = vrot.lane.b32.xlu1 %v3832_v38, %s6241_s25  ;;  %6184 = vset.pattern.permute.xlu0 %v13993_v55 }
0x166e   :  { %3859 = vrot.lane.b32.xlu2 %v3831_v56, %s6241_s25 }
0x16c7   :  { %v10203_v33 = vpop.permute.xlu0 %3851 }
0x16c8   :  { %13994 = vst [vmem:[#allocation69_spill] sm:$0xff] %v10203_v33 }
0x16cf   :  { %v10205_v35 = vpop.permute.xlu0 %3857 }
0x16d0   :  { %13995 = vst [vmem:[#allocation313_spill] sm:$0xff] %v10205_v35 }
0x16d7   :  { %v3894_v36 = vpop.permute.xlu0 %3893 }
0x16d8   :  { %v3900_v14 = vmul.f32 %v3894_v36, %v9921_v63  ;;  %v3897_v47 = vmul.f32 %v3894_v36, %v9911_v54  ;;  %v3896_v59 = vmul.f32 %v3894_v36, %v9909_v25  ;;  %v3903_v61 = vmul.f32 %v3894_v36, %v9933_v39 }
0x16d9   :  { %v3899_v38 = vmul.f32 %v3894_v36, %v9925_v57  ;;  %v3898_v56 = vmul.f32 %v3894_v36, %v9913_v42  ;;  %v3902_v55 = vmul.f32 %v3894_v36, %v9937_v51 }
0x16da   :  { %3924 = vrot.lane.b32.xlu0 %v3900_v14, %s6241_s25  ;;  %3918 = vrot.lane.b32.xlu1 %v3897_v47, %s6241_s25  ;;  %v3901_v14 = vmul.f32 %v3894_v36, %v9923_v48  ;;  %v3905_v47 = vmul.f32 %v3894_v36, %v9945_v60 }
0x16db   :  { %3916 = vrot.lane.b32.xlu2 %v3896_v59, %s6241_s25  ;;  %v3904_v59 = vmul.f32 %v3894_v36, %v9935_v16 }
0x16e2   :  { %3930 = vrot.lane.b32.xlu0 %v3903_v61, %s6241_s25  ;;  %3922 = vrot.lane.b32.xlu1 %v3899_v38, %s6241_s25  ;;  %v13996_v61 = vmov 15   ;;  %v10229_v38 = vpop.permute.xlu1 %3336 }
0x16e3   :  { %3920 = vrot.lane.b32.xlu2 %v3898_v56, %s6241_s25  ;;  %13997 = vst [vmem:[#allocation18_spill] sm:$0xff] %v10229_v38 }
0x16ea   :  { %3966 = vperm.xlu0 %6184, %v9806_v2   ;;  %3928 = vrot.lane.b32.xlu1 %v3902_v55, %s6241_s25  ;;  %v10233_v4 = vpop.permute.xlu1 %3342 }
0x16eb   :  { %3926 = vrot.lane.b32.xlu2 %v3901_v14, %s6241_s25 }
0x16f2   :  { %3934 = vrot.lane.b32.xlu1 %v3905_v47, %s6241_s25  ;;  %6185 = vset.pattern.permute.xlu0 %v13996_v61  ;;  %v10237_v55 = vpop.permute.xlu1 %3348 }
0x16f3   :  { %3932 = vrot.lane.b32.xlu2 %v3904_v59, %s6241_s25 }
0x16fa   :  { %v10242_v61 = vpop.permute.xlu1 %3405 }
0x16fb   :  { %14000 = vst [vmem:[#allocation222_spill] sm:$0xff] %v10242_v61 }
0x174c   :  { %v10231_v56 = vpop.permute.xlu0 %3924 }
0x174d   :  { %13998 = vst [vmem:[#allocation122_spill] sm:$0xff] %v10231_v56 }
0x1754   :  { %v10235_v25 = vpop.permute.xlu0 %3930 }
0x1755   :  { %13999 = vst [vmem:[#allocation148_spill] sm:$0xff] %v10235_v25 }
0x175c   :  { %v3967_v14 = vpop.permute.xlu0 %3966 }
0x175d   :  { %v3973_v60 = vmul.f32 %v3967_v14, %v9981_v18  ;;  %v3970_v36 = vmul.f32 %v3967_v14, %v9967_v62  ;;  %v3969_v47 = vmul.f32 %v3967_v14, %v9965_v15  ;;  %v3976_v59 = vmul.f32 %v3967_v14, %v9993_v49  ;;  %v10253_v15 = vpop.permute.xlu1 %3411 }
0x175e   :  { %v3972_v38 = vmul.f32 %v3967_v14, %v9977_v26  ;;  %v3971_v51 = vmul.f32 %v3967_v14, %v9969_v1  ;;  %14001 = vst [vmem:[#allocation129_spill] sm:$0xff] %v10253_v15 }
0x175f   :  { %3997 = vrot.lane.b32.xlu0 %v3973_v60, %s6241_s25  ;;  %3991 = vrot.lane.b32.xlu1 %v3970_v36, %s6241_s25  ;;  %v3975_v60 = vmul.f32 %v3967_v14, %v9989_v40  ;;  %v3974_v36 = vmul.f32 %v3967_v14, %v9979_v22 }
0x1760   :  { %3989 = vrot.lane.b32.xlu2 %v3969_v47, %s6241_s25 }
0x1765   :  { %v10260_v47 = vpop.permute.xlu1 %3417 }
0x1767   :  { %4003 = vrot.lane.b32.xlu0 %v3976_v59, %s6241_s25  ;;  %3995 = vrot.lane.b32.xlu1 %v3972_v38, %s6241_s25  ;;  %v3978_v59 = vmul.f32 %v3967_v14, %v10001_v46  ;;  %v3977_v38 = vmul.f32 %v3967_v14, %v9991_v34 }
0x1768   :  { %3993 = vrot.lane.b32.xlu2 %v3971_v51, %s6241_s25  ;;  %v14002_v51 = vmov 16  }
0x176d   :  { %v10267_v61 = vpop.permute.xlu1 %3423 }
0x176e   :  { %14003 = vst [vmem:[#allocation81_spill] sm:$0xff] %v10267_v61 }
0x176f   :  { %4039 = vperm.xlu0 %6185, %v9806_v2   ;;  %4001 = vrot.lane.b32.xlu1 %v3975_v60, %s6241_s25 }
0x1770   :  { %3999 = vrot.lane.b32.xlu2 %v3974_v36, %s6241_s25 }
0x1775   :  { %v10269_v40 = vpop.permute.xlu1 %3480 }
0x1776   :  { %14004 = vst [vmem:[#allocation44_spill] sm:$0xff] %v10269_v40 }
0x1777   :  { %4007 = vrot.lane.b32.xlu1 %v3978_v59, %s6241_s25  ;;  %6186 = vset.pattern.permute.xlu0 %v14002_v51 }
0x1778   :  { %4005 = vrot.lane.b32.xlu2 %v3977_v38, %s6241_s25 }
0x177d   :  { %v10271_v15 = vpop.permute.xlu1 %3484 }
0x177e   :  { %14005 = vst [vmem:[#allocation227_spill] sm:$0xff] %v10271_v15 }
0x1785   :  { %v10273_v60 = vpop.permute.xlu1 %3490 }
0x178d   :  { %v10275_v36 = vpop.permute.xlu1 %3496 }
0x178e   :  { %14006 = vst [vmem:[#allocation229_spill] sm:$0xff] %v10275_v36 }
0x1795   :  { %v10277_v26 = vpop.permute.xlu1 %3553 }
0x1796   :  { %14007 = vst [vmem:[#allocation73_spill] sm:$0xff] %v10277_v26 }
0x179d   :  { %v10279_v46 = vpop.permute.xlu1 %3557 }
0x179e   :  { %14008 = vst [vmem:[#allocation231_spill] sm:$0xff] %v10279_v46 }
0x17a5   :  { %v10281_v14 = vpop.permute.xlu1 %3563 }
0x17ad   :  { %v10283_v59 = vpop.permute.xlu1 %3569 }
0x17ae   :  { %14009 = vst [vmem:[#allocation120_spill] sm:$0xff] %v10283_v59 }
0x17b5   :  { %v10285_v51 = vpop.permute.xlu1 %3626 }
0x17b6   :  { %14010 = vst [vmem:[#allocation143_spill] sm:$0xff] %v10285_v51 }
0x17bd   :  { %v10291_v40 = vpop.permute.xlu1 %3630 }
0x17be   :  { %14013 = vst [vmem:[#allocation137_spill] sm:$0xff] %v10291_v40 }
0x17c5   :  { %v10298_v46 = vpop.permute.xlu1 %3636 }
0x17c6   :  { %14014 = vst [vmem:[#allocation225_spill] sm:$0xff] %v10298_v46 }
0x17d1   :  { %v10287_v38 = vpop.permute.xlu0 %3997 }
0x17d2   :  { %14011 = vst [vmem:[#allocation20_spill] sm:$0xff] %v10287_v38 }
0x17d9   :  { %v10289_v57 = vpop.permute.xlu0 %4003 }
0x17da   :  { %14012 = vst [vmem:[#allocation23_spill] sm:$0xff] %v10289_v57 }
0x17e1   :  { %v4040_v15 = vpop.permute.xlu0 %4039 }
0x17e2   :  { %v4046_v24 = vmul.f32 %v4040_v15, %v10035_v12  ;;  %v4043_v1 = vmul.f32 %v4040_v15, %v10033_v8  ;;  %v4042_v26 = vmul.f32 %v4040_v15, %v10031_v52  ;;  %v4049_v51 = vmul.f32 %v4040_v15, %v10045_v0  ;;  %v10307_v52 = vpop.permute.xlu1 %3642  ;;  %v4112_v8 = vld [vmem:[#allocation2 + $0x4] ss:$4 sm:$0xff] }
0x17e3   :  { %v4045_v62 = vmul.f32 %v4040_v15, %v10043_v3  ;;  %v4044_v40 = vmul.f32 %v4040_v15, %v10047_v21  ;;  %14015 = vst [vmem:[#allocation159_spill] sm:$0xff] %v10307_v52  ;;  %v4122_v42 = vperm.slane %v4112_v8, 1  ;;  %v4121_v54 = vperm.slane %v4112_v8, 0 }
0x17e4   :  { %4070 = vrot.lane.b32.xlu0 %v4046_v24, %s6241_s25  ;;  %4064 = vrot.lane.b32.xlu1 %v4043_v1, %s6241_s25  ;;  %v4048_v24 = vmul.f32 %v4040_v15, %v10055_v30  ;;  %v4047_v1 = vmul.f32 %v4040_v15, %v10057_v29 }
0x17e5   :  { %4062 = vrot.lane.b32.xlu2 %v4042_v26, %s6241_s25 }
0x17ea   :  { %v10314_v26 = vpop.permute.xlu1 %3699 }
0x17eb   :  { %14016 = vst [vmem:[#allocation138_spill] sm:$0xff] %v10314_v26 }
0x17ec   :  { %4076 = vrot.lane.b32.xlu0 %v4049_v51, %s6241_s25  ;;  %4068 = vrot.lane.b32.xlu1 %v4045_v62, %s6241_s25  ;;  %v4051_v51 = vmul.f32 %v4040_v15, %v10064_v7  ;;  %v4050_v62 = vmul.f32 %v4040_v15, %v10066_v28 }
0x17ed   :  { %4066 = vrot.lane.b32.xlu2 %v4044_v40, %s6241_s25  ;;  %v14017_v40 = vmov 18  }
0x17f2   :  { %v10321_v30 = vpop.permute.xlu1 %3703 }
0x17f3   :  { %14018 = vst [vmem:[#allocation46_spill] sm:$0xff] %v10321_v30 }
0x17f4   :  { %4116 = vperm.xlu0 %6186, %v9806_v2   ;;  %4074 = vrot.lane.b32.xlu1 %v4048_v24, %s6241_s25 }
0x17f5   :  { %4072 = vrot.lane.b32.xlu2 %v4047_v1, %s6241_s25 }
0x17fa   :  { %v10323_v3 = vpop.permute.xlu1 %3709 }
0x17fb   :  { %14019 = vst [vmem:[#allocation153_spill] sm:$0xff] %v10323_v3 }
0x17fc   :  { %4080 = vrot.lane.b32.xlu1 %v4051_v51, %s6241_s25  ;;  %6188 = vset.pattern.permute.xlu0 %v14017_v40 }
0x17fd   :  { %4078 = vrot.lane.b32.xlu2 %v4050_v62, %s6241_s25 }
0x1802   :  { %v10325_v2 = vpop.permute.xlu1 %3715 }
0x1803   :  { %14020 = vst [vmem:[#allocation230_spill] sm:$0xff] %v10325_v2 }
0x180a   :  { %v10327_v24 = vpop.permute.xlu1 %3772 }
0x180b   :  { %14021 = vst [vmem:[#allocation228_spill] sm:$0xff] %v10327_v24  ;;  %v4125_v24 = vperm.slane %v4112_v8, 4 }
0x1812   :  { %v10329_v1 = vpop.permute.xlu1 %3776 }
0x1813   :  { %14022 = vst [vmem:[#allocation233_spill] sm:$0xff] %v10329_v1 }
0x181a   :  { %v10331_v26 = vpop.permute.xlu1 %3782 }
0x181b   :  { %14023 = vst [vmem:[#allocation154_spill] sm:$0xff] %v10331_v26 }
0x1822   :  { %v10333_v7 = vpop.permute.xlu1 %3788 }
0x1823   :  { %14024 = vst [vmem:[#allocation232_spill] sm:$0xff] %v10333_v7 }
0x182a   :  { %v10335_v15 = vpop.permute.xlu1 %3845 }
0x182b   :  { %14025 = vst [vmem:[#allocation77_spill] sm:$0xff] %v10335_v15  ;;  %v4124_v15 = vperm.slane %v4112_v8, 3 }
0x1832   :  { %v10337_v51 = vpop.permute.xlu1 %3849 }
0x1833   :  { %14026 = vst [vmem:[#allocation235_spill] sm:$0xff] %v10337_v51  ;;  %v4128_v51 = vperm.slane %v4112_v8, 7 }
0x183a   :  { %v10341_v62 = vpop.permute.xlu1 %3855 }
0x183b   :  { %14028 = vst [vmem:[#allocation149_spill] sm:$0xff] %v10341_v62 }
0x1842   :  { %v10345_v21 = vpop.permute.xlu1 %3861 }
0x1843   :  { %14030 = vst [vmem:[#allocation35_spill] sm:$0xff] %v10345_v21 }
0x184a   :  { %v10347_v25 = vpop.permute.xlu1 %3918 }
0x184b   :  { %14031 = vst [vmem:[#allocation144_spill] sm:$0xff] %v10347_v25 }
0x1856   :  { %v10339_v40 = vpop.permute.xlu0 %4070 }
0x1857   :  { %14027 = vst [vmem:[#allocation130_spill] sm:$0xff] %v10339_v40 }
0x185e   :  { %v10343_v30 = vpop.permute.xlu0 %4076 }
0x185f   :  { %14029 = vst [vmem:[#allocation13_spill] sm:$0xff] %v10343_v30  ;;  %v4123_v30 = vperm.slane %v4112_v8, 2 }
0x1866   :  { %v4117_v1 = vpop.permute.xlu0 %4116 }
0x1867   :  { %v4143_v50 = vmul.f32 %v4125_v24, %v4117_v1  ;;  %v4140_v11 = vmul.f32 %v4122_v42, %v4117_v1  ;;  %v4139_v57 = vmul.f32 %v4121_v54, %v4117_v1  ;;  %v4146_v35 = vmul.f32 %v4128_v51, %v4117_v1  ;;  %v10355_v54 = vpop.permute.xlu1 %3922 }
0x1868   :  { %v4142_v40 = vmul.f32 %v4124_v15, %v4117_v1  ;;  %v4141_v53 = vmul.f32 %v4123_v30, %v4117_v1  ;;  %14032 = vst [vmem:[#allocation237_spill] sm:$0xff] %v10355_v54  ;;  %v4127_v42 = vperm.slane %v4112_v8, 6  ;;  %v6214_v15 = vld [vmem:[#allocation2 + $0x24] ss:$0 sm:$0xff] }
0x1869   :  { %4165 = vrot.lane.b32.xlu0 %v4143_v50, %s6246_s28  ;;  %4159 = vrot.lane.b32.xlu1 %v4140_v11, %s6246_s28  ;;  %v4126_v50 = vperm.slane %v4112_v8, 5  ;;  %v4147_v30 = vmul.f32 %v6214_v15, %v4117_v1 }
0x186a   :  { %4157 = vrot.lane.b32.xlu2 %v4139_v57, %s6246_s28  ;;  %v4145_v24 = vmul.f32 %v4127_v42, %v4117_v1 }
0x186b   :  { %v4144_v11 = vmul.f32 %v4126_v50, %v4117_v1 }
0x186f   :  { %v10359_v57 = vpop.permute.xlu1 %3928 }
0x1870   :  { %14033 = vst [vmem:[#allocation145_spill] sm:$0xff] %v10359_v57 }
0x1871   :  { %4171 = vrot.lane.b32.xlu0 %v4146_v35, %s6246_s28  ;;  %4163 = vrot.lane.b32.xlu1 %v4142_v40, %s6246_s28  ;;  %v10364_v35 = vld [vmem:[%s12317_s5] sm:$0xf] }
0x1872   :  { %4161 = vrot.lane.b32.xlu2 %v4141_v53, %s6246_s28  ;;  %v14035_v53 = vmov 19  }
0x1877   :  { %v10368_v8 = vpop.permute.xlu1 %3934 }
0x1878   :  { %14034 = vst [vmem:[#allocation83_spill] sm:$0xff] %v10368_v8 }
0x1879   :  { %4169 = vrot.lane.b32.xlu1 %v4145_v24, %s6246_s28 }
0x187a   :  { %4167 = vrot.lane.b32.xlu2 %v4144_v11, %s6246_s28 }
0x187f   :  { %v10371_v51 = vpop.permute.xlu1 %3991 }
0x1880   :  { %14036 = vst [vmem:[#allocation239_spill] sm:$0xff] %v10371_v51  ;;  %v4204_v51 = vld [vmem:[#allocation2 + $0x5] ss:$4 sm:$0xff] }
0x1881   :  { %4208 = vperm.xlu1 %6187, %v10364_v35   ;;  %v4213_v25 = vperm.slane %v4204_v51, 0  ;;  %v4214_v38 = vperm.slane %v4204_v51, 1 }
0x1882   :  { %4173 = vrot.lane.b32.xlu2 %v4147_v30, %s6246_s28 }
0x1887   :  { %v10373_v40 = vpop.permute.xlu1 %3995 }
0x1888   :  { %14037 = vst [vmem:[#allocation234_spill] sm:$0xff] %v10373_v40  ;;  %v4215_v40 = vperm.slane %v4204_v51, 2 }
0x1889   :  { %6189 = vset.pattern.permute.xlu1 %v14035_v53 }
0x188f   :  { %v10375_v42 = vpop.permute.xlu1 %4001 }
0x1890   :  { %14038 = vst [vmem:[#allocation155_spill] sm:$0xff] %v10375_v42 }
0x1897   :  { %v10377_v1 = vpop.permute.xlu1 %4007 }
0x1898   :  { %14039 = vst [vmem:[#allocation160_spill] sm:$0xff] %v10377_v1 }
0x189f   :  { %v10379_v50 = vpop.permute.xlu1 %4064 }
0x18a0   :  { %14040 = vst [vmem:[#allocation238_spill] sm:$0xff] %v10379_v50 }
0x18a7   :  { %v10381_v24 = vpop.permute.xlu1 %4068 }
0x18a8   :  { %14041 = vst [vmem:[#allocation236_spill] sm:$0xff] %v10381_v24  ;;  %v4218_v24 = vperm.slane %v4204_v51, 5 }
0x18af   :  { %v10383_v11 = vpop.permute.xlu1 %4074 }
0x18b0   :  { %14042 = vst [vmem:[#allocation241_spill] sm:$0xff] %v10383_v11 }
0x18b7   :  { %v10385_v15 = vpop.permute.xlu1 %4080 }
0x18b8   :  { %14043 = vst [vmem:[#allocation139_spill] sm:$0xff] %v10385_v15  ;;  %v4217_v15 = vperm.slane %v4204_v51, 4 }
0x18db   :  { %v10387_v30 = vpop.permute.xlu1 %4159 }
0x18dc   :  { %14044 = vst [vmem:[#allocation156_spill] sm:$0xff] %v10387_v30  ;;  %v4216_v30 = vperm.slane %v4204_v51, 3 }
0x18e3   :  { %v10389_v54 = vpop.permute.xlu1 %4163 }
0x18e4   :  { %14045 = vst [vmem:[#allocation27_spill] sm:$0xff] %v10389_v54 }
0x18eb   :  { %v10391_v53 = vpop.permute.xlu1 %4169 }
0x18ec   :  { %14046 = vst [vmem:[#allocation60_spill] sm:$0xff] %v10391_v53 }
0x18f3   :  { %v4209_v8 = vpop.permute.xlu1 %4208 }
0x18f4   :  { %v4233_v1 = vmul.f32 %v4215_v40, %v4209_v8  ;;  %v4231_v56 = vmul.f32 %v4213_v25, %v4209_v8  ;;  %v4232_v50 = vmul.f32 %v4214_v38, %v4209_v8  ;;  %v4236_v54 = vmul.f32 %v4218_v24, %v4209_v8  ;;  %v6215_v25 = vld [vmem:[#allocation2 + $0x25] ss:$0 sm:$0xff] }
0x18f5   :  { %v4234_v21 = vmul.f32 %v4216_v30, %v4209_v8  ;;  %v4235_v53 = vmul.f32 %v4217_v15, %v4209_v8  ;;  %v4219_v38 = vperm.slane %v4204_v51, 6  ;;  %v4220_v40 = vperm.slane %v4204_v51, 7 }
0x18f6   :  { %4253 = vrot.lane.b32.xlu1 %v4233_v1, %s6246_s28  ;;  %4249 = vrot.lane.b32.xlu0 %v4231_v56, %s6246_s28  ;;  %v4239_v1 = vmul.f32 %v6215_v25, %v4209_v8 }
0x18f7   :  { %4251 = vrot.lane.b32.xlu2 %v4232_v50, %s6246_s28  ;;  %v4237_v33 = vmul.f32 %v4219_v38, %v4209_v8  ;;  %v4238_v56 = vmul.f32 %v4220_v40, %v4209_v8  ;;  %v14047_v50 = vmov 20   ;;  %v4296_v8 = vld [vmem:[#allocation2 + $0x6] ss:$4 sm:$0xff] }
0x18f8   :  { %v4309_v30 = vperm.slane %v4296_v8, 4 }
0x18fe   :  { %4259 = vrot.lane.b32.xlu1 %v4236_v54, %s6246_s28  ;;  %4255 = vrot.lane.b32.xlu0 %v4234_v21, %s6246_s28  ;;  %v10404_v54 = vpop.permute.xlu0 %4165 }
0x18ff   :  { %4257 = vrot.lane.b32.xlu2 %v4235_v53, %s6246_s28  ;;  %14048 = vst [vmem:[#allocation150_spill] sm:$0xff] %v10404_v54  ;;  %v4306_v53 = vperm.slane %v4296_v8, 1 }
0x1906   :  { %4265 = vrot.lane.b32.xlu1 %v4239_v1, %s6246_s28  ;;  %4261 = vrot.lane.b32.xlu0 %v4237_v33, %s6246_s28  ;;  %v10406_v21 = vpop.permute.xlu0 %4171  ;;  %v4305_v33 = vperm.slane %v4296_v8, 0 }
0x1907   :  { %4263 = vrot.lane.b32.xlu2 %v4238_v56, %s6246_s28  ;;  %14049 = vst [vmem:[#allocation161_spill] sm:$0xff] %v10406_v21  ;;  %v4312_v56 = vperm.slane %v4296_v8, 7 }
0x190e   :  { %4300 = vperm.xlu0 %6188, %v10364_v35  }
0x1916   :  { %6190 = vset.pattern.permute.xlu0 %v14047_v50  ;;  %v4308_v50 = vperm.slane %v4296_v8, 3 }
0x1968   :  { %v10408_v24 = vpop.permute.xlu0 %4249 }
0x1969   :  { %14050 = vst [vmem:[#allocation240_spill] sm:$0xff] %v10408_v24  ;;  %v4307_v24 = vperm.slane %v4296_v8, 2 }
0x1970   :  { %v10410_v51 = vpop.permute.xlu0 %4255 }
0x1971   :  { %14051 = vst [vmem:[#allocation151_spill] sm:$0xff] %v10410_v51 }
0x1978   :  { %v10412_v15 = vpop.permute.xlu0 %4261 }
0x1979   :  { %14052 = vst [vmem:[#allocation87_spill] sm:$0xff] %v10412_v15 }
0x1980   :  { %v4301_v25 = vpop.permute.xlu0 %4300 }
0x1981   :  { %v4327_v38 = vmul.f32 %v4309_v30, %v4301_v25  ;;  %v4324_v40 = vmul.f32 %v4306_v53, %v4301_v25  ;;  %v4323_v1 = vmul.f32 %v4305_v33, %v4301_v25  ;;  %v4330_v51 = vmul.f32 %v4312_v56, %v4301_v25  ;;  %v10423_v56 = vpop.permute.xlu2 %3409 }
0x1982   :  { %v4326_v21 = vmul.f32 %v4308_v50, %v4301_v25  ;;  %v4325_v15 = vmul.f32 %v4307_v24, %v4301_v25  ;;  %v4311_v30 = vperm.slane %v4296_v8, 6  ;;  %v4310_v53 = vperm.slane %v4296_v8, 5  ;;  %14053 = vst [vmem:[#allocation243_spill] sm:$0xff] %v10423_v56 }
0x1983   :  { %4349 = vrot.lane.b32.xlu0 %v4327_v38, %s6246_s28  ;;  %4343 = vrot.lane.b32.xlu1 %v4324_v40, %s6246_s28  ;;  %v6216_v40 = vld [vmem:[#allocation2 + $0x26] ss:$0 sm:$0xff]  ;;  %v14054_v24 = vmov 32  }
0x1984   :  { %4341 = vrot.lane.b32.xlu2 %v4323_v1, %s6246_s28  ;;  %v4329_v33 = vmul.f32 %v4311_v30, %v4301_v25  ;;  %v4328_v38 = vmul.f32 %v4310_v53, %v4301_v25  ;;  %v4331_v1 = vmul.f32 %v6216_v40, %v4301_v25  ;;  %v4388_v25 = vld [vmem:[#allocation2 + $0x7] ss:$4 sm:$0xff] }
0x1985   :  { %v4399_v53 = vperm.slane %v4388_v25, 2 }
0x1989   :  { %v10439_v54 = vpop.permute.xlu2 %3415 }
0x198b   :  { %4355 = vrot.lane.b32.xlu0 %v4330_v51, %s6246_s28  ;;  %4347 = vrot.lane.b32.xlu1 %v4326_v21, %s6246_s28  ;;  %v10427_v21 = vpop.permute.xlu1 %4253 }
0x198c   :  { %4345 = vrot.lane.b32.xlu2 %v4325_v15, %s6246_s28  ;;  %14055 = vst [vmem:[#allocation245_spill] sm:$0xff] %v10427_v21  ;;  %v4400_v21 = vperm.slane %v4388_v25, 3 }
0x1993   :  { %4353 = vrot.lane.b32.xlu1 %v4329_v33, %s6246_s28  ;;  %v10429_v51 = vpop.permute.xlu1 %4259  ;;  %v4397_v33 = vperm.slane %v4388_v25, 0 }
0x1994   :  { %4351 = vrot.lane.b32.xlu2 %v4328_v38, %s6246_s28  ;;  %14056 = vst [vmem:[#allocation45_spill] sm:$0xff] %v10429_v51  ;;  %v4398_v38 = vperm.slane %v4388_v25, 1 }
0x199b   :  { %4392 = vperm.xlu1 %6189, %v10364_v35   ;;  %v10431_v15 = vpop.permute.xlu1 %4265 }
0x199c   :  { %4357 = vrot.lane.b32.xlu2 %v4331_v1, %s6246_s28  ;;  %14057 = vst [vmem:[#allocation100_spill] sm:$0xff] %v10431_v15 }
0x19a3   :  { %6202 = vset.pattern.permute.xlu1 %v14054_v24 }
0x19f5   :  { %v10433_v8 = vpop.permute.xlu1 %4343 }
0x19f6   :  { %14058 = vst [vmem:[#allocation66_spill] sm:$0xff] %v10433_v8  ;;  %v4402_v8 = vperm.slane %v4388_v25, 5 }
0x19fd   :  { %v10435_v50 = vpop.permute.xlu1 %4347 }
0x19fe   :  { %14059 = vst [vmem:[#allocation157_spill] sm:$0xff] %v10435_v50  ;;  %v4401_v50 = vperm.slane %v4388_v25, 4 }
0x1a05   :  { %v10437_v30 = vpop.permute.xlu1 %4353 }
0x1a06   :  { %14060 = vst [vmem:[#allocation247_spill] sm:$0xff] %v10437_v30 }
0x1a0d   :  { %v4393_v40 = vpop.permute.xlu1 %4392 }
0x1a0e   :  { %v4417_v1 = vmul.f32 %v4399_v53, %v4393_v40  ;;  %v4415_v56 = vmul.f32 %v4397_v33, %v4393_v40  ;;  %v4416_v24 = vmul.f32 %v4398_v38, %v4393_v40  ;;  %v4420_v30 = vmul.f32 %v4402_v8, %v4393_v40  ;;  %v10446_v53 = vpop.permute.xlu2 %3421  ;;  %v6217_v33 = vld [vmem:[#allocation2 + $0x27] ss:$0 sm:$0xff] }
0x1a0f   :  { %v4418_v15 = vmul.f32 %v4400_v21, %v4393_v40  ;;  %v4419_v51 = vmul.f32 %v4401_v50, %v4393_v40  ;;  %v4403_v38 = vperm.slane %v4388_v25, 6 }
0x1a10   :  { %4437 = vrot.lane.b32.xlu1 %v4417_v1, %s6246_s28  ;;  %4433 = vrot.lane.b32.xlu0 %v4415_v56, %s6246_s28  ;;  %v4404_v1 = vperm.slane %v4388_v25, 7  ;;  %v4423_v56 = vmul.f32 %v6217_v33, %v4393_v40 }
0x1a11   :  { %4435 = vrot.lane.b32.xlu2 %v4416_v24, %s6246_s28  ;;  %v4421_v11 = vmul.f32 %v4403_v38, %v4393_v40 }
0x1a12   :  { %v4422_v24 = vmul.f32 %v4404_v1, %v4393_v40  ;;  %v10466_v40 = vpop.permute.xlu0 %4349 }
0x1a13   :  { %14066 = vst [vmem:[#allocation244_spill] sm:$0xff] %v10466_v40 }
0x1a16   :  { %v10451_v21 = vpop.permute.xlu2 %3478 }
0x1a17   :  { %14061 = vst [vmem:[#allocation49_spill] sm:$0xff] %v10451_v21 }
0x1a18   :  { %4443 = vrot.lane.b32.xlu1 %v4420_v30, %s6246_s28  ;;  %4439 = vrot.lane.b32.xlu0 %v4418_v15, %s6246_s28  ;;  %v14062_v15 = vmov 21  }
0x1a19   :  { %4441 = vrot.lane.b32.xlu2 %v4419_v51, %s6246_s28 }
0x1a1a   :  { %v10470_v33 = vpop.permute.xlu0 %4355 }
0x1a1b   :  { %14067 = vst [vmem:[#allocation249_spill] sm:$0xff] %v10470_v33 }
0x1a1e   :  { %v10456_v8 = vpop.permute.xlu2 %3482 }
0x1a1f   :  { %14063 = vst [vmem:[#allocation242_spill] sm:$0xff] %v10456_v8 }
0x1a20   :  { %4449 = vrot.lane.b32.xlu1 %v4423_v56, %s6246_s28  ;;  %4445 = vrot.lane.b32.xlu0 %v4421_v11, %s6246_s28 }
0x1a21   :  { %4447 = vrot.lane.b32.xlu2 %v4422_v24, %s6246_s28 }
0x1a26   :  { %v10458_v51 = vpop.permute.xlu2 %3488 }
0x1a28   :  { %4484 = vperm.xlu0 %6190, %v10364_v35  }
0x1a2e   :  { %v10460_v50 = vpop.permute.xlu2 %3494 }
0x1a30   :  { %6191 = vset.pattern.permute.xlu0 %v14062_v15 }
0x1a36   :  { %v10462_v30 = vpop.permute.xlu2 %3551 }
0x1a37   :  { %14064 = vst [vmem:[#allocation166_spill] sm:$0xff] %v10462_v30  ;;  %v4480_v30 = vld [vmem:[#allocation2 + $0x4] ss:$4 sm:$0xff] }
0x1a38   :  { %v10486_v8 = vperm.slane %v4480_v30, 1  ;;  %v10488_v40 = vperm.slane %v4480_v30, 0  ;;  %v10502_v9 = vperm.slane %v4480_v30, 2 }
0x1a3a   :  { %14074 = vst [vmem:[#allocation254_spill] sm:$0xff] %v10486_v8 }
0x1a3b   :  { %14075 = vst [vmem:[#allocation257_spill] sm:$0xff] %v10488_v40 }
0x1a3c   :  { %14078 = vst [vmem:[#allocation255_spill] sm:$0xff] %v10502_v9 }
0x1a3e   :  { %v10464_v25 = vpop.permute.xlu2 %3555 }
0x1a3f   :  { %14065 = vst [vmem:[#allocation246_spill] sm:$0xff] %v10464_v25  ;;  %v10484_v25 = vperm.slane %v4480_v30, 4 }
0x1a41   :  { %14073 = vst [vmem:[#allocation70_spill] sm:$0xff] %v10484_v25 }
0x1a46   :  { %v10468_v11 = vpop.permute.xlu2 %3561 }
0x1a4e   :  { %v10472_v38 = vpop.permute.xlu2 %3567 }
0x1a56   :  { %v10476_v56 = vpop.permute.xlu2 %3624 }
0x1a57   :  { %14069 = vst [vmem:[#allocation248_spill] sm:$0xff] %v10476_v56 }
0x1a5e   :  { %v10480_v15 = vpop.permute.xlu2 %3628 }
0x1a5f   :  { %14071 = vst [vmem:[#allocation47_spill] sm:$0xff] %v10480_v15  ;;  %v10498_v15 = vperm.slane %v4480_v30, 7 }
0x1a61   :  { %14076 = vst [vmem:[#allocation250_spill] sm:$0xff] %v10498_v15 }
0x1a66   :  { %v10490_v7 = vpop.permute.xlu2 %3634 }
0x1a6e   :  { %v10507_v2 = vpop.permute.xlu2 %3640 }
0x1a6f   :  { %14079 = vst [vmem:[#allocation86_spill] sm:$0xff] %v10507_v2 }
0x1a82   :  { %v10474_v1 = vpop.permute.xlu0 %4433 }
0x1a83   :  { %14068 = vst [vmem:[#allocation167_spill] sm:$0xff] %v10474_v1 }
0x1a8a   :  { %v10478_v24 = vpop.permute.xlu0 %4439 }
0x1a8b   :  { %14070 = vst [vmem:[#allocation251_spill] sm:$0xff] %v10478_v24 }
0x1a92   :  { %v10482_v21 = vpop.permute.xlu0 %4445 }
0x1a93   :  { %14072 = vst [vmem:[#allocation36_spill] sm:$0xff] %v10482_v21  ;;  %v10500_v21 = vperm.slane %v4480_v30, 3 }
0x1a95   :  { %14077 = vst [vmem:[#allocation172_spill] sm:$0xff] %v10500_v21 }
0x1a9a   :  { %v4485_v33 = vpop.permute.xlu0 %4484 }
0x1a9b   :  { %v4513_v1 = vmul.f32 %v10484_v25, %v4485_v33  ;;  %v4510_v56 = vmul.f32 %v10486_v8, %v4485_v33  ;;  %v4509_v24 = vmul.f32 %v10488_v40, %v4485_v33  ;;  %v4516_v42 = vmul.f32 %v10498_v15, %v4485_v33  ;;  %v10518_v40 = vpop.permute.xlu2 %3697 }
0x1a9c   :  { %v4512_v25 = vmul.f32 %v10500_v21, %v4485_v33  ;;  %v4511_v8 = vmul.f32 %v10502_v9, %v4485_v33  ;;  %14082 = vst [vmem:[#allocation252_spill] sm:$0xff] %v10518_v40 }
0x1a9d   :  { %4537 = vrot.lane.b32.xlu0 %v4513_v1, %s6251_s29  ;;  %4531 = vrot.lane.b32.xlu1 %v4510_v56, %s6251_s29  ;;  %v10512_v1 = vperm.slane %v4480_v30, 6  ;;  %v10514_v56 = vperm.slane %v4480_v30, 5 }
0x1a9e   :  { %4529 = vrot.lane.b32.xlu2 %v4509_v24, %s6251_s29 }
0x1a9f   :  { %14080 = vst [vmem:[#allocation39_spill] sm:$0xff] %v10512_v1  ;;  %v4515_v24 = vmul.f32 %v10512_v1, %v4485_v33  ;;  %v4514_v15 = vmul.f32 %v10514_v56, %v4485_v33 }
0x1aa0   :  { %14081 = vst [vmem:[#allocation74_spill] sm:$0xff] %v10514_v56  ;;  %v14085_v56 = vmov 22  }
0x1aa3   :  { %v10532_v40 = vpop.permute.xlu2 %3701 }
0x1aa4   :  { %14086 = vst [vmem:[#allocation258_spill] sm:$0xff] %v10532_v40 }
0x1aa5   :  { %4543 = vrot.lane.b32.xlu0 %v4516_v42, %s6251_s29  ;;  %4535 = vrot.lane.b32.xlu1 %v4512_v25, %s6251_s29  ;;  %v4482_v42 = vld [vmem:[#allocation2 + $0x24] ss:$4 sm:$0x3] }
0x1aa6   :  { %4533 = vrot.lane.b32.xlu2 %v4511_v8, %s6251_s29  ;;  %v10523_v25 = vperm.slane %v4482_v42, 1  ;;  %v10525_v8 = vperm.slane %v4482_v42, 0 }
0x1aa8   :  { %14083 = vst [vmem:[#allocation259_spill] sm:$0xff] %v10523_v25  ;;  %v4518_v30 = vmul.f32 %v10523_v25, %v4485_v33  ;;  %v4517_v9 = vmul.f32 %v10525_v8, %v4485_v33 }
0x1aa9   :  { %14084 = vst [vmem:[#allocation173_spill] sm:$0xff] %v10525_v8 }
0x1aad   :  { %4583 = vperm.xlu0 %6191, %v10364_v35   ;;  %4541 = vrot.lane.b32.xlu1 %v4515_v24, %s6251_s29  ;;  %v10534_v24 = vpop.permute.xlu2 %3707 }
0x1aae   :  { %4539 = vrot.lane.b32.xlu2 %v4514_v15, %s6251_s29 }
0x1ab5   :  { %4547 = vrot.lane.b32.xlu1 %v4518_v30, %s6251_s29  ;;  %6192 = vset.pattern.permute.xlu0 %v14085_v56  ;;  %v10536_v15 = vpop.permute.xlu2 %3713 }
0x1ab6   :  { %4545 = vrot.lane.b32.xlu2 %v4517_v9, %s6251_s29  ;;  %14087 = vst [vmem:[#allocation261_spill] sm:$0xff] %v10536_v15  ;;  %v4579_v15 = vld [vmem:[#allocation2 + $0x5] ss:$4 sm:$0xff] }
0x1ab7   :  { %v10564_v2 = vperm.slane %v4579_v15, 0 }
0x1ab9   :  { %14100 = vst [vmem:[#allocation269_spill] sm:$0xff] %v10564_v2 }
0x1abd   :  { %v10538_v1 = vpop.permute.xlu2 %3770 }
0x1abe   :  { %14088 = vst [vmem:[#allocation263_spill] sm:$0xff] %v10538_v1  ;;  %v10558_v1 = vperm.slane %v4579_v15, 4 }
0x1ac0   :  { %14097 = vst [vmem:[#allocation267_spill] sm:$0xff] %v10558_v1 }
0x1ac5   :  { %v10540_v42 = vpop.permute.xlu2 %3774 }
0x1ac6   :  { %14089 = vst [vmem:[#allocation163_spill] sm:$0xff] %v10540_v42  ;;  %v10560_v42 = vperm.slane %v4579_v15, 1 }
0x1ac8   :  { %14098 = vst [vmem:[#allocation179_spill] sm:$0xff] %v10560_v42 }
0x1acd   :  { %v10542_v21 = vpop.permute.xlu2 %3780 }
0x1ad5   :  { %v10544_v25 = vpop.permute.xlu2 %3786 }
0x1ad6   :  { %14090 = vst [vmem:[#allocation41_spill] sm:$0xff] %v10544_v25 }
0x1add   :  { %v10546_v33 = vpop.permute.xlu2 %3843 }
0x1ade   :  { %14091 = vst [vmem:[#allocation79_spill] sm:$0xff] %v10546_v33 }
0x1ae5   :  { %v10548_v30 = vpop.permute.xlu2 %3847 }
0x1ae6   :  { %14092 = vst [vmem:[#allocation265_spill] sm:$0xff] %v10548_v30 }
0x1aed   :  { %v10550_v56 = vpop.permute.xlu2 %3853 }
0x1aee   :  { %14093 = vst [vmem:[#allocation260_spill] sm:$0xff] %v10550_v56 }
0x1af5   :  { %v10554_v40 = vpop.permute.xlu2 %3859 }
0x1af6   :  { %14095 = vst [vmem:[#allocation264_spill] sm:$0xff] %v10554_v40  ;;  %v10574_v40 = vperm.slane %v4579_v15, 3 }
0x1af8   :  { %14102 = vst [vmem:[#allocation169_spill] sm:$0xff] %v10574_v40 }
0x1afd   :  { %v10562_v57 = vpop.permute.xlu2 %3916 }
0x1afe   :  { %14099 = vst [vmem:[#allocation266_spill] sm:$0xff] %v10562_v57  ;;  %v10576_v57 = vperm.slane %v4579_v15, 2 }
0x1b00   :  { %14103 = vst [vmem:[#allocation43_spill] sm:$0xff] %v10576_v57 }
0x1b05   :  { %v10580_v56 = vpop.permute.xlu2 %3920 }
0x1b06   :  { %14104 = vst [vmem:[#allocation84_spill] sm:$0xff] %v10580_v56 }
0x1b0d   :  { %v10594_v56 = vpop.permute.xlu2 %3926 }
0x1b0e   :  { %14107 = vst [vmem:[#allocation271_spill] sm:$0xff] %v10594_v56 }
0x1b0f   :  { %v10552_v9 = vpop.permute.xlu0 %4537 }
0x1b10   :  { %14094 = vst [vmem:[#allocation178_spill] sm:$0xff] %v10552_v9 }
0x1b17   :  { %v10556_v8 = vpop.permute.xlu0 %4543 }
0x1b18   :  { %14096 = vst [vmem:[#allocation262_spill] sm:$0xff] %v10556_v8  ;;  %v10572_v8 = vperm.slane %v4579_v15, 7 }
0x1b1a   :  { %14101 = vst [vmem:[#allocation97_spill] sm:$0xff] %v10572_v8 }
0x1b1f   :  { %v4584_v25 = vpop.permute.xlu0 %4583 }
0x1b20   :  { %v4612_v33 = vmul.f32 %v10558_v1, %v4584_v25  ;;  %v4609_v30 = vmul.f32 %v10560_v42, %v4584_v25  ;;  %v4608_v9 = vmul.f32 %v10564_v2, %v4584_v25  ;;  %v4615_v52 = vmul.f32 %v10572_v8, %v4584_v25 }
0x1b21   :  { %v4611_v1 = vmul.f32 %v10574_v40, %v4584_v25  ;;  %v4610_v2 = vmul.f32 %v10576_v57, %v4584_v25 }
0x1b22   :  { %4636 = vrot.lane.b32.xlu0 %v4612_v33, %s6251_s29  ;;  %4630 = vrot.lane.b32.xlu1 %v4609_v30, %s6251_s29  ;;  %v10586_v33 = vperm.slane %v4579_v15, 6  ;;  %v10588_v30 = vperm.slane %v4579_v15, 5 }
0x1b23   :  { %4628 = vrot.lane.b32.xlu2 %v4608_v9, %s6251_s29 }
0x1b24   :  { %14105 = vst [vmem:[#allocation168_spill] sm:$0xff] %v10586_v33  ;;  %v4614_v9 = vmul.f32 %v10586_v33, %v4584_v25  ;;  %v4613_v8 = vmul.f32 %v10588_v30, %v4584_v25 }
0x1b25   :  { %14106 = vst [vmem:[#allocation8_spill] sm:$0xff] %v10588_v30  ;;  %v14110_v30 = vmov 23  }
0x1b2a   :  { %4642 = vrot.lane.b32.xlu0 %v4615_v52, %s6251_s29  ;;  %4634 = vrot.lane.b32.xlu1 %v4611_v1, %s6251_s29  ;;  %v4581_v52 = vld [vmem:[#allocation2 + $0x25] ss:$4 sm:$0x3] }
0x1b2b   :  { %4632 = vrot.lane.b32.xlu2 %v4610_v2, %s6251_s29  ;;  %v10597_v1 = vperm.slane %v4581_v52, 1  ;;  %v10599_v2 = vperm.slane %v4581_v52, 0 }
0x1b2d   :  { %14108 = vst [vmem:[#allocation3_spill] sm:$0xff] %v10597_v1  ;;  %v4617_v15 = vmul.f32 %v10597_v1, %v4584_v25  ;;  %v4616_v57 = vmul.f32 %v10599_v2, %v4584_v25 }
0x1b2e   :  { %14109 = vst [vmem:[#allocation76_spill] sm:$0xff] %v10599_v2 }
0x1b32   :  { %4682 = vperm.xlu0 %6192, %v10364_v35   ;;  %4640 = vrot.lane.b32.xlu1 %v4614_v9, %s6251_s29  ;;  %v10606_v9 = vpop.permute.xlu2 %3932 }
0x1b33   :  { %4638 = vrot.lane.b32.xlu2 %v4613_v8, %s6251_s29  ;;  %14111 = vst [vmem:[#allocation88_spill] sm:$0xff] %v10606_v9 }
0x1b3a   :  { %4646 = vrot.lane.b32.xlu1 %v4617_v15, %s6251_s29  ;;  %6193 = vset.pattern.permute.xlu0 %v14110_v30  ;;  %v10608_v33 = vpop.permute.xlu2 %3989 }
0x1b3b   :  { %4644 = vrot.lane.b32.xlu2 %v4616_v57, %s6251_s29  ;;  %14112 = vst [vmem:[#allocation273_spill] sm:$0xff] %v10608_v33 }
0x1b42   :  { %v10610_v8 = vpop.permute.xlu2 %3993 }
0x1b43   :  { %14113 = vst [vmem:[#allocation165_spill] sm:$0xff] %v10610_v8  ;;  %v4678_v8 = vld [vmem:[#allocation2 + $0x6] ss:$4 sm:$0xff] }
0x1b44   :  { %v10632_v9 = vperm.slane %v4678_v8, 4 }
0x1b46   :  { %14124 = vst [vmem:[#allocation98_spill] sm:$0xff] %v10632_v9 }
0x1b4a   :  { %v10612_v40 = vpop.permute.xlu2 %3999 }
0x1b4b   :  { %14114 = vst [vmem:[#allocation175_spill] sm:$0xff] %v10612_v40  ;;  %v10636_v40 = vperm.slane %v4678_v8, 0 }
0x1b4d   :  { %14126 = vst [vmem:[#allocation275_spill] sm:$0xff] %v10636_v40 }
0x1b52   :  { %v10614_v52 = vpop.permute.xlu2 %4005 }
0x1b53   :  { %14115 = vst [vmem:[#allocation93_spill] sm:$0xff] %v10614_v52  ;;  %v10634_v52 = vperm.slane %v4678_v8, 1 }
0x1b55   :  { %14125 = vst [vmem:[#allocation270_spill] sm:$0xff] %v10634_v52 }
0x1b5a   :  { %v10616_v42 = vpop.permute.xlu2 %4062 }
0x1b5b   :  { %14116 = vst [vmem:[#allocation82_spill] sm:$0xff] %v10616_v42 }
0x1b62   :  { %v10618_v1 = vpop.permute.xlu2 %4066 }
0x1b63   :  { %14117 = vst [vmem:[#allocation92_spill] sm:$0xff] %v10618_v1 }
0x1b6a   :  { %v10620_v25 = vpop.permute.xlu2 %4072 }
0x1b6b   :  { %14118 = vst [vmem:[#allocation268_spill] sm:$0xff] %v10620_v25  ;;  %v10650_v25 = vperm.slane %v4678_v8, 2 }
0x1b6d   :  { %14130 = vst [vmem:[#allocation180_spill] sm:$0xff] %v10650_v25 }
0x1b72   :  { %v10622_v15 = vpop.permute.xlu2 %4078 }
0x1b73   :  { %14119 = vst [vmem:[#allocation5_spill] sm:$0xff] %v10622_v15 }
0x1b7a   :  { %v10624_v30 = vpop.permute.xlu2 %4157 }
0x1b7b   :  { %14120 = vst [vmem:[#allocation184_spill] sm:$0xff] %v10624_v30 }
0x1b82   :  { %v10628_v2 = vpop.permute.xlu2 %4161 }
0x1b83   :  { %14122 = vst [vmem:[#allocation80_spill] sm:$0xff] %v10628_v2  ;;  %v10646_v2 = vperm.slane %v4678_v8, 7 }
0x1b85   :  { %14128 = vst [vmem:[#allocation274_spill] sm:$0xff] %v10646_v2 }
0x1b8a   :  { %v10638_v1 = vpop.permute.xlu2 %4167 }
0x1b8b   :  { %14127 = vst [vmem:[#allocation185_spill] sm:$0xff] %v10638_v1 }
0x1b92   :  { %v10655_v56 = vpop.permute.xlu2 %4173 }
0x1b93   :  { %14131 = vst [vmem:[#allocation6_spill] sm:$0xff] %v10655_v56 }
0x1b94   :  { %v10626_v57 = vpop.permute.xlu0 %4636 }
0x1b95   :  { %14121 = vst [vmem:[#allocation272_spill] sm:$0xff] %v10626_v57 }
0x1b9c   :  { %v10630_v33 = vpop.permute.xlu0 %4642 }
0x1b9d   :  { %14123 = vst [vmem:[#allocation85_spill] sm:$0xff] %v10630_v33  ;;  %v10648_v33 = vperm.slane %v4678_v8, 3 }
0x1b9f   :  { %14129 = vst [vmem:[#allocation95_spill] sm:$0xff] %v10648_v33 }
0x1ba4   :  { %v4683_v42 = vpop.permute.xlu0 %4682 }
0x1ba5   :  { %v4711_v15 = vmul.f32 %v10632_v9, %v4683_v42  ;;  %v4708_v30 = vmul.f32 %v10634_v52, %v4683_v42  ;;  %v4707_v57 = vmul.f32 %v10636_v40, %v4683_v42  ;;  %v4714_v1 = vmul.f32 %v10646_v2, %v4683_v42  ;;  %v10666_v40 = vpop.permute.xlu2 %4251 }
0x1ba6   :  { %v4710_v9 = vmul.f32 %v10648_v33, %v4683_v42  ;;  %v4709_v52 = vmul.f32 %v10650_v25, %v4683_v42  ;;  %14134 = vst [vmem:[#allocation277_spill] sm:$0xff] %v10666_v40 }
0x1ba7   :  { %4735 = vrot.lane.b32.xlu0 %v4711_v15, %s6251_s29  ;;  %4729 = vrot.lane.b32.xlu1 %v4708_v30, %s6251_s29  ;;  %v10660_v15 = vperm.slane %v4678_v8, 6  ;;  %v10662_v30 = vperm.slane %v4678_v8, 5 }
0x1ba8   :  { %4727 = vrot.lane.b32.xlu2 %v4707_v57, %s6251_s29 }
0x1ba9   :  { %14132 = vst [vmem:[#allocation164_spill] sm:$0xff] %v10660_v15  ;;  %v4713_v57 = vmul.f32 %v10660_v15, %v4683_v42  ;;  %v4712_v2 = vmul.f32 %v10662_v30, %v4683_v42 }
0x1baa   :  { %14133 = vst [vmem:[#allocation103_spill] sm:$0xff] %v10662_v30  ;;  %v14137_v30 = vmov 24  }
0x1bad   :  { %v10680_v40 = vpop.permute.xlu2 %4257 }
0x1bae   :  { %14138 = vst [vmem:[#allocation11_spill] sm:$0xff] %v10680_v40 }
0x1baf   :  { %4741 = vrot.lane.b32.xlu0 %v4714_v1, %s6251_s29  ;;  %4733 = vrot.lane.b32.xlu1 %v4710_v9, %s6251_s29  ;;  %v4680_v1 = vld [vmem:[#allocation2 + $0x26] ss:$4 sm:$0x3] }
0x1bb0   :  { %4731 = vrot.lane.b32.xlu2 %v4709_v52, %s6251_s29  ;;  %v10671_v9 = vperm.slane %v4680_v1, 1  ;;  %v10673_v52 = vperm.slane %v4680_v1, 0 }
0x1bb2   :  { %14135 = vst [vmem:[#allocation176_spill] sm:$0xff] %v10671_v9  ;;  %v4716_v8 = vmul.f32 %v10671_v9, %v4683_v42  ;;  %v4715_v25 = vmul.f32 %v10673_v52, %v4683_v42 }
0x1bb3   :  { %14136 = vst [vmem:[#allocation186_spill] sm:$0xff] %v10673_v52 }
0x1bb7   :  { %4781 = vperm.xlu0 %6193, %v10364_v35   ;;  %4739 = vrot.lane.b32.xlu1 %v4713_v57, %s6251_s29  ;;  %v10682_v57 = vpop.permute.xlu2 %4263 }
0x1bb8   :  { %4737 = vrot.lane.b32.xlu2 %v4712_v2, %s6251_s29  ;;  %14139 = vst [vmem:[#allocation90_spill] sm:$0xff] %v10682_v57 }
0x1bbf   :  { %4745 = vrot.lane.b32.xlu1 %v4716_v8, %s6251_s29  ;;  %6194 = vset.pattern.permute.xlu0 %v14137_v30  ;;  %v10684_v2 = vpop.permute.xlu2 %4341  ;;  %v10698_v30 = vpop.permute.xlu1 %4437 }
0x1bc0   :  { %4743 = vrot.lane.b32.xlu2 %v4715_v25, %s6251_s29  ;;  %14140 = vst [vmem:[#allocation107_spill] sm:$0xff] %v10684_v2 }
0x1bc1   :  { %14147 = vst [vmem:[#allocation181_spill] sm:$0xff] %v10698_v30 }
0x1bc7   :  { %v10686_v15 = vpop.permute.xlu2 %4345  ;;  %v10704_v57 = vpop.permute.xlu1 %4443 }
0x1bc8   :  { %14141 = vst [vmem:[#allocation279_spill] sm:$0xff] %v10686_v15 }
0x1bc9   :  { %14150 = vst [vmem:[#allocation109_spill] sm:$0xff] %v10704_v57 }
0x1bcf   :  { %v10688_v1 = vpop.permute.xlu2 %4351  ;;  %v10710_v56 = vpop.permute.xlu1 %4449 }
0x1bd0   :  { %14142 = vst [vmem:[#allocation171_spill] sm:$0xff] %v10688_v1 }
0x1bd1   :  { %14153 = vst [vmem:[#allocation276_spill] sm:$0xff] %v10710_v56 }
0x1bd7   :  { %v10690_v33 = vpop.permute.xlu2 %4357  ;;  %v10723_v57 = vpop.permute.xlu1 %4531 }
0x1bd8   :  { %14143 = vst [vmem:[#allocation96_spill] sm:$0xff] %v10690_v33  ;;  %v4777_v33 = vld [vmem:[#allocation2 + $0x7] ss:$4 sm:$0xff] }
0x1bd9   :  { %v10718_v1 = vperm.slane %v4777_v33, 0  ;;  %14158 = vst [vmem:[#allocation105_spill] sm:$0xff] %v10723_v57  ;;  %v10730_v56 = vperm.slane %v4777_v33, 3 }
0x1bdb   :  { %14157 = vst [vmem:[#allocation108_spill] sm:$0xff] %v10718_v1 }
0x1bdc   :  { %14160 = vst [vmem:[#allocation205_spill] sm:$0xff] %v10730_v56 }
0x1bdf   :  { %v10692_v9 = vpop.permute.xlu2 %4435 }
0x1be0   :  { %14144 = vst [vmem:[#allocation99_spill] sm:$0xff] %v10692_v9  ;;  %v10712_v9 = vperm.slane %v4777_v33, 4 }
0x1be2   :  { %14154 = vst [vmem:[#allocation190_spill] sm:$0xff] %v10712_v9 }
0x1be7   :  { %v10694_v42 = vpop.permute.xlu2 %4441 }
0x1be8   :  { %14145 = vst [vmem:[#allocation91_spill] sm:$0xff] %v10694_v42  ;;  %v10714_v42 = vperm.slane %v4777_v33, 1 }
0x1bea   :  { %14155 = vst [vmem:[#allocation280_spill] sm:$0xff] %v10714_v42 }
0x1bef   :  { %v10696_v8 = vpop.permute.xlu2 %4447 }
0x1bf0   :  { %14146 = vst [vmem:[#allocation194_spill] sm:$0xff] %v10696_v8 }
0x1bf7   :  { %v10700_v25 = vpop.permute.xlu2 %4529 }
0x1bf8   :  { %14148 = vst [vmem:[#allocation110_spill] sm:$0xff] %v10700_v25 }
0x1bff   :  { %v10706_v2 = vpop.permute.xlu2 %4533 }
0x1c00   :  { %14151 = vst [vmem:[#allocation170_spill] sm:$0xff] %v10706_v2 }
0x1c07   :  { %v10716_v8 = vpop.permute.xlu2 %4539 }
0x1c08   :  { %14156 = vst [vmem:[#allocation78_spill] sm:$0xff] %v10716_v8  ;;  %v10732_v8 = vperm.slane %v4777_v33, 2 }
0x1c0a   :  { %14161 = vst [vmem:[#allocation278_spill] sm:$0xff] %v10732_v8 }
0x1c0f   :  { %v10736_v40 = vpop.permute.xlu2 %4545 }
0x1c10   :  { %14162 = vst [vmem:[#allocation284_spill] sm:$0xff] %v10736_v40 }
0x1c19   :  { %v10702_v52 = vpop.permute.xlu0 %4735 }
0x1c1a   :  { %14149 = vst [vmem:[#allocation281_spill] sm:$0xff] %v10702_v52 }
0x1c21   :  { %v10708_v15 = vpop.permute.xlu0 %4741 }
0x1c22   :  { %14152 = vst [vmem:[#allocation125_spill] sm:$0xff] %v10708_v15  ;;  %v10728_v15 = vperm.slane %v4777_v33, 7 }
0x1c24   :  { %14159 = vst [vmem:[#allocation174_spill] sm:$0xff] %v10728_v15 }
0x1c29   :  { %v4782_v30 = vpop.permute.xlu0 %4781 }
0x1c2a   :  { %v4810_v25 = vmul.f32 %v10712_v9, %v4782_v30  ;;  %v4807_v52 = vmul.f32 %v10714_v42, %v4782_v30  ;;  %v4806_v2 = vmul.f32 %v10718_v1, %v4782_v30  ;;  %v4813_v9 = vmul.f32 %v10728_v15, %v4782_v30  ;;  %v10749_v1 = vpop.permute.xlu2 %4628 }
0x1c2b   :  { %v4809_v42 = vmul.f32 %v10730_v56, %v4782_v30  ;;  %v4808_v57 = vmul.f32 %v10732_v8, %v4782_v30  ;;  %14165 = vst [vmem:[#allocation282_spill] sm:$0xff] %v10749_v1  ;;  %v14169_v1 = vmov 25  }
0x1c2c   :  { %4834 = vrot.lane.b32.xlu0 %v4810_v25, %s6251_s29  ;;  %4828 = vrot.lane.b32.xlu1 %v4807_v52, %s6251_s29  ;;  %v10742_v52 = vpop.permute.xlu1 %4535  ;;  %v10746_v25 = vperm.slane %v4777_v33, 5 }
0x1c2d   :  { %4826 = vrot.lane.b32.xlu2 %v4806_v2, %s6251_s29  ;;  %v10744_v2 = vperm.slane %v4777_v33, 6 }
0x1c2e   :  { %14164 = vst [vmem:[#allocation191_spill] sm:$0xff] %v10746_v25  ;;  %v4811_v56 = vmul.f32 %v10746_v25, %v4782_v30 }
0x1c2f   :  { %14163 = vst [vmem:[#allocation106_spill] sm:$0xff] %v10744_v2  ;;  %v4812_v15 = vmul.f32 %v10744_v2, %v4782_v30 }
0x1c34   :  { %4840 = vrot.lane.b32.xlu0 %v4813_v9, %s6251_s29  ;;  %4832 = vrot.lane.b32.xlu1 %v4809_v42, %s6251_s29  ;;  %v4779_v9 = vld [vmem:[#allocation2 + $0x27] ss:$4 sm:$0x3] }
0x1c35   :  { %4830 = vrot.lane.b32.xlu2 %v4808_v57, %s6251_s29  ;;  %v10755_v57 = vpop.permute.xlu1 %4541  ;;  %v10757_v42 = vperm.slane %v4779_v9, 1  ;;  %v10759_v8 = vperm.slane %v4779_v9, 0 }
0x1c36   :  { %14166 = vst [vmem:[#allocation123_spill] sm:$0xff] %v10755_v57 }
0x1c37   :  { %14167 = vst [vmem:[#allocation101_spill] sm:$0xff] %v10757_v42  ;;  %v4815_v33 = vmul.f32 %v10757_v42, %v4782_v30  ;;  %v4814_v2 = vmul.f32 %v10759_v8, %v4782_v30 }
0x1c38   :  { %14168 = vst [vmem:[#allocation210_spill] sm:$0xff] %v10759_v8  ;;  %v3079_v8 = vmul.f32 %v9861_v31, %v9850_v45 }
0x1c3c   :  { %4876 = vperm.xlu0 %6194, %v10364_v35   ;;  %4838 = vrot.lane.b32.xlu1 %v4812_v15, %s6251_s29  ;;  %v10765_v35 = vpop.permute.xlu2 %4632 }
0x1c3d   :  { %4836 = vrot.lane.b32.xlu2 %v4811_v56, %s6251_s29  ;;  %14170 = vst [vmem:[#allocation287_spill] sm:$0xff] %v10765_v35  ;;  %v10768_v56 = vpop.permute.xlu1 %4547 }
0x1c3e   :  { %14171 = vst [vmem:[#allocation289_spill] sm:$0xff] %v10768_v56 }
0x1c44   :  { %4844 = vrot.lane.b32.xlu1 %v4815_v33, %s6251_s29  ;;  %6195 = vset.pattern.permute.xlu0 %v14169_v1  ;;  %v10770_v15 = vpop.permute.xlu2 %4638  ;;  %v3080_v1 = vmul.f32 %v9887_v27, %v9850_v45  ;;  %v3123_v27 = vmul.f32 %v9935_v16, %v10006_v13  ;;  %v3169_v16 = vmul.f32 %v9981_v18, %v9856_v37 }
0x1c45   :  { %4842 = vrot.lane.b32.xlu2 %v4814_v2, %s6251_s29  ;;  %14172 = vst [vmem:[#allocation114_spill] sm:$0xff] %v10770_v15  ;;  %v10772_v25 = vpop.permute.xlu1 %4630  ;;  %v3120_v2 = vmul.f32 %v9923_v48, %v10006_v13  ;;  %v3503_v18 = vsel %vm266_vm0, %v10458_v51, %v10273_v60 }
0x1c46   :  { %14173 = vst [vmem:[#allocation102_spill] sm:$0xff] %v10772_v25  ;;  %v3170_v25 = vmul.f32 %v9979_v22, %v9856_v37  ;;  %v3284_v22 = vsel %vm266_vm0, %v10013_v10, %v9955_v6 }
0x1c47   :  { %v3130_v56 = vadd.f32 %v3120_v2, %v3080_v1  ;;  %v3220_v1 = vmul.f32 %v10057_v29, %v9903_v43  ;;  %v3173_v29 = vmul.f32 %v9991_v34, %v9856_v37  ;;  %v3219_v34 = vmul.f32 %v10035_v12, %v9903_v43 }
0x1c4c   :  { %v10774_v9 = vpop.permute.xlu2 %4644 }
0x1c4d   :  { %14174 = vst [vmem:[#allocation7_spill] sm:$0xff] %v10774_v9  ;;  %v10776_v57 = vpop.permute.xlu1 %4634 }
0x1c54   :  { %v10778_v42 = vpop.permute.xlu2 %4727 }
0x1c55   :  { %14175 = vst [vmem:[#allocation115_spill] sm:$0xff] %v10778_v42  ;;  %v10780_v30 = vpop.permute.xlu1 %4640  ;;  %v3119_v42 = vmul.f32 %v9921_v63, %v10006_v13 }
0x1c56   :  { %14176 = vst [vmem:[#allocation291_spill] sm:$0xff] %v10780_v30  ;;  %v3180_v30 = vadd.f32 %v3170_v25, %v3130_v56  ;;  %v3082_v56 = vmul.f32 %v9873_v23, %v9850_v45  ;;  %v3223_v23 = vmul.f32 %v10066_v28, %v9903_v43  ;;  %v3356_v28 = vsel %vm266_vm0, %v9961_v32, %v10233_v4 }
0x1c57   :  { %v3129_v31 = vadd.f32 %v3119_v42, %v3079_v8  ;;  %v3430_v8 = vsel %vm266_vm0, %v10439_v54, %v10260_v47 }
0x1c58   :  { %v3230_v2 = vadd.f32 %v3220_v1, %v3180_v30  ;;  %v3122_v30 = vmul.f32 %v9933_v39, %v10006_v13  ;;  %v3287_v39 = vsel %vm266_vm0, %v10015_v17, %v9957_v44  ;;  %v14197_v44 = vld [vmem:[#allocation155_spill] sm:$0xff] }
0x1c59   :  { %v3179_v42 = vadd.f32 %v3169_v16, %v3129_v31 }
0x1c5a   :  { %v3303_v25 = vadd.f32 %v3284_v22, %v3230_v2  ;;  %v3283_v22 = vsel %vm266_vm0, %v9905_v58, %v10013_v10  ;;  %v3132_v12 = vadd.f32 %v3122_v30, %v3082_v56  ;;  %v3360_v10 = vsel %vm266_vm0, %v10237_v55, %v10023_v20 }
0x1c5b   :  { %v3229_v2 = vadd.f32 %v3219_v34, %v3179_v42 }
0x1c5c   :  { %v10782_v33 = vpop.permute.xlu2 %4731 }
0x1c5d   :  { %14177 = vst [vmem:[#allocation182_spill] sm:$0xff] %v10782_v33  ;;  %v10788_v35 = vpop.permute.xlu1 %4646  ;;  %v3083_v33 = vmul.f32 %v9896_v5, %v9850_v45  ;;  %v3357_v5 = vsel %vm266_vm0, %v10233_v4, %v10021_v41  ;;  %v3429_v4 = vsel %vm266_vm0, %v10027_v19, %v10439_v54  ;;  %v3506_v54 = vsel %vm266_vm0, %v10460_v50, %v10275_v36  ;;  %v14191_v36 = vld [vmem:[#allocation145_spill] sm:$0xff] }
0x1c5e   :  { %14178 = vst [vmem:[#allocation188_spill] sm:$0xff] %v10788_v35 }
0x1c5f   :  { %v3133_v35 = vadd.f32 %v3123_v27, %v3083_v33  ;;  %v3376_v27 = vadd.f32 %v3357_v5, %v3303_v25  ;;  %v3649_v25 = vsel %vm559_vm1, %v10490_v7, %v10298_v46  ;;  %v14211_v46 = vld [vmem:[#allocation150_spill] sm:$0xff] }
0x1c61   :  { %v3183_v33 = vadd.f32 %v3173_v29, %v3133_v35  ;;  %v3449_v1 = vadd.f32 %v3430_v8, %v3376_v27  ;;  %v3576_v35 = vsel %vm559_vm1, %v10468_v11, %v10281_v14  ;;  %v3302_v29 = vadd.f32 %v3283_v22, %v3229_v2 }
0x1c62   :  { %v3172_v8 = vmul.f32 %v9993_v49, %v9856_v37  ;;  %v3722_v27 = vsel %vm559_vm1, %v10534_v24, %v10323_v3  ;;  %v14210_v3 = vld [vmem:[#allocation185_spill] sm:$0xff] }
0x1c63   :  { %v3233_v5 = vadd.f32 %v3223_v23, %v3183_v33  ;;  %v3522_v16 = vadd.f32 %v3503_v18, %v3449_v1  ;;  %v3433_v33 = vsel %vm266_vm0, %v10446_v53, %v10267_v61  ;;  %v3375_v34 = vadd.f32 %v3356_v28, %v3302_v29  ;;  %v14182_v1 = vld [vmem:[#allocation75_spill] sm:$0xff]  ;;  %v14185_v29 = vld [vmem:[#allocation260_spill] sm:$0xff] }
0x1c64   :  { %v10800_v48 = vpop.permute.xlu2 %4737  ;;  %v3182_v18 = vadd.f32 %v3172_v8, %v3132_v12  ;;  %v3502_v22 = vsel %vm266_vm0, %v14182_v1, %v10458_v51  ;;  %v14184_v51 = vld [vmem:[#allocation221_spill] sm:$0xff]  ;;  %v3868_v8 = vsel %vm852_vm2, %v14185_v29, %v10341_v62  ;;  %v14192_v61 = vld [vmem:[#allocation271_spill] sm:$0xff] }
0x1c65   :  { %14179 = vst [vmem:[#allocation285_spill] sm:$0xff] %v10800_v48  ;;  %v10807_v63 = vpop.permute.xlu1 %4729  ;;  %v3306_v42 = vadd.f32 %v3287_v39, %v3233_v5  ;;  %v3595_v56 = vadd.f32 %v3576_v35, %v3522_v16  ;;  %v3795_v39 = vsel %vm559_vm1, %v10542_v21, %v10331_v26  ;;  %v3222_v35 = vmul.f32 %v10045_v0, %v9903_v43  ;;  %v14183_v16 = vld [vmem:[#allocation31_spill] sm:$0xff]  ;;  %v14204_v62 = vld [vmem:[#allocation241_spill] sm:$0xff]  ;;  %v14209_v26 = vld [vmem:[#allocation264_spill] sm:$0xff] }
0x1c66   :  { %14180 = vst [vmem:[#allocation196_spill] sm:$0xff] %v10807_v63  ;;  %v3448_v2 = vadd.f32 %v3429_v4, %v3375_v34  ;;  %v3286_v28 = vsel %vm266_vm0, %v14183_v16, %v10015_v17  ;;  %v14187_v17 = vld [vmem:[#allocation111_spill] sm:$0xff]  ;;  %v3941_v20 = vsel %vm852_vm2, %v14192_v61, %v14191_v36 }
0x1c67   :  { %v3379_v23 = vadd.f32 %v3360_v10, %v3306_v42  ;;  %v3668_v49 = vadd.f32 %v3649_v25, %v3595_v56  ;;  %v3575_v10 = vsel %vm559_vm1, %v14184_v51, %v10468_v11  ;;  %v3579_v25 = vsel %vm559_vm1, %v10472_v38, %v10283_v59  ;;  %v14188_v11 = vld [vmem:[#allocation42_spill] sm:$0xff] }
0x1c68   :  { %v3232_v42 = vadd.f32 %v3222_v35, %v3182_v18  ;;  %v3521_v56 = vadd.f32 %v3502_v22, %v3448_v2  ;;  %v3648_v34 = vsel %vm559_vm1, %v14188_v11, %v10490_v7  ;;  %v14193_v35 = vld [vmem:[#allocation65_spill] sm:$0xff]  ;;  %v14194_v2 = vld [vmem:[#allocation220_spill] sm:$0xff] }
0x1c69   :  { %v3452_v12 = vadd.f32 %v3433_v33, %v3379_v23  ;;  %v3741_v5 = vadd.f32 %v3722_v27, %v3668_v49  ;;  %v3359_v27 = vsel %vm266_vm0, %v14187_v17, %v10237_v55  ;;  %v14189_v23 = vld [vmem:[#allocation159_spill] sm:$0xff]  ;;  %v14190_v49 = vld [vmem:[#allocation86_spill] sm:$0xff]  ;;  %v3432_v55 = vsel %vm266_vm0, %v14193_v35, %v10446_v53 }
0x1c6a   :  { %v3652_v59 = vsel %vm559_vm1, %v14190_v49, %v14189_v23  ;;  %v3305_v18 = vadd.f32 %v3286_v28, %v3232_v42  ;;  %v3594_v22 = vadd.f32 %v3575_v10, %v3521_v56  ;;  %v3721_v7 = vsel %vm559_vm1, %v14194_v2, %v10534_v24  ;;  %v14200_v53 = vld [vmem:[#allocation131_spill] sm:$0xff]  ;;  %v14201_v24 = vld [vmem:[#allocation224_spill] sm:$0xff] }
0x1c6b   :  { %v3525_v4 = vadd.f32 %v3506_v54, %v3452_v12  ;;  %v3814_v33 = vadd.f32 %v3795_v39, %v3741_v5  ;;  %v14195_v12 = vld [vmem:[#allocation230_spill] sm:$0xff]  ;;  %v14196_v5 = vld [vmem:[#allocation261_spill] sm:$0xff]  ;;  %v3505_v56 = vsel %vm266_vm0, %v14200_v53, %v10460_v50 }
0x1c6c   :  { %v10839_v31 = vpop.permute.xlu2 %4743  ;;  %v3725_v23 = vsel %vm559_vm1, %v14196_v5, %v14195_v12  ;;  %v3378_v28 = vadd.f32 %v3359_v27, %v3305_v18  ;;  %v3667_v10 = vadd.f32 %v3648_v34, %v3594_v22  ;;  %v14203_v12 = vld [vmem:[#allocation41_spill] sm:$0xff]  ;;  %v14206_v22 = vld [vmem:[#allocation216_spill] sm:$0xff] }
0x1c6d   :  { %14181 = vst [vmem:[#allocation290_spill] sm:$0xff] %v10839_v31  ;;  %v10852_v30 = vpop.permute.xlu1 %4733  ;;  %v3598_v54 = vadd.f32 %v3579_v25, %v3525_v4  ;;  %v3887_v39 = vadd.f32 %v3868_v8, %v3814_v33  ;;  %v3794_v4 = vsel %vm559_vm1, %v14201_v24, %v10542_v21  ;;  %v14202_v33 = vld [vmem:[#allocation232_spill] sm:$0xff]  ;;  %v3578_v50 = vsel %vm559_vm1, %v14206_v22, %v10472_v38  ;;  %v14217_v24 = vld [vmem:[#allocation11_spill] sm:$0xff] }
0x1c6e   :  { %v3798_v36 = vsel %vm559_vm1, %v14203_v12, %v14202_v33 }
0x1c6f   :  { %v3671_v25 = vadd.f32 %v3652_v59, %v3598_v54  ;;  %v3960_v8 = vadd.f32 %v3941_v20, %v3887_v39  ;;  %v3451_v59 = vadd.f32 %v3432_v55, %v3378_v28  ;;  %v3740_v20 = vadd.f32 %v3721_v7, %v3667_v10  ;;  %v14207_v54 = vld [vmem:[#allocation69_spill] sm:$0xff]  ;;  %v14208_v39 = vld [vmem:[#allocation35_spill] sm:$0xff]  ;;  %v14213_v10 = vld [vmem:[#allocation122_spill] sm:$0xff] }
0x1c70   :  { %v3867_v21 = vsel %vm852_vm2, %v14207_v54, %v14185_v29  ;;  %v3871_v33 = vsel %vm852_vm2, %v14209_v26, %v14208_v39  ;;  %v14212_v28 = vld [vmem:[#allocation147_spill] sm:$0xff]  ;;  %v3940_v29 = vsel %vm852_vm2, %v14213_v10, %v14192_v61  ;;  %v14216_v54 = vld [vmem:[#allocation45_spill] sm:$0xff]  ;;  %v14220_v61 = vld [vmem:[#allocation20_spill] sm:$0xff] }
0x1c71   :  { %v3744_v34 = vadd.f32 %v3725_v23, %v3671_v25  ;;  %v3524_v55 = vadd.f32 %v3505_v56, %v3451_v59  ;;  %v3813_v7 = vadd.f32 %v3794_v4, %v3740_v20  ;;  %v3651_v38 = vsel %vm559_vm1, %v14212_v28, %v14190_v49  ;;  %v14214_v25 = vld [vmem:[#allocation83_spill] sm:$0xff]  ;;  %v14219_v49 = vld [vmem:[#allocation218_spill] sm:$0xff] }
0x1c72   :  { %v3724_v20 = vsel %vm559_vm1, %v14219_v49, %v14196_v5  ;;  %v14223_v28 = vld [vmem:[#allocation171_spill] sm:$0xff] }
0x1c73   :  { %v3817_v23 = vadd.f32 %v3798_v36, %v3744_v34  ;;  %v3597_v36 = vadd.f32 %v3578_v50, %v3524_v55  ;;  %v3886_v4 = vadd.f32 %v3867_v21, %v3813_v7  ;;  %v14225_v55 = vld [vmem:[#allocation112_spill] sm:$0xff]  ;;  %v14226_v7 = vld [vmem:[#allocation130_spill] sm:$0xff]  ;;  %v14230_v49 = vld [vmem:[#allocation91_spill] sm:$0xff] }
0x1c74   :  { %v3797_v5 = vsel %vm559_vm1, %v14225_v55, %v14203_v12  ;;  %v14232_v12 = vld [vmem:[#allocation313_spill] sm:$0xff]  ;;  %v14236_v55 = vld [vmem:[#allocation78_spill] sm:$0xff] }
0x1c75   :  { %v10912_v42 = vpop.permute.xlu1 %4739  ;;  %v3670_v50 = vadd.f32 %v3651_v38, %v3597_v36  ;;  %v3959_v21 = vadd.f32 %v3940_v29, %v3886_v4  ;;  %v3870_v4 = vsel %vm852_vm2, %v14232_v12, %v14209_v26 }
0x1c76   :  { %14199 = vst [vmem:[#allocation293_spill] sm:$0xff] %v10912_v42 }
0x1c77   :  { %v3743_v38 = vadd.f32 %v3724_v20, %v3670_v50 }
0x1c7d   :  { %v10976_v36 = vpop.permute.xlu1 %4745 }
0x1c7e   :  { %14231 = vst [vmem:[#allocation104_spill] sm:$0xff] %v10976_v36  ;;  %v14240_v36 = vld [vmem:[#allocation100_spill] sm:$0xff] }
0x1c87   :  { %v10886_v0 = vpop.permute.xlu2 %4826 }
0x1c88   :  { %14186 = vst [vmem:[#allocation288_spill] sm:$0xff] %v10886_v0  ;;  %v14198_v0 = vld [vmem:[#allocation175_spill] sm:$0xff] }
0x1c89   :  { %v4014_v63 = vsel %vm852_vm2, %v14198_v0, %v14197_v44  ;;  %v14205_v44 = vld [vmem:[#allocation268_spill] sm:$0xff]  ;;  %v4013_v34 = vsel %vm852_vm2, %v14220_v61, %v14198_v0  ;;  %v14229_v61 = vld [vmem:[#allocation109_spill] sm:$0xff] }
0x1c8a   :  { %v4087_v27 = vsel %vm852_vm2, %v14205_v44, %v14204_v62  ;;  %v4033_v18 = vadd.f32 %v4014_v63, %v3960_v8  ;;  %v4179_v62 = vsel %vm1165_vm3, %v14211_v46, %v14210_v3  ;;  %v14215_v8 = vld [vmem:[#allocation88_spill] sm:$0xff]  ;;  %v4271_v3 = vsel %vm1165_vm3, %v14217_v24, %v14216_v54 }
0x1c8b   :  { %v3944_v39 = vsel %vm852_vm2, %v14215_v8, %v14214_v25  ;;  %v14222_v25 = vld [vmem:[#allocation93_spill] sm:$0xff]  ;;  %v14224_v54 = vld [vmem:[#allocation244_spill] sm:$0xff]  ;;  %v4086_v0 = vsel %vm852_vm2, %v14226_v7, %v14205_v44  ;;  %v4032_v29 = vadd.f32 %v4013_v34, %v3959_v21 }
0x1c8c   :  { %v4106_v63 = vadd.f32 %v4087_v27, %v4033_v18  ;;  %v3890_v27 = vadd.f32 %v3871_v33, %v3817_v23  ;;  %v14221_v18 = vld [vmem:[#allocation160_spill] sm:$0xff]  ;;  %v14227_v23 = vld [vmem:[#allocation139_spill] sm:$0xff]  ;;  %v14234_v44 = vld [vmem:[#allocation161_spill] sm:$0xff] }
0x1c8d   :  { %v4017_v10 = vsel %vm852_vm2, %v14222_v25, %v14221_v18  ;;  %v14238_v21 = vld [vmem:[#allocation148_spill] sm:$0xff] }
0x1c8e   :  { %v4198_v59 = vadd.f32 %v4179_v62, %v4106_v63  ;;  %v3963_v33 = vadd.f32 %v3944_v39, %v3890_v27  ;;  %v14228_v63 = vld [vmem:[#allocation5_spill] sm:$0xff]  ;;  %v14233_v27 = vld [vmem:[#allocation6_spill] sm:$0xff]  ;;  %v3943_v26 = vsel %vm852_vm2, %v14238_v21, %v14215_v8 }
0x1c8f   :  { %v10950_v56 = vpop.permute.xlu2 %4830  ;;  %v4090_v18 = vsel %vm852_vm2, %v14228_v63, %v14227_v23  ;;  %v14235_v23 = vld [vmem:[#allocation27_spill] sm:$0xff] }
0x1c90   :  { %14218 = vst [vmem:[#allocation193_spill] sm:$0xff] %v10950_v56  ;;  %v4363_v56 = vsel %vm1165_vm3, %v14224_v54, %v14223_v28  ;;  %v4290_v62 = vadd.f32 %v4271_v3, %v4198_v59  ;;  %v4455_v28 = vsel %vm1165_vm3, %v14230_v49, %v14229_v61  ;;  %v4036_v39 = vadd.f32 %v4017_v10, %v3963_v33  ;;  %v14237_v61 = vld [vmem:[#allocation178_spill] sm:$0xff]  ;;  %v14239_v33 = vld [vmem:[#allocation151_spill] sm:$0xff] }
0x1c91   :  { %v4182_v59 = vsel %vm1165_vm3, %v14234_v44, %v14233_v27  ;;  %v4178_v7 = vsel %vm1165_vm3, %v14235_v23, %v14211_v46  ;;  %v4553_v20 = vsel %vm1540_vm4, %v14237_v61, %v14236_v55  ;;  %v3816_v10 = vadd.f32 %v3797_v5, %v3743_v38  ;;  %v14241_v27 = vld [vmem:[#allocation90_spill] sm:$0xff]  ;;  %v14242_v23 = vld [vmem:[#allocation272_spill] sm:$0xff]  ;;  %v14243_v38 = vld [vmem:[#allocation23_spill] sm:$0xff] }
0x1c92   :  { %v4382_v3 = vadd.f32 %v4363_v56, %v4290_v62  ;;  %v4105_v56 = vadd.f32 %v4086_v0, %v4032_v29  ;;  %v4109_v34 = vadd.f32 %v4090_v18, %v4036_v39  ;;  %v4270_v62 = vsel %vm1165_vm3, %v14239_v33, %v14217_v24  ;;  %v14244_v29 = vld [vmem:[#allocation96_spill] sm:$0xff]  ;;  %v14245_v39 = vld [vmem:[#allocation249_spill] sm:$0xff] }
0x1c93   :  { %v4274_v46 = vsel %vm1165_vm3, %v14241_v27, %v14240_v36  ;;  %v4652_v55 = vsel %vm1540_vm4, %v14242_v23, %v10770_v15  ;;  %v3889_v5 = vadd.f32 %v3870_v4, %v3816_v10  ;;  %v4016_v8 = vsel %vm852_vm2, %v14243_v38, %v14222_v25  ;;  %v14247_v33 = vld [vmem:[#allocation281_spill] sm:$0xff] }
0x1c94   :  { %v4474_v50 = vadd.f32 %v4455_v28, %v4382_v3  ;;  %v4201_v0 = vadd.f32 %v4182_v59, %v4109_v34  ;;  %v4197_v18 = vadd.f32 %v4178_v7, %v4105_v56  ;;  %v4366_v24 = vsel %vm1165_vm3, %v14245_v39, %v14244_v29  ;;  %v14246_v3 = vld [vmem:[#allocation157_spill] sm:$0xff]  ;;  %v14250_v34 = vld [vmem:[#allocation251_spill] sm:$0xff]  ;;  %v14251_v29 = vld [vmem:[#allocation276_spill] sm:$0xff] }
0x1c95   :  { %v4362_v36 = vsel %vm1165_vm3, %v14246_v3, %v14224_v54  ;;  %v4751_v15 = vsel %vm1540_vm4, %v14247_v33, %v10800_v48  ;;  %v3962_v7 = vadd.f32 %v3943_v26, %v3889_v5  ;;  %v14249_v25 = vld [vmem:[#allocation13_spill] sm:$0xff]  ;;  %v14252_v54 = vld [vmem:[#allocation194_spill] sm:$0xff] }
0x1c96   :  { %v4573_v28 = vadd.f32 %v4553_v20, %v4474_v50  ;;  %v4289_v59 = vadd.f32 %v4270_v62, %v4197_v18  ;;  %v4293_v20 = vadd.f32 %v4274_v46, %v4201_v0  ;;  %v4089_v56 = vsel %vm852_vm2, %v14249_v25, %v14228_v63  ;;  %v14254_v63 = vld [vmem:[#allocation262_spill] sm:$0xff] }
0x1c97   :  { %v11014_v4 = vpop.permute.xlu2 %4836  ;;  %v4454_v50 = vsel %vm1165_vm3, %v14250_v34, %v14230_v49  ;;  %v4458_v3 = vsel %vm1165_vm3, %v14252_v54, %v14251_v29  ;;  %v4035_v38 = vadd.f32 %v4016_v8, %v3962_v7  ;;  %v4556_v5 = vsel %vm1540_vm4, %v14254_v63, %v10736_v40  ;;  %v14255_v8 = vld [vmem:[#allocation87_spill] sm:$0xff] }
0x1c98   :  { %14248 = vst [vmem:[#allocation192_spill] sm:$0xff] %v11014_v4  ;;  %v4672_v10 = vadd.f32 %v4652_v55, %v4573_v28  ;;  %v4385_v48 = vadd.f32 %v4366_v24, %v4293_v20  ;;  %v4381_v21 = vadd.f32 %v4362_v36, %v4289_v59  ;;  %v14253_v55 = vld [vmem:[#allocation60_spill] sm:$0xff]  ;;  %v4552_v49 = vsel %vm1540_vm4, %v10742_v52, %v14237_v61  ;;  %v14256_v24 = vld [vmem:[#allocation85_spill] sm:$0xff] }
0x1c99   :  { %v4181_v46 = vsel %vm1165_vm3, %v14253_v55, %v14234_v44  ;;  %v4108_v36 = vadd.f32 %v4089_v56, %v4035_v38  ;;  %v4273_v44 = vsel %vm1165_vm3, %v14255_v8, %v14241_v27  ;;  %v4655_v7 = vsel %vm1540_vm4, %v14256_v24, %v10774_v9 }
0x1c9a   :  { %v4771_v12 = vadd.f32 %v4751_v15, %v4672_v10  ;;  %v4473_v15 = vadd.f32 %v4454_v50, %v4381_v21  ;;  %v4477_v18 = vadd.f32 %v4458_v3, %v4385_v48  ;;  %v4651_v61 = vsel %vm1540_vm4, %v10776_v57, %v14242_v23  ;;  %v14257_v21 = vld [vmem:[#allocation247_spill] sm:$0xff]  ;;  %v14259_v23 = vld [vmem:[#allocation36_spill] sm:$0xff] }
0x1c9b   :  { %v4200_v59 = vadd.f32 %v4181_v46, %v4108_v36  ;;  %v4365_v48 = vsel %vm1165_vm3, %v14257_v21, %v14245_v39  ;;  %v4750_v27 = vsel %vm1540_vm4, %v10852_v30, %v14247_v33  ;;  %v4457_v46 = vsel %vm1165_vm3, %v14259_v23, %v14252_v54 }
0x1c9c   :  { %v4576_v20 = vadd.f32 %v4556_v5, %v4477_v18  ;;  %v4572_v10 = vadd.f32 %v4552_v49, %v4473_v15  ;;  %v14262_v18 = vld [vmem:[#allocation123_spill] sm:$0xff] }
0x1c9d   :  { %v4292_v3 = vadd.f32 %v4273_v44, %v4200_v59  ;;  %v14263_v59 = vld [vmem:[#allocation291_spill] sm:$0xff] }
0x1c9e   :  { %v4835_v26 = vpop.permute.xlu0 %4834  ;;  %v11025_v62 = vpop.permute.xlu1 %4828  ;;  %v4675_v56 = vadd.f32 %v4655_v7, %v4576_v20  ;;  %v4671_v50 = vadd.f32 %v4651_v61, %v4572_v10  ;;  %v4654_v20 = vsel %vm1540_vm4, %v14263_v59, %v14256_v24  ;;  %v14318_v59 = vld [vmem:[#allocation190_spill] sm:$0xff] }
0x1c9f   :  { %v4850_v0 = vsel %vm1540_vm4, %v4835_v26, %v11014_v4  ;;  %v11061_v5 = vpop.permute.xlu2 %4842  ;;  %v4384_v49 = vadd.f32 %v4365_v48, %v4292_v3 }
0x1ca0   :  { %v11038_v28 = vadd.f32 %v4850_v0, %v4771_v12  ;;  %v14258_v12 = vld [vmem:[#allocation125_spill] sm:$0xff]  ;;  %14260 = vst [vmem:[#allocation197_spill] sm:$0xff] %v11061_v5  ;;  %v4770_v39 = vadd.f32 %v4750_v27, %v4671_v50 }
0x1ca1   :  { %v4754_v38 = vsel %vm1540_vm4, %v14258_v12, %v10839_v31  ;;  %v4555_v31 = vsel %vm1540_vm4, %v14262_v18, %v14254_v63  ;;  %v4476_v7 = vadd.f32 %v4457_v46, %v4384_v49  ;;  %v4753_v48 = vsel %vm1540_vm4, %v10912_v42, %v14258_v12  ;;  %v14266_v46 = vld [vmem:[#allocation254_spill] sm:$0xff] }
0x1ca2   :  { %v4774_v0 = vadd.f32 %v4754_v38, %v4675_v56  ;;  %v14265_v56 = vld [vmem:[#allocation70_spill] sm:$0xff] }
0x1ca3   :  { %v4575_v10 = vadd.f32 %v4555_v31, %v4476_v7  ;;  %v14268_v31 = vld [vmem:[#allocation250_spill] sm:$0xff]  ;;  %v14270_v7 = vld [vmem:[#allocation255_spill] sm:$0xff] }
0x1ca4   :  { %v14352_v18 = vld [vmem:[#allocation242_spill] sm:$0xff] }
0x1ca5   :  { %v4674_v38 = vadd.f32 %v4654_v20, %v4575_v10 }
0x1ca6   :  { %v4841_v36 = vpop.permute.xlu0 %4840  ;;  %v11063_v15 = vpop.permute.xlu1 %4832 }
0x1ca7   :  { %14261 = vst [vmem:[#allocation292_spill] sm:$0xff] %v11063_v15  ;;  %v4853_v33 = vsel %vm1540_vm4, %v4841_v36, %v11061_v5  ;;  %v4849_v44 = vsel %vm1540_vm4, %v11063_v15, %v4835_v26  ;;  %v4773_v63 = vadd.f32 %v4753_v48, %v4674_v38  ;;  %v14272_v48 = vld [vmem:[#allocation74_spill] sm:$0xff]  ;;  %v14353_v15 = vld [vmem:[#allocation44_spill] sm:$0xff] }
0x1ca8   :  { %v4873_v54 = vadd.f32 %v4853_v33, %v4774_v0  ;;  %v4869_v61 = vadd.f32 %v4849_v44, %v4770_v39  ;;  %v14267_v39 = vld [vmem:[#allocation257_spill] sm:$0xff]  ;;  %v14269_v33 = vld [vmem:[#allocation172_spill] sm:$0xff] }
0x1cae   :  { %v4877_v27 = vpop.permute.xlu0 %4876  ;;  %v11078_v3 = vpop.permute.xlu1 %4838 }
0x1caf   :  { %14264 = vst [vmem:[#allocation295_spill] sm:$0xff] %v11078_v3  ;;  %v4852_v26 = vsel %vm1540_vm4, %v11078_v3, %v4841_v36  ;;  %v4883_v50 = vmul.f32 %v4877_v27, %v14265_v56  ;;  %v4880_v49 = vmul.f32 %v4877_v27, %v14266_v46  ;;  %v4879_v24 = vmul.f32 %v4877_v27, %v14267_v39  ;;  %v14271_v36 = vld [vmem:[#allocation39_spill] sm:$0xff]  ;;  %v14284_v46 = vld [vmem:[#allocation269_spill] sm:$0xff] }
0x1cb0   :  { %v4872_v0 = vadd.f32 %v4852_v26, %v4773_v63  ;;  %v4886_v12 = vmul.f32 %v4877_v27, %v14268_v31  ;;  %v4882_v44 = vmul.f32 %v4877_v27, %v14269_v33  ;;  %v4881_v20 = vmul.f32 %v4877_v27, %v14270_v7  ;;  %v11099_v63 = vld [vmem:[%s12317_s5] sm:$0xf]  ;;  %v14274_v26 = vld [vmem:[#allocation259_spill] sm:$0xff] }
0x1cb1   :  { %4907 = vrot.lane.b32.xlu0 %v4883_v50, %s6256_s23  ;;  %4901 = vrot.lane.b32.xlu1 %v4880_v49, %s6256_s23  ;;  %v4885_v10 = vmul.f32 %v4877_v27, %v14271_v36  ;;  %v4884_v38 = vmul.f32 %v4877_v27, %v14272_v48  ;;  %14273 = vst [vmem:[#allocation187_spill] sm:$0xff] %v11099_v63  ;;  %v14275_v49 = vld [vmem:[#allocation173_spill] sm:$0xff]  ;;  %v14283_v33 = vld [vmem:[#allocation179_spill] sm:$0xff] }
0x1cb2   :  { %4899 = vrot.lane.b32.xlu2 %v4879_v24, %s6256_s23  ;;  %v4888_v50 = vmul.f32 %v4877_v27, %v14274_v26  ;;  %v4887_v24 = vmul.f32 %v4877_v27, %v14275_v49  ;;  %v14300_v3 = vld [vmem:[#allocation275_spill] sm:$0xff] }
0x1cb6   :  { %v11113_v5 = vpop.permute.xlu1 %4844 }
0x1cb7   :  { %14277 = vst [vmem:[#allocation297_spill] sm:$0xff] %v11113_v5 }
0x1cb9   :  { %4913 = vrot.lane.b32.xlu0 %v4886_v12, %s6256_s23  ;;  %4905 = vrot.lane.b32.xlu1 %v4882_v44, %s6256_s23  ;;  %v14276_v12 = vmov 26  }
0x1cba   :  { %4903 = vrot.lane.b32.xlu2 %v4881_v20, %s6256_s23 }
0x1cc1   :  { %4949 = vperm.xlu0 %6195, %v11099_v63   ;;  %4911 = vrot.lane.b32.xlu1 %v4885_v10, %s6256_s23 }
0x1cc2   :  { %4909 = vrot.lane.b32.xlu2 %v4884_v38, %s6256_s23 }
0x1cc9   :  { %4917 = vrot.lane.b32.xlu1 %v4888_v50, %s6256_s23  ;;  %6196 = vset.pattern.permute.xlu0 %v14276_v12 }
0x1cca   :  { %4915 = vrot.lane.b32.xlu2 %v4887_v24, %s6256_s23 }
0x1d0c   :  { %v11109_v44 = vpop.permute.xlu2 %4899 }
0x1d14   :  { %v11111_v20 = vpop.permute.xlu2 %4903 }
0x1d1c   :  { %v11115_v9 = vpop.permute.xlu2 %4909 }
0x1d1d   :  { %14278 = vst [vmem:[#allocation301_spill] sm:$0xff] %v11115_v9 }
0x1d23   :  { %v4908_v10 = vpop.permute.xlu0 %4907  ;;  %v11117_v38 = vpop.permute.xlu1 %4901 }
0x1d24   :  { %v4923_v27 = vsel %vm1911_vm5, %v4908_v10, %v11115_v9  ;;  %v11122_v29 = vpop.permute.xlu2 %4915  ;;  %v14299_v9 = vld [vmem:[#allocation270_spill] sm:$0xff] }
0x1d25   :  { %v4943_v50 = vadd.f32 %v4923_v27, %v11038_v28  ;;  %14279 = vst [vmem:[#allocation10_spill] sm:$0xff] %v11122_v29  ;;  %v14282_v28 = vld [vmem:[#allocation267_spill] sm:$0xff] }
0x1d2b   :  { %v4914_v12 = vpop.permute.xlu0 %4913  ;;  %v11124_v24 = vpop.permute.xlu1 %4905 }
0x1d2c   :  { %14280 = vst [vmem:[#allocation299_spill] sm:$0xff] %v11124_v24  ;;  %v4926_v40 = vsel %vm1911_vm5, %v4914_v12, %v11122_v29  ;;  %v4922_v5 = vsel %vm1911_vm5, %v11124_v24, %v4908_v10  ;;  %v14287_v10 = vld [vmem:[#allocation43_spill] sm:$0xff]  ;;  %v14319_v24 = vld [vmem:[#allocation280_spill] sm:$0xff] }
0x1d2d   :  { %v4946_v49 = vadd.f32 %v4926_v40, %v4873_v54  ;;  %v4942_v26 = vadd.f32 %v4922_v5, %v4869_v61  ;;  %v14285_v40 = vld [vmem:[#allocation97_spill] sm:$0xff] }
0x1d2e   :  { %v14286_v54 = vld [vmem:[#allocation169_spill] sm:$0xff] }
0x1d33   :  { %v4950_v48 = vpop.permute.xlu0 %4949  ;;  %v11130_v36 = vpop.permute.xlu1 %4911 }
0x1d34   :  { %14281 = vst [vmem:[#allocation294_spill] sm:$0xff] %v11130_v36  ;;  %v4925_v7 = vsel %vm1911_vm5, %v11130_v36, %v4914_v12  ;;  %v4956_v27 = vmul.f32 %v4950_v48, %v14282_v28  ;;  %v4953_v31 = vmul.f32 %v4950_v48, %v14283_v33  ;;  %v4952_v56 = vmul.f32 %v4950_v48, %v14284_v46  ;;  %v14289_v12 = vld [vmem:[#allocation8_spill] sm:$0xff] }
0x1d35   :  { %v4945_v39 = vadd.f32 %v4925_v7, %v4872_v0  ;;  %v4959_v5 = vmul.f32 %v4950_v48, %v14285_v40  ;;  %v4955_v61 = vmul.f32 %v4950_v48, %v14286_v54  ;;  %v4954_v29 = vmul.f32 %v4950_v48, %v14287_v10  ;;  %v14288_v0 = vld [vmem:[#allocation168_spill] sm:$0xff] }
0x1d36   :  { %4980 = vrot.lane.b32.xlu0 %v4956_v27, %s6256_s23  ;;  %4974 = vrot.lane.b32.xlu1 %v4953_v31, %s6256_s23  ;;  %v4958_v7 = vmul.f32 %v4950_v48, %v14288_v0  ;;  %v4957_v27 = vmul.f32 %v4950_v48, %v14289_v12  ;;  %v14291_v54 = vld [vmem:[#allocation76_spill] sm:$0xff] }
0x1d37   :  { %4972 = vrot.lane.b32.xlu2 %v4952_v56, %s6256_s23  ;;  %v14290_v56 = vld [vmem:[#allocation3_spill] sm:$0xff]  ;;  %v4960_v10 = vmul.f32 %v4950_v48, %v14291_v54 }
0x1d38   :  { %v4961_v31 = vmul.f32 %v4950_v48, %v14290_v56 }
0x1d3b   :  { %v11160_v12 = vpop.permute.xlu1 %4917 }
0x1d3c   :  { %14293 = vst [vmem:[#allocation158_spill] sm:$0xff] %v11160_v12 }
0x1d3e   :  { %4986 = vrot.lane.b32.xlu0 %v4959_v5, %s6256_s23  ;;  %4978 = vrot.lane.b32.xlu1 %v4955_v61, %s6256_s23  ;;  %v14292_v5 = vmov 27  }
0x1d3f   :  { %4976 = vrot.lane.b32.xlu2 %v4954_v29, %s6256_s23 }
0x1d46   :  { %5022 = vperm.xlu0 %6196, %v11099_v63   ;;  %4984 = vrot.lane.b32.xlu1 %v4958_v7, %s6256_s23 }
0x1d47   :  { %4982 = vrot.lane.b32.xlu2 %v4957_v27, %s6256_s23 }
0x1d4e   :  { %4990 = vrot.lane.b32.xlu1 %v4961_v31, %s6256_s23  ;;  %6197 = vset.pattern.permute.xlu0 %v14292_v5 }
0x1d4f   :  { %4988 = vrot.lane.b32.xlu2 %v4960_v10, %s6256_s23 }
0x1d91   :  { %v11156_v29 = vpop.permute.xlu2 %4972 }
0x1d99   :  { %v11158_v61 = vpop.permute.xlu2 %4976 }
0x1da1   :  { %v11162_v0 = vpop.permute.xlu2 %4982 }
0x1da2   :  { %14294 = vst [vmem:[#allocation202_spill] sm:$0xff] %v11162_v0 }
0x1da8   :  { %v4981_v7 = vpop.permute.xlu0 %4980  ;;  %v11164_v27 = vpop.permute.xlu1 %4974 }
0x1da9   :  { %v4996_v48 = vsel %vm1911_vm5, %v4981_v7, %v11162_v0  ;;  %v11168_v31 = vpop.permute.xlu2 %4988 }
0x1daa   :  { %v5016_v54 = vadd.f32 %v4996_v48, %v4943_v50  ;;  %14295 = vst [vmem:[#allocation298_spill] sm:$0xff] %v11168_v31  ;;  %v14298_v50 = vld [vmem:[#allocation98_spill] sm:$0xff] }
0x1db0   :  { %v4987_v5 = vpop.permute.xlu0 %4986  ;;  %v11170_v56 = vpop.permute.xlu1 %4978 }
0x1db1   :  { %14296 = vst [vmem:[#allocation296_spill] sm:$0xff] %v11170_v56  ;;  %v4999_v10 = vsel %vm1911_vm5, %v4987_v5, %v11168_v31  ;;  %v4995_v12 = vsel %vm1911_vm5, %v11170_v56, %v4981_v7 }
0x1db2   :  { %v5019_v40 = vadd.f32 %v4999_v10, %v4946_v49  ;;  %v5015_v46 = vadd.f32 %v4995_v12, %v4942_v26  ;;  %v14301_v26 = vld [vmem:[#allocation274_spill] sm:$0xff]  ;;  %v14302_v12 = vld [vmem:[#allocation95_spill] sm:$0xff]  ;;  %v14303_v10 = vld [vmem:[#allocation180_spill] sm:$0xff] }
0x1db8   :  { %v5023_v33 = vpop.permute.xlu0 %5022  ;;  %v11176_v28 = vpop.permute.xlu1 %4984 }
0x1db9   :  { %14297 = vst [vmem:[#allocation203_spill] sm:$0xff] %v11176_v28  ;;  %v4998_v0 = vsel %vm1911_vm5, %v11176_v28, %v4987_v5  ;;  %v5029_v48 = vmul.f32 %v5023_v33, %v14298_v50  ;;  %v5026_v36 = vmul.f32 %v5023_v33, %v14299_v9  ;;  %v5025_v42 = vmul.f32 %v5023_v33, %v14300_v3  ;;  %v14305_v5 = vld [vmem:[#allocation103_spill] sm:$0xff] }
0x1dba   :  { %v5018_v4 = vadd.f32 %v4998_v0, %v4945_v39  ;;  %v5032_v49 = vmul.f32 %v5023_v33, %v14301_v26  ;;  %v5028_v7 = vmul.f32 %v5023_v33, %v14302_v12  ;;  %v5027_v31 = vmul.f32 %v5023_v33, %v14303_v10  ;;  %v14304_v39 = vld [vmem:[#allocation164_spill] sm:$0xff]  ;;  %v14307_v26 = vld [vmem:[#allocation186_spill] sm:$0xff] }
0x1dbb   :  { %5053 = vrot.lane.b32.xlu0 %v5029_v48, %s6256_s23  ;;  %5047 = vrot.lane.b32.xlu1 %v5026_v36, %s6256_s23  ;;  %v5031_v0 = vmul.f32 %v5023_v33, %v14304_v39  ;;  %v5030_v48 = vmul.f32 %v5023_v33, %v14305_v5  ;;  %v5033_v10 = vmul.f32 %v5023_v33, %v14307_v26 }
0x1dbc   :  { %5045 = vrot.lane.b32.xlu2 %v5025_v42, %s6256_s23  ;;  %v14306_v42 = vld [vmem:[#allocation176_spill] sm:$0xff] }
0x1dbd   :  { %v5034_v36 = vmul.f32 %v5023_v33, %v14306_v42 }
0x1dc0   :  { %v11204_v39 = vpop.permute.xlu1 %4990 }
0x1dc1   :  { %14310 = vst [vmem:[#allocation309_spill] sm:$0xff] %v11204_v39 }
0x1dc3   :  { %5059 = vrot.lane.b32.xlu0 %v5032_v49, %s6256_s23  ;;  %5051 = vrot.lane.b32.xlu1 %v5028_v7, %s6256_s23  ;;  %v14308_v49 = vmov 28  }
0x1dc4   :  { %5049 = vrot.lane.b32.xlu2 %v5027_v31, %s6256_s23 }
0x1dcb   :  { %5095 = vperm.xlu0 %6197, %v11099_v63   ;;  %5057 = vrot.lane.b32.xlu1 %v5031_v0, %s6256_s23 }
0x1dcc   :  { %5055 = vrot.lane.b32.xlu2 %v5030_v48, %s6256_s23 }
0x1dd3   :  { %5063 = vrot.lane.b32.xlu1 %v5034_v36, %s6256_s23  ;;  %6198 = vset.pattern.permute.xlu0 %v14308_v49 }
0x1dd4   :  { %5061 = vrot.lane.b32.xlu2 %v5033_v10, %s6256_s23 }
0x1e16   :  { %v11202_v31 = vpop.permute.xlu2 %5045 }
0x1e17   :  { %14309 = vst [vmem:[#allocation300_spill] sm:$0xff] %v11202_v31  ;;  %v14354_v31 = vld [vmem:[#allocation227_spill] sm:$0xff] }
0x1e1e   :  { %v5050_v7 = vpop.permute.xlu2 %5049 }
0x1e26   :  { %v5056_v5 = vpop.permute.xlu2 %5055 }
0x1e2d   :  { %v5054_v12 = vpop.permute.xlu0 %5053  ;;  %v11206_v0 = vpop.permute.xlu1 %5047 }
0x1e2e   :  { %v5069_v48 = vsel %vm1911_vm5, %v5054_v12, %v5056_v5  ;;  %v11211_v33 = vsel %vm1911_vm5, %v11206_v0, %v5050_v7  ;;  %v11215_v49 = vpop.permute.xlu2 %5061 }
0x1e2f   :  { %14311 = vst [vmem:[#allocation303_spill] sm:$0xff] %v11211_v33  ;;  %v11213_v36 = vadd.f32 %v5069_v48, %v5016_v54 }
0x1e30   :  { %14313 = vst [vmem:[#allocation307_spill] sm:$0xff] %v11215_v49 }
0x1e31   :  { %14312 = vst [vmem:[#allocation305_spill] sm:$0xff] %v11213_v36 }
0x1e35   :  { %v5060_v10 = vpop.permute.xlu0 %5059  ;;  %v5052_v42 = vpop.permute.xlu1 %5051 }
0x1e36   :  { %v5072_v26 = vsel %vm1911_vm5, %v5060_v10, %v11215_v49  ;;  %v11220_v39 = vsel %vm1911_vm5, %v5050_v7, %v5052_v42  ;;  %v5068_v50 = vsel %vm1911_vm5, %v5052_v42, %v5054_v12  ;;  %v14321_v7 = vld [vmem:[#allocation108_spill] sm:$0xff]  ;;  %v14324_v12 = vld [vmem:[#allocation278_spill] sm:$0xff]  ;;  %v14326_v42 = vld [vmem:[#allocation191_spill] sm:$0xff] }
0x1e37   :  { %14314 = vst [vmem:[#allocation302_spill] sm:$0xff] %v11220_v39  ;;  %v11223_v3 = vadd.f32 %v5072_v26, %v5019_v40  ;;  %v11225_v9 = vadd.f32 %v5068_v50, %v5015_v46  ;;  %v14322_v46 = vld [vmem:[#allocation174_spill] sm:$0xff]  ;;  %v14323_v50 = vld [vmem:[#allocation205_spill] sm:$0xff] }
0x1e39   :  { %14315 = vst [vmem:[#allocation72_spill] sm:$0xff] %v11223_v3  ;;  %v14348_v3 = vld [vmem:[#allocation56_spill] sm:$0xff] }
0x1e3a   :  { %14316 = vst [vmem:[#allocation124_spill] sm:$0xff] %v11225_v9  ;;  %v14347_v9 = vld [vmem:[#allocation217_spill] sm:$0xff] }
0x1e3d   :  { %v5096_v28 = vpop.permute.xlu0 %5095  ;;  %v5058_v56 = vpop.permute.xlu1 %5057 }
0x1e3e   :  { %v11228_v54 = vsel %vm1911_vm5, %v5056_v5, %v5058_v56  ;;  %v5071_v48 = vsel %vm1911_vm5, %v5058_v56, %v5060_v10  ;;  %v5102_v36 = vmul.f32 %v5096_v28, %v14318_v59  ;;  %v5099_v49 = vmul.f32 %v5096_v28, %v14319_v24  ;;  %v14328_v10 = vld [vmem:[#allocation210_spill] sm:$0xff]  ;;  %v14337_v24 = vld [vmem:[#allocation136_spill] sm:$0xff] }
0x1e3f   :  { %14317 = vst [vmem:[#allocation223_spill] sm:$0xff] %v11228_v54  ;;  %v11233_v33 = vadd.f32 %v5071_v48, %v5018_v4  ;;  %v5098_v39 = vmul.f32 %v5096_v28, %v14321_v7  ;;  %v5105_v40 = vmul.f32 %v5096_v28, %v14322_v46  ;;  %v5101_v26 = vmul.f32 %v5096_v28, %v14323_v50  ;;  %v14325_v4 = vld [vmem:[#allocation106_spill] sm:$0xff]  ;;  %v14336_v50 = vld [vmem:[#allocation135_spill] sm:$0xff] }
0x1e40   :  { %5126 = vrot.lane.b32.xlu0 %v5102_v36, %s6256_s23  ;;  %5120 = vrot.lane.b32.xlu1 %v5099_v49, %s6256_s23  ;;  %v5100_v56 = vmul.f32 %v5096_v28, %v14324_v12  ;;  %v5104_v5 = vmul.f32 %v5096_v28, %v14325_v4  ;;  %v5103_v36 = vmul.f32 %v5096_v28, %v14326_v42  ;;  %v14331_v46 = vld [vmem:[#allocation30_spill] sm:$0xff] }
0x1e41   :  { %14320 = vst [vmem:[#allocation306_spill] sm:$0xff] %v11233_v33  ;;  %5118 = vrot.lane.b32.xlu2 %v5098_v39, %s6256_s23  ;;  %v14327_v39 = vld [vmem:[#allocation101_spill] sm:$0xff]  ;;  %v5106_v48 = vmul.f32 %v5096_v28, %v14328_v10  ;;  %v3077_v4 = vmul.f32 %v14331_v46, %v9850_v45  ;;  %v3118_v46 = vmul.f32 %v14337_v24, %v10006_v13 }
0x1e42   :  { %v5107_v49 = vmul.f32 %v5096_v28, %v14327_v39 }
0x1e48   :  { %5132 = vrot.lane.b32.xlu0 %v5105_v40, %s6256_s23  ;;  %5124 = vrot.lane.b32.xlu1 %v5101_v26, %s6256_s23  ;;  %v14329_v40 = vmov 29   ;;  %v14330_v26 = vld [vmem:[#allocation55_spill] sm:$0xff] }
0x1e49   :  { %5122 = vrot.lane.b32.xlu2 %v5100_v56, %s6256_s23  ;;  %v3076_v56 = vmul.f32 %v14330_v26, %v9850_v45  ;;  %v3078_v26 = vmul.f32 %v14336_v50, %v9850_v45 }
0x1e4b   :  { %v3128_v50 = vadd.f32 %v3118_v46, %v3078_v26 }
0x1e50   :  { %5168 = vperm.xlu0 %6198, %v11099_v63   ;;  %5130 = vrot.lane.b32.xlu1 %v5104_v5, %s6256_s23  ;;  %v14332_v5 = vld [vmem:[#allocation68_spill] sm:$0xff] }
0x1e51   :  { %5128 = vrot.lane.b32.xlu2 %v5103_v36, %s6256_s23  ;;  %v3116_v42 = vmul.f32 %v14332_v5, %v10006_v13  ;;  %v14333_v36 = vld [vmem:[#allocation208_spill] sm:$0xff]  ;;  %v14338_v5 = vld [vmem:[#allocation14_spill] sm:$0xff] }
0x1e52   :  { %v3117_v39 = vmul.f32 %v14333_v36, %v10006_v13  ;;  %v3216_v63 = vmul.f32 %v14338_v5, %v9903_v43  ;;  %v14346_v5 = vld [vmem:[#allocation9_spill] sm:$0xff] }
0x1e53   :  { %v3126_v59 = vadd.f32 %v3116_v42, %v3076_v56  ;;  %v14339_v42 = vld [vmem:[#allocation50_spill] sm:$0xff] }
0x1e54   :  { %v3127_v28 = vadd.f32 %v3117_v39, %v3077_v4  ;;  %v3217_v4 = vmul.f32 %v14339_v42, %v9903_v43  ;;  %v14340_v39 = vld [vmem:[#allocation142_spill] sm:$0xff] }
0x1e55   :  { %v14341_v56 = vld [vmem:[#allocation26_spill] sm:$0xff] }
0x1e56   :  { %v3280_v36 = vsel %vm266_vm0, %v14341_v56, %v14340_v39 }
0x1e58   :  { %5136 = vrot.lane.b32.xlu1 %v5107_v49, %s6256_s23  ;;  %6199 = vset.pattern.permute.xlu0 %v14329_v40  ;;  %v14334_v49 = vld [vmem:[#allocation141_spill] sm:$0xff]  ;;  %v14335_v40 = vld [vmem:[#allocation212_spill] sm:$0xff] }
0x1e59   :  { %5134 = vrot.lane.b32.xlu2 %v5106_v48, %s6256_s23  ;;  %v3166_v10 = vmul.f32 %v14334_v49, %v9856_v37  ;;  %v3167_v48 = vmul.f32 %v14335_v40, %v9856_v37  ;;  %v14342_v49 = vld [vmem:[#allocation119_spill] sm:$0xff] }
0x1e5a   :  { %v3281_v40 = vsel %vm266_vm0, %v14340_v39, %v14342_v49  ;;  %v3168_v39 = vmul.f32 %v14348_v3, %v9856_v37  ;;  %v3500_v3 = vsel %vm266_vm0, %v14352_v18, %v14354_v31 }
0x1e5b   :  { %v3176_v12 = vadd.f32 %v3166_v10, %v3126_v59  ;;  %v3177_v7 = vadd.f32 %v3167_v48, %v3127_v28  ;;  %v14343_v59 = vld [vmem:[#allocation146_spill] sm:$0xff]  ;;  %v14344_v10 = vld [vmem:[#allocation37_spill] sm:$0xff] }
0x1e5c   :  { %v3081_v24 = vmul.f32 %v14343_v59, %v9850_v45  ;;  %v3121_v28 = vmul.f32 %v14344_v10, %v10006_v13  ;;  %v14345_v48 = vld [vmem:[#allocation18_spill] sm:$0xff]  ;;  %v3178_v10 = vadd.f32 %v3168_v39, %v3128_v50  ;;  %v3282_v50 = vsel %vm266_vm0, %v14342_v49, %v9905_v58  ;;  %v14360_v58 = vld [vmem:[#allocation47_spill] sm:$0xff] }
0x1e5d   :  { %v3226_v33 = vadd.f32 %v3216_v63, %v3176_v12  ;;  %v3227_v54 = vadd.f32 %v3217_v4, %v3177_v7  ;;  %v3353_v42 = vsel %vm266_vm0, %v14346_v5, %v14345_v48  ;;  %v3354_v56 = vsel %vm266_vm0, %v14345_v48, %v14347_v9  ;;  %v14349_v7 = vld [vmem:[#allocation243_spill] sm:$0xff]  ;;  %v14350_v12 = vld [vmem:[#allocation32_spill] sm:$0xff]  ;;  %v14351_v4 = vld [vmem:[#allocation129_spill] sm:$0xff] }
0x1e5e   :  { %v3426_v46 = vsel %vm266_vm0, %v14350_v12, %v14349_v7  ;;  %v3427_v59 = vsel %vm266_vm0, %v14349_v7, %v14351_v4  ;;  %v3131_v45 = vadd.f32 %v3121_v28, %v3081_v24  ;;  %v3499_v48 = vsel %vm266_vm0, %v14353_v15, %v14352_v18  ;;  %v14357_v28 = vld [vmem:[#allocation246_spill] sm:$0xff]  ;;  %v14361_v49 = vld [vmem:[#allocation143_spill] sm:$0xff] }
0x1e5f   :  { %v3299_v26 = vadd.f32 %v3280_v36, %v3226_v33  ;;  %v3300_v63 = vadd.f32 %v3281_v40, %v3227_v54  ;;  %v14355_v33 = vld [vmem:[#allocation59_spill] sm:$0xff] }
0x1e60   :  { %v3218_v54 = vmul.f32 %v14355_v33, %v9903_v43 }
0x1e61   :  { %v3372_v13 = vadd.f32 %v3353_v42, %v3299_v26  ;;  %v3373_v5 = vadd.f32 %v3354_v56, %v3300_v63  ;;  %v14356_v56 = vld [vmem:[#allocation61_spill] sm:$0xff]  ;;  %v14359_v26 = vld [vmem:[#allocation231_spill] sm:$0xff] }
0x1e62   :  { %v3171_v24 = vmul.f32 %v14356_v56, %v9856_v37  ;;  %v14358_v42 = vld [vmem:[#allocation73_spill] sm:$0xff]  ;;  %v3573_v18 = vsel %vm559_vm1, %v14357_v28, %v14359_v26  ;;  %v3228_v63 = vadd.f32 %v3218_v54, %v3178_v10  ;;  %v14363_v10 = vld [vmem:[#allocation219_spill] sm:$0xff]  ;;  %v14366_v54 = vld [vmem:[#allocation46_spill] sm:$0xff] }
0x1e63   :  { %v3445_v36 = vadd.f32 %v3426_v46, %v3372_v13  ;;  %v3446_v40 = vadd.f32 %v3427_v59, %v3373_v5  ;;  %v3572_v39 = vsel %vm559_vm1, %v14358_v42, %v14357_v28  ;;  %v3355_v5 = vsel %vm266_vm0, %v14347_v9, %v9961_v32  ;;  %v14362_v59 = vld [vmem:[#allocation137_spill] sm:$0xff]  ;;  %v14365_v32 = vld [vmem:[#allocation138_spill] sm:$0xff] }
0x1e64   :  { %v3181_v13 = vadd.f32 %v3171_v24, %v3131_v45  ;;  %v3645_v46 = vsel %vm559_vm1, %v14361_v49, %v14360_v58  ;;  %v3646_v56 = vsel %vm559_vm1, %v14360_v58, %v14362_v59  ;;  %v3301_v42 = vadd.f32 %v3282_v50, %v3228_v63  ;;  %v14372_v58 = vld [vmem:[#allocation235_spill] sm:$0xff] }
0x1e65   :  { %v3518_v7 = vadd.f32 %v3499_v48, %v3445_v36  ;;  %v3519_v33 = vadd.f32 %v3500_v3, %v3446_v40  ;;  %v3221_v48 = vmul.f32 %v14363_v10, %v9903_v43  ;;  %v3428_v45 = vsel %vm266_vm0, %v14351_v4, %v10027_v19  ;;  %v14364_v3 = vld [vmem:[#allocation258_spill] sm:$0xff]  ;;  %v14367_v4 = vld [vmem:[#allocation163_spill] sm:$0xff] }
0x1e66   :  { %v3718_v9 = vsel %vm559_vm1, %v14365_v32, %v14364_v3  ;;  %v3719_v36 = vsel %vm559_vm1, %v14364_v3, %v14366_v54  ;;  %v3285_v40 = vsel %vm266_vm0, %v9955_v6, %v14183_v16  ;;  %v3374_v50 = vadd.f32 %v3355_v5, %v3301_v42 }
0x1e67   :  { %v3591_v15 = vadd.f32 %v3572_v39, %v3518_v7  ;;  %v3592_v12 = vadd.f32 %v3573_v18, %v3519_v33  ;;  %v3231_v39 = vadd.f32 %v3221_v48, %v3181_v13  ;;  %v3501_v19 = vsel %vm266_vm0, %v14354_v31, %v14182_v1  ;;  %v14368_v18 = vld [vmem:[#allocation228_spill] sm:$0xff]  ;;  %v14369_v7 = vld [vmem:[#allocation233_spill] sm:$0xff] }
0x1e68   :  { %v3791_v63 = vsel %vm559_vm1, %v14368_v18, %v14367_v4  ;;  %v3792_v33 = vsel %vm559_vm1, %v14367_v4, %v14369_v7  ;;  %v3358_v6 = vsel %vm266_vm0, %v10021_v41, %v14187_v17  ;;  %v3447_v16 = vadd.f32 %v3428_v45, %v3374_v50  ;;  %v14370_v31 = vld [vmem:[#allocation265_spill] sm:$0xff]  ;;  %v14374_v45 = vld [vmem:[#allocation144_spill] sm:$0xff] }
0x1e69   :  { %v3664_v24 = vadd.f32 %v3645_v46, %v3591_v15  ;;  %v3665_v28 = vadd.f32 %v3646_v56, %v3592_v12  ;;  %v3304_v42 = vadd.f32 %v3285_v40, %v3231_v39  ;;  %v3574_v1 = vsel %vm559_vm1, %v14359_v26, %v14184_v51  ;;  %v14371_v13 = vld [vmem:[#allocation77_spill] sm:$0xff]  ;;  %v14373_v26 = vld [vmem:[#allocation84_spill] sm:$0xff] }
0x1e6a   :  { %v3864_v5 = vsel %vm852_vm2, %v14371_v13, %v14370_v31  ;;  %v3865_v46 = vsel %vm852_vm2, %v14370_v31, %v14372_v58  ;;  %v3431_v41 = vsel %vm266_vm0, %v10260_v47, %v14193_v35  ;;  %v3520_v17 = vadd.f32 %v3501_v19, %v3447_v16  ;;  %v14378_v19 = vld [vmem:[#allocation234_spill] sm:$0xff]  ;;  %v14379_v16 = vld [vmem:[#allocation224_spill] sm:$0xff]  ;;  %v14383_v31 = vld [vmem:[#allocation147_spill] sm:$0xff] }
0x1e6b   :  { %v3737_v15 = vadd.f32 %v3718_v9, %v3664_v24  ;;  %v3738_v12 = vadd.f32 %v3719_v36, %v3665_v28  ;;  %v3377_v48 = vadd.f32 %v3358_v6, %v3304_v42  ;;  %v3647_v51 = vsel %vm559_vm1, %v14362_v59, %v14188_v11  ;;  %v14375_v9 = vld [vmem:[#allocation237_spill] sm:$0xff]  ;;  %v14377_v28 = vld [vmem:[#allocation239_spill] sm:$0xff]  ;;  %v14382_v42 = vld [vmem:[#allocation236_spill] sm:$0xff] }
0x1e6c   :  { %v3937_v3 = vsel %vm852_vm2, %v14374_v45, %v14373_v26  ;;  %v3938_v36 = vsel %vm852_vm2, %v14373_v26, %v14375_v9  ;;  %v3504_v47 = vsel %vm266_vm0, %v10273_v60, %v14200_v53  ;;  %v3593_v35 = vadd.f32 %v3574_v1, %v3520_v17  ;;  %v14376_v59 = vld [vmem:[#allocation165_spill] sm:$0xff]  ;;  %v14388_v26 = vld [vmem:[#allocation80_spill] sm:$0xff] }
0x1e6d   :  { %v3810_v56 = vadd.f32 %v3791_v63, %v3737_v15  ;;  %v3811_v10 = vadd.f32 %v3792_v33, %v3738_v12  ;;  %v3450_v24 = vadd.f32 %v3431_v41, %v3377_v48  ;;  %v3720_v11 = vsel %vm559_vm1, %v14366_v54, %v14194_v2  ;;  %v14380_v54 = vld [vmem:[#allocation92_spill] sm:$0xff]  ;;  %v14381_v15 = vld [vmem:[#allocation238_spill] sm:$0xff] }
0x1e6e   :  { %v4010_v39 = vsel %vm852_vm2, %v14377_v28, %v14376_v59  ;;  %v4011_v4 = vsel %vm852_vm2, %v14376_v59, %v14378_v19  ;;  %v3577_v60 = vsel %vm559_vm1, %v10281_v14, %v14206_v22  ;;  %v3666_v53 = vadd.f32 %v3647_v51, %v3593_v35  ;;  %v14387_v48 = vld [vmem:[#allocation184_spill] sm:$0xff]  ;;  %v14390_v35 = vld [vmem:[#allocation153_spill] sm:$0xff] }
0x1e6f   :  { %v3883_v40 = vadd.f32 %v3864_v5, %v3810_v56  ;;  %v3884_v50 = vadd.f32 %v3865_v46, %v3811_v10  ;;  %v3523_v6 = vadd.f32 %v3504_v47, %v3450_v24  ;;  %v3793_v2 = vsel %vm559_vm1, %v14369_v7, %v14379_v16  ;;  %v14384_v5 = vld [vmem:[#allocation225_spill] sm:$0xff]  ;;  %v14386_v10 = vld [vmem:[#allocation156_spill] sm:$0xff]  ;;  %v14389_v47 = vld [vmem:[#allocation218_spill] sm:$0xff] }
0x1e70   :  { %v4083_v12 = vsel %vm852_vm2, %v14381_v15, %v14380_v54  ;;  %v4084_v1 = vsel %vm852_vm2, %v14380_v54, %v14382_v42  ;;  %v3650_v14 = vsel %vm559_vm1, %v14384_v5, %v14383_v31  ;;  %v3739_v22 = vadd.f32 %v3720_v11, %v3666_v53  ;;  %v14385_v56 = vld [vmem:[#allocation69_spill] sm:$0xff]  ;;  %v14396_v16 = vld [vmem:[#allocation154_spill] sm:$0xff]  ;;  %v14397_v5 = vld [vmem:[#allocation20_spill] sm:$0xff] }
0x1e71   :  { %v3956_v63 = vadd.f32 %v3937_v3, %v3883_v40  ;;  %v3957_v33 = vadd.f32 %v3938_v36, %v3884_v50  ;;  %v3596_v17 = vadd.f32 %v3577_v60, %v3523_v6  ;;  %v3866_v7 = vsel %vm852_vm2, %v14372_v58, %v14385_v56  ;;  %v14393_v60 = vld [vmem:[#allocation277_spill] sm:$0xff]  ;;  %v14395_v6 = vld [vmem:[#allocation112_spill] sm:$0xff] }
0x1e72   :  { %v4175_v51 = vsel %vm1165_vm3, %v14387_v48, %v14386_v10  ;;  %v4176_v3 = vsel %vm1165_vm3, %v14386_v10, %v14388_v26  ;;  %v3723_v40 = vsel %vm559_vm1, %v14390_v35, %v14389_v47  ;;  %v3812_v50 = vadd.f32 %v3793_v2, %v3739_v22  ;;  %v14399_v22 = vld [vmem:[#allocation107_spill] sm:$0xff]  ;;  %v14401_v56 = vld [vmem:[#allocation313_spill] sm:$0xff] }
0x1e73   :  { %v4029_v46 = vadd.f32 %v4010_v39, %v3956_v63  ;;  %v4030_v41 = vadd.f32 %v4011_v4, %v3957_v33  ;;  %v3669_v59 = vadd.f32 %v3650_v14, %v3596_v17  ;;  %v14391_v39 = vld [vmem:[#allocation122_spill] sm:$0xff]  ;;  %v14392_v4 = vld [vmem:[#allocation245_spill] sm:$0xff]  ;;  %v14394_v63 = vld [vmem:[#allocation240_spill] sm:$0xff]  ;;  %v3796_v54 = vsel %vm559_vm1, %v14396_v16, %v14395_v6 }
0x1e74   :  { %v3939_v58 = vsel %vm852_vm2, %v14375_v9, %v14391_v39  ;;  %v4268_v53 = vsel %vm1165_vm3, %v14393_v60, %v14392_v4  ;;  %v4267_v33 = vsel %vm1165_vm3, %v14394_v63, %v14393_v60  ;;  %v3885_v2 = vadd.f32 %v3866_v7, %v3812_v50  ;;  %v14398_v14 = vld [vmem:[#allocation66_spill] sm:$0xff]  ;;  %v14402_v10 = vld [vmem:[#allocation149_spill] sm:$0xff]  ;;  %v14407_v60 = vld [vmem:[#allocation148_spill] sm:$0xff] }
0x1e75   :  { %v4102_v24 = vadd.f32 %v4083_v12, %v4029_v46  ;;  %v4103_v11 = vadd.f32 %v4084_v1, %v4030_v41  ;;  %v3742_v31 = vadd.f32 %v3723_v40, %v3669_v59  ;;  %v4012_v9 = vsel %vm852_vm2, %v14378_v19, %v14397_v5  ;;  %v14400_v41 = vld [vmem:[#allocation279_spill] sm:$0xff]  ;;  %v14403_v40 = vld [vmem:[#allocation130_spill] sm:$0xff]  ;;  %v14404_v50 = vld [vmem:[#allocation181_spill] sm:$0xff] }
0x1e76   :  { %v4359_v46 = vsel %vm1165_vm3, %v14399_v22, %v14398_v14  ;;  %v4360_v17 = vsel %vm1165_vm3, %v14398_v14, %v14400_v41  ;;  %v3869_v47 = vsel %vm852_vm2, %v14402_v10, %v14401_v56  ;;  %v3958_v7 = vadd.f32 %v3939_v58, %v3885_v2  ;;  %v14406_v59 = vld [vmem:[#allocation167_spill] sm:$0xff]  ;;  %v14408_v6 = vld [vmem:[#allocation145_spill] sm:$0xff]  ;;  %v14412_v5 = vld [vmem:[#allocation170_spill] sm:$0xff] }
0x1e77   :  { %v4194_v12 = vadd.f32 %v4175_v51, %v4102_v24  ;;  %v4195_v1 = vadd.f32 %v4176_v3, %v4103_v11  ;;  %v3815_v35 = vadd.f32 %v3796_v54, %v3742_v31  ;;  %v4085_v19 = vsel %vm852_vm2, %v14382_v42, %v14403_v40  ;;  %v14405_v24 = vld [vmem:[#allocation99_spill] sm:$0xff] }
0x1e78   :  { %v4452_v11 = vsel %vm1165_vm3, %v14405_v24, %v14404_v50  ;;  %v4451_v39 = vsel %vm1165_vm3, %v14406_v59, %v14405_v24  ;;  %v3942_v16 = vsel %vm852_vm2, %v14408_v6, %v14407_v60  ;;  %v4031_v58 = vadd.f32 %v4012_v9, %v3958_v7  ;;  %v14409_v2 = vld [vmem:[#allocation27_spill] sm:$0xff] }
0x1e79   :  { %v4287_v51 = vadd.f32 %v4268_v53, %v4195_v1  ;;  %v4286_v3 = vadd.f32 %v4267_v33, %v4194_v12  ;;  %v3888_v54 = vadd.f32 %v3869_v47, %v3815_v35  ;;  %v4177_v42 = vsel %vm1165_vm3, %v14388_v26, %v14409_v2  ;;  %v14410_v12 = vld [vmem:[#allocation105_spill] sm:$0xff]  ;;  %v14411_v1 = vld [vmem:[#allocation110_spill] sm:$0xff]  ;;  %v14413_v56 = vld [vmem:[#allocation23_spill] sm:$0xff] }
0x1e7a   :  { %v4549_v31 = vsel %vm1540_vm4, %v14411_v1, %v14410_v12  ;;  %v4550_v14 = vsel %vm1540_vm4, %v14410_v12, %v14412_v5  ;;  %v14414_v10 = vld [vmem:[#allocation155_spill] sm:$0xff]  ;;  %v4104_v9 = vadd.f32 %v4085_v19, %v4031_v58  ;;  %v14419_v2 = vld [vmem:[#allocation241_spill] sm:$0xff] }
0x1e7b   :  { %v4378_v53 = vadd.f32 %v4359_v46, %v4286_v3  ;;  %v4379_v33 = vadd.f32 %v4360_v17, %v4287_v51  ;;  %v4015_v40 = vsel %vm852_vm2, %v14414_v10, %v14413_v56  ;;  %v3961_v47 = vadd.f32 %v3942_v16, %v3888_v54  ;;  %v14415_v7 = vld [vmem:[#allocation151_spill] sm:$0xff]  ;;  %v14416_v51 = vld [vmem:[#allocation102_spill] sm:$0xff] }
0x1e7c   :  { %v4269_v26 = vsel %vm1165_vm3, %v14392_v4, %v14415_v7  ;;  %v14417_v3 = vld [vmem:[#allocation282_spill] sm:$0xff]  ;;  %v14418_v24 = vld [vmem:[#allocation287_spill] sm:$0xff]  ;;  %v4088_v19 = vsel %vm852_vm2, %v14419_v2, %v14249_v25  ;;  %v14424_v7 = vld [vmem:[#allocation185_spill] sm:$0xff]  ;;  %v11501_v2 = vpop.permute.xlu1 %5063 }
0x1e7d   :  { %v4471_v46 = vadd.f32 %v4452_v11, %v4379_v33  ;;  %v4470_v17 = vadd.f32 %v4451_v39, %v4378_v53  ;;  %v4648_v35 = vsel %vm1540_vm4, %v14417_v3, %v14416_v51  ;;  %v4649_v60 = vsel %vm1540_vm4, %v14416_v51, %v14418_v24  ;;  %v14420_v53 = vld [vmem:[#allocation157_spill] sm:$0xff]  ;;  %v14421_v33 = vld [vmem:[#allocation196_spill] sm:$0xff]  ;;  %v14422_v54 = vld [vmem:[#allocation115_spill] sm:$0xff] }
0x1e7e   :  { %v4196_v11 = vadd.f32 %v4177_v42, %v4104_v9  ;;  %v4034_v58 = vadd.f32 %v4015_v40, %v3961_v47  ;;  %v4361_v4 = vsel %vm1165_vm3, %v14400_v41, %v14420_v53  ;;  %v4747_v12 = vsel %vm1540_vm4, %v14422_v54, %v14421_v33  ;;  %v14423_v56 = vld [vmem:[#allocation182_spill] sm:$0xff]  ;;  %v14425_v9 = vld [vmem:[#allocation288_spill] sm:$0xff]  ;;  %v14427_v51 = vld [vmem:[#allocation45_spill] sm:$0xff] }
0x1e7f   :  { %v4569_v39 = vadd.f32 %v4549_v31, %v4470_v17  ;;  %v4570_v16 = vadd.f32 %v4550_v14, %v4471_v46  ;;  %v4748_v10 = vsel %vm1540_vm4, %v14421_v33, %v14423_v56  ;;  %v4180_v25 = vsel %vm1165_vm3, %v14424_v7, %v14253_v55  ;;  %v14426_v17 = vld [vmem:[#allocation193_spill] sm:$0xff] }
0x1e80   :  { %v4288_v42 = vadd.f32 %v4269_v26, %v4196_v11  ;;  %v4107_v40 = vadd.f32 %v4088_v19, %v4034_v58  ;;  %v4453_v41 = vsel %vm1165_vm3, %v14404_v50, %v14250_v34  ;;  %v4846_v46 = vsel %vm1540_vm4, %v14425_v9, %v11025_v62 }
0x1e81   :  { %v4668_v31 = vadd.f32 %v4648_v35, %v4569_v39  ;;  %v4669_v14 = vadd.f32 %v4649_v60, %v4570_v16  ;;  %v4847_v47 = vsel %vm1540_vm4, %v11025_v62, %v14426_v17  ;;  %v4272_v55 = vsel %vm1165_vm3, %v14427_v51, %v14255_v8  ;;  %v14428_v8 = vld [vmem:[#allocation171_spill] sm:$0xff] }
0x1e82   :  { %v4380_v26 = vadd.f32 %v4361_v4, %v4288_v42  ;;  %v4199_v19 = vadd.f32 %v4180_v25, %v4107_v40  ;;  %v4551_v34 = vsel %vm1540_vm4, %v14412_v5, %v10742_v52  ;;  %v4919_v50 = vsel %vm1911_vm5, %v11109_v44, %v11117_v38  ;;  %v14429_v4 = vld [vmem:[#allocation109_spill] sm:$0xff] }
0x1e83   :  { %v4767_v35 = vadd.f32 %v4747_v12, %v4668_v31  ;;  %v4768_v60 = vadd.f32 %v4748_v10, %v4669_v14  ;;  %v4920_v62 = vsel %vm1911_vm5, %v11117_v38, %v11111_v20  ;;  %v4364_v11 = vsel %vm1165_vm3, %v14428_v8, %v14257_v21  ;;  %v14436_v8 = vld [vmem:[#allocation305_spill] sm:$0xff] }
0x1e84   :  { %v4472_v39 = vadd.f32 %v4453_v41, %v4380_v26  ;;  %v4291_v53 = vadd.f32 %v4272_v55, %v4199_v19  ;;  %v4650_v52 = vsel %vm1540_vm4, %v14418_v24, %v10776_v57  ;;  %v4992_v5 = vsel %vm1911_vm5, %v11156_v29, %v11164_v27  ;;  %v14430_v24 = vld [vmem:[#allocation300_spill] sm:$0xff] }
0x1e85   :  { %v4866_v16 = vadd.f32 %v4846_v46, %v4767_v35  ;;  %v4867_v58 = vadd.f32 %v4847_v47, %v4768_v60  ;;  %v4993_v38 = vsel %vm1911_vm5, %v11164_v27, %v11158_v61  ;;  %v4456_v21 = vsel %vm1165_vm3, %v14429_v4, %v14259_v23  ;;  %v14431_v41 = vld [vmem:[#allocation292_spill] sm:$0xff]  ;;  %v14432_v46 = vld [vmem:[#allocation123_spill] sm:$0xff]  ;;  %v14433_v47 = vld [vmem:[#allocation78_spill] sm:$0xff] }
0x1e86   :  { %v4571_v33 = vadd.f32 %v4551_v34, %v4472_v39  ;;  %v4383_v7 = vadd.f32 %v4364_v11, %v4291_v53  ;;  %v4749_v57 = vsel %vm1540_vm4, %v14423_v56, %v10852_v30  ;;  %v5065_v25 = vsel %vm1911_vm5, %v14430_v24, %v11206_v0  ;;  %v14434_v30 = vld [vmem:[#allocation303_spill] sm:$0xff]  ;;  %v14438_v53 = vld [vmem:[#allocation114_spill] sm:$0xff] }
0x1e87   :  { %v4939_v12 = vadd.f32 %v4919_v50, %v4866_v16  ;;  %v4940_v10 = vadd.f32 %v4920_v62, %v4867_v58  ;;  %v4848_v23 = vsel %vm1540_vm4, %v14426_v17, %v14431_v41  ;;  %v4554_v51 = vsel %vm1540_vm4, %v14433_v47, %v14432_v46  ;;  %v14435_v0 = vld [vmem:[#allocation299_spill] sm:$0xff]  ;;  %v14444_v41 = vld [vmem:[#allocation302_spill] sm:$0xff] }
0x1e88   :  { %v4670_v31 = vadd.f32 %v4650_v52, %v4571_v33  ;;  %v4475_v40 = vadd.f32 %v4456_v21, %v4383_v7  ;;  %v4921_v19 = vsel %vm1911_vm5, %v11111_v20, %v14435_v0  ;;  %v14437_v58 = vld [vmem:[#allocation291_spill] sm:$0xff]  ;;  %v14439_v52 = vld [vmem:[#allocation296_spill] sm:$0xff]  ;;  %v14440_v21 = vld [vmem:[#allocation293_spill] sm:$0xff] }
0x1e89   :  { %v5012_v14 = vadd.f32 %v4992_v5, %v4939_v12  ;;  %v5013_v27 = vadd.f32 %v4993_v38, %v4940_v10  ;;  %v4653_v20 = vsel %vm1540_vm4, %v14438_v53, %v14437_v58  ;;  %v4994_v5 = vsel %vm1911_vm5, %v11158_v61, %v14439_v52  ;;  %v14441_v33 = vld [vmem:[#allocation285_spill] sm:$0xff]  ;;  %v14445_v61 = vld [vmem:[#allocation294_spill] sm:$0xff] }
0x1e8a   :  { %v4769_v55 = vadd.f32 %v4749_v57, %v4670_v31  ;;  %v4574_v38 = vadd.f32 %v4554_v51, %v4475_v40  ;;  %v4752_v12 = vsel %vm1540_vm4, %v14441_v33, %v14440_v21  ;;  %v14442_v57 = vld [vmem:[#allocation295_spill] sm:$0xff]  ;;  %v14446_v40 = vld [vmem:[#allocation301_spill] sm:$0xff]  ;;  %v14453_v33 = vld [vmem:[#allocation254_spill] sm:$0xff] }
0x1e8b   :  { %v5085_v26 = vadd.f32 %v5065_v25, %v5012_v14  ;;  %v5086_v56 = vadd.f32 %v14434_v30, %v5013_v27  ;;  %v14443_v25 = vld [vmem:[#allocation192_spill] sm:$0xff]  ;;  %v4924_v51 = vsel %vm1911_vm5, %v14446_v40, %v14445_v61  ;;  %v14459_v61 = vld [vmem:[#allocation39_spill] sm:$0xff] }
0x1e8c   :  { %v4868_v62 = vadd.f32 %v4848_v23, %v4769_v55  ;;  %v4673_v10 = vadd.f32 %v4653_v20, %v4574_v38  ;;  %v4851_v31 = vsel %vm1540_vm4, %v14443_v25, %v14442_v57  ;;  %v14451_v20 = vld [vmem:[#allocation223_spill] sm:$0xff]  ;;  %v14455_v25 = vld [vmem:[#allocation257_spill] sm:$0xff] }
0x1e8e   :  { %v4941_v4 = vadd.f32 %v4921_v19, %v4868_v62  ;;  %v4772_v27 = vadd.f32 %v4752_v12, %v4673_v10  ;;  %v14450_v62 = vld [vmem:[#allocation202_spill] sm:$0xff] }
0x1e90   :  { %v5014_v7 = vadd.f32 %v4994_v5, %v4941_v4  ;;  %v14452_v4 = vld [vmem:[#allocation70_spill] sm:$0xff] }
0x1e92   :  { %v5087_v23 = vadd.f32 %v14444_v41, %v5014_v7  ;;  %v14454_v7 = vld [vmem:[#allocation306_spill] sm:$0xff]  ;;  %v14457_v41 = vld [vmem:[#allocation172_spill] sm:$0xff] }
0x1e9b   :  { %v11410_v36 = vpop.permute.xlu2 %5118 }
0x1ea3   :  { %v11472_v6 = vpop.permute.xlu2 %5122 }
0x1eab   :  { %v5129_v42 = vpop.permute.xlu2 %5128 }
0x1eb2   :  { %v5127_v35 = vpop.permute.xlu0 %5126  ;;  %v5121_v60 = vpop.permute.xlu1 %5120 }
0x1eb3   :  { %v5142_v34 = vsel %vm1911_vm5, %v5127_v35, %v5129_v42  ;;  %v5138_v50 = vsel %vm1911_vm5, %v11410_v36, %v5121_v60  ;;  %v5139_v17 = vsel %vm1911_vm5, %v5121_v60, %v11472_v6  ;;  %v11567_v14 = vpop.permute.xlu2 %5134  ;;  %v14447_v60 = vld [vmem:[#allocation72_spill] sm:$0xff] }
0x1eb4   :  { %v11549_v11 = vadd.f32 %v5142_v34, %v14436_v8  ;;  %v11551_v39 = vadd.f32 %v5138_v50, %v5085_v26  ;;  %v11553_v16 = vadd.f32 %v5139_v17, %v5086_v56  ;;  %v4871_v56 = vadd.f32 %v4851_v31, %v4772_v27  ;;  %v14448_v34 = vld [vmem:[#allocation124_spill] sm:$0xff]  ;;  %v14449_v17 = vld [vmem:[#allocation203_spill] sm:$0xff] }
0x1eb5   :  { %v4997_v8 = vsel %vm1911_vm5, %v14450_v62, %v14449_v17  ;;  %v14464_v17 = vmov 30   ;;  %v14465_v62 = vld [vmem:[#allocation21_spill] sm:$0xff] }
0x1eb6   :  { %v4944_v58 = vadd.f32 %v4924_v51, %v4871_v56  ;;  %v14460_v51 = vld [vmem:[#allocation74_spill] sm:$0xff] }
0x1eb8   :  { %v5017_v53 = vadd.f32 %v4997_v8, %v4944_v58  ;;  %v14466_v8 = vld [vmem:[#allocation206_spill] sm:$0xff] }
0x1eb9   :  { %v3075_v58 = vmul.f32 %v14466_v8, %v14465_v62 }
0x1eba   :  { %v5133_v46 = vpop.permute.xlu0 %5132  ;;  %v5125_v47 = vpop.permute.xlu1 %5124  ;;  %v5090_v52 = vadd.f32 %v14451_v20, %v5017_v53  ;;  %v14467_v53 = vld [vmem:[#allocation211_spill] sm:$0xff]  ;;  %v14468_v20 = vld [vmem:[#allocation58_spill] sm:$0xff] }
0x1ebb   :  { %v5145_v55 = vsel %vm1911_vm5, %v5133_v46, %v11567_v14  ;;  %v5140_v26 = vsel %vm1911_vm5, %v11472_v6, %v5125_v47  ;;  %v5141_v30 = vsel %vm1911_vm5, %v5125_v47, %v5127_v35 }
0x1ebc   :  { %v11579_v0 = vadd.f32 %v5145_v55, %v14447_v60  ;;  %v11581_v19 = vadd.f32 %v5140_v26, %v5087_v23  ;;  %v11584_v50 = vadd.f32 %v5141_v30, %v14448_v34  ;;  %v14461_v26 = vld [vmem:[#allocation187_spill] sm:$0xff]  ;;  %v14463_v60 = vld [vmem:[#allocation173_spill] sm:$0xff] }
0x1ebd   :  { %v14462_v30 = vld [vmem:[#allocation259_spill] sm:$0xff] }
0x1ec2   :  { %v5169_v6 = vpop.permute.xlu0 %5168  ;;  %v5131_v5 = vpop.permute.xlu1 %5130 }
0x1ec3   :  { %v5143_v35 = vsel %vm1911_vm5, %v5129_v42, %v5131_v5  ;;  %v5144_v38 = vsel %vm1911_vm5, %v5131_v5, %v5133_v46  ;;  %v5175_v21 = vmul.f32 %v5169_v6, %v14452_v4  ;;  %v5172_v12 = vmul.f32 %v5169_v6, %v14453_v33  ;;  %v14456_v42 = vld [vmem:[#allocation250_spill] sm:$0xff]  ;;  %v14458_v46 = vld [vmem:[#allocation255_spill] sm:$0xff] }
0x1ec4   :  { %v11594_v10 = vadd.f32 %v5143_v35, %v5090_v52  ;;  %v11597_v57 = vadd.f32 %v5144_v38, %v14454_v7  ;;  %v5171_v31 = vmul.f32 %v5169_v6, %v14455_v25  ;;  %v5178_v27 = vmul.f32 %v5169_v6, %v14456_v42  ;;  %v14469_v35 = vld [vmem:[#allocation48_spill] sm:$0xff]  ;;  %v14471_v7 = vld [vmem:[#allocation26_spill] sm:$0xff] }
0x1ec5   :  { %5199 = vrot.lane.b32.xlu0 %v5175_v21, %s6261_s26  ;;  %5193 = vrot.lane.b32.xlu1 %v5172_v12, %s6261_s26  ;;  %v5174_v23 = vmul.f32 %v5169_v6, %v14457_v41  ;;  %v5173_v47 = vmul.f32 %v5169_v6, %v14458_v46  ;;  %v5177_v40 = vmul.f32 %v5169_v6, %v14459_v61  ;;  %v14470_v12 = vld [vmem:[#allocation16_spill] sm:$0xff] }
0x1ec6   :  { %5191 = vrot.lane.b32.xlu2 %v5171_v31, %s6261_s26  ;;  %v5176_v55 = vmul.f32 %v5169_v6, %v14460_v51  ;;  %v5180_v56 = vmul.f32 %v5169_v6, %v14462_v30  ;;  %v5179_v34 = vmul.f32 %v5169_v6, %v14463_v60  ;;  %v3115_v52 = vmul.f32 %v14468_v20, %v14467_v53  ;;  %v14472_v31 = vld [vmem:[#allocation215_spill] sm:$0xff]  ;;  %v14477_v20 = vld [vmem:[#allocation44_spill] sm:$0xff] }
0x1ec7   :  { %v3165_v38 = vmul.f32 %v14469_v35, %v9856_v37  ;;  %v3215_v6 = vmul.f32 %v14470_v12, %v9903_v43  ;;  %v14480_v12 = vld [vmem:[#allocation166_spill] sm:$0xff] }
0x1ec8   :  { %v3125_v5 = vadd.f32 %v3115_v52, %v3075_v58  ;;  %v14478_v52 = vld [vmem:[#allocation49_spill] sm:$0xff] }
0x1eca   :  { %v3175_v21 = vadd.f32 %v3165_v38, %v3125_v5  ;;  %v3498_v5 = vsel %vm266_vm0, %v14478_v52, %v14477_v20  ;;  %v14479_v38 = vld [vmem:[#allocation73_spill] sm:$0xff]  ;;  %v14485_v20 = vld [vmem:[#allocation266_spill] sm:$0xff] }
0x1ecd   :  { %5205 = vrot.lane.b32.xlu0 %v5178_v27, %s6261_s26  ;;  %5197 = vrot.lane.b32.xlu1 %v5174_v23, %s6261_s26  ;;  %v3279_v27 = vsel %vm266_vm0, %v14472_v31, %v14471_v7  ;;  %v3225_v23 = vadd.f32 %v3215_v6, %v3175_v21  ;;  %v3571_v7 = vsel %vm559_vm1, %v14480_v12, %v14479_v38  ;;  %v14481_v6 = vld [vmem:[#allocation248_spill] sm:$0xff]  ;;  %v14487_v38 = vld [vmem:[#allocation82_spill] sm:$0xff] }
0x1ece   :  { %5195 = vrot.lane.b32.xlu2 %v5173_v47, %s6261_s26  ;;  %v14473_v47 = vld [vmem:[#allocation9_spill] sm:$0xff]  ;;  %v3644_v31 = vsel %vm559_vm1, %v14481_v6, %v14361_v49  ;;  %v3936_v49 = vsel %vm852_vm2, %v14485_v20, %v14374_v45 }
0x1ed5   :  { %5241 = vperm.xlu0 %6199, %v14461_v26   ;;  %5203 = vrot.lane.b32.xlu1 %v5177_v40, %s6261_s26  ;;  %v14474_v40 = vld [vmem:[#allocation214_spill] sm:$0xff] }
0x1ed6   :  { %5201 = vrot.lane.b32.xlu2 %v5176_v55, %s6261_s26  ;;  %v3352_v55 = vsel %vm266_vm0, %v14474_v40, %v14473_v47 }
0x1edd   :  { %5209 = vrot.lane.b32.xlu1 %v5180_v56, %s6261_s26  ;;  %6200 = vset.pattern.permute.xlu0 %v14464_v17  ;;  %v3298_v56 = vadd.f32 %v3279_v27, %v3225_v23  ;;  %v14476_v17 = vld [vmem:[#allocation222_spill] sm:$0xff]  ;;  %v14482_v23 = vld [vmem:[#allocation252_spill] sm:$0xff] }
0x1ede   :  { %5207 = vrot.lane.b32.xlu2 %v5179_v34, %s6261_s26  ;;  %v14475_v34 = vld [vmem:[#allocation32_spill] sm:$0xff]  ;;  %v3717_v47 = vsel %vm559_vm1, %v14482_v23, %v14365_v32 }
0x1edf   :  { %v3425_v8 = vsel %vm266_vm0, %v14476_v17, %v14475_v34  ;;  %v3371_v58 = vadd.f32 %v3352_v55, %v3298_v56  ;;  %v14483_v55 = vld [vmem:[#allocation263_spill] sm:$0xff] }
0x1ee0   :  { %v3790_v56 = vsel %vm559_vm1, %v14483_v55, %v14368_v18  ;;  %v14484_v17 = vld [vmem:[#allocation79_spill] sm:$0xff]  ;;  %v4082_v18 = vsel %vm852_vm2, %v14487_v38, %v14381_v15 }
0x1ee1   :  { %v3444_v35 = vadd.f32 %v3425_v8, %v3371_v58  ;;  %v3863_v8 = vsel %vm852_vm2, %v14484_v17, %v14371_v13  ;;  %v14488_v38 = vld [vmem:[#allocation267_spill] sm:$0xff] }
0x1ee3   :  { %v3517_v21 = vadd.f32 %v3498_v5, %v3444_v35  ;;  %v14486_v5 = vld [vmem:[#allocation273_spill] sm:$0xff] }
0x1ee4   :  { %v4009_v32 = vsel %vm852_vm2, %v14486_v5, %v14377_v28 }
0x1ee5   :  { %v3590_v27 = vadd.f32 %v3571_v7, %v3517_v21 }
0x1ee7   :  { %v3663_v40 = vadd.f32 %v3644_v31, %v3590_v27 }
0x1ee9   :  { %v3736_v34 = vadd.f32 %v3717_v47, %v3663_v40 }
0x1eeb   :  { %v3809_v58 = vadd.f32 %v3790_v56, %v3736_v34 }
0x1eed   :  { %v3882_v52 = vadd.f32 %v3863_v8, %v3809_v58 }
0x1eef   :  { %v3955_v35 = vadd.f32 %v3936_v49, %v3882_v52 }
0x1ef1   :  { %v4028_v12 = vadd.f32 %v4009_v32, %v3955_v35 }
0x1ef3   :  { %v4101_v7 = vadd.f32 %v4082_v18, %v4028_v12  ;;  %v14489_v12 = vld [vmem:[#allocation179_spill] sm:$0xff] }
0x1ef5   :  { %v4193_v21 = vadd.f32 %v14387_v48, %v4101_v7 }
0x1ef7   :  { %v4285_v13 = vadd.f32 %v14394_v63, %v4193_v21 }
0x1ef9   :  { %v4377_v6 = vadd.f32 %v14399_v22, %v4285_v13 }
0x1efb   :  { %v4469_v45 = vadd.f32 %v14406_v59, %v4377_v6  ;;  %v11675_v59 = vpop.permute.xlu1 %5136 }
0x1efd   :  { %v4568_v31 = vadd.f32 %v14411_v1, %v4469_v45  ;;  %v14492_v45 = vld [vmem:[#allocation169_spill] sm:$0xff] }
0x1eff   :  { %v4667_v27 = vadd.f32 %v14417_v3, %v4568_v31 }
0x1f01   :  { %v4766_v28 = vadd.f32 %v14422_v54, %v4667_v27  ;;  %v14493_v27 = vld [vmem:[#allocation43_spill] sm:$0xff] }
0x1f03   :  { %v4865_v23 = vadd.f32 %v14425_v9, %v4766_v28 }
0x1f05   :  { %v4938_v15 = vadd.f32 %v11109_v44, %v4865_v23  ;;  %v14495_v23 = vld [vmem:[#allocation8_spill] sm:$0xff] }
0x1f07   :  { %v5011_v47 = vadd.f32 %v11156_v29, %v4938_v15 }
0x1f09   :  { %v5084_v48 = vadd.f32 %v14430_v24, %v5011_v47  ;;  %v14496_v47 = vld [vmem:[#allocation3_spill] sm:$0xff] }
0x1f0b   :  { %v5157_v63 = vadd.f32 %v11410_v36, %v5084_v48 }
0x1f20   :  { %v5192_v40 = vpop.permute.xlu2 %5191 }
0x1f21   :  { %v5230_v22 = vadd.f32 %v5192_v40, %v5157_v63  ;;  %v14497_v63 = vld [vmem:[#allocation76_spill] sm:$0xff] }
0x1f28   :  { %v5196_v55 = vpop.permute.xlu2 %5195 }
0x1f30   :  { %v5202_v1 = vpop.permute.xlu2 %5201 }
0x1f37   :  { %v5200_v56 = vpop.permute.xlu0 %5199  ;;  %v5194_v3 = vpop.permute.xlu1 %5193 }
0x1f38   :  { %v5215_v54 = vsel %vm2204_vm6, %v5200_v56, %v5202_v1  ;;  %v5211_v9 = vsel %vm2204_vm6, %v5192_v40, %v5194_v3  ;;  %v5212_v44 = vsel %vm2204_vm6, %v5194_v3, %v5196_v55  ;;  %v11683_v34 = vpop.permute.xlu2 %5207  ;;  %v14501_v3 = vmov 33  }
0x1f39   :  { %v5235_v29 = vadd.f32 %v5215_v54, %v11549_v11  ;;  %v5231_v24 = vadd.f32 %v5211_v9, %v11551_v39  ;;  %v5232_v36 = vadd.f32 %v5212_v44, %v11553_v16 }
0x1f3f   :  { %v5206_v17 = vpop.permute.xlu0 %5205  ;;  %v5198_v8 = vpop.permute.xlu1 %5197 }
0x1f40   :  { %v5218_v58 = vsel %vm2204_vm6, %v5206_v17, %v11683_v34  ;;  %v5213_v20 = vsel %vm2204_vm6, %v5196_v55, %v5198_v8  ;;  %v5214_v49 = vsel %vm2204_vm6, %v5198_v8, %v5200_v56  ;;  %v14498_v55 = vmov 35  }
0x1f41   :  { %v5238_v52 = vadd.f32 %v5218_v58, %v11579_v0  ;;  %v5233_v5 = vadd.f32 %v5213_v20, %v11581_v19  ;;  %v5234_v11 = vadd.f32 %v5214_v49, %v11584_v50  ;;  %v14490_v0 = vld [vmem:[#allocation269_spill] sm:$0xff]  ;;  %v14500_v56 = vmov 34  }
0x1f42   :  { %v14491_v50 = vld [vmem:[#allocation97_spill] sm:$0xff] }
0x1f47   :  { %v5242_v39 = vpop.permute.xlu0 %5241  ;;  %v5204_v32 = vpop.permute.xlu1 %5203 }
0x1f48   :  { %v5216_v16 = vsel %vm2204_vm6, %v5202_v1, %v5204_v32  ;;  %v5217_v35 = vsel %vm2204_vm6, %v5204_v32, %v5206_v17  ;;  %v5248_v18 = vmul.f32 %v5242_v39, %v14488_v38  ;;  %v5245_v7 = vmul.f32 %v5242_v39, %v14489_v12 }
0x1f49   :  { %v11697_v21 = vadd.f32 %v5216_v16, %v11594_v10  ;;  %v11700_v13 = vadd.f32 %v5217_v35, %v11597_v57  ;;  %v5244_v19 = vmul.f32 %v5242_v39, %v14490_v0  ;;  %v5251_v6 = vmul.f32 %v5242_v39, %v14491_v50  ;;  %v14494_v10 = vld [vmem:[#allocation168_spill] sm:$0xff] }
0x1f4a   :  { %5272 = vrot.lane.b32.xlu0 %v5248_v18, %s6261_s26  ;;  %5266 = vrot.lane.b32.xlu1 %v5245_v7, %s6261_s26  ;;  %v5247_v31 = vmul.f32 %v5242_v39, %v14492_v45  ;;  %v5246_v28 = vmul.f32 %v5242_v39, %v14493_v27  ;;  %v5250_v57 = vmul.f32 %v5242_v39, %v14494_v10  ;;  %v14499_v1 = vmov 0  }
0x1f4b   :  { %5264 = vrot.lane.b32.xlu2 %v5244_v19, %s6261_s26  ;;  %v5249_v15 = vmul.f32 %v5242_v39, %v14495_v23  ;;  %v5253_v48 = vmul.f32 %v5242_v39, %v14496_v47  ;;  %v5252_v40 = vmul.f32 %v5242_v39, %v14497_v63 }
0x1f4f   :  { %v11734_v17 = vpop.permute.xlu1 %5209 }
0x1f52   :  { %5278 = vrot.lane.b32.xlu0 %v5251_v6, %s6261_s26  ;;  %5270 = vrot.lane.b32.xlu1 %v5247_v31, %s6261_s26 }
0x1f53   :  { %5268 = vrot.lane.b32.xlu2 %v5246_v28, %s6261_s26 }
0x1f5a   :  { %5314 = vperm.xlu0 %6200, %v14461_v26   ;;  %5276 = vrot.lane.b32.xlu1 %v5250_v57, %s6261_s26 }
0x1f5b   :  { %5274 = vrot.lane.b32.xlu2 %v5249_v15, %s6261_s26 }
0x1f62   :  { %6205 = vset.pattern.permute.xlu0 %v14498_v55  ;;  %5282 = vrot.lane.b32.xlu1 %v5253_v48, %s6261_s26 }
0x1f63   :  { %5280 = vrot.lane.b32.xlu2 %v5252_v40, %s6261_s26  ;;  %5679 = vperm.xlu0 %6205, %v14461_v26  }
0x1f6a   :  { %5460 = vperm.xlu1 %6202, %v14461_v26  }
0x1f6b   :  { %5387 = vperm.xlu2 %6201, %v14461_v26   ;;  %6208 = vset.pattern.permute.xlu0 %v14499_v1 }
0x1f72   :  { %6204 = vset.pattern.permute.xlu1 %v14500_v56  ;;  %v14503_v56 = vld [vmem:[#allocation270_spill] sm:$0xff] }
0x1f73   :  { %6203 = vset.pattern.permute.xlu2 %v14501_v3  ;;  %5606 = vperm.xlu1 %6204, %v14461_v26   ;;  %v14504_v3 = vld [vmem:[#allocation275_spill] sm:$0xff] }
0x1f74   :  { %5533 = vperm.xlu2 %6203, %v14461_v26  }
0x1f7b   :  { %6207 = vset.pattern.permute.xlu1 %v14499_v1 }
0x1f7c   :  { %6206 = vset.pattern.permute.xlu2 %v14499_v1 }
0x1fa5   :  { %v5265_v54 = vpop.permute.xlu2 %5264 }
0x1fa6   :  { %v11732_v9 = vadd.f32 %v5265_v54, %v5230_v22 }
0x1fad   :  { %v5269_v44 = vpop.permute.xlu2 %5268 }
0x1fb5   :  { %v5275_v8 = vpop.permute.xlu2 %5274 }
0x1fbc   :  { %v5273_v58 = vpop.permute.xlu0 %5272  ;;  %v5267_v20 = vpop.permute.xlu1 %5266 }
0x1fbd   :  { %v5288_v49 = vsel %vm2204_vm6, %v5273_v58, %v5275_v8  ;;  %v5284_v39 = vsel %vm2204_vm6, %v5265_v54, %v5267_v20  ;;  %v5285_v32 = vsel %vm2204_vm6, %v5267_v20, %v5269_v44  ;;  %v5281_v26 = vpop.permute.xlu2 %5280 }
0x1fbe   :  { %v11739_v16 = vadd.f32 %v5288_v49, %v5235_v29  ;;  %v11741_v35 = vadd.f32 %v5284_v39, %v5231_v24  ;;  %v11743_v18 = vadd.f32 %v5285_v32, %v5232_v36  ;;  %v14502_v24 = vld [vmem:[#allocation108_spill] sm:$0xff]  ;;  %v14506_v49 = vld [vmem:[#allocation95_spill] sm:$0xff] }
0x1fbf   :  { %v14507_v39 = vld [vmem:[#allocation180_spill] sm:$0xff] }
0x1fc4   :  { %v5279_v22 = vpop.permute.xlu0 %5278  ;;  %v5271_v7 = vpop.permute.xlu1 %5270 }
0x1fc5   :  { %v5291_v19 = vsel %vm2204_vm6, %v5279_v22, %v5281_v26  ;;  %v5286_v6 = vsel %vm2204_vm6, %v5269_v44, %v5271_v7  ;;  %v5287_v31 = vsel %vm2204_vm6, %v5271_v7, %v5273_v58  ;;  %v11748_v28 = vpop.permute.xlu2 %5387  ;;  %v14505_v44 = vld [vmem:[#allocation98_spill] sm:$0xff] }
0x1fc6   :  { %v11750_v57 = vadd.f32 %v5291_v19, %v5238_v52  ;;  %v11752_v15 = vadd.f32 %v5286_v6, %v5233_v5  ;;  %v11754_v29 = vadd.f32 %v5287_v31, %v5234_v11  ;;  %v5390_v36 = vmul.f32 %v11748_v28, %v14502_v24  ;;  %v14509_v19 = vld [vmem:[#allocation280_spill] sm:$0xff] }
0x1fc7   :  { %v5391_v6 = vmul.f32 %v11748_v28, %v14509_v19 }
0x1fc8   :  { %5410 = vrot.lane.b32.xlu0 %v5390_v36, %s6261_s26  ;;  %v14510_v36 = vld [vmem:[#allocation205_spill] sm:$0xff] }
0x1fcc   :  { %v11759_v48 = vpop.permute.xlu0 %5314  ;;  %v5277_v40 = vpop.permute.xlu1 %5276 }
0x1fcd   :  { %v5289_v55 = vsel %vm2204_vm6, %v5275_v8, %v5277_v40  ;;  %v5290_v1 = vsel %vm2204_vm6, %v5277_v40, %v5279_v22  ;;  %v5318_v52 = vmul.f32 %v11759_v48, %v14503_v56  ;;  %v5317_v5 = vmul.f32 %v11759_v48, %v14504_v3  ;;  %v14508_v22 = vld [vmem:[#allocation278_spill] sm:$0xff] }
0x1fce   :  { %v11768_v11 = vadd.f32 %v5289_v55, %v11697_v21  ;;  %v11771_v54 = vadd.f32 %v5290_v1, %v11700_v13  ;;  %v5321_v58 = vmul.f32 %v11759_v48, %v14505_v44  ;;  %v5320_v21 = vmul.f32 %v11759_v48, %v14506_v49  ;;  %v14511_v55 = vld [vmem:[#allocation190_spill] sm:$0xff] }
0x1fcf   :  { %5339 = vrot.lane.b32.xlu1 %v5318_v52, %s6261_s26  ;;  %5337 = vrot.lane.b32.xlu2 %v5317_v5, %s6261_s26  ;;  %v5319_v13 = vmul.f32 %v11759_v48, %v14507_v39  ;;  %v5392_v7 = vmul.f32 %v11748_v28, %v14508_v22  ;;  %v5393_v40 = vmul.f32 %v11748_v28, %v14510_v36  ;;  %v14512_v52 = vld [vmem:[#allocation103_spill] sm:$0xff] }
0x1fd0   :  { %5345 = vrot.lane.b32.xlu0 %v5321_v58, %s6261_s26  ;;  %v5394_v1 = vmul.f32 %v11748_v28, %v14511_v55  ;;  %v5322_v5 = vmul.f32 %v11759_v48, %v14512_v52 }
0x1fd4   :  { %v5283_v8 = vpop.permute.xlu1 %5282 }
0x1fd5   :  { %v11779_v20 = vsel %vm2204_vm6, %v5281_v26, %v5283_v8 }
0x1fd7   :  { %5343 = vrot.lane.b32.xlu1 %v5320_v21, %s6261_s26  ;;  %5341 = vrot.lane.b32.xlu2 %v5319_v13, %s6261_s26  ;;  %v14513_v13 = vld [vmem:[#allocation191_spill] sm:$0xff] }
0x1fdc   :  { %v11787_v32 = vpop.permute.xlu1 %5460 }
0x1fdd   :  { %v5464_v26 = vmul.f32 %v11787_v32, %v14453_v33  ;;  %v5463_v31 = vmul.f32 %v11787_v32, %v14455_v25  ;;  %v11807_v33 = vpop.permute.xlu2 %5533  ;;  %v5465_v25 = vmul.f32 %v11787_v32, %v14458_v46  ;;  %v5466_v8 = vmul.f32 %v11787_v32, %v14457_v41 }
0x1fde   :  { %v5537_v58 = vmul.f32 %v11807_v33, %v14489_v12  ;;  %v5536_v21 = vmul.f32 %v11807_v33, %v14490_v0  ;;  %v5538_v12 = vmul.f32 %v11807_v33, %v14493_v27 }
0x1fdf   :  { %5414 = vrot.lane.b32.xlu1 %v5392_v7, %s6261_s26  ;;  %5412 = vrot.lane.b32.xlu2 %v5391_v6, %s6261_s26  ;;  %v5395_v7 = vmul.f32 %v11748_v28, %v14513_v13  ;;  %v14514_v6 = vld [vmem:[#allocation164_spill] sm:$0xff] }
0x1fe0   :  { %5485 = vrot.lane.b32.xlu0 %v5464_v26, %s6266_s27  ;;  %v5323_v41 = vmul.f32 %v11759_v48, %v14514_v6  ;;  %v5467_v26 = vmul.f32 %v11787_v32, %v14452_v4  ;;  %v5540_v4 = vmul.f32 %v11807_v33, %v14488_v38 }
0x1fe5   :  { %v11827_v46 = vpop.permute.xlu1 %5606 }
0x1fe6   :  { %v5609_v0 = vmul.f32 %v11827_v46, %v14504_v3  ;;  %v5610_v3 = vmul.f32 %v11827_v46, %v14503_v56  ;;  %v5468_v56 = vmul.f32 %v11787_v32, %v14460_v51  ;;  %v5612_v38 = vmul.f32 %v11827_v46, %v14506_v49 }
0x1fe7   :  { %5483 = vrot.lane.b32.xlu1 %v5463_v31, %s6266_s27  ;;  %5416 = vrot.lane.b32.xlu2 %v5393_v40, %s6261_s26  ;;  %v5539_v31 = vmul.f32 %v11807_v33, %v14492_v45  ;;  %v14515_v40 = vld [vmem:[#allocation274_spill] sm:$0xff]  ;;  %v11856_v45 = vpop.permute.xlu0 %5679  ;;  %v5613_v49 = vmul.f32 %v11827_v46, %v14505_v44 }
0x1fe8   :  { %5418 = vrot.lane.b32.xlu0 %v5394_v1, %s6261_s26  ;;  %v5324_v27 = vmul.f32 %v11759_v48, %v14515_v40  ;;  %v5611_v1 = vmul.f32 %v11827_v46, %v14507_v39  ;;  %v5683_v39 = vmul.f32 %v11856_v45, %v14509_v19  ;;  %v5684_v51 = vmul.f32 %v11856_v45, %v14508_v22  ;;  %v14518_v19 = vld [vmem:[#allocation186_spill] sm:$0xff] }
0x1fe9   :  { %v5541_v22 = vmul.f32 %v11807_v33, %v14495_v23 }
0x1fef   :  { %5347 = vrot.lane.b32.xlu1 %v5322_v5, %s6261_s26  ;;  %5487 = vrot.lane.b32.xlu2 %v5465_v25, %s6266_s27  ;;  %v14516_v5 = vld [vmem:[#allocation106_spill] sm:$0xff] }
0x1ff0   :  { %5558 = vrot.lane.b32.xlu0 %v5537_v58, %s6266_s27  ;;  %v5396_v25 = vmul.f32 %v11748_v28, %v14516_v5  ;;  %v5682_v58 = vmul.f32 %v11856_v45, %v14502_v24 }
0x1ff7   :  { %5489 = vrot.lane.b32.xlu2 %v5466_v8, %s6266_s27  ;;  %5556 = vrot.lane.b32.xlu1 %v5536_v21, %s6266_s27  ;;  %v14517_v8 = vld [vmem:[#allocation174_spill] sm:$0xff] }
0x1ff8   :  { %5420 = vrot.lane.b32.xlu0 %v5395_v7, %s6261_s26  ;;  %v5397_v21 = vmul.f32 %v11748_v28, %v14517_v8  ;;  %v5325_v7 = vmul.f32 %v11759_v48, %v14518_v19 }
0x1fff   :  { %5560 = vrot.lane.b32.xlu2 %v5538_v12, %s6266_s27  ;;  %5349 = vrot.lane.b32.xlu1 %v5323_v41, %s6261_s26  ;;  %v5469_v41 = vmul.f32 %v11787_v32, %v14459_v61  ;;  %v5614_v61 = vmul.f32 %v11827_v46, %v14512_v52  ;;  %v5471_v52 = vmul.f32 %v11787_v32, %v14463_v60  ;;  %v14521_v60 = vld [vmem:[#allocation101_spill] sm:$0xff] }
0x2000   :  { %5629 = vrot.lane.b32.xlu0 %v5609_v0, %s6266_s27  ;;  %v14519_v0 = vld [vmem:[#allocation210_spill] sm:$0xff] }
0x2007   :  { %5491 = vrot.lane.b32.xlu2 %v5467_v26, %s6266_s27  ;;  %5562 = vrot.lane.b32.xlu1 %v5539_v31, %s6266_s27  ;;  %v5398_v26 = vmul.f32 %v11748_v28, %v14519_v0  ;;  %v5685_v31 = vmul.f32 %v11856_v45, %v14510_v36  ;;  %v5470_v36 = vmul.f32 %v11787_v32, %v14456_v42 }
0x2008   :  { %5351 = vrot.lane.b32.xlu0 %v5324_v27, %s6261_s26 }
0x200f   :  { %5631 = vrot.lane.b32.xlu2 %v5610_v3, %s6266_s27  ;;  %5633 = vrot.lane.b32.xlu1 %v5611_v1, %s6266_s27 }
0x2010   :  { %5564 = vrot.lane.b32.xlu0 %v5540_v4, %s6266_s27 }
0x2017   :  { %5422 = vrot.lane.b32.xlu2 %v5396_v25, %s6261_s26  ;;  %5493 = vrot.lane.b32.xlu1 %v5468_v56, %s6266_s27 }
0x2018   :  { %5704 = vrot.lane.b32.xlu0 %v5683_v39, %s6266_s27 }
0x201f   :  { %5635 = vrot.lane.b32.xlu2 %v5612_v38, %s6266_s27  ;;  %5702 = vrot.lane.b32.xlu1 %v5682_v58, %s6266_s27 }
0x2020   :  { %5424 = vrot.lane.b32.xlu0 %v5397_v21, %s6261_s26  ;;  %v5399_v21 = vmul.f32 %v11748_v28, %v14521_v60 }
0x2027   :  { %5706 = vrot.lane.b32.xlu2 %v5684_v51, %s6266_s27  ;;  %5353 = vrot.lane.b32.xlu1 %v5325_v7, %s6261_s26  ;;  %v5687_v7 = vmul.f32 %v11856_v45, %v14513_v13  ;;  %v5543_v13 = vmul.f32 %v11807_v33, %v14491_v50 }
0x2028   :  { %5637 = vrot.lane.b32.xlu0 %v5613_v49, %s6266_s27 }
0x2029   :  { %v5338_v24 = vpop.permute.xlu2 %5337 }
0x202a   :  { %v5376_v12 = vadd.f32 %v5338_v24, %v11732_v9  ;;  %v14520_v9 = vld [vmem:[#allocation176_spill] sm:$0xff] }
0x202b   :  { %v5326_v27 = vmul.f32 %v11759_v48, %v14520_v9  ;;  %v5542_v48 = vmul.f32 %v11807_v33, %v14494_v10  ;;  %v5686_v10 = vmul.f32 %v11856_v45, %v14511_v55 }
0x202f   :  { %5495 = vrot.lane.b32.xlu2 %v5469_v41, %s6266_s27  ;;  %5566 = vrot.lane.b32.xlu1 %v5541_v22, %s6266_s27  ;;  %v5615_v41 = vmul.f32 %v11827_v46, %v14514_v6  ;;  %v5616_v22 = vmul.f32 %v11827_v46, %v14515_v40 }
0x2030   :  { %5426 = vrot.lane.b32.xlu0 %v5398_v26, %s6261_s26 }
0x2031   :  { %v5342_v44 = vpop.permute.xlu2 %5341 }
0x2037   :  { %5708 = vrot.lane.b32.xlu2 %v5685_v31, %s6266_s27  ;;  %5355 = vrot.lane.b32.xlu1 %v5326_v27, %s6261_s26 }
0x2038   :  { %5639 = vrot.lane.b32.xlu0 %v5614_v61, %s6266_s27  ;;  %v5472_v61 = vmul.f32 %v11787_v32, %v14462_v30  ;;  %v5688_v30 = vmul.f32 %v11856_v45, %v14516_v5  ;;  %v5690_v32 = vmul.f32 %v11856_v45, %v14519_v0 }
0x2039   :  { %v5413_v23 = vpop.permute.xlu2 %5412 }
0x203a   :  { %v5411_v3 = vpop.permute.xlu0 %5410 }
0x203b   :  { %v11904_v1 = vadd.f32 %v5411_v3, %v5376_v12  ;;  %v5430_v4 = vsel %vm2204_vm6, %v5411_v3, %v5413_v23  ;;  %v5544_v3 = vmul.f32 %v11807_v33, %v14497_v63  ;;  %v5545_v63 = vmul.f32 %v11807_v33, %v14496_v47 }
0x203c   :  { %v5689_v47 = vmul.f32 %v11856_v45, %v14517_v8  ;;  %v5618_v33 = vmul.f32 %v11827_v46, %v14520_v9 }
0x203f   :  { %5497 = vrot.lane.b32.xlu2 %v5470_v36, %s6266_s27  ;;  %5568 = vrot.lane.b32.xlu1 %v5542_v48, %s6266_s27 }
0x2040   :  { %5499 = vrot.lane.b32.xlu0 %v5471_v52, %s6266_s27 }
0x2041   :  { %v5340_v25 = vpop.permute.xlu1 %5339  ;;  %v5417_v56 = vpop.permute.xlu2 %5416 }
0x2042   :  { %v5357_v39 = vsel %vm2204_vm6, %v5338_v24, %v5340_v25  ;;  %v5358_v38 = vsel %vm2204_vm6, %v5340_v25, %v5342_v44  ;;  %v5346_v49 = vpop.permute.xlu0 %5345 }
0x2043   :  { %v5377_v42 = vadd.f32 %v5357_v39, %v11741_v35  ;;  %v5378_v58 = vadd.f32 %v5358_v38, %v11743_v18 }
0x2045   :  { %v11924_v51 = vadd.f32 %v5430_v4, %v5377_v42 }
0x2047   :  { %5710 = vrot.lane.b32.xlu2 %v5686_v10, %s6266_s27  ;;  %5428 = vrot.lane.b32.xlu1 %v5399_v21, %s6261_s26 }
0x2048   :  { %5712 = vrot.lane.b32.xlu0 %v5687_v7, %s6266_s27 }
0x2049   :  { %v5344_v35 = vpop.permute.xlu1 %5343  ;;  %v11931_v18 = vpop.permute.xlu2 %5487 }
0x204a   :  { %v5359_v55 = vsel %vm2204_vm6, %v5342_v44, %v5344_v35  ;;  %v5360_v24 = vsel %vm2204_vm6, %v5344_v35, %v5346_v49 }
0x204b   :  { %v5379_v28 = vadd.f32 %v5359_v55, %v11752_v15  ;;  %v5380_v12 = vadd.f32 %v5360_v24, %v11754_v29 }
0x204f   :  { %5570 = vrot.lane.b32.xlu2 %v5543_v13, %s6266_s27  ;;  %5641 = vrot.lane.b32.xlu1 %v5615_v41, %s6266_s27 }
0x2050   :  { %5643 = vrot.lane.b32.xlu0 %v5616_v22, %s6266_s27 }
0x2051   :  { %v5415_v26 = vpop.permute.xlu1 %5414  ;;  %v5490_v44 = vpop.permute.xlu2 %5489 }
0x2052   :  { %v5431_v15 = vsel %vm2204_vm6, %v5413_v23, %v5415_v26  ;;  %v5432_v29 = vsel %vm2204_vm6, %v5415_v26, %v5417_v56  ;;  %v11948_v31 = vpop.permute.xlu0 %5485  ;;  %v5505_v50 = vsel %vm2497_vm7, %v11931_v18, %v5490_v44  ;;  %v5617_v23 = vmul.f32 %v11827_v46, %v14518_v19 }
0x2053   :  { %v5451_v6 = vadd.f32 %v5431_v15, %v5378_v58  ;;  %v5452_v27 = vadd.f32 %v5432_v29, %v5379_v28 }
0x2055   :  { %v11952_v40 = vadd.f32 %v5505_v50, %v5452_v27 }
0x2057   :  { %5501 = vrot.lane.b32.xlu2 %v5472_v61, %s6266_s27  ;;  %5572 = vrot.lane.b32.xlu1 %v5544_v3, %s6266_s27 }
0x2058   :  { %5645 = vrot.lane.b32.xlu0 %v5617_v23, %s6266_s27 }
0x2059   :  { %v5484_v4 = vpop.permute.xlu1 %5483  ;;  %v5561_v36 = vpop.permute.xlu2 %5560 }
0x205a   :  { %v5419_v48 = vpop.permute.xlu0 %5418 }
0x205b   :  { %v5433_v52 = vsel %vm2204_vm6, %v5417_v56, %v5419_v48 }
0x205c   :  { %v5453_v25 = vadd.f32 %v5433_v52, %v5380_v12 }
0x205f   :  { %5714 = vrot.lane.b32.xlu2 %v5688_v30, %s6266_s27  ;;  %5574 = vrot.lane.b32.xlu1 %v5545_v63, %s6266_s27 }
0x2060   :  { %5718 = vrot.lane.b32.xlu0 %v5690_v32, %s6266_s27 }
0x2061   :  { %v5348_v19 = vpop.permute.xlu1 %5347  ;;  %v5492_v39 = vpop.permute.xlu2 %5491 }
0x2062   :  { %v5361_v56 = vsel %vm2204_vm6, %v5346_v49, %v5348_v19  ;;  %v5559_v38 = vpop.permute.xlu0 %5558  ;;  %v5506_v42 = vsel %vm2497_vm7, %v5490_v44, %v5492_v39 }
0x2063   :  { %v5381_v5 = vadd.f32 %v5361_v56, %v11739_v16  ;;  %v11976_v58 = vadd.f32 %v5506_v42, %v5453_v25  ;;  %v5691_v16 = vmul.f32 %v11856_v45, %v14521_v60  ;;  %v5577_v15 = vsel %vm2497_vm7, %v5559_v38, %v5561_v36  ;;  %v14522_v42 = vld [vmem:[#allocation53_spill] sm:$0xff] }
0x2067   :  { %5716 = vrot.lane.b32.xlu2 %v5689_v47, %s6266_s27  ;;  %5647 = vrot.lane.b32.xlu1 %v5618_v33, %s6266_s27 }
0x2069   :  { %v5557_v0 = vpop.permute.xlu1 %5556  ;;  %v5632_v10 = vpop.permute.xlu2 %5631 }
0x206a   :  { %v5421_v21 = vpop.permute.xlu0 %5420  ;;  %v5576_v30 = vsel %vm2497_vm7, %v5557_v0, %v5559_v38  ;;  %v14524_v38 = vld [vmem:[#allocation213_spill] sm:$0xff] }
0x206b   :  { %v5434_v7 = vsel %vm2204_vm6, %v5419_v48, %v5421_v21  ;;  %v3124_v47 = vmul.f32 %v14524_v38, %v14467_v53 }
0x206c   :  { %v5454_v49 = vadd.f32 %v5434_v7, %v5381_v5 }
0x206f   :  { %5720 = vrot.lane.b32.xlu2 %v5691_v16, %s6266_s27 }
0x2071   :  { %v5350_v35 = vpop.permute.xlu1 %5349  ;;  %v5423_v8 = vpop.permute.xlu2 %5422 }
0x2072   :  { %v5630_v55 = vpop.permute.xlu0 %5629  ;;  %v5362_v46 = vsel %vm2204_vm6, %v5348_v19, %v5350_v35  ;;  %v5435_v9 = vsel %vm2204_vm6, %v5421_v21, %v5423_v8 }
0x2073   :  { %v5382_v24 = vadd.f32 %v5362_v46, %v11768_v11  ;;  %v5504_v11 = vsel %vm2497_vm7, %v11948_v31, %v11931_v18  ;;  %v5649_v56 = vsel %vm2497_vm7, %v5630_v55, %v5632_v10 }
0x2074   :  { %v5524_v29 = vadd.f32 %v5504_v11, %v5451_v6  ;;  %v5522_v6 = vadd.f32 %v5484_v4, %v11904_v1  ;;  %v14523_v1 = vld [vmem:[#allocation209_spill] sm:$0xff] }
0x2075   :  { %v11991_v28 = vadd.f32 %v5435_v9, %v5382_v24 }
0x2076   :  { %v5597_v27 = vadd.f32 %v5577_v15, %v5524_v29  ;;  %v5595_v19 = vadd.f32 %v5557_v0, %v5522_v6  ;;  %v14526_v29 = vld [vmem:[#allocation71_spill] sm:$0xff] }
0x2078   :  { %v5668_v21 = vadd.f32 %v5630_v55, %v5595_v19 }
0x2079   :  { %v11993_v12 = vpop.permute.xlu1 %5562  ;;  %v11995_v13 = vpop.permute.xlu2 %5635 }
0x207a   :  { %v11997_v41 = vpop.permute.xlu0 %5351  ;;  %v5578_v63 = vsel %vm2497_vm7, %v5561_v36, %v11993_v12 }
0x207b   :  { %v5363_v45 = vsel %vm2204_vm6, %v5350_v35, %v11997_v41  ;;  %v5598_v33 = vadd.f32 %v5578_v63, %v11952_v40 }
0x207c   :  { %v5383_v60 = vadd.f32 %v5363_v45, %v11771_v54  ;;  %v5503_v54 = vsel %vm2497_vm7, %v5484_v4, %v11948_v31  ;;  %v3084_v4 = vmul.f32 %v14523_v1, %v14465_v62 }
0x207d   :  { %v5523_v31 = vadd.f32 %v5503_v54, %v11924_v51  ;;  %v14528_v54 = vld [vmem:[#allocation24_spill] sm:$0xff] }
0x207e   :  { %v3134_v24 = vadd.f32 %v3124_v47, %v3084_v4  ;;  %v14530_v4 = vld [vmem:[#allocation12_spill] sm:$0xff] }
0x207f   :  { %v5596_v36 = vadd.f32 %v5576_v30, %v5523_v31 }
0x2081   :  { %v5634_v22 = vpop.permute.xlu1 %5633  ;;  %v5707_v26 = vpop.permute.xlu2 %5706  ;;  %v5669_v0 = vadd.f32 %v5649_v56, %v5596_v36  ;;  %v14531_v36 = vld [vmem:[#allocation40_spill] sm:$0xff] }
0x2082   :  { %v12002_v44 = vpop.permute.xlu0 %5564  ;;  %v5650_v50 = vsel %vm2497_vm7, %v5632_v10, %v5634_v22 }
0x2083   :  { %v5670_v23 = vadd.f32 %v5650_v50, %v5597_v27  ;;  %v3174_v50 = vmul.f32 %v14526_v29, %v9856_v37  ;;  %v14527_v27 = vld [vmem:[#allocation25_spill] sm:$0xff]  ;;  %v5579_v1 = vsel %vm2497_vm7, %v11993_v12, %v12002_v44 }
0x2089   :  { %v12009_v61 = vpop.permute.xlu1 %5493  ;;  %v12011_v3 = vpop.permute.xlu2 %5495 }
0x208a   :  { %v5705_v48 = vpop.permute.xlu0 %5704  ;;  %v5507_v52 = vsel %vm2497_vm7, %v5492_v39, %v12009_v61  ;;  %v5651_v39 = vsel %vm2497_vm7, %v5634_v22, %v11995_v13  ;;  %v14525_v22 = vld [vmem:[#allocation201_spill] sm:$0xff] }
0x208b   :  { %v5723_v18 = vsel %vm2497_vm7, %v5705_v48, %v5707_v26  ;;  %v12018_v25 = vadd.f32 %v5507_v52, %v5454_v49  ;;  %v5671_v7 = vadd.f32 %v5651_v39, %v5598_v33 }
0x208c   :  { %v12024_v32 = vadd.f32 %v5723_v18, %v5670_v23  ;;  %v14529_v18 = vld [vmem:[#allocation38_spill] sm:$0xff] }
0x208d   :  { %v3224_v6 = vmul.f32 %v14529_v18, %v9903_v43  ;;  %v14539_v18 = vld [vmem:[#allocation35_spill] sm:$0xff] }
0x208e   :  { %v5753_v5 = vmul.f32 %v12024_v32, %v14522_v42 }
0x2090   :  { %v5763_v51 = vmul.f32 %v5753_v5, %v5753_v5 }
0x2091   :  { %v5703_v10 = vpop.permute.xlu1 %5702  ;;  %v5709_v49 = vpop.permute.xlu2 %5708 }
0x2092   :  { %v5783_v16 = vrot.slane %v5763_v51, 4  ;;  %v12037_v35 = vpop.permute.xlu0 %5424  ;;  %v5722_v46 = vsel %vm2497_vm7, %v5703_v10, %v5705_v48  ;;  %v12040_v9 = vadd.f32 %v5703_v10, %v5668_v21  ;;  %v5724_v62 = vsel %vm2497_vm7, %v5707_v26, %v5709_v49  ;;  %v14532_v21 = vld [vmem:[#allocation81_spill] sm:$0xff] }
0x2093   :  { %v5436_v53 = vsel %vm2204_vm6, %v5423_v8, %v12037_v35  ;;  %v12045_v40 = vadd.f32 %v5722_v46, %v5669_v0  ;;  %v12047_v55 = vadd.f32 %v5724_v62, %v5671_v7  ;;  %v3184_v48 = vadd.f32 %v3174_v50, %v3134_v24  ;;  %v14533_v62 = vld [vmem:[#allocation229_spill] sm:$0xff] }
0x2094   :  { %v12049_v45 = vadd.f32 %v5436_v53, %v5383_v60  ;;  %v5751_v11 = vmul.f32 %v12040_v9, %v14525_v22  ;;  %v5803_v15 = vsel %vm2843_vm8, %v5753_v5, %v5783_v16 }
0x2095   :  { %v5752_v26 = vmul.f32 %v12045_v40, %v14527_v27  ;;  %5825 = vrot.lane.b32.xlu2 %v5803_v15, %s6270_s1  ;;  %v5754_v23 = vmul.f32 %v12047_v55, %v14528_v54  ;;  %v3234_v42 = vadd.f32 %v3224_v6, %v3184_v48  ;;  %v14536_v15 = vld [vmem:[#allocation159_spill] sm:$0xff]  ;;  %v14537_v27 = vld [vmem:[#allocation230_spill] sm:$0xff]  ;;  %v14538_v48 = vld [vmem:[#allocation232_spill] sm:$0xff] }
0x2096   :  { %v5761_v8 = vmul.f32 %v5751_v11, %v5751_v11 }
0x2097   :  { %v5762_v60 = vmul.f32 %v5752_v26, %v5752_v26  ;;  %v5764_v37 = vmul.f32 %v5754_v23, %v5754_v23  ;;  %v3307_v38 = vadd.f32 %v14530_v4, %v3234_v42  ;;  %v14542_v4 = vld [vmem:[#allocation139_spill] sm:$0xff] }
0x2098   :  { %v5781_v52 = vrot.slane %v5761_v8, 4 }
0x2099   :  { %v5782_v30 = vrot.slane %v5762_v60, 4  ;;  %v12063_v63 = vpop.permute.xlu1 %5353  ;;  %v12065_v31 = vpop.permute.xlu2 %5497  ;;  %v5784_v47 = vrot.slane %v5764_v37, 4  ;;  %v3380_v33 = vadd.f32 %v14531_v36, %v3307_v38 }
0x209a   :  { %v5638_v19 = vpop.permute.xlu0 %5637  ;;  %v5364_v56 = vsel %vm2204_vm6, %v11997_v41, %v12063_v63  ;;  %v5801_v39 = vsel %vm2843_vm8, %v5751_v11, %v5781_v52 }
0x209b   :  { %v12072_v5 = vadd.f32 %v5364_v56, %v11750_v57  ;;  %5821 = vrot.lane.b32.xlu1 %v5801_v39, %s6270_s1  ;;  %v5802_v43 = vsel %vm2843_vm8, %v5752_v26, %v5782_v30  ;;  %v5652_v41 = vsel %vm2497_vm7, %v11995_v13, %v5638_v19  ;;  %v5599_v57 = vadd.f32 %v5579_v1, %v11976_v58  ;;  %v14534_v13 = vld [vmem:[#allocation120_spill] sm:$0xff]  ;;  %v14535_v58 = vld [vmem:[#allocation63_spill] sm:$0xff] }
0x209c   :  { %5823 = vrot.lane.b32.xlu0 %v5802_v43, %s6270_s1  ;;  %v3453_v51 = vadd.f32 %v14532_v21, %v3380_v33  ;;  %v5804_v46 = vsel %vm2843_vm8, %v5754_v23, %v5784_v47  ;;  %v14540_v30 = vld [vmem:[#allocation83_spill] sm:$0xff]  ;;  %v14541_v56 = vld [vmem:[#allocation160_spill] sm:$0xff]  ;;  %v14543_v47 = vld [vmem:[#allocation6_spill] sm:$0xff] }
0x209d   :  { %v5672_v0 = vadd.f32 %v5652_v41, %v5599_v57  ;;  %v14544_v33 = vld [vmem:[#allocation100_spill] sm:$0xff] }
0x209e   :  { %v3526_v24 = vadd.f32 %v14533_v62, %v3453_v51 }
0x20a0   :  { %v3599_v22 = vadd.f32 %v14534_v13, %v3526_v24  ;;  %v14546_v24 = vld [vmem:[#allocation289_spill] sm:$0xff]  ;;  %v14547_v13 = vld [vmem:[#allocation284_spill] sm:$0xff] }
0x20a1   :  { %v5567_v7 = vpop.permute.xlu1 %5566  ;;  %v5711_v10 = vpop.permute.xlu2 %5710 }
0x20a2   :  { %v12086_v16 = vpop.permute.xlu0 %5426  ;;  %v5725_v12 = vsel %vm2497_vm7, %v5709_v49, %v5711_v10  ;;  %v3672_v29 = vadd.f32 %v14536_v15, %v3599_v22  ;;  %v5580_v36 = vsel %vm2497_vm7, %v12002_v44, %v5567_v7  ;;  %v4557_v22 = vsel %vm1540_vm4, %v14547_v13, %v14546_v24  ;;  %v14548_v15 = vld [vmem:[#allocation276_spill] sm:$0xff] }
0x20a3   :  { %v12091_v53 = vadd.f32 %v5725_v12, %v5672_v0  ;;  %5827 = vrot.lane.b32.xlu1 %v5804_v46, %s6270_s1  ;;  %v5600_v51 = vadd.f32 %v5580_v36, %v12018_v25  ;;  %v14545_v0 = vld [vmem:[#allocation96_spill] sm:$0xff]  ;;  %v5508_v25 = vsel %vm2497_vm7, %v12009_v61, %v12011_v3 }
0x20a4   :  { %v3745_v26 = vadd.f32 %v14537_v27, %v3672_v29  ;;  %v14550_v27 = vld [vmem:[#allocation7_spill] sm:$0xff] }
0x20a5   :  { %v5755_v11 = vmul.f32 %v12091_v53, %v14535_v58 }
0x20a6   :  { %v3818_v60 = vadd.f32 %v14538_v48, %v3745_v26  ;;  %v5509_v48 = vsel %vm2497_vm7, %v12011_v3, %v12065_v31 }
0x20a7   :  { %v5765_v50 = vmul.f32 %v5755_v11, %v5755_v11  ;;  %v5529_v3 = vadd.f32 %v5509_v48, %v12049_v45  ;;  %v14559_v45 = vld [vmem:[#allocation298_spill] sm:$0xff] }
0x20a8   :  { %v3891_v6 = vadd.f32 %v14539_v18, %v3818_v60  ;;  %v14551_v60 = vld [vmem:[#allocation104_spill] sm:$0xff] }
0x20a9   :  { %v5785_v8 = vrot.slane %v5765_v50, 4  ;;  %v12099_v49 = vpop.permute.xlu1 %5355  ;;  %v12101_v54 = vpop.permute.xlu2 %5570  ;;  %v14549_v50 = vld [vmem:[#allocation188_spill] sm:$0xff] }
0x20aa   :  { %v5640_v23 = vpop.permute.xlu0 %5639  ;;  %v3964_v37 = vadd.f32 %v14540_v30, %v3891_v6  ;;  %v14553_v6 = vld [vmem:[#allocation34_spill] sm:$0xff] }
0x20ab   :  { %v5805_v52 = vsel %vm2843_vm8, %v5755_v11, %v5785_v8  ;;  %v5653_v21 = vsel %vm2497_vm7, %v5638_v19, %v5640_v23  ;;  %v4656_v19 = vsel %vm1540_vm4, %v14550_v27, %v14549_v50 }
0x20ac   :  { %5829 = vrot.lane.b32.xlu0 %v5805_v52, %s6270_s1  ;;  %v4037_v39 = vadd.f32 %v14541_v56, %v3964_v37  ;;  %v5673_v58 = vadd.f32 %v5653_v21, %v5600_v51  ;;  %v14552_v52 = vld [vmem:[#allocation290_spill] sm:$0xff]  ;;  %v5528_v56 = vadd.f32 %v5508_v25, %v11991_v28 }
0x20ad   :  { %v4755_v18 = vsel %vm1540_vm4, %v14552_v52, %v14551_v60  ;;  %v14561_v52 = vld [vmem:[#allocation204_spill] sm:$0xff] }
0x20ae   :  { %v4110_v38 = vadd.f32 %v14542_v4, %v4037_v39  ;;  %v14554_v39 = vld [vmem:[#allocation297_spill] sm:$0xff] }
0x20af   :  { %v14555_v4 = vld [vmem:[#allocation197_spill] sm:$0xff] }
0x20b0   :  { %v4202_v41 = vadd.f32 %v14543_v47, %v4110_v38  ;;  %v4854_v38 = vsel %vm1540_vm4, %v14555_v4, %v14554_v39 }
0x20b1   :  { %v5569_v42 = vpop.permute.xlu1 %5568  ;;  %v12109_v43 = vpop.permute.xlu2 %5501 }
0x20b2   :  { %v12111_v1 = vpop.permute.xlu0 %5499  ;;  %v4294_v57 = vadd.f32 %v14544_v33, %v4202_v41  ;;  %v5582_v61 = vsel %vm2497_vm7, %v5569_v42, %v12101_v54 }
0x20b3   :  { %v5602_v51 = vadd.f32 %v5582_v61, %v5529_v3 }
0x20b4   :  { %v4386_v12 = vadd.f32 %v14545_v0, %v4294_v57  ;;  %v14557_v57 = vld [vmem:[#allocation10_spill] sm:$0xff] }
0x20b6   :  { %v4478_v29 = vadd.f32 %v14548_v15, %v4386_v12 }
0x20b8   :  { %v4577_v8 = vadd.f32 %v4557_v22, %v4478_v29 }
0x20b9   :  { %v12121_v46 = vpop.permute.xlu1 %5428  ;;  %v5715_v62 = vpop.permute.xlu2 %5714 }
0x20ba   :  { %v5713_v11 = vpop.permute.xlu0 %5712  ;;  %v4676_v37 = vadd.f32 %v4656_v19, %v4577_v8 }
0x20bb   :  { %v5726_v44 = vsel %vm2497_vm7, %v5711_v10, %v5713_v11  ;;  %v5581_v10 = vsel %vm2497_vm7, %v5567_v7, %v5569_v42  ;;  %v14556_v7 = vld [vmem:[#allocation158_spill] sm:$0xff]  ;;  %v5727_v29 = vsel %vm2497_vm7, %v5713_v11, %v5715_v62  ;;  %v5437_v11 = vsel %vm2204_vm6, %v12037_v35, %v12086_v16 }
0x20bc   :  { %v12134_v26 = vadd.f32 %v5726_v44, %v5673_v58  ;;  %v4775_v41 = vadd.f32 %v4755_v18, %v4676_v37  ;;  %v5601_v36 = vadd.f32 %v5581_v10, %v5528_v56  ;;  %v4927_v21 = vsel %vm1911_vm5, %v14557_v57, %v14556_v7  ;;  %v14558_v58 = vld [vmem:[#allocation309_spill] sm:$0xff]  ;;  %v14562_v10 = vld [vmem:[#allocation207_spill] sm:$0xff] }
0x20bd   :  { %v5000_v15 = vsel %vm1911_vm5, %v14559_v45, %v14558_v58  ;;  %v5219_v35 = vsel %vm2204_vm6, %v11683_v34, %v11734_v17  ;;  %v5457_v61 = vadd.f32 %v5437_v11, %v12072_v5  ;;  %v5438_v5 = vsel %vm2204_vm6, %v12086_v16, %v12121_v46 }
0x20be   :  { %v5756_v30 = vmul.f32 %v12134_v26, %v14553_v6  ;;  %v4874_v24 = vadd.f32 %v4854_v38, %v4775_v41 }
0x20c0   :  { %v5766_v47 = vmul.f32 %v5756_v30, %v5756_v30  ;;  %v4947_v27 = vadd.f32 %v4927_v21, %v4874_v24 }
0x20c1   :  { %v5642_v33 = vpop.permute.xlu1 %5641  ;;  %v5717_v42 = vpop.permute.xlu2 %5716 }
0x20c2   :  { %v5786_v0 = vrot.slane %v5766_v47, 4  ;;  %v5644_v28 = vpop.permute.xlu0 %5643  ;;  %v5654_v12 = vsel %vm2497_vm7, %v5640_v23, %v5642_v33  ;;  %v5728_v25 = vsel %vm2497_vm7, %v5715_v62, %v5717_v42  ;;  %v14560_v23 = vld [vmem:[#allocation307_spill] sm:$0xff]  ;;  %v5020_v60 = vadd.f32 %v5000_v15, %v4947_v27 }
0x20c3   :  { %v5655_v13 = vsel %vm2497_vm7, %v5642_v33, %v5644_v28  ;;  %v5674_v22 = vadd.f32 %v5654_v12, %v5601_v36  ;;  %v5073_v8 = vsel %vm1911_vm5, %v14560_v23, %v11501_v2  ;;  %v5146_v62 = vsel %vm1911_vm5, %v11567_v14, %v11675_v59  ;;  %v14563_v12 = vld [vmem:[#allocation134_spill] sm:$0xff] }
0x20c4   :  { %v5675_v44 = vadd.f32 %v5655_v13, %v5602_v51  ;;  %v5806_v50 = vsel %vm2843_vm8, %v5756_v30, %v5786_v0  ;;  %v5093_v30 = vadd.f32 %v5073_v8, %v5020_v60  ;;  %v5510_v2 = vsel %vm2497_vm7, %v12065_v31, %v12111_v1 }
0x20c5   :  { %v12162_v19 = vadd.f32 %v5727_v29, %v5674_v22  ;;  %5831 = vrot.lane.b32.xlu2 %v5806_v50, %s6270_s1  ;;  %v5530_v3 = vadd.f32 %v5510_v2, %v5457_v61  ;;  %v5365_v36 = vsel %vm2204_vm6, %v12063_v63, %v12099_v49 }
0x20c6   :  { %v12169_v48 = vadd.f32 %v5728_v25, %v5675_v44  ;;  %v5166_v38 = vadd.f32 %v5146_v62, %v5093_v30 }
0x20c7   :  { %v5757_v18 = vmul.f32 %v12162_v19, %v14561_v52 }
0x20c8   :  { %v5758_v6 = vmul.f32 %v12169_v48, %v14562_v10  ;;  %v5239_v41 = vadd.f32 %v5219_v35, %v5166_v38 }
0x20c9   :  { %v5573_v37 = vpop.permute.xlu1 %5572  ;;  %v5767_v56 = vmul.f32 %v5757_v18, %v5757_v18  ;;  %v5721_v15 = vpop.permute.xlu2 %5720 }
0x20ca   :  { %v5768_v39 = vmul.f32 %v5758_v6, %v5758_v6  ;;  %v5646_v4 = vpop.permute.xlu0 %5645  ;;  %v5583_v14 = vsel %vm2497_vm7, %v12101_v54, %v5573_v37  ;;  %v5312_v17 = vadd.f32 %v11779_v20, %v5239_v41  ;;  %v5511_v20 = vsel %vm2497_vm7, %v12111_v1, %v12109_v43  ;;  %v14564_v43 = vld [vmem:[#allocation140_spill] sm:$0xff] }
0x20cb   :  { %v5787_v59 = vrot.slane %v5767_v56, 4  ;;  %v5603_v33 = vadd.f32 %v5583_v14, %v5530_v3  ;;  %v5656_v7 = vsel %vm2497_vm7, %v5644_v28, %v5646_v4 }
0x20cc   :  { %v5788_v47 = vrot.slane %v5768_v39, 4  ;;  %v5385_v54 = vadd.f32 %v5365_v36, %v5312_v17 }
0x20cd   :  { %v5807_v31 = vsel %vm2843_vm8, %v5757_v18, %v5787_v59  ;;  %v5676_v51 = vadd.f32 %v5656_v7, %v5603_v33 }
0x20ce   :  { %5833 = vrot.lane.b32.xlu1 %v5807_v31, %s6270_s1  ;;  %v5808_v34 = vsel %vm2843_vm8, %v5758_v6, %v5788_v47  ;;  %v5458_v63 = vadd.f32 %v5438_v5, %v5385_v54 }
0x20cf   :  { %5835 = vrot.lane.b32.xlu0 %v5808_v34, %s6270_s1 }
0x20d0   :  { %v5531_v46 = vadd.f32 %v5511_v20, %v5458_v63 }
0x20d1   :  { %v5575_v57 = vpop.permute.xlu1 %5574 }
0x20d2   :  { %v5719_v21 = vpop.permute.xlu0 %5718  ;;  %v5584_v16 = vsel %vm2497_vm7, %v5573_v37, %v5575_v57 }
0x20d3   :  { %v5729_v49 = vsel %vm2497_vm7, %v5717_v42, %v5719_v21  ;;  %v5604_v28 = vadd.f32 %v5584_v16, %v5531_v46  ;;  %v5730_v29 = vsel %vm2497_vm7, %v5719_v21, %v5721_v15  ;;  %v5924_v21 = vld [vmem:[%s12313_s0 + $0x4] sm:$0xff]  ;;  %v5875_v15 = vld [vmem:[%s12318_s6] sm:$0xf] }
0x20d4   :  { %v12203_v0 = vadd.f32 %v5729_v49, %v5676_v51  ;;  %5934 = vst [vmem:[#allocation1] ss:$2 sm:$0xff] %v5924_v21  ;;  %v5928_v49 = vld [vmem:[%s12313_s0 + $0x24] sm:$0xf] }
0x20d6   :  { %v5759_v24 = vmul.f32 %v12203_v0, %v14563_v12 }
0x20d8   :  { %v5769_v13 = vmul.f32 %v5759_v24, %v5759_v24 }
0x20d9   :  { %v5648_v22 = vpop.permute.xlu1 %5647 }
0x20da   :  { %v5789_v58 = vrot.slane %v5769_v13, 4  ;;  %v5657_v45 = vsel %vm2497_vm7, %v5646_v4, %v5648_v22 }
0x20db   :  { %v5677_v42 = vadd.f32 %v5657_v45, %v5604_v28  ;;  %v5941_v20 = vld.sshfl [vmem:[#allocation1] sm:$0xff pattern:$0x75316420]  ;;  %v5942_v12 = vld.sshfl [vmem:[#allocation1 + $0x8] sm:$0xff pattern:$0x75316420] }
0x20dc   :  { %v5809_v44 = vsel %vm2843_vm8, %v5759_v24, %v5789_v58  ;;  %5949 = vst [vmem:[#allocation1] ss:$2 sm:$0xff] %v5928_v49  ;;  %v5925_v24 = vld [vmem:[%s12313_s0 + $0xc] sm:$0xff]  ;;  %v5926_v28 = vld [vmem:[%s12313_s0 + $0x14] sm:$0xff] }
0x20dd   :  { %v12214_v50 = vadd.f32 %v5730_v29, %v5677_v42  ;;  %5837 = vrot.lane.b32.xlu2 %v5809_v44, %s6270_s1  ;;  %5936 = vst [vmem:[#allocation1 + $0x10] ss:$2 sm:$0xff] %v5925_v24  ;;  %v5927_v44 = vld [vmem:[%s12313_s0 + $0x1c] sm:$0xff] }
0x20de   :  { %5938 = vst [vmem:[#allocation1 + $0x20] ss:$2 sm:$0xff] %v5926_v28 }
0x20df   :  { %v5760_v1 = vmul.f32 %v12214_v50, %v14564_v43  ;;  %5940 = vst [vmem:[#allocation1 + $0x30] ss:$2 sm:$0xff] %v5927_v44 }
0x20e1   :  { %v5770_v27 = vmul.f32 %v5760_v1, %v5760_v1 }
0x20e3   :  { %v5790_v25 = vrot.slane %v5770_v27, 4 }
0x20e5   :  { %v5810_v23 = vsel %vm2843_vm8, %v5760_v1, %v5790_v25  ;;  %v5891_v1 = vld [vmem:[%s12319_s7] sm:$0xf] }
0x20e6   :  { %5839 = vrot.lane.b32.xlu1 %v5810_v23, %s6270_s1  ;;  %v5943_v23 = vld.sshfl [vmem:[#allocation1 + $0x10] sm:$0xff pattern:$0x75316420] }
0x20ef   :  { %v5826_v11 = vpop.permute.xlu2 %5825 }
0x210d   :  { %v5822_v8 = vpop.permute.xlu1 %5821 }
0x210e   :  { %v5824_v60 = vpop.permute.xlu0 %5823 }
0x210f   :  { %v5841_v18 = vsel %vm2884_vm9, %v5822_v8, %v5824_v60  ;;  %v5842_v62 = vsel %vm2884_vm9, %v5824_v60, %v5826_v11  ;;  %v5944_v8 = vld.sshfl [vmem:[#allocation1 + $0x18] sm:$0xff pattern:$0x75316420]  ;;  %v5945_v60 = vld.sshfl [vmem:[#allocation1 + $0x20] sm:$0xff pattern:$0x75316420] }
0x2110   :  { %v5859_v30 = vadd.f32 %v5842_v62, %v5841_v18  ;;  %v5948_v18 = vld.sshfl [vmem:[#allocation1 + $0x38] sm:$0xff pattern:$0x75316420]  ;;  %v5950_v62 = vld.sshfl [vmem:[#allocation1] sm:$0xff pattern:$0x75316420] }
0x2115   :  { %v5828_v52 = vpop.permute.xlu1 %5827 }
0x2116   :  { %v5843_v6 = vsel %vm2884_vm9, %v5826_v11, %v5828_v52  ;;  %v5946_v11 = vld.sshfl [vmem:[#allocation1 + $0x28] sm:$0xff pattern:$0x75316420] }
0x2117   :  { %v5860_v37 = vadd.f32 %v5859_v30, %v5843_v6 }
0x211e   :  { %v5830_v10 = vpop.permute.xlu0 %5829 }
0x211f   :  { %v5844_v2 = vsel %vm2884_vm9, %v5828_v52, %v5830_v10  ;;  %v5832_v35 = vpop.permute.xlu2 %5831  ;;  %v5947_v52 = vld.sshfl [vmem:[#allocation1 + $0x30] sm:$0xff pattern:$0x75316420] }
0x2120   :  { %v5861_v56 = vadd.f32 %v5860_v37, %v5844_v2  ;;  %v5845_v39 = vsel %vm2884_vm9, %v5830_v10, %v5832_v35 }
0x2122   :  { %v5862_v38 = vadd.f32 %v5861_v56, %v5845_v39 }
0x2137   :  { %v5838_v41 = vpop.permute.xlu2 %5837 }
0x2140   :  { %v5834_v61 = vpop.permute.xlu1 %5833 }
0x2141   :  { %v5846_v4 = vsel %vm2884_vm9, %v5832_v35, %v5834_v61  ;;  %v5836_v59 = vpop.permute.xlu0 %5835 }
0x2142   :  { %v5863_v14 = vadd.f32 %v5862_v38, %v5846_v4  ;;  %v5847_v3 = vsel %vm2884_vm9, %v5834_v61, %v5836_v59  ;;  %v5848_v31 = vsel %vm2884_vm9, %v5836_v59, %v5838_v41 }
0x2144   :  { %v5864_v47 = vadd.f32 %v5863_v14, %v5847_v3 }
0x2146   :  { %v5865_v36 = vadd.f32 %v5864_v47, %v5848_v31 }
0x2158   :  { %v5840_v33 = vpop.permute.xlu1 %5839 }
0x2159   :  { %v5849_v34 = vsel %vm2884_vm9, %v5838_v41, %v5840_v33 }
0x215a   :  { %v5866_v17 = vadd.f32 %v5865_v36, %v5849_v34 }
0x215c   :  { %5867 = vadd.xlane.f32.xlu0 %v5866_v17 }
0x21cf   :  { %v5868_v5 = vpop.xlane.xlu0 %5867 }
0x21d0   :  { %v5869_v54 = vmul.f32 0.001953125, %v5868_v5 }
0x21d2   :  { %v5870_v7 = vmul.f32 %v5869_v54, %v5869_v54 }
0x21d4   :  { %v5872_v57 = vrot.slane %v5870_v7, 4 }
0x21d6   :  { %v5874_v51 = vsub.f32 %v5869_v54, %v5872_v57 }
0x21d8   :  { %v5876_v63 = vadd.f32 1e-05, %v5874_v51 }
0x21da   :  { %6220 = vrsqrt.f32 %v5876_v63  ;;  %vm5883_vm14 = vweird.f32 %v5876_v63 }
0x21e0   :  { %v6221_v16 = vpop.eup %6220 }
0x21e1   :  { %v5878_v46 = vmul.f32 %v6221_v16, %v5876_v63  ;;  %vm5884_vm13 = vweird.f32 %v6221_v16 }
0x21e2   :  { %vm5885_vm15 = vmor %vm5883_vm14, %vm5884_vm13 }
0x21e3   :  { %v5879_v13 = vmul.f32 %v6221_v16, %v5878_v46 }
0x21e5   :  { %v5880_v22 = vmul.f32 0.5, %v5879_v13 }
0x21e7   :  { %v5881_v58 = vsub.f32 1.5, %v5880_v22 }
0x21e9   :  { %v5882_v45 = vmul.f32 %v6221_v16, %v5881_v58 }
0x21eb   :  { %v5886_v42 = vsel %vm5885_vm15, %v6221_v16, %v5882_v45 }
0x21ec   :  { %v5888_v29 = vrot.slane %v5886_v42, 4 }
0x21ee   :  { %v5890_v43 = vmul.f32 %v5888_v29, %v5875_v15 }
0x21f0   :  { %v5892_v27 = vmul.f32 %v5890_v43, %v5869_v54  ;;  %5896 = vperm.xlu2 %6206, %v5890_v43  }
0x21f2   :  { %v5893_v25 = vsub.f32 %v5891_v1, %v5892_v27 }
0x21f4   :  { %5911 = vperm.xlu1 %6207, %v5893_v25  }
0x21f8   :  { %5951 = vrot.lane.b32.xlu2 %v5941_v20, %s6246_s28 }
0x21fc   :  { %5953 = vrot.lane.b32.xlu1 %v5942_v12, %s6246_s28 }
0x2200   :  { %5955 = vrot.lane.b32.xlu2 %v5943_v23, %s6246_s28 }
0x2204   :  { %5957 = vrot.lane.b32.xlu1 %v5944_v8, %s6246_s28 }
0x2208   :  { %5959 = vrot.lane.b32.xlu2 %v5945_v60, %s6246_s28 }
0x220c   :  { %5961 = vrot.lane.b32.xlu1 %v5946_v11, %s6246_s28 }
0x2210   :  { %5963 = vrot.lane.b32.xlu2 %v5947_v52, %s6246_s28 }
0x2214   :  { %5965 = vrot.lane.b32.xlu1 %v5948_v18, %s6246_s28 }
0x2218   :  { %5967 = vrot.lane.b32.xlu2 %v5950_v62, %s6246_s28 }
0x224a   :  { %v5897_v10 = vpop.permute.xlu2 %5896 }
0x224b   :  { %v5899_v37 = vmul.f32 %v5897_v10, %v12040_v9  ;;  %v5900_v56 = vmul.f32 %v5897_v10, %v12045_v40  ;;  %v5901_v47 = vmul.f32 %v5897_v10, %v12024_v32  ;;  %v5902_v31 = vmul.f32 %v5897_v10, %v12047_v55 }
0x224c   :  { %v5903_v51 = vmul.f32 %v5897_v10, %v12091_v53  ;;  %v5904_v63 = vmul.f32 %v5897_v10, %v12134_v26  ;;  %v5908_v13 = vmul.f32 %v5897_v10, %v12214_v50  ;;  %v5905_v26 = vmul.f32 %v5897_v10, %v12162_v19 }
0x224d   :  { %v5906_v15 = vmul.f32 %v5897_v10, %v12169_v48  ;;  %v5907_v43 = vmul.f32 %v5897_v10, %v12203_v0 }
0x2252   :  { %v5952_v6 = vpop.permute.xlu2 %5951 }
0x225a   :  { %v5956_v30 = vpop.permute.xlu2 %5955 }
0x2262   :  { %v5960_v61 = vpop.permute.xlu2 %5959 }
0x2266   :  { %v5912_v2 = vpop.permute.xlu1 %5911 }
0x2267   :  { %v5914_v35 = vadd.f32 %v5912_v2, %v5899_v37  ;;  %v5915_v39 = vadd.f32 %v5912_v2, %v5900_v56  ;;  %v5916_v9 = vadd.f32 %v5912_v2, %v5901_v47  ;;  %v5917_v34 = vadd.f32 %v5912_v2, %v5902_v31 }
0x2268   :  { %v5918_v20 = vadd.f32 %v5912_v2, %v5903_v51  ;;  %v5919_v12 = vadd.f32 %v5912_v2, %v5904_v63  ;;  %v5923_v53 = vadd.f32 %v5912_v2, %v5908_v13  ;;  %v5920_v27 = vadd.f32 %v5912_v2, %v5905_v26 }
0x2269   :  { %v5987_v59 = vadd.f32 %v5952_v6, %v5914_v35  ;;  %v5921_v25 = vadd.f32 %v5912_v2, %v5906_v15  ;;  %v5922_v23 = vadd.f32 %v5912_v2, %v5907_v43 }
0x226a   :  { %v5964_v5 = vpop.permute.xlu2 %5963 }
0x226b   :  { %v5997_v36 = vmax.f32 %v5987_v59, 0.0 }
0x226e   :  { %v5954_v4 = vpop.permute.xlu1 %5953 }
0x226f   :  { %v5969_v38 = vsel %vm1165_vm3, %v5952_v6, %v5954_v4  ;;  %v5970_v33 = vsel %vm1165_vm3, %v5954_v4, %v5956_v30 }
0x2270   :  { %v5988_v14 = vadd.f32 %v5969_v38, %v5915_v39  ;;  %v5989_v7 = vadd.f32 %v5970_v33, %v5916_v9 }
0x2272   :  { %v5998_v3 = vmax.f32 %v5988_v14, 0.0  ;;  %v5999_v32 = vmax.f32 %v5989_v7, 0.0  ;;  %v5968_v58 = vpop.permute.xlu2 %5967 }
0x2273   :  { %v5996_v42 = vadd.f32 %v5968_v58, %v5923_v53 }
0x2274   :  { %v6017_v41 = vrot.slane %v5998_v3, 4 }
0x2275   :  { %v6006_v19 = vmax.f32 %v5996_v42, 0.0 }
0x2276   :  { %v5958_v40 = vpop.permute.xlu1 %5957  ;;  %v6022_v17 = vsel %vm2843_vm8, %v5997_v36, %v6017_v41 }
0x2277   :  { %v5971_v54 = vsel %vm1165_vm3, %v5956_v30, %v5958_v40  ;;  %6027 = vrot.lane.b32.xlu0 %v6022_v17, %s6270_s1  ;;  %v5972_v49 = vsel %vm1165_vm3, %v5958_v40, %v5960_v61  ;;  %v6021_v10 = vrot.slane %v6006_v19, 4 }
0x2278   :  { %v5990_v57 = vadd.f32 %v5971_v54, %v5917_v34  ;;  %v5991_v28 = vadd.f32 %v5972_v49, %v5918_v20 }
0x227a   :  { %v6000_v21 = vmax.f32 %v5990_v57, 0.0  ;;  %v6001_v29 = vmax.f32 %v5991_v28, 0.0 }
0x227c   :  { %v6018_v55 = vrot.slane %v6000_v21, 4 }
0x227e   :  { %v5962_v24 = vpop.permute.xlu1 %5961  ;;  %v6023_v16 = vsel %vm2843_vm8, %v5999_v32, %v6018_v55 }
0x227f   :  { %v5973_v46 = vsel %vm1165_vm3, %v5960_v61, %v5962_v24  ;;  %6029 = vrot.lane.b32.xlu1 %v6023_v16, %s6270_s1  ;;  %v5974_v1 = vsel %vm1165_vm3, %v5962_v24, %v5964_v5 }
0x2280   :  { %v5992_v22 = vadd.f32 %v5973_v46, %v5919_v12  ;;  %v5993_v48 = vadd.f32 %v5974_v1, %v5920_v27 }
0x2282   :  { %v6002_v45 = vmax.f32 %v5992_v22, 0.0  ;;  %v6003_v6 = vmax.f32 %v5993_v48, 0.0 }
0x2284   :  { %v6019_v44 = vrot.slane %v6002_v45, 4 }
0x2286   :  { %v5966_v50 = vpop.permute.xlu1 %5965  ;;  %v6024_v8 = vsel %vm2843_vm8, %v6001_v29, %v6019_v44 }
0x2287   :  { %v5975_v60 = vsel %vm1165_vm3, %v5964_v5, %v5966_v50  ;;  %v5976_v11 = vsel %vm1165_vm3, %v5966_v50, %v5968_v58  ;;  %6031 = vrot.lane.b32.xlu2 %v6024_v8, %s6270_s1 }
0x2288   :  { %v5994_v52 = vadd.f32 %v5975_v60, %v5921_v25  ;;  %v5995_v18 = vadd.f32 %v5976_v11, %v5922_v23 }
0x228a   :  { %v6004_v62 = vmax.f32 %v5994_v52, 0.0  ;;  %v6005_v0 = vmax.f32 %v5995_v18, 0.0 }
0x228c   :  { %v6020_v30 = vrot.slane %v6004_v62, 4  ;;  %v6026_v2 = vsel %vm2843_vm8, %v6005_v0, %v6021_v10 }
0x228e   :  { %v6025_v37 = vsel %vm2843_vm8, %v6003_v6, %v6020_v30 }
0x228f   :  { %6035 = vrot.lane.b32.xlu2 %v6026_v2, %s6270_s1  ;;  %6033 = vrot.lane.b32.xlu1 %v6025_v37, %s6270_s1 }
0x22e1   :  { %v6032_v56 = vpop.permute.xlu2 %6031 }
0x22e2   :  { %v6039_v14 = vrot.slane %v6032_v56, 4 }
0x22e9   :  { %v6036_v35 = vpop.permute.xlu2 %6035  ;;  %v6028_v4 = vpop.permute.xlu0 %6027 }
0x22ea   :  { %v6041_v61 = vrot.slane %v6036_v35, 4  ;;  %v6037_v59 = vrot.slane %v6028_v4, 4 }
0x22ec   :  { %v6050_v39 = vsel %vm2884_vm9, %v6036_v35, %v6041_v61 }
0x22ed   :  { %6060 = vst [vmem:[%s12320_s8 + $0x20] sm:$0xf] %v6050_v39 }
0x22f1   :  { %v6030_v38 = vpop.permute.xlu1 %6029 }
0x22f2   :  { %v6038_v3 = vrot.slane %v6030_v38, 4 }
0x22f4   :  { %v6042_v47 = vsel %vm2843_vm8, %v6037_v59, %v6038_v3  ;;  %v6044_v41 = vsel %vm2843_vm8, %v6038_v3, %v6039_v14 }
0x22f5   :  { %v6043_v31 = vsel %vm2884_vm9, %v6028_v4, %v6042_v47  ;;  %v6045_v36 = vsel %vm2884_vm9, %v6030_v38, %v6044_v41 }
0x22f6   :  { %6056 = vst [vmem:[%s12320_s8] sm:$0xff] %v6043_v31 }
0x22f7   :  { %6057 = vst [vmem:[%s12320_s8 + $0x8] sm:$0xff] %v6045_v36 }
0x2301   :  { %v6034_v33 = vpop.permute.xlu1 %6033 }
0x2302   :  { %v6040_v9 = vrot.slane %v6034_v33, 4 }
0x2304   :  { %v6046_v34 = vsel %vm2843_vm8, %v6039_v14, %v6040_v9  ;;  %v6048_v40 = vsel %vm2843_vm8, %v6040_v9, %v6041_v61 }
0x2305   :  { %v6047_v17 = vsel %vm2884_vm9, %v6032_v56, %v6046_v34  ;;  %v6049_v5 = vsel %vm2884_vm9, %v6034_v33, %v6048_v40 }
0x2306   :  { %6058 = vst [vmem:[%s12320_s8 + $0x10] sm:$0xff] %v6047_v17 }
0x2307   :  { %6059 = vst [vmem:[%s12320_s8 + $0x18] sm:$0xff] %v6049_v5 }

</bundles_post_ra>
